<compile_context>
chip_gen: v7x
topology: tpu7x:2x2x1
jax: 0.10.0
libtpu: 0.0.40
codegen_flags: <defaults>
</compile_context>

<pallas_src>
import functools

import jax
import jax.numpy as jnp
import numpy as np
from jax.experimental import pallas as pl
from jax.experimental.pallas import tpu as pltpu

CELL = 128                 # cell_size = in_size = hybrid_in_size
NUM_ATTS = 4
CAT = 2 * CELL             # 256 (concatenated modalities)


def _round_up(x, m):
    return -(-x // m) * m


def marn_chunk_kernel(eeg_ref, eog_ref,
                      Wt_ref, bWUV_ref, bUV_ref, UV_ref,
                      A1_ref, a1b_ref, A2_ref, a2b_ref,
                      D1bd_ref, d1b_ref, D2bd_ref, d2b_ref,
                      out_ref,
                      ia_s, c_s, h_s, z_s,
                      *, tc, bb):
    chunk = pl.program_id(1)

    # NOTE: the recurrent state lives in VMEM scratch and persists across grid
    # steps.  This is only correct because the time axis is the LAST (fastest
    # varying, "arbitrary") grid axis: each batch block sees all its time
    # chunks consecutively.  Do not reorder the grid axes.
    @pl.when(chunk == 0)
    def _init_state():
        c_s[...] = jnp.zeros_like(c_s)
        h_s[...] = jnp.zeros_like(h_s)
        z_s[...] = jnp.zeros_like(z_s)

    # ---- hoisted input projection for the whole chunk, both modalities ----
    # Per-step-contiguous layout: for each t, rows [0:bb] = eeg, [bb:2bb] = eog,
    # so the inner loop reads ia_s[t] directly (no per-step concat).
    x = jnp.concatenate([eeg_ref[...], eog_ref[...]], axis=1)   # (tc, 2bb, 128) bf16
    x = x.reshape(tc * 2 * bb, CELL)
    ia = jnp.dot(x, Wt_ref[...], preferred_element_type=jnp.float32) + bWUV_ref[...]
    ia_s[...] = ia.reshape(tc, 2 * bb, 4 * CELL)

    # At global t == 0 the U/V affines (incl. their biases bU, bV) are zero in
    # the reference (h, z are None).  bU+bV was folded into the projection bias
    # above, so undo it once for the very first step instead of gating every
    # step of the unrolled loop.
    @pl.when(chunk == 0)
    def _drop_uv_bias_at_t0():
        ia_s[0] = ia_s[0] - bUV_ref[...]

    UV = UV_ref[...]
    A1 = A1_ref[...]; a1b = a1b_ref[...]
    A2 = A2_ref[...]; a2b = a2b_ref[...]
    D1 = D1bd_ref[...]; d1b = d1b_ref[...]
    D2 = D2bd_ref[...]; d2b = d2b_ref[...]

    def step(t, carry):
        c, h, z = carry                                  # [2*bb, 128] f32 each

        # fused recurrent affine (both modalities): [2B,256] @ [256,512]
        hz = jnp.concatenate([h, z], axis=1).astype(jnp.bfloat16)
        rec = jnp.dot(hz, UV, preferred_element_type=jnp.float32)
        sums = ia_s[t] + rec                             # [2B, 512]

        # one fused sigmoid over the contiguous f|i|o slab, one tanh for ch
        g = jax.nn.sigmoid(sums[:, :3 * CELL])
        f_t = g[:, :CELL]
        i_t = g[:, CELL:2 * CELL]
        o_t = g[:, 2 * CELL:]
        ch_t = jnp.tanh(sums[:, 3 * CELL:])
        c_n = f_t * c + i_t * ch_t
        h_n = jnp.tanh(c_n) * o_t                        # [2B, 128]

        h_eeg = h_n[:bb]
        h_eog = h_n[bb:]

        # ---- MultipleAttentionFusion ----
        in_t = jnp.concatenate([h_eeg, h_eog], axis=1).astype(jnp.bfloat16)
        hid = jnp.tanh(jnp.dot(in_t, A1, preferred_element_type=jnp.float32) + a1b)
        logits = jnp.dot(hid.astype(jnp.bfloat16), A2,
                         preferred_element_type=jnp.float32) + a2b   # [B, 1024]

        # softmax over the 4 heads of the [B, 4, 256] view (dim=1)
        hd = [logits[:, a * CAT:(a + 1) * CAT] for a in range(NUM_ATTS)]
        m = jnp.maximum(jnp.maximum(hd[0], hd[1]), jnp.maximum(hd[2], hd[3]))
        e = [jnp.exp(hh - m) for hh in hd]
        inv = pl.reciprocal(e[0] + e[1] + e[2] + e[3], approx=True)  # [B, 256]

        # att_out = atts * cat(h0.repeat(1,4), h1.repeat(1,4)) assembled
        # directly in the reference's [B, 1024] layout (softmax 1/denominator
        # folded into the repeated-h factors).
        h00 = jnp.concatenate([h_eeg, h_eeg], axis=1) * inv   # [B, 256]
        h11 = jnp.concatenate([h_eog, h_eog], axis=1) * inv
        om = jnp.concatenate([(e[0] * h00).astype(jnp.bfloat16),
                              (e[1] * h00).astype(jnp.bfloat16),
                              (e[2] * h11).astype(jnp.bfloat16),
                              (e[3] * h11).astype(jnp.bfloat16)],
                             axis=1)                           # [B, 1024]

        # fused dim-reduce: block-diagonal weights give z = [z_eeg | z_eog]
        # in one D1 matmul + one D2 matmul (was 4 matmuls), and the result is
        # already cat(z_t, dim=1) — written to out_ref with no reshuffle.
        hid2 = jnp.tanh(jnp.dot(om, D1, preferred_element_type=jnp.float32) + d1b)
        z_t = jnp.dot(hid2.astype(jnp.bfloat16), D2,
                      preferred_element_type=jnp.float32) + d2b      # [B, 256]

        out_ref[t] = z_t
        z_n = jnp.concatenate([z_t[:, :CELL], z_t[:, CELL:]], axis=0)  # stacked state
        return c_n, h_n, z_n

    c_f, h_f, z_f = jax.lax.fori_loop(
        0, tc, step, (c_s[...], h_s[...], z_s[...]), unroll=True)
    c_s[...] = c_f
    h_s[...] = h_f
    z_s[...] = z_f


def init_params(key):
    def lin(k, fan_in, fan_out, scale=0.05):
        kw, kb = jax.random.split(k)
        W = scale * jax.random.normal(kw, (fan_in, fan_out), jnp.float32)
        b = scale * jax.random.normal(kb, (1, fan_out), jnp.float32)
        return W, b

    keys = jax.random.split(key, 9)
    Wt, bW = lin(keys[0], CELL, 4 * CELL)            # LSTHM W
    Ut, bU = lin(keys[1], CELL, 4 * CELL)            # LSTHM U
    Vt, bV = lin(keys[2], CELL, 4 * CELL)            # LSTHM V
    A1, a1b = lin(keys[3], CAT, 128)                 # attention Linear(256,128)
    A2, a2b = lin(keys[4], 128, CAT * NUM_ATTS)      # attention Linear(128,1024)
    D1_0, d1b0 = lin(keys[5], NUM_ATTS * CELL, 128)  # dim_reduce eeg Linear(512,128)
    D2_0, d2b0 = lin(keys[6], 128, 128)              # dim_reduce eeg Linear(128,128)
    D1_1, d1b1 = lin(keys[7], NUM_ATTS * CELL, 128)  # dim_reduce eog Linear(512,128)
    D2_1, d2b1 = lin(keys[8], 128, 128)              # dim_reduce eog Linear(128,128)
    return (Wt, bW, Ut, bU, Vt, bV, A1, a1b, A2, a2b,
            D1_0, d1b0, D2_0, d2b0, D1_1, d1b1, D2_1, d2b1)


def _vmem_bytes_estimate(tc, bb):
    """Rough VMEM footprint (scratch + double-buffered blocks + weights)."""
    ia = tc * 2 * bb * 4 * CELL * 4
    state = 3 * 2 * bb * CELL * 4
    io = 2 * 2 * tc * bb * CELL * 2 + 2 * tc * bb * 2 * CELL * 4
    wts = 2 * (CELL * 4 * CELL + CAT * 4 * CELL + CAT * CELL
               + CELL * NUM_ATTS * CAT + 2 * NUM_ATTS * CELL * CAT + CAT * CAT)
    biases = 4 * (2 * 4 * CELL + CELL + NUM_ATTS * CAT + 2 * CAT)
    return ia + state + io + 2 * (wts + biases)


def marn_forward(eeg, eog, params, *, tchunk=4, batch_block=None):
    """MARN forward pass.

    batch_block: rows per batch grid block.  Default (None) = the whole padded
    batch — best for single-TensorCore chips (v5e/v6e).  On v7x (2 TCs/chip),
    pass e.g. batch_block = round_up(B,8)//2 when B >= 16 so the "parallel"
    batch axis has extent >= 2 and both cores get work; keep it <= ~256 there
    so the ia_s scratch fits v7x's smaller (64 MiB) VMEM.
    """
    (Wt, bW, Ut, bU, Vt, bV, A1, a1b, A2, a2b,
     D1_0, d1b0, D2_0, d2b0, D1_1, d1b1, D2_1, d2b1) = params
    T, B, D = eeg.shape
    assert D == CELL

    # ---- one-time weight repacking (outside the recurrence) ----
    UV = jnp.concatenate([Ut, Vt], axis=0)            # [256, 512]  (h|z) @ [U;V]
    bUV = bU + bV                                     # removed at t == 0 only
    bWUV = bW + bUV                                   # folded projection bias

    # block-diagonal fused dim-reduce weights (om[B,1024] -> [hid0|hid1] -> [z0|z1])
    D1bd = jnp.zeros((2 * NUM_ATTS * CELL, 2 * CELL), jnp.float32)
    D1bd = D1bd.at[:NUM_ATTS * CELL, :CELL].set(D1_0)
    D1bd = D1bd.at[NUM_ATTS * CELL:, CELL:].set(D1_1)
    d1b = jnp.concatenate([d1b0, d1b1], axis=1)       # [1, 256]
    D2bd = jnp.zeros((2 * CELL, 2 * CELL), jnp.float32)
    D2bd = D2bd.at[:CELL, :CELL].set(D2_0)
    D2bd = D2bd.at[CELL:, CELL:].set(D2_1)
    d2b = jnp.concatenate([d2b0, d2b1], axis=1)       # [1, 256]

    bf = lambda w: w.astype(jnp.bfloat16)             # MXU operands only
    weights = (bf(Wt), bWUV, bUV, bf(UV),
               bf(A1), a1b, bf(A2), a2b,
               bf(D1bd), d1b, bf(D2bd), d2b)

    # ---- padding / blocking ----
    tc = max(1, min(tchunk, T))
    Tp = _round_up(T, tc)
    Bp = _round_up(B, 8)
    BB = Bp if batch_block is None else batch_block
    assert BB % 8 == 0 and Bp % BB == 0

    eeg = eeg.astype(jnp.bfloat16)                    # halve input DMA bytes
    eog = eog.astype(jnp.bfloat16)
    if (Tp, Bp) != (T, B):
        pad = ((0, Tp - T), (0, Bp - B), (0, 0))
        eeg = jnp.pad(eeg, pad)
        eog = jnp.pad(eog, pad)

    # time MUST be the last (inner, "arbitrary") grid axis: the recurrent state
    # scratch relies on each batch block seeing its chunks consecutively.
    grid = (Bp // BB, Tp // tc)

    def wspec(shape):
        return pl.BlockSpec(shape, lambda b, c: (0,) * len(shape))

    in_specs = [
        pl.BlockSpec((tc, BB, CELL), lambda b, c: (c, b, 0)),   # eeg chunk
        pl.BlockSpec((tc, BB, CELL), lambda b, c: (c, b, 0)),   # eog chunk
    ] + [wspec(w.shape) for w in weights]

    out_specs = pl.BlockSpec((tc, BB, 2 * CELL), lambda b, c: (c, b, 0))

    # VMEM budget: only raise the scoped limit when the tiling actually needs
    # it (v7x has just 64 MiB physical VMEM).
    est = _vmem_bytes_estimate(tc, BB)
    vmem_limit = None
    if est > 12 * 2 ** 20:
        vmem_limit = min(int(est * 2), 96 * 2 ** 20)

    grid_spec = pltpu.PrefetchScalarGridSpec(
        num_scalar_prefetch=0,
        grid=grid,
        in_specs=in_specs,
        out_specs=out_specs,
        scratch_shapes=[
            pltpu.VMEM((tc, 2 * BB, 4 * CELL), jnp.float32),   # staged x@W + bias
            pltpu.VMEM((2 * BB, CELL), jnp.float32),           # c state (eeg|eog)
            pltpu.VMEM((2 * BB, CELL), jnp.float32),           # h state
            pltpu.VMEM((2 * BB, CELL), jnp.float32),           # z state
        ],
    )

    out = pl.pallas_call(
        functools.partial(marn_chunk_kernel, tc=tc, bb=BB),
        out_shape=jax.ShapeDtypeStruct((Tp, Bp, 2 * CELL), jnp.float32),
        grid_spec=grid_spec,
        compiler_params=pltpu.CompilerParams(
            dimension_semantics=("parallel", "arbitrary"),
            vmem_limit_bytes=vmem_limit),
    )(eeg, eog, *weights)

    return out[:T, :B]


def marn_reference(eeg, eog, params):
    """Pure-JAX f32 reference mirroring the PyTorch forward (incl. None handling)."""
    (Wt, bW, Ut, bU, Vt, bV, A1, a1b, A2, a2b,
     D1_0, d1b0, D2_0, d2b0, D1_1, d1b1, D2_1, d2b1) = params
    T, B, _ = eeg.shape

    def lsthm(x, c, h, z):
        ia = x @ Wt + bW
        oa = (h @ Ut + bU) if h is not None else jnp.zeros_like(ia)
        ha = (z @ Vt + bV) if z is not None else jnp.zeros_like(ia)
        sums = ia + oa + ha
        f = jax.nn.sigmoid(sums[:, :CELL])
        i = jax.nn.sigmoid(sums[:, CELL:2 * CELL])
        o = jax.nn.sigmoid(sums[:, 2 * CELL:3 * CELL])
        ch = jnp.tanh(sums[:, 3 * CELL:])
        cp = c if c is not None else jnp.zeros_like(f)
        c_t = f * cp + i * ch
        return c_t, jnp.tanh(c_t) * o

    co, ho, zo = [None, None], [None, None], [None, None]
    outs = []
    for t in range(T):
        c0, h0 = lsthm(eeg[t], co[0], ho[0], zo[0])
        c1, h1 = lsthm(eog[t], co[1], ho[1], zo[1])
        in_tensor = jnp.concatenate([h0, h1], axis=1)
        logits = jnp.tanh(in_tensor @ A1 + a1b) @ A2 + a2b
        atts = jax.nn.softmax(logits.reshape(B, NUM_ATTS, CAT), axis=1).reshape(B, -1)
        out_tensor = jnp.concatenate([jnp.tile(h0, (1, NUM_ATTS)),
                                      jnp.tile(h1, (1, NUM_ATTS))], axis=1)
        att_out = atts * out_tensor
        om0, om1 = att_out[:, :NUM_ATTS * CELL], att_out[:, NUM_ATTS * CELL:]
        z0 = jnp.tanh(om0 @ D1_0 + d1b0) @ D2_0 + d2b0
        z1 = jnp.tanh(om1 @ D1_1 + d1b1) @ D2_1 + d2b1
        co, ho, zo = [c0, c1], [h0, h1], [z0, z1]
        outs.append(jnp.concatenate([z0, z1], axis=1)[None])
    return jnp.concatenate(outs, axis=0)

# TODO(synk): nn.AvgPool1d(11) (self.avg) is declared in __init__ but never used
# in forward(), so it is intentionally not implemented.


if __name__ == "__main__":
    key = jax.random.PRNGKey(0)
    kp, ke, ko = jax.random.split(key, 3)
    params = init_params(kp)

    T, B = 8, 8
    eeg = jax.random.normal(ke, (T, B, CELL), jnp.float32)
    eog = jax.random.normal(ko, (T, B, CELL), jnp.float32)

    out = jax.block_until_ready(jax.jit(marn_forward)(eeg, eog, params))
    ref = jax.block_until_ready(marn_reference(eeg, eog, params))

    assert out.shape == (T, B, 2 * CELL), out.shape
    # bf16 MXU operands (f32 accumulation / state) vs. a pure-f32 reference.
    np.testing.assert_allclose(np.asarray(out), np.asarray(ref), rtol=2e-2, atol=2e-2)
    print("KERNEL_OK")
</pallas_src>

<mosaic_0001>
module attributes {stable_mosaic.version = 11 : i64} {
  func.func @marn_chunk_kernel(%arg0: i32, %arg1: i32, %arg2: memref<4x8x128xbf16, #tpu.memory_space<vmem>>, %arg3: memref<4x8x128xbf16, #tpu.memory_space<vmem>>, %arg4: memref<128x512xbf16, #tpu.memory_space<vmem>>, %arg5: memref<1x512xf32, #tpu.memory_space<vmem>>, %arg6: memref<1x512xf32, #tpu.memory_space<vmem>>, %arg7: memref<256x512xbf16, #tpu.memory_space<vmem>>, %arg8: memref<256x128xbf16, #tpu.memory_space<vmem>>, %arg9: memref<1x128xf32, #tpu.memory_space<vmem>>, %arg10: memref<128x1024xbf16, #tpu.memory_space<vmem>>, %arg11: memref<1x1024xf32, #tpu.memory_space<vmem>>, %arg12: memref<1024x256xbf16, #tpu.memory_space<vmem>>, %arg13: memref<1x256xf32, #tpu.memory_space<vmem>>, %arg14: memref<256x256xbf16, #tpu.memory_space<vmem>>, %arg15: memref<1x256xf32, #tpu.memory_space<vmem>>, %arg16: memref<4x8x256xf32, #tpu.memory_space<vmem>>, %arg17: memref<4x16x512xf32, #tpu.memory_space<vmem>>, %arg18: memref<16x128xf32, #tpu.memory_space<vmem>>, %arg19: memref<16x128xf32, #tpu.memory_space<vmem>>, %arg20: memref<16x128xf32, #tpu.memory_space<vmem>>) attributes {dimension_semantics = [#tpu.dimension_semantics<parallel>, #tpu.dimension_semantics<arbitrary>], iteration_bounds = array<i64: 1, 2>, scalar_prefetch = 0 : i64, scratch_operands = 4 : i64, tpu.core_type = #tpu.core_type<tc>, window_params = [{transform_indices = @transform_0, window_bounds = array<i64: 4, 8, 128>}, {transform_indices = @transform_1, window_bounds = array<i64: 4, 8, 128>}, {pipeline_mode = #tpu.pipeline_mode<synchronous>, transform_indices = @transform_2, window_bounds = array<i64: 128, 512>}, {pipeline_mode = #tpu.pipeline_mode<synchronous>, transform_indices = @transform_3, window_bounds = array<i64: 1, 512>}, {pipeline_mode = #tpu.pipeline_mode<synchronous>, transform_indices = @transform_4, window_bounds = array<i64: 1, 512>}, {pipeline_mode = #tpu.pipeline_mode<synchronous>, transform_indices = @transform_5, window_bounds = array<i64: 256, 512>}, {pipeline_mode = #tpu.pipeline_mode<synchronous>, transform_indices = @transform_6, window_bounds = array<i64: 256, 128>}, {pipeline_mode = #tpu.pipeline_mode<synchronous>, transform_indices = @transform_7, window_bounds = array<i64: 1, 128>}, {pipeline_mode = #tpu.pipeline_mode<synchronous>, transform_indices = @transform_8, window_bounds = array<i64: 128, 1024>}, {pipeline_mode = #tpu.pipeline_mode<synchronous>, transform_indices = @transform_9, window_bounds = array<i64: 1, 1024>}, {pipeline_mode = #tpu.pipeline_mode<synchronous>, transform_indices = @transform_10, window_bounds = array<i64: 1024, 256>}, {pipeline_mode = #tpu.pipeline_mode<synchronous>, transform_indices = @transform_11, window_bounds = array<i64: 1, 256>}, {pipeline_mode = #tpu.pipeline_mode<synchronous>, transform_indices = @transform_12, window_bounds = array<i64: 256, 256>}, {pipeline_mode = #tpu.pipeline_mode<synchronous>, transform_indices = @transform_13, window_bounds = array<i64: 1, 256>}, {transform_indices = @transform_14, window_bounds = array<i64: 4, 8, 256>}]} {
    %c0_i32 = arith.constant 0 : i32
    %0 = arith.cmpi eq, %arg1, %c0_i32 : i32
    %1 = arith.extui %0 : i1 to i32
    %c0_i32_0 = arith.constant 0 : i32
    %2 = arith.cmpi ne, %1, %c0_i32_0 : i32
    scf.if %2 {
      %cst_86 = arith.constant 0.000000e+00 : f32
      %360 = vector.broadcast %cst_86 : f32 to vector<16x128xf32>
      %c0_87 = arith.constant 0 : index
      %c0_88 = arith.constant 0 : index
      %361 = vector.load %arg18[%c0_87, %c0_88] : memref<16x128xf32, #tpu.memory_space<vmem>>, vector<16x128xf32>
      tpu.vector_store %arg18[%c0_87, %c0_88], %360 {strides = array<i32>} : memref<16x128xf32, #tpu.memory_space<vmem>>, vector<16x128xf32>,
      %cst_89 = arith.constant 0.000000e+00 : f32
      %362 = vector.broadcast %cst_89 : f32 to vector<16x128xf32>
      %c0_90 = arith.constant 0 : index
      %c0_91 = arith.constant 0 : index
      %363 = vector.load %arg19[%c0_90, %c0_91] : memref<16x128xf32, #tpu.memory_space<vmem>>, vector<16x128xf32>
      tpu.vector_store %arg19[%c0_90, %c0_91], %362 {strides = array<i32>} : memref<16x128xf32, #tpu.memory_space<vmem>>, vector<16x128xf32>,
      %cst_92 = arith.constant 0.000000e+00 : f32
      %364 = vector.broadcast %cst_92 : f32 to vector<16x128xf32>
      %c0_93 = arith.constant 0 : index
      %c0_94 = arith.constant 0 : index
      %365 = vector.load %arg20[%c0_93, %c0_94] : memref<16x128xf32, #tpu.memory_space<vmem>>, vector<16x128xf32>
      tpu.vector_store %arg20[%c0_93, %c0_94], %364 {strides = array<i32>} : memref<16x128xf32, #tpu.memory_space<vmem>>, vector<16x128xf32>,
    } else {
    }
    %c0 = arith.constant 0 : index
    %c0_1 = arith.constant 0 : index
    %c0_2 = arith.constant 0 : index
    %3 = vector.load %arg2[%c0, %c0_1, %c0_2] : memref<4x8x128xbf16, #tpu.memory_space<vmem>>, vector<4x8x128xbf16>
    %c0_3 = arith.constant 0 : index
    %c0_4 = arith.constant 0 : index
    %c0_5 = arith.constant 0 : index
    %4 = vector.load %arg3[%c0_3, %c0_4, %c0_5] : memref<4x8x128xbf16, #tpu.memory_space<vmem>>, vector<4x8x128xbf16>
    %5 = tpu.concatenate %3, %4 in 1 : vector<4x8x128xbf16>, vector<4x8x128xbf16> -> vector<4x16x128xbf16>
    %6 = vector.shape_cast %5 : vector<4x16x128xbf16> to vector<64x128xbf16>
    %c0_6 = arith.constant 0 : index
    %c0_7 = arith.constant 0 : index
    %7 = vector.load %arg4[%c0_6, %c0_7] : memref<128x512xbf16, #tpu.memory_space<vmem>>, vector<128x512xbf16>
    %cst = arith.constant dense<0.000000e+00> : vector<64x512xf32>
    %8 = tpu.matmul %6, %7, %cst {dimension_numbers = #tpu.dot_dimension_numbers<[1], [0], [0], [1], [0, 0, 1, 1], [], []>} : vector<64x128xbf16>, vector<128x512xbf16>, vector<64x512xf32> -> vector<64x512xf32>
    %c0_8 = arith.constant 0 : index
    %c0_9 = arith.constant 0 : index
    %9 = vector.load %arg5[%c0_8, %c0_9] : memref<1x512xf32, #tpu.memory_space<vmem>>, vector<1x512xf32>
    %10 = vector.broadcast %9 : vector<1x512xf32> to vector<64x512xf32>
    %11 = arith.addf %8, %10 : vector<64x512xf32>
    %12 = vector.shape_cast %11 : vector<64x512xf32> to vector<4x16x512xf32>
    %c0_10 = arith.constant 0 : index
    %c0_11 = arith.constant 0 : index
    %c0_12 = arith.constant 0 : index
    %13 = vector.load %arg17[%c0_10, %c0_11, %c0_12] : memref<4x16x512xf32, #tpu.memory_space<vmem>>, vector<4x16x512xf32>
    tpu.vector_store %arg17[%c0_10, %c0_11, %c0_12], %12 {strides = array<i32>} : memref<4x16x512xf32, #tpu.memory_space<vmem>>, vector<4x16x512xf32>,
    %c0_i32_13 = arith.constant 0 : i32
    %14 = arith.cmpi eq, %arg1, %c0_i32_13 : i32
    %15 = arith.extui %14 : i1 to i32
    %c0_i32_14 = arith.constant 0 : i32
    %16 = arith.cmpi ne, %15, %c0_i32_14 : i32
    scf.if %16 {
      %c0_86 = arith.constant 0 : index
      %c0_87 = arith.constant 0 : index
      %c0_88 = arith.constant 0 : index
      %360 = vector.load %arg17[%c0_86, %c0_87, %c0_88] : memref<4x16x512xf32, #tpu.memory_space<vmem>>, vector<1x16x512xf32>
      %361 = vector.shape_cast %360 : vector<1x16x512xf32> to vector<16x512xf32>
      %c0_89 = arith.constant 0 : index
      %c0_90 = arith.constant 0 : index
      %362 = vector.load %arg6[%c0_89, %c0_90] : memref<1x512xf32, #tpu.memory_space<vmem>>, vector<1x512xf32>
      %363 = vector.broadcast %362 : vector<1x512xf32> to vector<16x512xf32>
      %364 = arith.subf %361, %363 : vector<16x512xf32>
      %c0_91 = arith.constant 0 : index
      %c0_92 = arith.constant 0 : index
      %c0_93 = arith.constant 0 : index
      %365 = vector.load %arg17[%c0_91, %c0_92, %c0_93] : memref<4x16x512xf32, #tpu.memory_space<vmem>>, vector<1x16x512xf32>
      %366 = vector.shape_cast %365 : vector<1x16x512xf32> to vector<16x512xf32>
      %367 = vector.shape_cast %364 : vector<16x512xf32> to vector<1x16x512xf32>
      tpu.vector_store %arg17[%c0_91, %c0_92, %c0_93], %367 {strides = array<i32>} : memref<4x16x512xf32, #tpu.memory_space<vmem>>, vector<1x16x512xf32>,
    } else {
    }
    %c0_15 = arith.constant 0 : index
    %c0_16 = arith.constant 0 : index
    %17 = vector.load %arg7[%c0_15, %c0_16] : memref<256x512xbf16, #tpu.memory_space<vmem>>, vector<256x512xbf16>
    %c0_17 = arith.constant 0 : index
    %c0_18 = arith.constant 0 : index
    %18 = vector.load %arg8[%c0_17, %c0_18] : memref<256x128xbf16, #tpu.memory_space<vmem>>, vector<256x128xbf16>
    %c0_19 = arith.constant 0 : index
    %c0_20 = arith.constant 0 : index
    %19 = vector.load %arg9[%c0_19, %c0_20] : memref<1x128xf32, #tpu.memory_space<vmem>>, vector<1x128xf32>
    %c0_21 = arith.constant 0 : index
    %c0_22 = arith.constant 0 : index
    %20 = vector.load %arg10[%c0_21, %c0_22] : memref<128x1024xbf16, #tpu.memory_space<vmem>>, vector<128x1024xbf16>
    %c0_23 = arith.constant 0 : index
    %c0_24 = arith.constant 0 : index
    %21 = vector.load %arg11[%c0_23, %c0_24] : memref<1x1024xf32, #tpu.memory_space<vmem>>, vector<1x1024xf32>
    %c0_25 = arith.constant 0 : index
    %c0_26 = arith.constant 0 : index
    %22 = vector.load %arg12[%c0_25, %c0_26] : memref<1024x256xbf16, #tpu.memory_space<vmem>>, vector<1024x256xbf16>
    %c0_27 = arith.constant 0 : index
    %c0_28 = arith.constant 0 : index
    %23 = vector.load %arg13[%c0_27, %c0_28] : memref<1x256xf32, #tpu.memory_space<vmem>>, vector<1x256xf32>
    %c0_29 = arith.constant 0 : index
    %c0_30 = arith.constant 0 : index
    %24 = vector.load %arg14[%c0_29, %c0_30] : memref<256x256xbf16, #tpu.memory_space<vmem>>, vector<256x256xbf16>
    %c0_31 = arith.constant 0 : index
    %c0_32 = arith.constant 0 : index
    %25 = vector.load %arg15[%c0_31, %c0_32] : memref<1x256xf32, #tpu.memory_space<vmem>>, vector<1x256xf32>
    %c0_33 = arith.constant 0 : index
    %c0_34 = arith.constant 0 : index
    %26 = vector.load %arg18[%c0_33, %c0_34] : memref<16x128xf32, #tpu.memory_space<vmem>>, vector<16x128xf32>
    %c0_35 = arith.constant 0 : index
    %c0_36 = arith.constant 0 : index
    %27 = vector.load %arg19[%c0_35, %c0_36] : memref<16x128xf32, #tpu.memory_space<vmem>>, vector<16x128xf32>
    %c0_37 = arith.constant 0 : index
    %c0_38 = arith.constant 0 : index
    %28 = vector.load %arg20[%c0_37, %c0_38] : memref<16x128xf32, #tpu.memory_space<vmem>>, vector<16x128xf32>
    %c0_i32_39 = arith.constant 0 : i32
    %29 = tpu.concatenate %27, %28 in 1 : vector<16x128xf32>, vector<16x128xf32> -> vector<16x256xf32>
    %30 = arith.truncf %29 : vector<16x256xf32> to vector<16x256xbf16>
    %cst_40 = arith.constant dense<0.000000e+00> : vector<16x512xf32>
    %31 = tpu.matmul %30, %17, %cst_40 {dimension_numbers = #tpu.dot_dimension_numbers<[1], [0], [0], [1], [0, 0, 1, 1], [], []>} : vector<16x256xbf16>, vector<256x512xbf16>, vector<16x512xf32> -> vector<16x512xf32>
    %32 = arith.index_cast %c0_i32_39 : i32 to index
    %c0_41 = arith.constant 0 : index
    %c0_42 = arith.constant 0 : index
    %33 = vector.load %arg17[%32, %c0_41, %c0_42] : memref<4x16x512xf32, #tpu.memory_space<vmem>>, vector<1x16x512xf32>
    %34 = vector.shape_cast %33 : vector<1x16x512xf32> to vector<16x512xf32>
    %35 = arith.addf %34, %31 : vector<16x512xf32>
    %36 = vector.extract_strided_slice %35 {offsets = [0, 0], sizes = [16, 384], strides = [1, 1]} : vector<16x512xf32> to vector<16x384xf32>
    %37 = arith.negf %36 : vector<16x384xf32>
    %38 = math.exp %37 : vector<16x384xf32>
    %cst_43 = arith.constant 1.000000e+00 : f32
    %39 = vector.broadcast %cst_43 : f32 to vector<16x384xf32>
    %40 = arith.addf %39, %38 : vector<16x384xf32>
    %41 = arith.divf %39, %40 : vector<16x384xf32>
    %42 = vector.extract_strided_slice %41 {offsets = [0, 0], sizes = [16, 128], strides = [1, 1]} : vector<16x384xf32> to vector<16x128xf32>
    %43 = vector.extract_strided_slice %41 {offsets = [0, 128], sizes = [16, 128], strides = [1, 1]} : vector<16x384xf32> to vector<16x128xf32>
    %44 = vector.extract_strided_slice %41 {offsets = [0, 256], sizes = [16, 128], strides = [1, 1]} : vector<16x384xf32> to vector<16x128xf32>
    %45 = vector.extract_strided_slice %35 {offsets = [0, 384], sizes = [16, 128], strides = [1, 1]} : vector<16x512xf32> to vector<16x128xf32>
    %46 = math.tanh %45 : vector<16x128xf32>
    %47 = arith.mulf %42, %26 : vector<16x128xf32>
    %48 = arith.mulf %43, %46 : vector<16x128xf32>
    %49 = arith.addf %47, %48 : vector<16x128xf32>
    %50 = math.tanh %49 : vector<16x128xf32>
    %51 = arith.mulf %50, %44 : vector<16x128xf32>
    %52 = vector.extract_strided_slice %51 {offsets = [0, 0], sizes = [8, 128], strides = [1, 1]} : vector<16x128xf32> to vector<8x128xf32>
    %53 = vector.extract_strided_slice %51 {offsets = [8, 0], sizes = [8, 128], strides = [1, 1]} : vector<16x128xf32> to vector<8x128xf32>
    %54 = tpu.concatenate %52, %53 in 1 : vector<8x128xf32>, vector<8x128xf32> -> vector<8x256xf32>
    %55 = arith.truncf %54 : vector<8x256xf32> to vector<8x256xbf16>
    %cst_44 = arith.constant dense<0.000000e+00> : vector<8x128xf32>
    %56 = tpu.matmul %55, %18, %cst_44 {dimension_numbers = #tpu.dot_dimension_numbers<[1], [0], [0], [1], [0, 0, 1, 1], [], []>} : vector<8x256xbf16>, vector<256x128xbf16>, vector<8x128xf32> -> vector<8x128xf32>
    %57 = vector.broadcast %19 : vector<1x128xf32> to vector<8x128xf32>
    %58 = arith.addf %56, %57 : vector<8x128xf32>
    %59 = math.tanh %58 : vector<8x128xf32>
    %60 = arith.truncf %59 : vector<8x128xf32> to vector<8x128xbf16>
    %cst_45 = arith.constant dense<0.000000e+00> : vector<8x1024xf32>
    %61 = tpu.matmul %60, %20, %cst_45 {dimension_numbers = #tpu.dot_dimension_numbers<[1], [0], [0], [1], [0, 0, 1, 1], [], []>} : vector<8x128xbf16>, vector<128x1024xbf16>, vector<8x1024xf32> -> vector<8x1024xf32>
    %62 = vector.broadcast %21 : vector<1x1024xf32> to vector<8x1024xf32>
    %63 = arith.addf %61, %62 : vector<8x1024xf32>
    %64 = vector.extract_strided_slice %63 {offsets = [0, 0], sizes = [8, 256], strides = [1, 1]} : vector<8x1024xf32> to vector<8x256xf32>
    %65 = vector.extract_strided_slice %63 {offsets = [0, 256], sizes = [8, 256], strides = [1, 1]} : vector<8x1024xf32> to vector<8x256xf32>
    %66 = vector.extract_strided_slice %63 {offsets = [0, 512], sizes = [8, 256], strides = [1, 1]} : vector<8x1024xf32> to vector<8x256xf32>
    %67 = vector.extract_strided_slice %63 {offsets = [0, 768], sizes = [8, 256], strides = [1, 1]} : vector<8x1024xf32> to vector<8x256xf32>
    %68 = arith.maximumf %64, %65 : vector<8x256xf32>
    %69 = arith.maximumf %66, %67 : vector<8x256xf32>
    %70 = arith.maximumf %68, %69 : vector<8x256xf32>
    %71 = arith.subf %64, %70 : vector<8x256xf32>
    %72 = math.exp %71 : vector<8x256xf32>
    %73 = arith.subf %65, %70 : vector<8x256xf32>
    %74 = math.exp %73 : vector<8x256xf32>
    %75 = arith.subf %66, %70 : vector<8x256xf32>
    %76 = math.exp %75 : vector<8x256xf32>
    %77 = arith.subf %67, %70 : vector<8x256xf32>
    %78 = math.exp %77 : vector<8x256xf32>
    %79 = arith.addf %72, %74 : vector<8x256xf32>
    %80 = arith.addf %79, %76 : vector<8x256xf32>
    %81 = arith.addf %80, %78 : vector<8x256xf32>
    %82 = tpu.reciprocal %81 {approx = true} : vector<8x256xf32> -> vector<8x256xf32>
    %83 = tpu.concatenate %52, %52 in 1 : vector<8x128xf32>, vector<8x128xf32> -> vector<8x256xf32>
    %84 = arith.mulf %83, %82 : vector<8x256xf32>
    %85 = tpu.concatenate %53, %53 in 1 : vector<8x128xf32>, vector<8x128xf32> -> vector<8x256xf32>
    %86 = arith.mulf %85, %82 : vector<8x256xf32>
    %87 = arith.mulf %72, %84 : vector<8x256xf32>
    %88 = arith.truncf %87 : vector<8x256xf32> to vector<8x256xbf16>
    %89 = arith.mulf %74, %84 : vector<8x256xf32>
    %90 = arith.truncf %89 : vector<8x256xf32> to vector<8x256xbf16>
    %91 = arith.mulf %76, %86 : vector<8x256xf32>
    %92 = arith.truncf %91 : vector<8x256xf32> to vector<8x256xbf16>
    %93 = arith.mulf %78, %86 : vector<8x256xf32>
    %94 = arith.truncf %93 : vector<8x256xf32> to vector<8x256xbf16>
    %95 = tpu.concatenate %88, %90, %92, %94 in 1 : vector<8x256xbf16>, vector<8x256xbf16>, vector<8x256xbf16>, vector<8x256xbf16> -> vector<8x1024xbf16>
    %cst_46 = arith.constant dense<0.000000e+00> : vector<8x256xf32>
    %96 = tpu.matmul %95, %22, %cst_46 {dimension_numbers = #tpu.dot_dimension_numbers<[1], [0], [0], [1], [0, 0, 1, 1], [], []>} : vector<8x1024xbf16>, vector<1024x256xbf16>, vector<8x256xf32> -> vector<8x256xf32>
    %97 = vector.broadcast %23 : vector<1x256xf32> to vector<8x256xf32>
    %98 = arith.addf %96, %97 : vector<8x256xf32>
    %99 = math.tanh %98 : vector<8x256xf32>
    %100 = arith.truncf %99 : vector<8x256xf32> to vector<8x256xbf16>
    %cst_47 = arith.constant dense<0.000000e+00> : vector<8x256xf32>
    %101 = tpu.matmul %100, %24, %cst_47 {dimension_numbers = #tpu.dot_dimension_numbers<[1], [0], [0], [1], [0, 0, 1, 1], [], []>} : vector<8x256xbf16>, vector<256x256xbf16>, vector<8x256xf32> -> vector<8x256xf32>
    %102 = vector.broadcast %25 : vector<1x256xf32> to vector<8x256xf32>
    %103 = arith.addf %101, %102 : vector<8x256xf32>
    %104 = arith.index_cast %c0_i32_39 : i32 to index
    %c0_48 = arith.constant 0 : index
    %c0_49 = arith.constant 0 : index
    %105 = vector.load %arg16[%104, %c0_48, %c0_49] : memref<4x8x256xf32, #tpu.memory_space<vmem>>, vector<1x8x256xf32>
    %106 = vector.shape_cast %105 : vector<1x8x256xf32> to vector<8x256xf32>
    %107 = vector.shape_cast %103 : vector<8x256xf32> to vector<1x8x256xf32>
    tpu.vector_store %arg16[%104, %c0_48, %c0_49], %107 {strides = array<i32>} : memref<4x8x256xf32, #tpu.memory_space<vmem>>, vector<1x8x256xf32>,
    %108 = vector.extract_strided_slice %103 {offsets = [0, 0], sizes = [8, 128], strides = [1, 1]} : vector<8x256xf32> to vector<8x128xf32>
    %109 = vector.extract_strided_slice %103 {offsets = [0, 128], sizes = [8, 128], strides = [1, 1]} : vector<8x256xf32> to vector<8x128xf32>
    %110 = tpu.concatenate %108, %109 in 0 : vector<8x128xf32>, vector<8x128xf32> -> vector<16x128xf32>
    %c1_i32 = arith.constant 1 : i32
    %111 = tpu.concatenate %51, %110 in 1 : vector<16x128xf32>, vector<16x128xf32> -> vector<16x256xf32>
    %112 = arith.truncf %111 : vector<16x256xf32> to vector<16x256xbf16>
    %cst_50 = arith.constant dense<0.000000e+00> : vector<16x512xf32>
    %113 = tpu.matmul %112, %17, %cst_50 {dimension_numbers = #tpu.dot_dimension_numbers<[1], [0], [0], [1], [0, 0, 1, 1], [], []>} : vector<16x256xbf16>, vector<256x512xbf16>, vector<16x512xf32> -> vector<16x512xf32>
    %114 = arith.index_cast %c1_i32 : i32 to index
    %c0_51 = arith.constant 0 : index
    %c0_52 = arith.constant 0 : index
    %115 = vector.load %arg17[%114, %c0_51, %c0_52] : memref<4x16x512xf32, #tpu.memory_space<vmem>>, vector<1x16x512xf32>
    %116 = vector.shape_cast %115 : vector<1x16x512xf32> to vector<16x512xf32>
    %117 = arith.addf %116, %113 : vector<16x512xf32>
    %118 = vector.extract_strided_slice %117 {offsets = [0, 0], sizes = [16, 384], strides = [1, 1]} : vector<16x512xf32> to vector<16x384xf32>
    %119 = arith.negf %118 : vector<16x384xf32>
    %120 = math.exp %119 : vector<16x384xf32>
    %cst_53 = arith.constant 1.000000e+00 : f32
    %121 = vector.broadcast %cst_53 : f32 to vector<16x384xf32>
    %122 = arith.addf %121, %120 : vector<16x384xf32>
    %123 = arith.divf %121, %122 : vector<16x384xf32>
    %124 = vector.extract_strided_slice %123 {offsets = [0, 0], sizes = [16, 128], strides = [1, 1]} : vector<16x384xf32> to vector<16x128xf32>
    %125 = vector.extract_strided_slice %123 {offsets = [0, 128], sizes = [16, 128], strides = [1, 1]} : vector<16x384xf32> to vector<16x128xf32>
    %126 = vector.extract_strided_slice %123 {offsets = [0, 256], sizes = [16, 128], strides = [1, 1]} : vector<16x384xf32> to vector<16x128xf32>
    %127 = vector.extract_strided_slice %117 {offsets = [0, 384], sizes = [16, 128], strides = [1, 1]} : vector<16x512xf32> to vector<16x128xf32>
    %128 = math.tanh %127 : vector<16x128xf32>
    %129 = arith.mulf %124, %49 : vector<16x128xf32>
    %130 = arith.mulf %125, %128 : vector<16x128xf32>
    %131 = arith.addf %129, %130 : vector<16x128xf32>
    %132 = math.tanh %131 : vector<16x128xf32>
    %133 = arith.mulf %132, %126 : vector<16x128xf32>
    %134 = vector.extract_strided_slice %133 {offsets = [0, 0], sizes = [8, 128], strides = [1, 1]} : vector<16x128xf32> to vector<8x128xf32>
    %135 = vector.extract_strided_slice %133 {offsets = [8, 0], sizes = [8, 128], strides = [1, 1]} : vector<16x128xf32> to vector<8x128xf32>
    %136 = tpu.concatenate %134, %135 in 1 : vector<8x128xf32>, vector<8x128xf32> -> vector<8x256xf32>
    %137 = arith.truncf %136 : vector<8x256xf32> to vector<8x256xbf16>
    %cst_54 = arith.constant dense<0.000000e+00> : vector<8x128xf32>
    %138 = tpu.matmul %137, %18, %cst_54 {dimension_numbers = #tpu.dot_dimension_numbers<[1], [0], [0], [1], [0, 0, 1, 1], [], []>} : vector<8x256xbf16>, vector<256x128xbf16>, vector<8x128xf32> -> vector<8x128xf32>
    %139 = vector.broadcast %19 : vector<1x128xf32> to vector<8x128xf32>
    %140 = arith.addf %138, %139 : vector<8x128xf32>
    %141 = math.tanh %140 : vector<8x128xf32>
    %142 = arith.truncf %141 : vector<8x128xf32> to vector<8x128xbf16>
    %cst_55 = arith.constant dense<0.000000e+00> : vector<8x1024xf32>
    %143 = tpu.matmul %142, %20, %cst_55 {dimension_numbers = #tpu.dot_dimension_numbers<[1], [0], [0], [1], [0, 0, 1, 1], [], []>} : vector<8x128xbf16>, vector<128x1024xbf16>, vector<8x1024xf32> -> vector<8x1024xf32>
    %144 = vector.broadcast %21 : vector<1x1024xf32> to vector<8x1024xf32>
    %145 = arith.addf %143, %144 : vector<8x1024xf32>
    %146 = vector.extract_strided_slice %145 {offsets = [0, 0], sizes = [8, 256], strides = [1, 1]} : vector<8x1024xf32> to vector<8x256xf32>
    %147 = vector.extract_strided_slice %145 {offsets = [0, 256], sizes = [8, 256], strides = [1, 1]} : vector<8x1024xf32> to vector<8x256xf32>
    %148 = vector.extract_strided_slice %145 {offsets = [0, 512], sizes = [8, 256], strides = [1, 1]} : vector<8x1024xf32> to vector<8x256xf32>
    %149 = vector.extract_strided_slice %145 {offsets = [0, 768], sizes = [8, 256], strides = [1, 1]} : vector<8x1024xf32> to vector<8x256xf32>
    %150 = arith.maximumf %146, %147 : vector<8x256xf32>
    %151 = arith.maximumf %148, %149 : vector<8x256xf32>
    %152 = arith.maximumf %150, %151 : vector<8x256xf32>
    %153 = arith.subf %146, %152 : vector<8x256xf32>
    %154 = math.exp %153 : vector<8x256xf32>
    %155 = arith.subf %147, %152 : vector<8x256xf32>
    %156 = math.exp %155 : vector<8x256xf32>
    %157 = arith.subf %148, %152 : vector<8x256xf32>
    %158 = math.exp %157 : vector<8x256xf32>
    %159 = arith.subf %149, %152 : vector<8x256xf32>
    %160 = math.exp %159 : vector<8x256xf32>
    %161 = arith.addf %154, %156 : vector<8x256xf32>
    %162 = arith.addf %161, %158 : vector<8x256xf32>
    %163 = arith.addf %162, %160 : vector<8x256xf32>
    %164 = tpu.reciprocal %163 {approx = true} : vector<8x256xf32> -> vector<8x256xf32>
    %165 = tpu.concatenate %134, %134 in 1 : vector<8x128xf32>, vector<8x128xf32> -> vector<8x256xf32>
    %166 = arith.mulf %165, %164 : vector<8x256xf32>
    %167 = tpu.concatenate %135, %135 in 1 : vector<8x128xf32>, vector<8x128xf32> -> vector<8x256xf32>
    %168 = arith.mulf %167, %164 : vector<8x256xf32>
    %169 = arith.mulf %154, %166 : vector<8x256xf32>
    %170 = arith.truncf %169 : vector<8x256xf32> to vector<8x256xbf16>
    %171 = arith.mulf %156, %166 : vector<8x256xf32>
    %172 = arith.truncf %171 : vector<8x256xf32> to vector<8x256xbf16>
    %173 = arith.mulf %158, %168 : vector<8x256xf32>
    %174 = arith.truncf %173 : vector<8x256xf32> to vector<8x256xbf16>
    %175 = arith.mulf %160, %168 : vector<8x256xf32>
    %176 = arith.truncf %175 : vector<8x256xf32> to vector<8x256xbf16>
    %177 = tpu.concatenate %170, %172, %174, %176 in 1 : vector<8x256xbf16>, vector<8x256xbf16>, vector<8x256xbf16>, vector<8x256xbf16> -> vector<8x1024xbf16>
    %cst_56 = arith.constant dense<0.000000e+00> : vector<8x256xf32>
    %178 = tpu.matmul %177, %22, %cst_56 {dimension_numbers = #tpu.dot_dimension_numbers<[1], [0], [0], [1], [0, 0, 1, 1], [], []>} : vector<8x1024xbf16>, vector<1024x256xbf16>, vector<8x256xf32> -> vector<8x256xf32>
    %179 = vector.broadcast %23 : vector<1x256xf32> to vector<8x256xf32>
    %180 = arith.addf %178, %179 : vector<8x256xf32>
    %181 = math.tanh %180 : vector<8x256xf32>
    %182 = arith.truncf %181 : vector<8x256xf32> to vector<8x256xbf16>
    %cst_57 = arith.constant dense<0.000000e+00> : vector<8x256xf32>
    %183 = tpu.matmul %182, %24, %cst_57 {dimension_numbers = #tpu.dot_dimension_numbers<[1], [0], [0], [1], [0, 0, 1, 1], [], []>} : vector<8x256xbf16>, vector<256x256xbf16>, vector<8x256xf32> -> vector<8x256xf32>
    %184 = vector.broadcast %25 : vector<1x256xf32> to vector<8x256xf32>
    %185 = arith.addf %183, %184 : vector<8x256xf32>
    %186 = arith.index_cast %c1_i32 : i32 to index
    %c0_58 = arith.constant 0 : index
    %c0_59 = arith.constant 0 : index
    %187 = vector.load %arg16[%186, %c0_58, %c0_59] : memref<4x8x256xf32, #tpu.memory_space<vmem>>, vector<1x8x256xf32>
    %188 = vector.shape_cast %187 : vector<1x8x256xf32> to vector<8x256xf32>
    %189 = vector.shape_cast %185 : vector<8x256xf32> to vector<1x8x256xf32>
    tpu.vector_store %arg16[%186, %c0_58, %c0_59], %189 {strides = array<i32>} : memref<4x8x256xf32, #tpu.memory_space<vmem>>, vector<1x8x256xf32>,
    %190 = vector.extract_strided_slice %185 {offsets = [0, 0], sizes = [8, 128], strides = [1, 1]} : vector<8x256xf32> to vector<8x128xf32>
    %191 = vector.extract_strided_slice %185 {offsets = [0, 128], sizes = [8, 128], strides = [1, 1]} : vector<8x256xf32> to vector<8x128xf32>
    %192 = tpu.concatenate %190, %191 in 0 : vector<8x128xf32>, vector<8x128xf32> -> vector<16x128xf32>
    %c2_i32 = arith.constant 2 : i32
    %193 = tpu.concatenate %133, %192 in 1 : vector<16x128xf32>, vector<16x128xf32> -> vector<16x256xf32>
    %194 = arith.truncf %193 : vector<16x256xf32> to vector<16x256xbf16>
    %cst_60 = arith.constant dense<0.000000e+00> : vector<16x512xf32>
    %195 = tpu.matmul %194, %17, %cst_60 {dimension_numbers = #tpu.dot_dimension_numbers<[1], [0], [0], [1], [0, 0, 1, 1], [], []>} : vector<16x256xbf16>, vector<256x512xbf16>, vector<16x512xf32> -> vector<16x512xf32>
    %196 = arith.index_cast %c2_i32 : i32 to index
    %c0_61 = arith.constant 0 : index
    %c0_62 = arith.constant 0 : index
    %197 = vector.load %arg17[%196, %c0_61, %c0_62] : memref<4x16x512xf32, #tpu.memory_space<vmem>>, vector<1x16x512xf32>
    %198 = vector.shape_cast %197 : vector<1x16x512xf32> to vector<16x512xf32>
    %199 = arith.addf %198, %195 : vector<16x512xf32>
    %200 = vector.extract_strided_slice %199 {offsets = [0, 0], sizes = [16, 384], strides = [1, 1]} : vector<16x512xf32> to vector<16x384xf32>
    %201 = arith.negf %200 : vector<16x384xf32>
    %202 = math.exp %201 : vector<16x384xf32>
    %cst_63 = arith.constant 1.000000e+00 : f32
    %203 = vector.broadcast %cst_63 : f32 to vector<16x384xf32>
    %204 = arith.addf %203, %202 : vector<16x384xf32>
    %205 = arith.divf %203, %204 : vector<16x384xf32>
    %206 = vector.extract_strided_slice %205 {offsets = [0, 0], sizes = [16, 128], strides = [1, 1]} : vector<16x384xf32> to vector<16x128xf32>
    %207 = vector.extract_strided_slice %205 {offsets = [0, 128], sizes = [16, 128], strides = [1, 1]} : vector<16x384xf32> to vector<16x128xf32>
    %208 = vector.extract_strided_slice %205 {offsets = [0, 256], sizes = [16, 128], strides = [1, 1]} : vector<16x384xf32> to vector<16x128xf32>
    %209 = vector.extract_strided_slice %199 {offsets = [0, 384], sizes = [16, 128], strides = [1, 1]} : vector<16x512xf32> to vector<16x128xf32>
    %210 = math.tanh %209 : vector<16x128xf32>
    %211 = arith.mulf %206, %131 : vector<16x128xf32>
    %212 = arith.mulf %207, %210 : vector<16x128xf32>
    %213 = arith.addf %211, %212 : vector<16x128xf32>
    %214 = math.tanh %213 : vector<16x128xf32>
    %215 = arith.mulf %214, %208 : vector<16x128xf32>
    %216 = vector.extract_strided_slice %215 {offsets = [0, 0], sizes = [8, 128], strides = [1, 1]} : vector<16x128xf32> to vector<8x128xf32>
    %217 = vector.extract_strided_slice %215 {offsets = [8, 0], sizes = [8, 128], strides = [1, 1]} : vector<16x128xf32> to vector<8x128xf32>
    %218 = tpu.concatenate %216, %217 in 1 : vector<8x128xf32>, vector<8x128xf32> -> vector<8x256xf32>
    %219 = arith.truncf %218 : vector<8x256xf32> to vector<8x256xbf16>
    %cst_64 = arith.constant dense<0.000000e+00> : vector<8x128xf32>
    %220 = tpu.matmul %219, %18, %cst_64 {dimension_numbers = #tpu.dot_dimension_numbers<[1], [0], [0], [1], [0, 0, 1, 1], [], []>} : vector<8x256xbf16>, vector<256x128xbf16>, vector<8x128xf32> -> vector<8x128xf32>
    %221 = vector.broadcast %19 : vector<1x128xf32> to vector<8x128xf32>
    %222 = arith.addf %220, %221 : vector<8x128xf32>
    %223 = math.tanh %222 : vector<8x128xf32>
    %224 = arith.truncf %223 : vector<8x128xf32> to vector<8x128xbf16>
    %cst_65 = arith.constant dense<0.000000e+00> : vector<8x1024xf32>
    %225 = tpu.matmul %224, %20, %cst_65 {dimension_numbers = #tpu.dot_dimension_numbers<[1], [0], [0], [1], [0, 0, 1, 1], [], []>} : vector<8x128xbf16>, vector<128x1024xbf16>, vector<8x1024xf32> -> vector<8x1024xf32>
    %226 = vector.broadcast %21 : vector<1x1024xf32> to vector<8x1024xf32>
    %227 = arith.addf %225, %226 : vector<8x1024xf32>
    %228 = vector.extract_strided_slice %227 {offsets = [0, 0], sizes = [8, 256], strides = [1, 1]} : vector<8x1024xf32> to vector<8x256xf32>
    %229 = vector.extract_strided_slice %227 {offsets = [0, 256], sizes = [8, 256], strides = [1, 1]} : vector<8x1024xf32> to vector<8x256xf32>
    %230 = vector.extract_strided_slice %227 {offsets = [0, 512], sizes = [8, 256], strides = [1, 1]} : vector<8x1024xf32> to vector<8x256xf32>
    %231 = vector.extract_strided_slice %227 {offsets = [0, 768], sizes = [8, 256], strides = [1, 1]} : vector<8x1024xf32> to vector<8x256xf32>
    %232 = arith.maximumf %228, %229 : vector<8x256xf32>
    %233 = arith.maximumf %230, %231 : vector<8x256xf32>
    %234 = arith.maximumf %232, %233 : vector<8x256xf32>
    %235 = arith.subf %228, %234 : vector<8x256xf32>
    %236 = math.exp %235 : vector<8x256xf32>
    %237 = arith.subf %229, %234 : vector<8x256xf32>
    %238 = math.exp %237 : vector<8x256xf32>
    %239 = arith.subf %230, %234 : vector<8x256xf32>
    %240 = math.exp %239 : vector<8x256xf32>
    %241 = arith.subf %231, %234 : vector<8x256xf32>
    %242 = math.exp %241 : vector<8x256xf32>
    %243 = arith.addf %236, %238 : vector<8x256xf32>
    %244 = arith.addf %243, %240 : vector<8x256xf32>
    %245 = arith.addf %244, %242 : vector<8x256xf32>
    %246 = tpu.reciprocal %245 {approx = true} : vector<8x256xf32> -> vector<8x256xf32>
    %247 = tpu.concatenate %216, %216 in 1 : vector<8x128xf32>, vector<8x128xf32> -> vector<8x256xf32>
    %248 = arith.mulf %247, %246 : vector<8x256xf32>
    %249 = tpu.concatenate %217, %217 in 1 : vector<8x128xf32>, vector<8x128xf32> -> vector<8x256xf32>
    %250 = arith.mulf %249, %246 : vector<8x256xf32>
    %251 = arith.mulf %236, %248 : vector<8x256xf32>
    %252 = arith.truncf %251 : vector<8x256xf32> to vector<8x256xbf16>
    %253 = arith.mulf %238, %248 : vector<8x256xf32>
    %254 = arith.truncf %253 : vector<8x256xf32> to vector<8x256xbf16>
    %255 = arith.mulf %240, %250 : vector<8x256xf32>
    %256 = arith.truncf %255 : vector<8x256xf32> to vector<8x256xbf16>
    %257 = arith.mulf %242, %250 : vector<8x256xf32>
    %258 = arith.truncf %257 : vector<8x256xf32> to vector<8x256xbf16>
    %259 = tpu.concatenate %252, %254, %256, %258 in 1 : vector<8x256xbf16>, vector<8x256xbf16>, vector<8x256xbf16>, vector<8x256xbf16> -> vector<8x1024xbf16>
    %cst_66 = arith.constant dense<0.000000e+00> : vector<8x256xf32>
    %260 = tpu.matmul %259, %22, %cst_66 {dimension_numbers = #tpu.dot_dimension_numbers<[1], [0], [0], [1], [0, 0, 1, 1], [], []>} : vector<8x1024xbf16>, vector<1024x256xbf16>, vector<8x256xf32> -> vector<8x256xf32>
    %261 = vector.broadcast %23 : vector<1x256xf32> to vector<8x256xf32>
    %262 = arith.addf %260, %261 : vector<8x256xf32>
    %263 = math.tanh %262 : vector<8x256xf32>
    %264 = arith.truncf %263 : vector<8x256xf32> to vector<8x256xbf16>
    %cst_67 = arith.constant dense<0.000000e+00> : vector<8x256xf32>
    %265 = tpu.matmul %264, %24, %cst_67 {dimension_numbers = #tpu.dot_dimension_numbers<[1], [0], [0], [1], [0, 0, 1, 1], [], []>} : vector<8x256xbf16>, vector<256x256xbf16>, vector<8x256xf32> -> vector<8x256xf32>
    %266 = vector.broadcast %25 : vector<1x256xf32> to vector<8x256xf32>
    %267 = arith.addf %265, %266 : vector<8x256xf32>
    %268 = arith.index_cast %c2_i32 : i32 to index
    %c0_68 = arith.constant 0 : index
    %c0_69 = arith.constant 0 : index
    %269 = vector.load %arg16[%268, %c0_68, %c0_69] : memref<4x8x256xf32, #tpu.memory_space<vmem>>, vector<1x8x256xf32>
    %270 = vector.shape_cast %269 : vector<1x8x256xf32> to vector<8x256xf32>
    %271 = vector.shape_cast %267 : vector<8x256xf32> to vector<1x8x256xf32>
    tpu.vector_store %arg16[%268, %c0_68, %c0_69], %271 {strides = array<i32>} : memref<4x8x256xf32, #tpu.memory_space<vmem>>, vector<1x8x256xf32>,
    %272 = vector.extract_strided_slice %267 {offsets = [0, 0], sizes = [8, 128], strides = [1, 1]} : vector<8x256xf32> to vector<8x128xf32>
    %273 = vector.extract_strided_slice %267 {offsets = [0, 128], sizes = [8, 128], strides = [1, 1]} : vector<8x256xf32> to vector<8x128xf32>
    %274 = tpu.concatenate %272, %273 in 0 : vector<8x128xf32>, vector<8x128xf32> -> vector<16x128xf32>
    %c3_i32 = arith.constant 3 : i32
    %275 = tpu.concatenate %215, %274 in 1 : vector<16x128xf32>, vector<16x128xf32> -> vector<16x256xf32>
    %276 = arith.truncf %275 : vector<16x256xf32> to vector<16x256xbf16>
    %cst_70 = arith.constant dense<0.000000e+00> : vector<16x512xf32>
    %277 = tpu.matmul %276, %17, %cst_70 {dimension_numbers = #tpu.dot_dimension_numbers<[1], [0], [0], [1], [0, 0, 1, 1], [], []>} : vector<16x256xbf16>, vector<256x512xbf16>, vector<16x512xf32> -> vector<16x512xf32>
    %278 = arith.index_cast %c3_i32 : i32 to index
    %c0_71 = arith.constant 0 : index
    %c0_72 = arith.constant 0 : index
    %279 = vector.load %arg17[%278, %c0_71, %c0_72] : memref<4x16x512xf32, #tpu.memory_space<vmem>>, vector<1x16x512xf32>
    %280 = vector.shape_cast %279 : vector<1x16x512xf32> to vector<16x512xf32>
    %281 = arith.addf %280, %277 : vector<16x512xf32>
    %282 = vector.extract_strided_slice %281 {offsets = [0, 0], sizes = [16, 384], strides = [1, 1]} : vector<16x512xf32> to vector<16x384xf32>
    %283 = arith.negf %282 : vector<16x384xf32>
    %284 = math.exp %283 : vector<16x384xf32>
    %cst_73 = arith.constant 1.000000e+00 : f32
    %285 = vector.broadcast %cst_73 : f32 to vector<16x384xf32>
    %286 = arith.addf %285, %284 : vector<16x384xf32>
    %287 = arith.divf %285, %286 : vector<16x384xf32>
    %288 = vector.extract_strided_slice %287 {offsets = [0, 0], sizes = [16, 128], strides = [1, 1]} : vector<16x384xf32> to vector<16x128xf32>
    %289 = vector.extract_strided_slice %287 {offsets = [0, 128], sizes = [16, 128], strides = [1, 1]} : vector<16x384xf32> to vector<16x128xf32>
    %290 = vector.extract_strided_slice %287 {offsets = [0, 256], sizes = [16, 128], strides = [1, 1]} : vector<16x384xf32> to vector<16x128xf32>
    %291 = vector.extract_strided_slice %281 {offsets = [0, 384], sizes = [16, 128], strides = [1, 1]} : vector<16x512xf32> to vector<16x128xf32>
    %292 = math.tanh %291 : vector<16x128xf32>
    %293 = arith.mulf %288, %213 : vector<16x128xf32>
    %294 = arith.mulf %289, %292 : vector<16x128xf32>
    %295 = arith.addf %293, %294 : vector<16x128xf32>
    %296 = math.tanh %295 : vector<16x128xf32>
    %297 = arith.mulf %296, %290 : vector<16x128xf32>
    %298 = vector.extract_strided_slice %297 {offsets = [0, 0], sizes = [8, 128], strides = [1, 1]} : vector<16x128xf32> to vector<8x128xf32>
    %299 = vector.extract_strided_slice %297 {offsets = [8, 0], sizes = [8, 128], strides = [1, 1]} : vector<16x128xf32> to vector<8x128xf32>
    %300 = tpu.concatenate %298, %299 in 1 : vector<8x128xf32>, vector<8x128xf32> -> vector<8x256xf32>
    %301 = arith.truncf %300 : vector<8x256xf32> to vector<8x256xbf16>
    %cst_74 = arith.constant dense<0.000000e+00> : vector<8x128xf32>
    %302 = tpu.matmul %301, %18, %cst_74 {dimension_numbers = #tpu.dot_dimension_numbers<[1], [0], [0], [1], [0, 0, 1, 1], [], []>} : vector<8x256xbf16>, vector<256x128xbf16>, vector<8x128xf32> -> vector<8x128xf32>
    %303 = vector.broadcast %19 : vector<1x128xf32> to vector<8x128xf32>
    %304 = arith.addf %302, %303 : vector<8x128xf32>
    %305 = math.tanh %304 : vector<8x128xf32>
    %306 = arith.truncf %305 : vector<8x128xf32> to vector<8x128xbf16>
    %cst_75 = arith.constant dense<0.000000e+00> : vector<8x1024xf32>
    %307 = tpu.matmul %306, %20, %cst_75 {dimension_numbers = #tpu.dot_dimension_numbers<[1], [0], [0], [1], [0, 0, 1, 1], [], []>} : vector<8x128xbf16>, vector<128x1024xbf16>, vector<8x1024xf32> -> vector<8x1024xf32>
    %308 = vector.broadcast %21 : vector<1x1024xf32> to vector<8x1024xf32>
    %309 = arith.addf %307, %308 : vector<8x1024xf32>
    %310 = vector.extract_strided_slice %309 {offsets = [0, 0], sizes = [8, 256], strides = [1, 1]} : vector<8x1024xf32> to vector<8x256xf32>
    %311 = vector.extract_strided_slice %309 {offsets = [0, 256], sizes = [8, 256], strides = [1, 1]} : vector<8x1024xf32> to vector<8x256xf32>
    %312 = vector.extract_strided_slice %309 {offsets = [0, 512], sizes = [8, 256], strides = [1, 1]} : vector<8x1024xf32> to vector<8x256xf32>
    %313 = vector.extract_strided_slice %309 {offsets = [0, 768], sizes = [8, 256], strides = [1, 1]} : vector<8x1024xf32> to vector<8x256xf32>
    %314 = arith.maximumf %310, %311 : vector<8x256xf32>
    %315 = arith.maximumf %312, %313 : vector<8x256xf32>
    %316 = arith.maximumf %314, %315 : vector<8x256xf32>
    %317 = arith.subf %310, %316 : vector<8x256xf32>
    %318 = math.exp %317 : vector<8x256xf32>
    %319 = arith.subf %311, %316 : vector<8x256xf32>
    %320 = math.exp %319 : vector<8x256xf32>
    %321 = arith.subf %312, %316 : vector<8x256xf32>
    %322 = math.exp %321 : vector<8x256xf32>
    %323 = arith.subf %313, %316 : vector<8x256xf32>
    %324 = math.exp %323 : vector<8x256xf32>
    %325 = arith.addf %318, %320 : vector<8x256xf32>
    %326 = arith.addf %325, %322 : vector<8x256xf32>
    %327 = arith.addf %326, %324 : vector<8x256xf32>
    %328 = tpu.reciprocal %327 {approx = true} : vector<8x256xf32> -> vector<8x256xf32>
    %329 = tpu.concatenate %298, %298 in 1 : vector<8x128xf32>, vector<8x128xf32> -> vector<8x256xf32>
    %330 = arith.mulf %329, %328 : vector<8x256xf32>
    %331 = tpu.concatenate %299, %299 in 1 : vector<8x128xf32>, vector<8x128xf32> -> vector<8x256xf32>
    %332 = arith.mulf %331, %328 : vector<8x256xf32>
    %333 = arith.mulf %318, %330 : vector<8x256xf32>
    %334 = arith.truncf %333 : vector<8x256xf32> to vector<8x256xbf16>
    %335 = arith.mulf %320, %330 : vector<8x256xf32>
    %336 = arith.truncf %335 : vector<8x256xf32> to vector<8x256xbf16>
    %337 = arith.mulf %322, %332 : vector<8x256xf32>
    %338 = arith.truncf %337 : vector<8x256xf32> to vector<8x256xbf16>
    %339 = arith.mulf %324, %332 : vector<8x256xf32>
    %340 = arith.truncf %339 : vector<8x256xf32> to vector<8x256xbf16>
    %341 = tpu.concatenate %334, %336, %338, %340 in 1 : vector<8x256xbf16>, vector<8x256xbf16>, vector<8x256xbf16>, vector<8x256xbf16> -> vector<8x1024xbf16>
    %cst_76 = arith.constant dense<0.000000e+00> : vector<8x256xf32>
    %342 = tpu.matmul %341, %22, %cst_76 {dimension_numbers = #tpu.dot_dimension_numbers<[1], [0], [0], [1], [0, 0, 1, 1], [], []>} : vector<8x1024xbf16>, vector<1024x256xbf16>, vector<8x256xf32> -> vector<8x256xf32>
    %343 = vector.broadcast %23 : vector<1x256xf32> to vector<8x256xf32>
    %344 = arith.addf %342, %343 : vector<8x256xf32>
    %345 = math.tanh %344 : vector<8x256xf32>
    %346 = arith.truncf %345 : vector<8x256xf32> to vector<8x256xbf16>
    %cst_77 = arith.constant dense<0.000000e+00> : vector<8x256xf32>
    %347 = tpu.matmul %346, %24, %cst_77 {dimension_numbers = #tpu.dot_dimension_numbers<[1], [0], [0], [1], [0, 0, 1, 1], [], []>} : vector<8x256xbf16>, vector<256x256xbf16>, vector<8x256xf32> -> vector<8x256xf32>
    %348 = vector.broadcast %25 : vector<1x256xf32> to vector<8x256xf32>
    %349 = arith.addf %347, %348 : vector<8x256xf32>
    %350 = arith.index_cast %c3_i32 : i32 to index
    %c0_78 = arith.constant 0 : index
    %c0_79 = arith.constant 0 : index
    %351 = vector.load %arg16[%350, %c0_78, %c0_79] : memref<4x8x256xf32, #tpu.memory_space<vmem>>, vector<1x8x256xf32>
    %352 = vector.shape_cast %351 : vector<1x8x256xf32> to vector<8x256xf32>
    %353 = vector.shape_cast %349 : vector<8x256xf32> to vector<1x8x256xf32>
    tpu.vector_store %arg16[%350, %c0_78, %c0_79], %353 {strides = array<i32>} : memref<4x8x256xf32, #tpu.memory_space<vmem>>, vector<1x8x256xf32>,
    %354 = vector.extract_strided_slice %349 {offsets = [0, 0], sizes = [8, 128], strides = [1, 1]} : vector<8x256xf32> to vector<8x128xf32>
    %355 = vector.extract_strided_slice %349 {offsets = [0, 128], sizes = [8, 128], strides = [1, 1]} : vector<8x256xf32> to vector<8x128xf32>
    %356 = tpu.concatenate %354, %355 in 0 : vector<8x128xf32>, vector<8x128xf32> -> vector<16x128xf32>
    %c4_i32 = arith.constant 4 : i32
    %c0_80 = arith.constant 0 : index
    %c0_81 = arith.constant 0 : index
    %357 = vector.load %arg18[%c0_80, %c0_81] : memref<16x128xf32, #tpu.memory_space<vmem>>, vector<16x128xf32>
    tpu.vector_store %arg18[%c0_80, %c0_81], %295 {strides = array<i32>} : memref<16x128xf32, #tpu.memory_space<vmem>>, vector<16x128xf32>,
    %c0_82 = arith.constant 0 : index
    %c0_83 = arith.constant 0 : index
    %358 = vector.load %arg19[%c0_82, %c0_83] : memref<16x128xf32, #tpu.memory_space<vmem>>, vector<16x128xf32>
    tpu.vector_store %arg19[%c0_82, %c0_83], %297 {strides = array<i32>} : memref<16x128xf32, #tpu.memory_space<vmem>>, vector<16x128xf32>,
    %c0_84 = arith.constant 0 : index
    %c0_85 = arith.constant 0 : index
    %359 = vector.load %arg20[%c0_84, %c0_85] : memref<16x128xf32, #tpu.memory_space<vmem>>, vector<16x128xf32>
    tpu.vector_store %arg20[%c0_84, %c0_85], %356 {strides = array<i32>} : memref<16x128xf32, #tpu.memory_space<vmem>>, vector<16x128xf32>,
    return
  }
  func.func @transform_0(%arg0: i32, %arg1: i32) -> (i32, i32, i32) {
    %c0_i32 = arith.constant 0 : i32
    %c0_i32_0 = arith.constant 0 : i32
    return %arg1, %arg0, %c0_i32 : i32, i32, i32
  }
  func.func @transform_1(%arg0: i32, %arg1: i32) -> (i32, i32, i32) {
    %c0_i32 = arith.constant 0 : i32
    %c0_i32_0 = arith.constant 0 : i32
    return %arg1, %arg0, %c0_i32 : i32, i32, i32
  }
  func.func @transform_2(%arg0: i32, %arg1: i32) -> (i32, i32) {
    %c0_i32 = arith.constant 0 : i32
    %c0_i32_0 = arith.constant 0 : i32
    %c0_i32_1 = arith.constant 0 : i32
    return %c0_i32, %c0_i32_0 : i32, i32
  }
  func.func @transform_3(%arg0: i32, %arg1: i32) -> (i32, i32) {
    %c0_i32 = arith.constant 0 : i32
    %c0_i32_0 = arith.constant 0 : i32
    %c0_i32_1 = arith.constant 0 : i32
    return %c0_i32, %c0_i32_0 : i32, i32
  }
  func.func @transform_4(%arg0: i32, %arg1: i32) -> (i32, i32) {
    %c0_i32 = arith.constant 0 : i32
    %c0_i32_0 = arith.constant 0 : i32
    %c0_i32_1 = arith.constant 0 : i32
    return %c0_i32, %c0_i32_0 : i32, i32
  }
  func.func @transform_5(%arg0: i32, %arg1: i32) -> (i32, i32) {
    %c0_i32 = arith.constant 0 : i32
    %c0_i32_0 = arith.constant 0 : i32
    %c0_i32_1 = arith.constant 0 : i32
    return %c0_i32, %c0_i32_0 : i32, i32
  }
  func.func @transform_6(%arg0: i32, %arg1: i32) -> (i32, i32) {
    %c0_i32 = arith.constant 0 : i32
    %c0_i32_0 = arith.constant 0 : i32
    %c0_i32_1 = arith.constant 0 : i32
    return %c0_i32, %c0_i32_0 : i32, i32
  }
  func.func @transform_7(%arg0: i32, %arg1: i32) -> (i32, i32) {
    %c0_i32 = arith.constant 0 : i32
    %c0_i32_0 = arith.constant 0 : i32
    %c0_i32_1 = arith.constant 0 : i32
    return %c0_i32, %c0_i32_0 : i32, i32
  }
  func.func @transform_8(%arg0: i32, %arg1: i32) -> (i32, i32) {
    %c0_i32 = arith.constant 0 : i32
    %c0_i32_0 = arith.constant 0 : i32
    %c0_i32_1 = arith.constant 0 : i32
    return %c0_i32, %c0_i32_0 : i32, i32
  }
  func.func @transform_9(%arg0: i32, %arg1: i32) -> (i32, i32) {
    %c0_i32 = arith.constant 0 : i32
    %c0_i32_0 = arith.constant 0 : i32
    %c0_i32_1 = arith.constant 0 : i32
    return %c0_i32, %c0_i32_0 : i32, i32
  }
  func.func @transform_10(%arg0: i32, %arg1: i32) -> (i32, i32) {
    %c0_i32 = arith.constant 0 : i32
    %c0_i32_0 = arith.constant 0 : i32
    %c0_i32_1 = arith.constant 0 : i32
    return %c0_i32, %c0_i32_0 : i32, i32
  }
  func.func @transform_11(%arg0: i32, %arg1: i32) -> (i32, i32) {
    %c0_i32 = arith.constant 0 : i32
    %c0_i32_0 = arith.constant 0 : i32
    %c0_i32_1 = arith.constant 0 : i32
    return %c0_i32, %c0_i32_0 : i32, i32
  }
  func.func @transform_12(%arg0: i32, %arg1: i32) -> (i32, i32) {
    %c0_i32 = arith.constant 0 : i32
    %c0_i32_0 = arith.constant 0 : i32
    %c0_i32_1 = arith.constant 0 : i32
    return %c0_i32, %c0_i32_0 : i32, i32
  }
  func.func @transform_13(%arg0: i32, %arg1: i32) -> (i32, i32) {
    %c0_i32 = arith.constant 0 : i32
    %c0_i32_0 = arith.constant 0 : i32
    %c0_i32_1 = arith.constant 0 : i32
    return %c0_i32, %c0_i32_0 : i32, i32
  }
  func.func @transform_14(%arg0: i32, %arg1: i32) -> (i32, i32, i32) {
    %c0_i32 = arith.constant 0 : i32
    %c0_i32_0 = arith.constant 0 : i32
    return %arg1, %arg0, %c0_i32 : i32, i32, i32
  }
}

</mosaic_0001>

<bundles_post_ra>
// kernel: marn_forward.1
= control target key start
LH: loop header
LB: loop body
LE: loop exit
PB: predicated region body
PF: predicated region fallthrough
CT: control target
= control target key end

     0   :  { %s11848_s0 = inlined_call_operand.vmem [shape: bf16[8,8,128], index: 0, kind: input, shape index: {}]   ;;  %s11849_s1 = inlined_call_operand.vmem [shape: bf16[8,8,128], index: 1, kind: input, shape index: {}]   ;;  %s11850_s2 = inlined_call_operand.vmem [shape: bf16[128,512], index: 2, kind: input, shape index: {}]   ;;  %s11851_s3 = inlined_call_operand.vmem [shape: f32[1,512], index: 3, kind: input, shape index: {}]   ;;  %s11852_s4 = inlined_call_operand.vmem [shape: f32[1,512], index: 4, kind: input, shape index: {}]   ;;  %s11853_s5 = inlined_call_operand.vmem [shape: bf16[256,512], index: 5, kind: input, shape index: {}]   ;;  %s11854_s6 = inlined_call_operand.vmem [shape: bf16[256,128], index: 6, kind: input, shape index: {}]   ;;  %s11855_s7 = inlined_call_operand.vmem [shape: f32[1,128], index: 7, kind: input, shape index: {}]   ;;  %s11856_s8 = inlined_call_operand.vmem [shape: bf16[128,1024], index: 8, kind: input, shape index: {}]   ;;  %s11857_s9 = inlined_call_operand.vmem [shape: f32[1,1024], index: 9, kind: input, shape index: {}]   ;;  %s11858_s10 = inlined_call_operand.vmem [shape: bf16[1024,256], index: 10, kind: input, shape index: {}]   ;;  %s11859_s11 = inlined_call_operand.vmem [shape: f32[1,256], index: 11, kind: input, shape index: {}]   ;;  %s11860_s12 = inlined_call_operand.vmem [shape: bf16[256,256], index: 12, kind: input, shape index: {}]   ;;  %s11861_s13 = inlined_call_operand.vmem [shape: f32[1,256], index: 13, kind: input, shape index: {}]   ;;  %s11862_s14 = inlined_call_operand.hbm [shape: f32[8,8,256], index: 14, kind: output, shape index: {}]  }
   0x1   :  { %12053 = sst [smem:[#allocation108_spill]] %s11848_s0 }
   0x2   :  { %12054 = sst [smem:[#allocation109_spill]] %s11849_s1 }
   0x3   :  { %19 = vsyncpa [#allocation7], 0 }
   0x4   :  { %21 = vsyncpa [#allocation7 + $0x1], 0  ;;  %s7700_s29 = smov 0   ;;  %s7702_s30 = smov 0  }
   0x5   :  { %s7704_s15 = smov 0   ;;  %s7706_s16 = smov 0  }
   0x6   :  { %s7708_s17 = smov 0   ;;  %s7710_s18 = smov 0  }
   0x7 LB: > { %12055 = sst [smem:[#allocation9_spill]] %s7606_s15  ;;  %s5587_s19 = sadd.s32 4294967295, %s7618_s18   ;;  %s7618_s18 = sphi %s7710_s18, %s27_s18   ;;  %s7614_s17 = sphi %s7708_s17, %s12397_s17   ;;  %s7610_s16 = sphi %s7706_s16, %s12396_s16   ;;  %s7606_s15 = sphi %s7704_s15, %s12400_s15   ;;  %s7602_s30 = sphi %s7702_s30, %s12399_s30   ;;  %s7598_s29 = sphi %s7700_s29, %s12398_s29  }
   0x8   : > { %12056 = sst [smem:[#allocation10_spill]] %s7614_s17  ;;  %s5588_s20 = sadd.s32 4294967294, %s7618_s18  }
   0x9   : > { %s36_s21 = sadd.s32 1, %s7614_s17  ;;  %s356_s22 = sadd.s32 1, %s7606_s15 }
   0xa   : > { %p37_p0 = scmp.ge.s32.totalorder %s36_s21, 2  ;;  %p366_p1 = scmp.ne.s32.totalorder %s7606_s15, %s7602_s30 }
   0xb   : > { %p367_p2 = scmp.eq.s32.totalorder %s5587_s19, 1  ;;  %p372_p3 = scmp.ne.s32.totalorder %s7602_s30, %s7598_s29 }
   0xc   : > { %s12402_s21 = smov (%p37_p0, %s36_s21), 0  ;;  %p373_p5 = scmp.eq.s32.totalorder %s5588_s20, 1 }
   0xd   : > { %12057 = sst [smem:[#allocation11_spill]] %s12402_s21  ;;  %p7740_p4 = por %p367_p2, %p366_p1 }
   0xe   : > { %s351_s24 = ssub.s32 %s7614_s17, %s12402_s21  ;;  %p5591_p6 = scmp.ge.s32.totalorder %s7618_s18, 1 }
   0xf   : > { %p354_p7 = scmp.eq.s32.totalorder %s351_s24, 0  ;;  %p7747_p8 = por %p373_p5, %p372_p3 }
  0x10   : > { %p451_p9 = scmp.lt.s32.totalorder %s7618_s18, 3 }
  0x11   : > { %s12059_s25 = scalar_select %p7747_p8, 1, 0 }
  0x12   : > { %s7753_s26 = scalar_select %p354_p7, %s7606_s15, %s356_s22  }
  0x13   : > { %12060 = sst [smem:[#allocation12_spill]] %s12059_s25  ;;  %p452_p10 = pnand %p5591_p6, %p451_p9 }
  0x14   : > { %12061 = sst [smem:[#allocation13_spill]] %s7753_s26 }
  0x15   : > { %455 = sbr.rel (%p452_p10) target bundleno = 6362 (0x18da), region = 76 }
  0x1c   : > { %s11867_s27 = sand.u32 1, %s7602_s30   ;;  %s5593_s28 = sshll.u32 %s7610_s16, 2 }
  0x1d   : > { %s5592_s19 = sshll.u32 %s11867_s27, 6  ;;  %p509_p11 = scmp.lt.s32.totalorder %s5593_s28, 7 }
  0x1e   : > { %s12062_s0 = sld [smem:[#allocation108_spill]]  ;;  %s12063_s1 = sld [smem:[#allocation109_spill]] }
  0x1f   : > { %s12404_s28 = smov (!%p509_p11, %s5593_s28), 7  ;;  %s7769_s15 = scalar_lea.vmem [#allocation6], %s5592_s19 }
  0x20   : > { %s5594_s20 = sshll.u32 %s12404_s28, 2  ;;  %p5597_p12 = scmp.ne.s32.totalorder %s7610_s16, 0 }
  0x21   : > { %v7620_v0 = vmov (!%p5597_p12), 0.0  }
  0x22   : > { %531 = sbr.rel (%p5597_p12) target bundleno = 41 (0x29), region = 80  ;;  %532 = vst [vmem:[#allocation3] sm:$0xff] (!%p5597_p12), %v7620_v0  ;;  %533 = vst [vmem:[#allocation3 + $0x8] sm:$0xff] (!%p5597_p12), %v7620_v0 }
  0x23   : > { %534 = vst [vmem:[#allocation4] sm:$0xff] (!%p5597_p12), %v7620_v0  ;;  %535 = vst [vmem:[#allocation4 + $0x8] sm:$0xff] (!%p5597_p12), %v7620_v0 }
  0x24   : > { %s7762_s17 = scalar_lea.vmem %s12062_s0, %s5594_s20  ;;  %s7767_s26 = scalar_lea.vmem %s12063_s1, %s5594_s20  ;;  %536 = vst [vmem:[#allocation5] sm:$0xff] (!%p5597_p12), %v7620_v0  ;;  %537 = vst [vmem:[#allocation5 + $0x8] sm:$0xff] (!%p5597_p12), %v7620_v0 }
  0x29 PF: > { %v6277_v1 = vld [vmem:[%s11850_s2 + $0x4] ss:$16 sps:$4 sm:$0xff]   ;;  %v6279_v2 = vld [vmem:[%s11850_s2] ss:$16 sps:$4 sm:$0xff]   ;;  %v11870_v3 = vmov 0   ;;  %vm558_vm0 = vcmask 1043456   ;;  %v609_v46 = vlaneseq }
  0x2a   : > { %821 = vmatprep.mubr.bf16.mxu1 %v11870_v3  ;;  %789 = vmatprep.subr.bf16.mxu1 %v6277_v1  ;;  %v6280_v4 = vld [vmem:[%s11850_s2 + $0x24] ss:$16 sps:$4 sm:$0xff]   ;;  %v6282_v5 = vld [vmem:[%s11850_s2 + $0x20] ss:$16 sps:$4 sm:$0xff]   ;;  %v6304_v20 = vld [vmem:[%s11850_s2 + $0xc] ss:$16 sps:$4 sm:$0xff]  }
  0x2b   : > { %790 = vmatpush1.bf16.msra.mxu1 %v6279_v2  ;;  %v6283_v6 = vld [vmem:[%s11850_s2 + $0x44] ss:$16 sps:$4 sm:$0xff]   ;;  %v6285_v7 = vld [vmem:[%s11850_s2 + $0x40] ss:$16 sps:$4 sm:$0xff]   ;;  %v6302_v22 = vld [vmem:[%s11850_s2 + $0x8] ss:$16 sps:$4 sm:$0xff]  }
  0x2c   : > { %791 = vmatprep.subr.bf16.mxu1 %v6280_v4  ;;  %v6286_v8 = vld [vmem:[%s11850_s2 + $0x64] ss:$16 sps:$4 sm:$0xff]   ;;  %v6288_v9 = vld [vmem:[%s11850_s2 + $0x60] ss:$16 sps:$4 sm:$0xff]   ;;  %v6307_v23 = vld [vmem:[%s11850_s2 + $0x2c] ss:$16 sps:$4 sm:$0xff]  }
  0x2d   : > { %v6289_v10 = vld [vmem:[%s11850_s2 + $0x84] ss:$16 sps:$4 sm:$0xff]   ;;  %v6291_v11 = vld [vmem:[%s11850_s2 + $0x80] ss:$16 sps:$4 sm:$0xff]   ;;  %v6305_v24 = vld [vmem:[%s11850_s2 + $0x28] ss:$16 sps:$4 sm:$0xff]  }
  0x2e   : > { %v6292_v12 = vld [vmem:[%s11850_s2 + $0xa4] ss:$16 sps:$4 sm:$0xff]   ;;  %v6294_v13 = vld [vmem:[%s11850_s2 + $0xa0] ss:$16 sps:$4 sm:$0xff]   ;;  %v6311_v27 = vld [vmem:[%s11850_s2 + $0x4c] ss:$16 sps:$4 sm:$0xff]  }
  0x2f   : > { %792 = vmatpush1.bf16.msra.mxu1 %v6282_v5  ;;  %v6295_v14 = vld [vmem:[%s11850_s2 + $0xc4] ss:$16 sps:$4 sm:$0xff]   ;;  %v6297_v15 = vld [vmem:[%s11850_s2 + $0xc0] ss:$16 sps:$4 sm:$0xff]   ;;  %v6309_v29 = vld [vmem:[%s11850_s2 + $0x48] ss:$16 sps:$4 sm:$0xff]  }
  0x30   : > { %793 = vmatprep.subr.bf16.mxu1 %v6283_v6  ;;  %v6298_v16 = vld [vmem:[%s11850_s2 + $0xe4] ss:$16 sps:$4 sm:$0xff]   ;;  %v6300_v17 = vld [vmem:[%s11850_s2 + $0xe0] ss:$16 sps:$4 sm:$0xff]   ;;  %v6314_v30 = vld [vmem:[%s11850_s2 + $0x6c] ss:$16 sps:$4 sm:$0xff]  }
  0x31   : > { %v6301_v18 = vld [vmem:[%s7767_s26] ss:$0 sps:$4 sm:$0xff]   ;;  %v6308_v25 = vld [vmem:[%s7767_s26 + $0x4] ss:$0 sps:$4 sm:$0xff]   ;;  %v6312_v31 = vld [vmem:[%s11850_s2 + $0x68] ss:$16 sps:$4 sm:$0xff]  }
  0x32   : > { %v538_v19 = vld [vmem:[%s7762_s17] sm:$0xf]  ;;  %v539_v26 = vld [vmem:[%s7762_s17 + $0x4] sm:$0xf]  ;;  %v6315_v32 = vld [vmem:[%s7767_s26 + $0x8] ss:$0 sps:$4 sm:$0xff]  }
  0x33   : > { %794 = vmatpush1.bf16.msra.mxu1 %v6285_v7  ;;  %v561_v21 = vsel %vm558_vm0, %v538_v19, %v6301_v18  ;;  %v565_v28 = vsel %vm558_vm0, %v539_v26, %v6308_v25  ;;  %v540_v33 = vld [vmem:[%s7762_s17 + $0x8] sm:$0xf]  ;;  %v6318_v34 = vld [vmem:[%s11850_s2 + $0x8c] ss:$16 sps:$4 sm:$0xff]   ;;  %v7890_v47 = vshrl.u32 %v609_v46, 7 }
  0x34   : > { %795 = vmatprep.subr.bf16.mxu1 %v6286_v8  ;;  %v569_v35 = vsel %vm558_vm0, %v540_v33, %v6315_v32  ;;  %v6316_v36 = vld [vmem:[%s11850_s2 + $0x88] ss:$16 sps:$4 sm:$0xff]   ;;  %v6321_v37 = vld [vmem:[%s11850_s2 + $0xac] ss:$16 sps:$4 sm:$0xff]   ;;  %v607_v49 = vld [vmem:[%s11851_s3] sm:$0xf] }
  0x35   : > { %v6319_v38 = vld [vmem:[%s11850_s2 + $0xa8] ss:$16 sps:$4 sm:$0xff]   ;;  %v6322_v39 = vld [vmem:[%s7767_s26 + $0xc] ss:$0 sps:$4 sm:$0xff]   ;;  %v7893_v48 = vsub.s32 2, %v7890_v47  ;;  %v7899_v50 = vsub.s32 3, %v7890_v47 }
  0x36   : > { %v541_v40 = vld [vmem:[%s7762_s17 + $0xc] sm:$0xf]  ;;  %v6323_v43 = vld [vmem:[%s11850_s2 + $0xc8] ss:$16 sps:$4 sm:$0xff]   ;;  %v7920_v53 = vsub.s32 0, %v7890_v47  ;;  %v7923_v54 = vsub.s32 1, %v7890_v47 }
  0x37   : > { %796 = vmatpush1.bf16.msra.mxu1 %v6288_v9  ;;  %v6325_v41 = vld [vmem:[%s11850_s2 + $0xcc] ss:$16 sps:$4 sm:$0xff]   ;;  %v573_v42 = vsel %vm558_vm0, %v541_v40, %v6322_v39  ;;  %v6326_v45 = vld [vmem:[%s11850_s2 + $0xe8] ss:$16 sps:$4 sm:$0xff]   ;;  %v7902_v51 = vrot.slane %v607_v49, %v7893_v48  ;;  %v7905_v52 = vrot.slane %v607_v49, %v7899_v50 }
  0x38   : > { %797 = vmatprep.subr.bf16.mxu1 %v6289_v10  ;;  %v6328_v44 = vld [vmem:[%s11850_s2 + $0xec] ss:$16 sps:$4 sm:$0xff]   ;;  %v612_v55 = vrot.slane %v607_v49, %v7920_v53  ;;  %v616_v56 = vrot.slane %v607_v49, %v7923_v54 }
  0x39   : > { %6114 = vst [vmem:[#allocation2 + $0x50] sm:$0xff] %v7902_v51  ;;  %6120 = vst [vmem:[#allocation2 + $0x70] sm:$0xff] %v7902_v51 }
  0x3a   : > { %6126 = vst [vmem:[#allocation2 + $0x90] sm:$0xff] %v7902_v51  ;;  %6132 = vst [vmem:[#allocation2 + $0xb0] sm:$0xff] %v7902_v51 }
  0x3b   : > { %798 = vmatpush1.bf16.msra.mxu1 %v6291_v11  ;;  %6138 = vst [vmem:[#allocation2 + $0xd0] sm:$0xff] %v7902_v51  ;;  %6144 = vst [vmem:[#allocation2 + $0xf0] sm:$0xff] %v7902_v51 }
  0x3c   : > { %799 = vmatprep.subr.bf16.mxu1 %v6292_v12  ;;  %6117 = vst [vmem:[#allocation2 + $0x58] sm:$0xff] %v7905_v52  ;;  %6123 = vst [vmem:[#allocation2 + $0x78] sm:$0xff] %v7905_v52 }
  0x3d   : > { %6129 = vst [vmem:[#allocation2 + $0x98] sm:$0xff] %v7905_v52  ;;  %6135 = vst [vmem:[#allocation2 + $0xb8] sm:$0xff] %v7905_v52 }
  0x3e   : > { %6141 = vst [vmem:[#allocation2 + $0xd8] sm:$0xff] %v7905_v52  ;;  %6147 = vst [vmem:[#allocation2 + $0xf8] sm:$0xff] %v7905_v52 }
  0x3f   : > { %800 = vmatpush1.bf16.msra.mxu1 %v6294_v13 }
  0x40   : > { %801 = vmatprep.subr.bf16.mxu1 %v6295_v14 }
  0x43   : > { %802 = vmatpush1.bf16.msra.mxu1 %v6297_v15 }
  0x44   : > { %803 = vmatprep.subr.bf16.mxu1 %v6298_v16 }
  0x47   : > { %804 = vmatpush1.bf16.msra.mxu1 %v6300_v17 }
  0x48   : > { %862 = vmatprep.subr.bf16.mxu1 %v6304_v20 }
  0x4a   : > { %822 = vmatmul.mubr.bf16.vlgmr.msra.gmra.mrb[0].mxu1 %v561_v21 }
  0x4b   : > { %863 = vmatpush1.bf16.msra.mxu1 %v6302_v22  ;;  %831 = vmatprep.mubr.bf16.mxu1 %v11870_v3 }
  0x4c   : > { %864 = vmatprep.subr.bf16.mxu1 %v6307_v23 }
  0x4f   : > { %865 = vmatpush1.bf16.msra.mxu1 %v6305_v24 }
  0x50   : > { %866 = vmatprep.subr.bf16.mxu1 %v6311_v27 }
  0x52   : > { %832 = vmatmul.mubr.bf16.gmra.mrb[4].mxu1 %v565_v28 }
  0x53   : > { %867 = vmatpush1.bf16.msra.mxu1 %v6309_v29  ;;  %841 = vmatprep.mubr.bf16.mxu1 %v11870_v3 }
  0x54   : > { %868 = vmatprep.subr.bf16.mxu1 %v6314_v30 }
  0x57   : > { %869 = vmatpush1.bf16.msra.mxu1 %v6312_v31 }
  0x58   : > { %870 = vmatprep.subr.bf16.mxu1 %v6318_v34 }
  0x5a   : > { %842 = vmatmul.mubr.bf16.gmra.mrb[8].mxu1 %v569_v35 }
  0x5b   : > { %871 = vmatpush1.bf16.msra.mxu1 %v6316_v36  ;;  %851 = vmatprep.mubr.bf16.mxu1 %v11870_v3 }
  0x5c   : > { %872 = vmatprep.subr.bf16.mxu1 %v6321_v37 }
  0x5f   : > { %873 = vmatpush1.bf16.msra.mxu1 %v6319_v38 }
  0x60   : > { %874 = vmatprep.subr.bf16.mxu1 %v6325_v41 }
  0x62   : > { %852 = vmatmul.mubr.bf16.gmra.mrb[12].mxu1 %v573_v42 }
  0x63   : > { %875 = vmatpush1.bf16.msra.mxu1 %v6323_v43  ;;  %894 = vmatprep.mubr.bf16.mxu1 %v11870_v3 }
  0x64   : > { %876 = vmatprep.subr.bf16.mxu1 %v6328_v44 }
  0x67   : > { %877 = vmatpush1.bf16.msra.mxu1 %v6326_v45 }
  0x6a   : > { %895 = vmatmul.mubr.bf16.vlgmr.msra.gmra.mrb[16].mxu1 %v561_v21 }
  0x6b   : > { %904 = vmatprep.mubr.bf16.mxu1 %v11870_v3 }
  0x72   : > { %905 = vmatmul.mubr.bf16.gmra.mrb[20].mxu1 %v565_v28 }
  0x73   : > { %914 = vmatprep.mubr.bf16.mxu1 %v11870_v3 }
  0x7a   : > { %915 = vmatmul.mubr.bf16.gmra.mrb[24].mxu1 %v569_v35  ;;  %v978_v35 = vld [vmem:[%s11852_s4] sm:$0xf] (!%p5597_p12) }
  0x7b   : > { %924 = vmatprep.mubr.bf16.mxu1 %v11870_v3  ;;  %v983_v37 = vrot.slane (!%p5597_p12), %v978_v35, %v7920_v53  ;;  %v987_v38 = vrot.slane (!%p5597_p12), %v978_v35, %v7923_v54  ;;  %v991_v40 = vrot.slane (!%p5597_p12), %v978_v35, %v7893_v48 }
  0x82   : > { %925 = vmatmul.mubr.bf16.gmra.mrb[28].mxu1 %v573_v42  ;;  %v995_v42 = vrot.slane (!%p5597_p12), %v978_v35, %v7899_v50 }
 0x11d   : > { %v823_v57 = vpop.f32.mrb[0].mxu1 }
 0x11e   : > { %v824_v58 = vadd.f32 %v823_v57, %v612_v55  ;;  %v825_v59 = vpop.f32.mrb[1].mxu1 }
 0x11f   : > { %v826_v60 = vadd.f32 %v825_v59, %v616_v56  ;;  %v827_v61 = vpop.f32.mrb[2].mxu1 }
 0x120   : > { %935 = vst [vmem:[#allocation2] sm:$0xff] %v824_v58  ;;  %v828_v62 = vadd.f32 %v827_v61, %v612_v55  ;;  %v829_v63 = vpop.f32.mrb[3].mxu1 }
 0x121   : > { %936 = vst [vmem:[#allocation2 + $0x8] sm:$0xff] %v826_v60  ;;  %v830_v0 = vadd.f32 %v829_v63, %v616_v56 }
 0x122   : > { %939 = vst [vmem:[#allocation2 + $0x20] sm:$0xff] %v828_v62 }
 0x123   : > { %940 = vst [vmem:[#allocation2 + $0x28] sm:$0xff] %v830_v0 }
 0x125   : > { %v833_v1 = vpop.f32.mrb[4].mxu1 }
 0x126   : > { %v834_v2 = vadd.f32 %v833_v1, %v612_v55  ;;  %v835_v4 = vpop.f32.mrb[5].mxu1 }
 0x127   : > { %v836_v5 = vadd.f32 %v835_v4, %v616_v56  ;;  %v837_v6 = vpop.f32.mrb[6].mxu1  ;;  %v970_v34 = vld [vmem:[#allocation2] sm:$0xff] (!%p5597_p12) }
 0x128   : > { %6067 = vst [vmem:[#allocation2 + $0x40] sm:$0xff] %v834_v2  ;;  %v838_v7 = vadd.f32 %v837_v6, %v612_v55  ;;  %v839_v8 = vpop.f32.mrb[7].mxu1  ;;  %v971_v36 = vld [vmem:[#allocation2 + $0x8] sm:$0xff] (!%p5597_p12)  ;;  %v1000_v49 = vsub.f32 (!%p5597_p12), %v970_v34, %v983_v37 }
 0x129   : > { %6071 = vst [vmem:[#allocation2 + $0x48] sm:$0xff] %v836_v5  ;;  %v840_v9 = vadd.f32 %v839_v8, %v616_v56  ;;  %v974_v43 = vld [vmem:[#allocation2 + $0x20] sm:$0xff] (!%p5597_p12) }
 0x12a   : > { %6075 = vst [vmem:[#allocation2 + $0x60] sm:$0xff] %v838_v7  ;;  %v975_v44 = vld [vmem:[#allocation2 + $0x28] sm:$0xff] (!%p5597_p12)  ;;  %1008 = vst [vmem:[#allocation2] sm:$0xff] (!%p5597_p12), %v1000_v49 }
 0x12b   : > { %6079 = vst [vmem:[#allocation2 + $0x68] sm:$0xff] %v840_v9  ;;  %v1005_v57 = vsub.f32 (!%p5597_p12), %v975_v44, %v987_v38 }
 0x12d   : > { %v843_v10 = vpop.f32.mrb[8].mxu1  ;;  %1013 = vst [vmem:[#allocation2 + $0x28] sm:$0xff] (!%p5597_p12), %v1005_v57 }
 0x12e   : > { %v844_v11 = vadd.f32 %v843_v10, %v612_v55  ;;  %v845_v12 = vpop.f32.mrb[9].mxu1 }
 0x12f   : > { %v846_v13 = vadd.f32 %v845_v12, %v616_v56  ;;  %v847_v14 = vpop.f32.mrb[10].mxu1 }
 0x130   : > { %6083 = vst [vmem:[#allocation2 + $0x80] sm:$0xff] %v844_v11  ;;  %v848_v15 = vadd.f32 %v847_v14, %v612_v55  ;;  %v849_v16 = vpop.f32.mrb[11].mxu1 }
 0x131   : > { %6087 = vst [vmem:[#allocation2 + $0x88] sm:$0xff] %v846_v13  ;;  %v850_v17 = vadd.f32 %v849_v16, %v616_v56 }
 0x132   : > { %6091 = vst [vmem:[#allocation2 + $0xa0] sm:$0xff] %v848_v15 }
 0x133   : > { %6095 = vst [vmem:[#allocation2 + $0xa8] sm:$0xff] %v850_v17 }
 0x135   : > { %v853_v18 = vpop.f32.mrb[12].mxu1 }
 0x136   : > { %v854_v19 = vadd.f32 %v853_v18, %v612_v55  ;;  %v855_v20 = vpop.f32.mrb[13].mxu1 }
 0x137   : > { %v856_v21 = vadd.f32 %v855_v20, %v616_v56  ;;  %v857_v22 = vpop.f32.mrb[14].mxu1 }
 0x138   : > { %6099 = vst [vmem:[#allocation2 + $0xc0] sm:$0xff] %v854_v19  ;;  %v858_v23 = vadd.f32 %v857_v22, %v612_v55  ;;  %v859_v24 = vpop.f32.mrb[15].mxu1 }
 0x139   : > { %6103 = vst [vmem:[#allocation2 + $0xc8] sm:$0xff] %v856_v21  ;;  %v860_v25 = vadd.f32 %v859_v24, %v616_v56  ;;  %v1004_v56 = vsub.f32 (!%p5597_p12), %v974_v43, %v983_v37 }
 0x13a   : > { %6107 = vst [vmem:[#allocation2 + $0xe0] sm:$0xff] %v858_v23 }
 0x13b   : > { %6111 = vst [vmem:[#allocation2 + $0xe8] sm:$0xff] %v860_v25  ;;  %1012 = vst [vmem:[#allocation2 + $0x20] sm:$0xff] (!%p5597_p12), %v1004_v56 }
 0x13d   : > { %v896_v26 = vpop.f32.mrb[16].mxu1  ;;  %969 = sbr.rel (%p5597_p12) target bundleno = 334 (0x14e), region = 84 }
 0x13e   : > { %v897_v27 = vadd.f32 %v896_v26, %v7902_v51  ;;  %v898_v28 = vpop.f32.mrb[17].mxu1 }
 0x13f   : > { %v899_v29 = vadd.f32 %v898_v28, %v7905_v52  ;;  %v900_v30 = vpop.f32.mrb[18].mxu1 }
 0x140   : > { %937 = vst [vmem:[#allocation2 + $0x10] sm:$0xff] %v897_v27  ;;  %v901_v31 = vadd.f32 %v900_v30, %v7902_v51  ;;  %v902_v32 = vpop.f32.mrb[19].mxu1  ;;  %v1001_v51 = vsub.f32 (!%p5597_p12), %v971_v36, %v987_v38 }
 0x141   : > { %938 = vst [vmem:[#allocation2 + $0x18] sm:$0xff] %v899_v29  ;;  %v903_v33 = vadd.f32 %v902_v32, %v7905_v52 }
 0x142   : > { %941 = vst [vmem:[#allocation2 + $0x30] sm:$0xff] %v901_v31  ;;  %1009 = vst [vmem:[#allocation2 + $0x8] sm:$0xff] (!%p5597_p12), %v1001_v51 }
 0x143   : > { %942 = vst [vmem:[#allocation2 + $0x38] sm:$0xff] %v903_v33 }
 0x147   : > { %v972_v39 = vld [vmem:[#allocation2 + $0x10] sm:$0xff] }
 0x148   : > { %v973_v41 = vld [vmem:[#allocation2 + $0x18] sm:$0xff]  ;;  %v1002_v52 = vsub.f32 %v972_v39, %v991_v40 }
 0x149   : > { %v976_v45 = vld [vmem:[#allocation2 + $0x30] sm:$0xff]  ;;  %v1003_v55 = vsub.f32 %v973_v41, %v995_v42 }
 0x14a   : > { %v977_v46 = vld [vmem:[#allocation2 + $0x38] sm:$0xff]  ;;  %v1006_v58 = vsub.f32 %v976_v45, %v991_v40  ;;  %1010 = vst [vmem:[#allocation2 + $0x10] sm:$0xff] %v1002_v52 }
 0x14b   : > { %v1007_v59 = vsub.f32 %v977_v46, %v995_v42  ;;  %1011 = vst [vmem:[#allocation2 + $0x18] sm:$0xff] %v1003_v55 }
 0x14c   : > { %1014 = vst [vmem:[#allocation2 + $0x30] sm:$0xff] %v1006_v58 }
 0x14d   : > { %1015 = vst [vmem:[#allocation2 + $0x38] sm:$0xff] %v1007_v59 }
 0x14e PF: > { %v6329_v60 = vld [vmem:[%s11853_s5 + $0x4] ss:$16 sps:$4 sm:$0xff]   ;;  %v6331_v61 = vld [vmem:[%s11853_s5] ss:$16 sps:$4 sm:$0xff]   ;;  %v1345_v11 = vld [vmem:[#allocation5 + $0x8] sm:$0xff]  ;;  %s5977_s20 = sshll.u32 %s7610_s16, 10 }
 0x14f   : > { %1668 = vmatprep.subr.bf16.mxu1 %v6329_v60  ;;  %v6332_v62 = vld [vmem:[%s11853_s5 + $0x24] ss:$16 sps:$4 sm:$0xff]   ;;  %v6334_v63 = vld [vmem:[%s11853_s5 + $0x20] ss:$16 sps:$4 sm:$0xff]   ;;  %v1343_v33 = vld [vmem:[#allocation4 + $0x8] sm:$0xff]  ;;  %s5496_s24 = sshll.u32 %s7769_s15, 4  ;;  %s11793_s21 = scalar_lea.hbm %s11862_s14, %s5977_s20  ;;  %s11795_s24 = int_to_ptr.vmem [resolvable:$true] %s5496_s24 }
 0x150   : > { %1669 = vmatpush1.bf16.msra.mxu1 %v6331_v61  ;;  %v6335_v0 = vld [vmem:[%s11853_s5 + $0x44] ss:$16 sps:$4 sm:$0xff]   ;;  %v6337_v1 = vld [vmem:[%s11853_s5 + $0x40] ss:$16 sps:$4 sm:$0xff]   ;;  %v6377_v34 = vld [vmem:[%s11853_s5 + $0xc] ss:$16 sps:$4 sm:$0xff]  }
 0x151   : > { %1670 = vmatprep.subr.bf16.mxu1 %v6332_v62  ;;  %v6338_v2 = vld [vmem:[%s11853_s5 + $0x64] ss:$16 sps:$4 sm:$0xff]   ;;  %v6340_v4 = vld [vmem:[%s11853_s5 + $0x60] ss:$16 sps:$4 sm:$0xff]   ;;  %v6379_v35 = vld [vmem:[%s11853_s5 + $0x8] ss:$16 sps:$4 sm:$0xff]  }
 0x152   : > { %v6341_v5 = vld [vmem:[%s11853_s5 + $0x84] ss:$16 sps:$4 sm:$0xff]   ;;  %v6343_v6 = vld [vmem:[%s11853_s5 + $0x80] ss:$16 sps:$4 sm:$0xff]   ;;  %v6380_v37 = vld [vmem:[%s11853_s5 + $0x2c] ss:$16 sps:$4 sm:$0xff]  }
 0x153   : > { %v6344_v7 = vld [vmem:[%s11853_s5 + $0xa4] ss:$16 sps:$4 sm:$0xff]   ;;  %v6346_v8 = vld [vmem:[%s11853_s5 + $0xa0] ss:$16 sps:$4 sm:$0xff]   ;;  %v6382_v38 = vld [vmem:[%s11853_s5 + $0x28] ss:$16 sps:$4 sm:$0xff]  }
 0x154   : > { %1671 = vmatpush1.bf16.msra.mxu1 %v6334_v63  ;;  %v6347_v9 = vld [vmem:[%s11853_s5 + $0xc4] ss:$16 sps:$4 sm:$0xff]   ;;  %v6349_v13 = vld [vmem:[%s11853_s5 + $0xc0] ss:$16 sps:$4 sm:$0xff]   ;;  %v6383_v39 = vld [vmem:[%s11853_s5 + $0x4c] ss:$16 sps:$4 sm:$0xff]  }
 0x155   : > { %1672 = vmatprep.subr.bf16.mxu1 %v6335_v0  ;;  %v1344_v10 = vld [vmem:[#allocation5] sm:$0xff]  ;;  %v1342_v32 = vld [vmem:[#allocation4] sm:$0xff]  ;;  %v6385_v40 = vld [vmem:[%s11853_s5 + $0x48] ss:$16 sps:$4 sm:$0xff]   ;;  %s12392_s16 = sand.u32 1, %s7602_s30   ;;  %s7540_s0 = scalar_lea.vmem %s11795_s24, 1024 }
 0x156   : > { %v1347_v12 = vpack.c.bf16 %v1345_v11, %v1344_v10  ;;  %v6350_v14 = vld [vmem:[%s11853_s5 + $0xe4] ss:$16 sps:$4 sm:$0xff]   ;;  %v6352_v15 = vld [vmem:[%s11853_s5 + $0xe0] ss:$16 sps:$4 sm:$0xff]   ;;  %v8042_v36 = vpack.c.bf16 %v1343_v33, %v1342_v32  ;;  %v6386_v41 = vld [vmem:[%s11853_s5 + $0x6c] ss:$16 sps:$4 sm:$0xff]   ;;  %p7541_p13 = scmp.ne.s32.totalorder %s11795_s24, %s7540_s0 }
 0x157   : > { %v6353_v16 = vld [vmem:[%s11853_s5 + $0x104] ss:$16 sps:$4 sm:$0xff]   ;;  %v6355_v17 = vld [vmem:[%s11853_s5 + $0x100] ss:$16 sps:$4 sm:$0xff]   ;;  %v6388_v42 = vld [vmem:[%s11853_s5 + $0x68] ss:$16 sps:$4 sm:$0xff]  }
 0x158   : > { %1673 = vmatpush1.bf16.msra.mxu1 %v6337_v1  ;;  %1700 = vmatprep.mubr.bf16.mxu1 %v1347_v12  ;;  %v6356_v18 = vld [vmem:[%s11853_s5 + $0x124] ss:$16 sps:$4 sm:$0xff]   ;;  %v6358_v19 = vld [vmem:[%s11853_s5 + $0x120] ss:$16 sps:$4 sm:$0xff]   ;;  %v6389_v43 = vld [vmem:[%s11853_s5 + $0x8c] ss:$16 sps:$4 sm:$0xff]   ;;  %p7542_p0 = pnand %p7541_p13, %p7740_p4 }
 0x159   : > { %1674 = vmatprep.subr.bf16.mxu1 %v6338_v2  ;;  %v6359_v20 = vld [vmem:[%s11853_s5 + $0x144] ss:$16 sps:$4 sm:$0xff]   ;;  %v6361_v21 = vld [vmem:[%s11853_s5 + $0x140] ss:$16 sps:$4 sm:$0xff]   ;;  %v6391_v44 = vld [vmem:[%s11853_s5 + $0x88] ss:$16 sps:$4 sm:$0xff]  }
 0x15a   : > { %v6362_v22 = vld [vmem:[%s11853_s5 + $0x164] ss:$16 sps:$4 sm:$0xff]   ;;  %v6364_v23 = vld [vmem:[%s11853_s5 + $0x160] ss:$16 sps:$4 sm:$0xff]   ;;  %v6392_v45 = vld [vmem:[%s11853_s5 + $0xac] ss:$16 sps:$4 sm:$0xff]   ;;  %p7543_p1 = pneg %p7542_p0 }
 0x15b   : > { %v6365_v24 = vld [vmem:[%s11853_s5 + $0x184] ss:$16 sps:$4 sm:$0xff]   ;;  %v6367_v25 = vld [vmem:[%s11853_s5 + $0x180] ss:$16 sps:$4 sm:$0xff]   ;;  %v6394_v46 = vld [vmem:[%s11853_s5 + $0xa8] ss:$16 sps:$4 sm:$0xff]  }
 0x15c   : > { %1675 = vmatpush1.bf16.msra.mxu1 %v6340_v4  ;;  %v6368_v26 = vld [vmem:[%s11853_s5 + $0x1a4] ss:$16 sps:$4 sm:$0xff]   ;;  %v6370_v27 = vld [vmem:[%s11853_s5 + $0x1a0] ss:$16 sps:$4 sm:$0xff]   ;;  %v6395_v49 = vld [vmem:[%s11853_s5 + $0xcc] ss:$16 sps:$4 sm:$0xff]  }
 0x15d   : > { %1676 = vmatprep.subr.bf16.mxu1 %v6341_v5  ;;  %v6371_v28 = vld [vmem:[%s11853_s5 + $0x1c4] ss:$16 sps:$4 sm:$0xff]   ;;  %v6373_v29 = vld [vmem:[%s11853_s5 + $0x1c0] ss:$16 sps:$4 sm:$0xff]   ;;  %v6397_v51 = vld [vmem:[%s11853_s5 + $0xc8] ss:$16 sps:$4 sm:$0xff]  }
 0x15e   : > { %v6374_v30 = vld [vmem:[%s11853_s5 + $0x1e4] ss:$16 sps:$4 sm:$0xff]   ;;  %v6376_v31 = vld [vmem:[%s11853_s5 + $0x1e0] ss:$16 sps:$4 sm:$0xff]   ;;  %v6398_v52 = vld [vmem:[%s11853_s5 + $0xec] ss:$16 sps:$4 sm:$0xff]  }
 0x15f   : > { %v6400_v55 = vld [vmem:[%s11853_s5 + $0xe8] ss:$16 sps:$4 sm:$0xff]   ;;  %v6401_v56 = vld [vmem:[%s11853_s5 + $0x10c] ss:$16 sps:$4 sm:$0xff]   ;;  %v6426_v10 = vld [vmem:[%s11854_s6] sm:$0xff]   ;;  %s11802_s28 = scalar_lea.sflag [#allocation7], %s12392_s16 }
 0x160   : > { %1677 = vmatpush1.bf16.msra.mxu1 %v6343_v6  ;;  %v6403_v57 = vld [vmem:[%s11853_s5 + $0x108] ss:$16 sps:$4 sm:$0xff]   ;;  %v6404_v58 = vld [vmem:[%s11853_s5 + $0x12c] ss:$16 sps:$4 sm:$0xff]   ;;  %v1125_v32 = vld [vmem:[%s11856_s8 + $0x60] sm:$0xff]  ;;  %s7622_s1 = smov [#allocation6]  }
 0x161   : > { %1678 = vmatprep.subr.bf16.mxu1 %v6344_v7  ;;  %v6406_v59 = vld [vmem:[%s11853_s5 + $0x128] ss:$16 sps:$4 sm:$0xff]   ;;  %v6407_v60 = vld [vmem:[%s11853_s5 + $0x14c] ss:$16 sps:$4 sm:$0xff]   ;;  %s7544_s26 = sshll.u32 %s7622_s1, 4  ;;  %s7545_s26 = int_to_ptr.vmem [resolvable:$false] %s7544_s26 }
 0x162   : > { %v6409_v61 = vld [vmem:[%s11853_s5 + $0x148] ss:$16 sps:$4 sm:$0xff]   ;;  %v6410_v62 = vld [vmem:[%s11853_s5 + $0x16c] ss:$16 sps:$4 sm:$0xff]   ;;  %s7546_s17 = scalar_lea.vmem %s7545_s26, 2048  ;;  %p7547_p2 = scmp.lt.s32.totalorder %s11795_s24, %s7545_s26 }
 0x163   : > { %v6412_v63 = vld [vmem:[%s11853_s5 + $0x168] ss:$16 sps:$4 sm:$0xff]   ;;  %v6413_v0 = vld [vmem:[%s11853_s5 + $0x18c] ss:$16 sps:$4 sm:$0xff]   ;;  %p7548_p3 = scmp.lt.s32.totalorder %s7546_s17, %s7540_s0 }
 0x164   : > { %1679 = vmatpush1.bf16.msra.mxu1 %v6346_v8  ;;  %v6415_v1 = vld [vmem:[%s11853_s5 + $0x188] ss:$16 sps:$4 sm:$0xff]   ;;  %v6416_v2 = vld [vmem:[%s11853_s5 + $0x1ac] ss:$16 sps:$4 sm:$0xff]  }
 0x165   : > { %1680 = vmatprep.subr.bf16.mxu1 %v6347_v9  ;;  %v6418_v4 = vld [vmem:[%s11853_s5 + $0x1a8] ss:$16 sps:$4 sm:$0xff]   ;;  %v6419_v5 = vld [vmem:[%s11853_s5 + $0x1cc] ss:$16 sps:$4 sm:$0xff]   ;;  %v6425_v9 = vld [vmem:[%s11854_s6 + $0x40] sm:$0xff]   ;;  %p7549_p5 = por %p7548_p3, %p7547_p2 }
 0x166   : > { %v6421_v6 = vld [vmem:[%s11853_s5 + $0x1c8] ss:$16 sps:$4 sm:$0xff]   ;;  %v6422_v7 = vld [vmem:[%s11853_s5 + $0x1ec] ss:$16 sps:$4 sm:$0xff]   ;;  %5978 = vmatprep.subr.bf16.mxu0 %v6425_v9 }
 0x167   : > { %v6424_v8 = vld [vmem:[%s11853_s5 + $0x1e8] ss:$16 sps:$4 sm:$0xff]   ;;  %5979 = vmatpush3.bf16.msra.mxu0 %v6426_v10  ;;  %v1756_v10 = vld [vmem:[#allocation2 + $0x10] sm:$0xff]  ;;  %p7550_p6 = pnand %p7549_p5, %p7543_p1 }
 0x168   : > { %1681 = vmatpush1.bf16.msra.mxu1 %v6349_v13  ;;  %v6427_v11 = vld [vmem:[%s11854_s6 + $0x48] sm:$0xff]   ;;  %v6429_v13 = vld [vmem:[%s11854_s6 + $0x50] sm:$0xff]  }
 0x169   : > { %1682 = vmatprep.subr.bf16.mxu1 %v6350_v14  ;;  %5980 = vmatprep.subr.bf16.mxu0 %v6427_v11  ;;  %v6430_v14 = vld [vmem:[%s11854_s6 + $0x10] sm:$0xff]  }
 0x16c   : > { %1683 = vmatpush1.bf16.msra.mxu1 %v6352_v15  ;;  %v6431_v15 = vld [vmem:[%s11854_s6 + $0x58] sm:$0xff]  }
 0x16d   : > { %1684 = vmatprep.subr.bf16.mxu1 %v6353_v16  ;;  %v6432_v16 = vld [vmem:[%s11854_s6 + $0x18] sm:$0xff]  }
 0x170   : > { %1685 = vmatpush1.bf16.msra.mxu1 %v6355_v17  ;;  %v6433_v17 = vld [vmem:[%s11854_s6 + $0x60] sm:$0xff]  }
 0x171   : > { %1686 = vmatprep.subr.bf16.mxu1 %v6356_v18  ;;  %v6434_v18 = vld [vmem:[%s11854_s6 + $0x20] sm:$0xff]  }
 0x174   : > { %1687 = vmatpush1.bf16.msra.mxu1 %v6358_v19  ;;  %v6435_v19 = vld [vmem:[%s11854_s6 + $0x68] sm:$0xff]  }
 0x175   : > { %1688 = vmatprep.subr.bf16.mxu1 %v6359_v20  ;;  %v6436_v20 = vld [vmem:[%s11854_s6 + $0x28] sm:$0xff]  }
 0x178   : > { %1689 = vmatpush1.bf16.msra.mxu1 %v6361_v21  ;;  %v6437_v21 = vld [vmem:[%s11854_s6 + $0x70] sm:$0xff]  }
 0x179   : > { %1690 = vmatprep.subr.bf16.mxu1 %v6362_v22  ;;  %v6438_v22 = vld [vmem:[%s11854_s6 + $0x30] sm:$0xff]  }
 0x17c   : > { %1691 = vmatpush1.bf16.msra.mxu1 %v6364_v23  ;;  %v6439_v23 = vld [vmem:[%s11854_s6 + $0x78] sm:$0xff]  }
 0x17d   : > { %1692 = vmatprep.subr.bf16.mxu1 %v6365_v24  ;;  %v6440_v24 = vld [vmem:[%s11854_s6 + $0x38] sm:$0xff]  }
 0x180   : > { %1693 = vmatpush1.bf16.msra.mxu1 %v6367_v25  ;;  %v1113_v25 = vld [vmem:[%s11856_s8] sm:$0xff] }
 0x181   : > { %1694 = vmatprep.subr.bf16.mxu1 %v6368_v26  ;;  %v1117_v26 = vld [vmem:[%s11856_s8 + $0x20] sm:$0xff] }
 0x184   : > { %1695 = vmatpush1.bf16.msra.mxu1 %v6370_v27  ;;  %v1114_v27 = vld [vmem:[%s11856_s8 + $0x8] sm:$0xff] }
 0x185   : > { %1696 = vmatprep.subr.bf16.mxu1 %v6371_v28  ;;  %v8194_v28 = vcombine.high %v1113_v25, %v1117_v26 }
 0x187   : > { %12064 = vst [vmem:[#allocation14_spill] sm:$0xff] %v8194_v28 }
 0x188   : > { %1697 = vmatpush1.bf16.msra.mxu1 %v6373_v29  ;;  %v1118_v29 = vld [vmem:[%s11856_s8 + $0x28] sm:$0xff] }
 0x189   : > { %1698 = vmatprep.subr.bf16.mxu1 %v6374_v30  ;;  %v8199_v30 = vcombine.low %v1113_v25, %v1117_v26  ;;  %v8207_v33 = vcombine.high %v1114_v27, %v1118_v29 }
 0x18b   : > { %12065 = vst [vmem:[#allocation15_spill] sm:$0xff] %v8207_v33 }
 0x18c   : > { %1699 = vmatpush1.bf16.msra.mxu1 %v6376_v31  ;;  %v1121_v31 = vld [vmem:[%s11856_s8 + $0x40] sm:$0xff] }
 0x18d   : > { %1711 = vmatprep.subr.bf16.mxu1 %v6377_v34  ;;  %v8209_v34 = vcombine.low %v1114_v27, %v1118_v29  ;;  %v1340_v29 = vld [vmem:[#allocation3] sm:$0xff] }
 0x18f   : > { %1701 = vmatmul.mubr.bf16.vlgmr.msra.gmra.mrb[32].mxu1 %v8042_v36  ;;  %12066 = vst [vmem:[#allocation16_spill] sm:$0xff] %v8209_v34 }
 0x190   : > { %1712 = vmatpush1.bf16.msra.mxu1 %v6379_v35  ;;  %1743 = vmatprep.mubr.bf16.mxu1 %v1347_v12  ;;  %v6428_v12 = vld [vmem:[%s11854_s6 + $0x8] sm:$0xff]   ;;  %v8211_v35 = vcombine.high %v1121_v31, %v1125_v32 }
 0x191   : > { %1713 = vmatprep.subr.bf16.mxu1 %v6380_v37  ;;  %5981 = vmatpush3.bf16.msra.mxu0 %v6428_v12  ;;  %v1129_v37 = vld [vmem:[%s11856_s8 + $0x80] sm:$0xff]  ;;  %v1757_v12 = vld [vmem:[#allocation2 + $0x18] sm:$0xff] }
 0x192   : > { %5982 = vmatprep.subr.bf16.mxu0 %v6429_v13 }
 0x194   : > { %1714 = vmatpush1.bf16.msra.mxu1 %v6382_v38  ;;  %v1133_v38 = vld [vmem:[%s11856_s8 + $0xa0] sm:$0xff] }
 0x195   : > { %1715 = vmatprep.subr.bf16.mxu1 %v6383_v39  ;;  %5983 = vmatpush3.bf16.msra.mxu0 %v6430_v14  ;;  %v8225_v39 = vcombine.high %v1129_v37, %v1133_v38  ;;  %v1760_v14 = vld [vmem:[#allocation2 + $0x30] sm:$0xff] }
 0x196   : > { %5984 = vmatprep.subr.bf16.mxu0 %v6431_v15 }
 0x198   : > { %1716 = vmatpush1.bf16.msra.mxu1 %v6385_v40  ;;  %v8228_v40 = vcombine.low %v1129_v37, %v1133_v38  ;;  %v1341_v37 = vld [vmem:[#allocation3 + $0x8] sm:$0xff] }
 0x199   : > { %1717 = vmatprep.subr.bf16.mxu1 %v6386_v41  ;;  %5985 = vmatpush3.bf16.msra.mxu0 %v6432_v16  ;;  %v1137_v41 = vld [vmem:[%s11856_s8 + $0xc0] sm:$0xff] }
 0x19a   : > { %5986 = vmatprep.subr.bf16.mxu0 %v6433_v17  ;;  %v1761_v17 = vld [vmem:[#allocation2 + $0x38] sm:$0xff] }
 0x19c   : > { %1718 = vmatpush1.bf16.msra.mxu1 %v6388_v42  ;;  %v1141_v42 = vld [vmem:[%s11856_s8 + $0xe0] sm:$0xff] }
 0x19d   : > { %1719 = vmatprep.subr.bf16.mxu1 %v6389_v43  ;;  %5987 = vmatpush3.bf16.msra.mxu0 %v6434_v18  ;;  %v8237_v43 = vcombine.high %v1137_v41, %v1141_v42 }
 0x19e   : > { %5988 = vmatprep.subr.bf16.mxu0 %v6435_v19 }
 0x1a0   : > { %1720 = vmatpush1.bf16.msra.mxu1 %v6391_v44  ;;  %v8240_v44 = vcombine.low %v1137_v41, %v1141_v42 }
 0x1a1   : > { %1721 = vmatprep.subr.bf16.mxu1 %v6392_v45  ;;  %5989 = vmatpush3.bf16.msra.mxu0 %v6436_v20 }
 0x1a2   : > { %5990 = vmatprep.subr.bf16.mxu0 %v6437_v21 }
 0x1a4   : > { %1722 = vmatpush1.bf16.msra.mxu1 %v6394_v46 }
 0x1a5   : > { %1723 = vmatprep.subr.bf16.mxu1 %v6395_v49  ;;  %5991 = vmatpush3.bf16.msra.mxu0 %v6438_v22 }
 0x1a6   : > { %5992 = vmatprep.subr.bf16.mxu0 %v6439_v23 }
 0x1a8   : > { %1724 = vmatpush1.bf16.msra.mxu1 %v6397_v51 }
 0x1a9   : > { %1725 = vmatprep.subr.bf16.mxu1 %v6398_v52  ;;  %5993 = vmatpush3.bf16.msra.mxu0 %v6440_v24  ;;  %v1754_v52 = vld [vmem:[#allocation2] sm:$0xff] }
 0x1aa   : > { %2366 = vmatprep.subr.bf16.mxu0 %v8207_v33 }
 0x1ac   : > { %1726 = vmatpush1.bf16.msra.mxu1 %v6400_v55  ;;  %v1755_v55 = vld [vmem:[#allocation2 + $0x8] sm:$0xff] }
 0x1ad   : > { %1727 = vmatprep.subr.bf16.mxu1 %v6401_v56  ;;  %v1758_v56 = vld [vmem:[#allocation2 + $0x20] sm:$0xff] }
 0x1b0   : > { %1728 = vmatpush1.bf16.msra.mxu1 %v6403_v57 }
 0x1b1   : > { %1729 = vmatprep.subr.bf16.mxu1 %v6404_v58  ;;  %v1759_v58 = vld [vmem:[#allocation2 + $0x28] sm:$0xff] }
 0x1b4   : > { %1730 = vmatpush1.bf16.msra.mxu1 %v6406_v59 }
 0x1b5   : > { %1731 = vmatprep.subr.bf16.mxu1 %v6407_v60 }
 0x1b8   : > { %1732 = vmatpush1.bf16.msra.mxu1 %v6409_v61 }
 0x1b9   : > { %1733 = vmatprep.subr.bf16.mxu1 %v6410_v62 }
 0x1bc   : > { %1734 = vmatpush1.bf16.msra.mxu1 %v6412_v63 }
 0x1bd   : > { %1735 = vmatprep.subr.bf16.mxu1 %v6413_v0 }
 0x1c0   : > { %1736 = vmatpush1.bf16.msra.mxu1 %v6415_v1 }
 0x1c1   : > { %1737 = vmatprep.subr.bf16.mxu1 %v6416_v2 }
 0x1c4   : > { %1738 = vmatpush1.bf16.msra.mxu1 %v6418_v4 }
 0x1c5   : > { %1739 = vmatprep.subr.bf16.mxu1 %v6419_v5 }
 0x1c8   : > { %1740 = vmatpush1.bf16.msra.mxu1 %v6421_v6 }
 0x1c9   : > { %1741 = vmatprep.subr.bf16.mxu1 %v6422_v7 }
 0x1cc   : > { %1742 = vmatpush1.bf16.msra.mxu1 %v6424_v8 }
 0x1cd   : > { %2325 = vmatprep.subr.bf16.mxu1 %v8194_v28 }
 0x1cf   : > { %1744 = vmatmul.mubr.bf16.vlgmr.msra.gmra.mrb[36].mxu1 %v8042_v36  ;;  %v8216_v36 = vcombine.low %v1121_v31, %v1125_v32 }
 0x1d0   : > { %2357 = vmatprep.mubr.bf16.mxu1 %v11870_v3  ;;  %2326 = vmatpush1.bf16.msra.mxu1 %v8199_v30 }
 0x1d1   : > { %2327 = vmatprep.subr.bf16.mxu1 %v8211_v35 }
 0x1d4   : > { %2328 = vmatpush1.bf16.msra.mxu1 %v8216_v36 }
 0x1d5   : > { %2329 = vmatprep.subr.bf16.mxu1 %v8225_v39 }
 0x1d8   : > { %2330 = vmatpush1.bf16.msra.mxu1 %v8228_v40 }
 0x1d9   : > { %2331 = vmatprep.subr.bf16.mxu1 %v8237_v43 }
 0x1dc   : > { %2332 = vmatpush1.bf16.msra.mxu1 %v8240_v44 }
 0x262   : > { %v1702_v45 = vpop.f32.mrb[32].mxu1 }
 0x263   : > { %v1704_v46 = vpop.f32.mrb[33].mxu1  ;;  %v1762_v57 = vadd.f32 %v1754_v52, %v1702_v45 }
 0x264   : > { %v1706_v49 = vpop.f32.mrb[34].mxu1  ;;  %v1763_v59 = vadd.f32 %v1755_v55, %v1704_v46 }
 0x265   : > { %v1708_v51 = vpop.f32.mrb[35].mxu1  ;;  %v1766_v60 = vadd.f32 %v1758_v56, %v1706_v49  ;;  %v5699_v62 = vmul.f32 -1.442695, %v1762_v57 }
 0x266   : > { %v1767_v61 = vadd.f32 %v1759_v58, %v1708_v51  ;;  %v5700_v63 = vmul.f32 -1.442695, %v1763_v59 }
 0x267   : > { %v5702_v0 = vmul.f32 -1.442695, %v1766_v60  ;;  %6681 = vpow2.f32 %v5699_v62 }
 0x268   : > { %v5703_v1 = vmul.f32 -1.442695, %v1767_v61  ;;  %6683 = vpow2.f32 %v5700_v63 }
 0x269   : > { %6685 = vpow2.f32 %v5702_v0  ;;  %v1122_v0 = vld [vmem:[%s11856_s8 + $0x48] sm:$0xff] }
 0x26a   : > { %6687 = vpow2.f32 %v5703_v1  ;;  %v1126_v1 = vld [vmem:[%s11856_s8 + $0x68] sm:$0xff] }
 0x271   : > { %v6682_v2 = vpop.eup %6681 }
 0x272   : > { %v6684_v4 = vpop.eup %6683  ;;  %v1788_v7 = vadd.f32 1.0, %v6682_v2 }
 0x273   : > { %v6686_v5 = vpop.eup %6685  ;;  %v1789_v8 = vadd.f32 1.0, %v6684_v4 }
 0x274   : > { %v6688_v6 = vpop.eup %6687  ;;  %v1791_v9 = vadd.f32 1.0, %v6686_v5  ;;  %6689 = vrcp.f32 %v1788_v7  ;;  %v8264_v5 = vcombine.high %v1122_v0, %v1126_v1  ;;  %v1134_v7 = vld [vmem:[%s11856_s8 + $0xa8] sm:$0xff] }
 0x275   : > { %v1792_v11 = vadd.f32 1.0, %v6688_v6  ;;  %6691 = vrcp.f32 %v1789_v8  ;;  %v1130_v6 = vld [vmem:[%s11856_s8 + $0x88] sm:$0xff]  ;;  %v8273_v8 = vcombine.low %v1122_v0, %v1126_v1 }
 0x276   : > { %6693 = vrcp.f32 %v1791_v9  ;;  %12067 = vst [vmem:[#allocation17_spill] sm:$0xff] %v8264_v5  ;;  %v8277_v9 = vcombine.high %v1130_v6, %v1134_v7 }
 0x277   : > { %6695 = vrcp.f32 %v1792_v11  ;;  %12068 = vst [vmem:[#allocation18_spill] sm:$0xff] %v8273_v8  ;;  %v1142_v11 = vld [vmem:[%s11856_s8 + $0xe8] sm:$0xff] }
 0x278   : > { %12069 = vst [vmem:[#allocation19_spill] sm:$0xff] %v8277_v9 }
 0x27e   : > { %v6690_v25 = vpop.eup %6689 }
 0x27f   : > { %v6692_v26 = vpop.eup %6691  ;;  %v1808_v41 = vmul.f32 %v6690_v25, %v1340_v29  ;;  %v1154_v25 = vld [vmem:[%s11856_s8 + $0x148] sm:$0xff] }
 0x280   : > { %v6694_v27 = vpop.eup %6693 }
 0x281   : > { %v6696_v31 = vpop.eup %6695  ;;  %v1809_v51 = vmul.f32 %v6694_v27, %v1341_v37  ;;  %v1158_v27 = vld [vmem:[%s11856_s8 + $0x168] sm:$0xff]  ;;  %v1161_v37 = vld [vmem:[%s11856_s8 + $0x180] sm:$0xff] }
 0x282   : > { %v8334_v29 = vcombine.high %v1154_v25, %v1158_v27 }
 0x284   : > { %12075 = vst [vmem:[#allocation25_spill] sm:$0xff] %v8334_v29 }
 0x2a2   : > { %v1745_v13 = vpop.f32.mrb[36].mxu1 }
 0x2a3   : > { %v1764_v15 = vadd.f32 %v1756_v10, %v1745_v13  ;;  %v1747_v16 = vpop.f32.mrb[37].mxu1  ;;  %v1138_v10 = vld [vmem:[%s11856_s8 + $0xc8] sm:$0xff] }
 0x2a4   : > { %v1765_v18 = vadd.f32 %v1757_v12, %v1747_v16  ;;  %v1749_v19 = vpop.f32.mrb[38].mxu1  ;;  %v8286_v12 = vcombine.low %v1130_v6, %v1134_v7  ;;  %v8289_v13 = vcombine.high %v1138_v10, %v1142_v11  ;;  %v1149_v16 = vld [vmem:[%s11856_s8 + $0x120] sm:$0xff]  ;;  %v1116_v6 = vld [vmem:[%s11856_s8 + $0x18] sm:$0xff] }
 0x2a5   : > { %v5701_v20 = vmul.f32 -1.442695, %v1764_v15  ;;  %v1768_v21 = vadd.f32 %v1760_v14, %v1749_v19  ;;  %v1751_v22 = vpop.f32.mrb[39].mxu1  ;;  %v8292_v14 = vcombine.low %v1138_v10, %v1142_v11  ;;  %v1145_v15 = vld [vmem:[%s11856_s8 + $0x100] sm:$0xff]  ;;  %v1150_v19 = vld [vmem:[%s11856_s8 + $0x128] sm:$0xff]  ;;  %v1120_v10 = vld [vmem:[%s11856_s8 + $0x38] sm:$0xff] }
 0x2a6   : > { %6697 = vtanh.f32 %v1765_v18  ;;  %v1769_v23 = vadd.f32 %v1761_v17, %v1751_v22  ;;  %12070 = vst [vmem:[#allocation20_spill] sm:$0xff] %v8286_v12  ;;  %12071 = vst [vmem:[#allocation21_spill] sm:$0xff] %v8289_v13  ;;  %v1146_v17 = vld [vmem:[%s11856_s8 + $0x108] sm:$0xff]  ;;  %v8305_v18 = vcombine.high %v1145_v15, %v1149_v16  ;;  %v8406_v11 = vcombine.high %v1116_v6, %v1120_v10 }
 0x2a7   : > { %6699 = vpow2.f32 %v5701_v20  ;;  %v5704_v24 = vmul.f32 -1.442695, %v1768_v21  ;;  %12072 = vst [vmem:[#allocation22_spill] sm:$0xff] %v8292_v14  ;;  %v8310_v20 = vcombine.high %v1146_v17, %v1150_v19  ;;  %v8312_v21 = vcombine.low %v1145_v15, %v1149_v16 }
 0x2a8   : > { %6701 = vtanh.f32 %v1769_v23  ;;  %v8314_v22 = vcombine.low %v1146_v17, %v1150_v19  ;;  %2333 = vmatprep.subr.bf16.mxu1 %v8305_v18  ;;  %v1153_v23 = vld [vmem:[%s11856_s8 + $0x140] sm:$0xff]  ;;  %12085 = vst [vmem:[#allocation35_spill] sm:$0xff] %v8406_v11  ;;  %v8411_v16 = vcombine.low %v1116_v6, %v1120_v10  ;;  %v1135_v6 = vld [vmem:[%s11856_s8 + $0xb0] sm:$0xff]  ;;  %v1132_v10 = vld [vmem:[%s11856_s8 + $0x98] sm:$0xff] }
 0x2a9   : > { %6703 = vpow2.f32 %v5704_v24  ;;  %12073 = vst [vmem:[#allocation23_spill] sm:$0xff] %v8310_v20  ;;  %2334 = vmatpush1.bf16.msra.mxu1 %v8312_v21  ;;  %v1157_v24 = vld [vmem:[%s11856_s8 + $0x160] sm:$0xff] }
 0x2aa   : > { %12074 = vst [vmem:[#allocation24_spill] sm:$0xff] %v8314_v22  ;;  %12087 = vst [vmem:[#allocation37_spill] sm:$0xff] %v8411_v16  ;;  %v5705_v19 = vld [vmem:[%s11855_s7] ss:$0 sm:$0xff] }
 0x2b0   : > { %v6698_v32 = vpop.eup %6697 }
 0x2b1   : > { %v6700_v38 = vpop.eup %6699  ;;  %v1810_v42 = vmul.f32 %v6698_v32, %v6692_v26  ;;  %v8329_v26 = vcombine.high %v1153_v23, %v1157_v24  ;;  %v8338_v32 = vcombine.low %v1154_v25, %v1158_v27 }
 0x2b2   : > { %v6702_v45 = vpop.eup %6701  ;;  %v1790_v46 = vadd.f32 1.0, %v6700_v38  ;;  %v1165_v38 = vld [vmem:[%s11856_s8 + $0x1a0] sm:$0xff] }
 0x2b3   : > { %v6704_v49 = vpop.eup %6703  ;;  %v8244_v52 = vadd.f32 %v1810_v42, %v1808_v41  ;;  %v1811_v55 = vmul.f32 %v6702_v45, %v6696_v31  ;;  %v8336_v31 = vcombine.low %v1153_v23, %v1157_v24  ;;  %12076 = vst [vmem:[#allocation26_spill] sm:$0xff] %v8338_v32  ;;  %2335 = vmatprep.subr.bf16.mxu1 %v8329_v26  ;;  %v1162_v41 = vld [vmem:[%s11856_s8 + $0x188] sm:$0xff] }
 0x2b4   : > { %6705 = vrcp.f32 %v1790_v46  ;;  %v1793_v56 = vadd.f32 1.0, %v6704_v49  ;;  %v8353_v42 = vcombine.high %v1161_v37, %v1165_v38  ;;  %v1166_v45 = vld [vmem:[%s11856_s8 + $0x1a8] sm:$0xff]  ;;  %v8360_v49 = vcombine.low %v1161_v37, %v1165_v38  ;;  %v1123_v38 = vld [vmem:[%s11856_s8 + $0x50] sm:$0xff] }
 0x2b5   : > { %6707 = vtanh.f32 %v8244_v52  ;;  %v8247_v57 = vadd.f32 %v1811_v55, %v1809_v51  ;;  %2336 = vmatpush1.bf16.msra.mxu1 %v8336_v31  ;;  %v8358_v46 = vcombine.high %v1162_v41, %v1166_v45  ;;  %v8362_v51 = vcombine.low %v1162_v41, %v1166_v45  ;;  %v1169_v55 = vld [vmem:[%s11856_s8 + $0x1c0] sm:$0xff]  ;;  %v1127_v41 = vld [vmem:[%s11856_s8 + $0x70] sm:$0xff]  ;;  %v1124_v45 = vld [vmem:[%s11856_s8 + $0x58] sm:$0xff] }
 0x2b6   : > { %6709 = vrcp.f32 %v1793_v56  ;;  %12078 = vst [vmem:[#allocation28_spill] sm:$0xff] %v8360_v49  ;;  %2337 = vmatprep.subr.bf16.mxu1 %v8353_v42  ;;  %v1173_v56 = vld [vmem:[%s11856_s8 + $0x1e0] sm:$0xff] }
 0x2b7   : > { %6711 = vtanh.f32 %v8247_v57  ;;  %12077 = vst [vmem:[#allocation27_spill] sm:$0xff] %v8358_v46  ;;  %12079 = vst [vmem:[#allocation29_spill] sm:$0xff] %v8362_v51  ;;  %v8384_v0 = vcombine.low %v1169_v55, %v1173_v56 }
 0x2b9   : > { %2338 = vmatpush1.bf16.msra.mxu1 %v8360_v49  ;;  %12082 = vst [vmem:[#allocation32_spill] sm:$0xff] %v8384_v0 }
 0x2be   : > { %v6706_v58 = vpop.eup %6705 }
 0x2bf   : > { %v6708_v59 = vpop.eup %6707 }
 0x2c0   : > { %v6710_v60 = vpop.eup %6709  ;;  %v8250_v62 = vmul.f32 %v6708_v59, %v6706_v58  ;;  %v1170_v58 = vld [vmem:[%s11856_s8 + $0x1c8] sm:$0xff]  ;;  %v8377_v59 = vcombine.high %v1169_v55, %v1173_v56  ;;  %v1128_v55 = vld [vmem:[%s11856_s8 + $0x78] sm:$0xff] }
 0x2c1   : > { %v6712_v61 = vpop.eup %6711 }
 0x2c2   : > { %v8252_v63 = vmul.f32 %v6712_v61, %v6710_v60  ;;  %v1818_v4 = vpack.c.bf16 %v8250_v62, %v8250_v62  ;;  %12080 = vst [vmem:[#allocation30_spill] sm:$0xff] %v8377_v59  ;;  %v1174_v60 = vld [vmem:[%s11856_s8 + $0x1e8] sm:$0xff]  ;;  %2339 = vmatprep.subr.bf16.mxu1 %v8377_v59 }
 0x2c3   : > { %v8382_v61 = vcombine.high %v1170_v58, %v1174_v60  ;;  %v8386_v1 = vcombine.low %v1170_v58, %v1174_v60  ;;  %2340 = vmatpush1.bf16.msra.mxu1 %v8384_v0  ;;  %v8431_v60 = vcombine.high %v1123_v38, %v1127_v41 }
 0x2c4   : > { %v1819_v2 = vpack.c.bf16 %v8252_v63, %v8252_v63 }
 0x2c5   : > { %12081 = vst [vmem:[#allocation31_spill] sm:$0xff] %v8382_v61  ;;  %12083 = vst [vmem:[#allocation33_spill] sm:$0xff] %v8386_v1 }
 0x2c6   : > { %1954 = vmatprep.mubr.bf16.mxu0 %v1819_v2  ;;  %v1115_v2 = vld [vmem:[%s11856_s8 + $0x10] sm:$0xff]  ;;  %12088 = vst [vmem:[#allocation38_spill] sm:$0xff] %v8431_v60 }
 0x2c7   : > { %1955 = vmatmul.mubr.bf16.vlgmr.msra.gmra.mrb[0].mxu0 %v1818_v4  ;;  %v1119_v4 = vld [vmem:[%s11856_s8 + $0x30] sm:$0xff] }
 0x2c8   : > { %2367 = vmatpush1.bf16.msra.mxu0 %v8209_v34  ;;  %2398 = vmatprep.mubr.bf16.mxu0 %v11870_v3  ;;  %v8401_v7 = vcombine.high %v1115_v2, %v1119_v4  ;;  %v8408_v15 = vcombine.low %v1115_v2, %v1119_v4  ;;  %v8433_v2 = vcombine.high %v1124_v45, %v1128_v55  ;;  %v1131_v4 = vld [vmem:[%s11856_s8 + $0x90] sm:$0xff] }
 0x2c9   : > { %2368 = vmatprep.subr.bf16.mxu0 %v8264_v5 }
 0x2ca   : > { %12084 = vst [vmem:[#allocation34_spill] sm:$0xff] %v8401_v7  ;;  %12086 = vst [vmem:[#allocation36_spill] sm:$0xff] %v8408_v15  ;;  %2407 = vmatprep.subr.bf16.mxu1 %v8401_v7 }
 0x2cb   : > { %12089 = vst [vmem:[#allocation39_spill] sm:$0xff] %v8433_v2 }
 0x2cc   : > { %2369 = vmatpush1.bf16.msra.mxu0 %v8273_v8 }
 0x2cd   : > { %2370 = vmatprep.subr.bf16.mxu0 %v8277_v9 }
 0x2d0   : > { %2371 = vmatpush1.bf16.msra.mxu0 %v8286_v12 }
 0x2d1   : > { %2372 = vmatprep.subr.bf16.mxu0 %v8289_v13 }
 0x2d4   : > { %2373 = vmatpush1.bf16.msra.mxu0 %v8292_v14 }
 0x2d5   : > { %2374 = vmatprep.subr.bf16.mxu0 %v8310_v20  ;;  %v1306_v20 = vld [vmem:[%s11859_s11] sm:$0x3] }
 0x2d6   : > { %v9340_v14 = vrot.slane %v1306_v20, %v7920_v53  ;;  %v9343_v13 = vrot.slane %v1306_v20, %v7923_v54  ;;  %v9350_v20 = vld [vmem:[%s11853_s5] ss:$16 sps:$4 sm:$0xff]  }
 0x2d8   : > { %2375 = vmatpush1.bf16.msra.mxu0 %v8314_v22  ;;  %v6582_v22 = vld [vmem:[%s11858_s10 + $0x2f4] ss:$8 sps:$4 sm:$0xff]   ;;  %12125 = vst [vmem:[#allocation75_spill] sm:$0xff] %v9340_v14  ;;  %12126 = vst [vmem:[#allocation76_spill] sm:$0xff] %v9343_v13 }
 0x2d9   : > { %2376 = vmatprep.subr.bf16.mxu0 %v8334_v29  ;;  %v6578_v29 = vld [vmem:[%s11858_s10 + $0x2d0] ss:$8 sps:$4 sm:$0xff]  }
 0x2dc   : > { %2377 = vmatpush1.bf16.msra.mxu0 %v8338_v32 }
 0x2dd   : > { %2378 = vmatprep.subr.bf16.mxu0 %v8358_v46 }
 0x2e0   : > { %2379 = vmatpush1.bf16.msra.mxu0 %v8362_v51 }
 0x2e1   : > { %2380 = vmatprep.subr.bf16.mxu0 %v8382_v61 }
 0x2e4   : > { %2381 = vmatpush1.bf16.msra.mxu0 %v8386_v1 }
 0x2e5   : > { %2448 = vmatprep.subr.bf16.mxu0 %v8406_v11  ;;  %v1155_v11 = vld [vmem:[%s11856_s8 + $0x150] sm:$0xff] }
 0x39a   : > { %v5994_v17 = vpop.f32.mrb[0].mxu0 }
 0x39b   : > { %v5995_v23 = vpop.f32.mrb[1].mxu0 }
 0x39c   : > { %v5996_v24 = vadd.f32 %v5995_v23, %v5994_v17  ;;  %v5997_v25 = vpop.f32.mrb[2].mxu0  ;;  %v1136_v17 = vld [vmem:[%s11856_s8 + $0xb8] sm:$0xff]  ;;  %v8453_v23 = vcombine.low %v1124_v45, %v1128_v55  ;;  %v8477_v45 = vcombine.low %v1131_v4, %v1135_v6 }
 0x39d   : > { %v5998_v27 = vpop.f32.mrb[3].mxu0  ;;  %v8459_v25 = vcombine.high %v1132_v10, %v1136_v17  ;;  %v8479_v55 = vcombine.low %v1132_v10, %v1136_v17 }
 0x39e   : > { %v1957_v37 = vadd.f32 %v5996_v24, %v5705_v19  ;;  %v8451_v19 = vcombine.low %v1123_v38, %v1127_v41  ;;  %12091 = vst [vmem:[#allocation41_spill] sm:$0xff] %v8453_v23  ;;  %v8457_v24 = vcombine.high %v1131_v4, %v1135_v6  ;;  %v1139_v27 = vld [vmem:[%s11856_s8 + $0xd0] sm:$0xff]  ;;  %v1140_v38 = vld [vmem:[%s11856_s8 + $0xd8] sm:$0xff]  ;;  %12094 = vst [vmem:[#allocation44_spill] sm:$0xff] %v8477_v45 }
 0x39f   : > { %12093 = vst [vmem:[#allocation43_spill] sm:$0xff] %v8459_v25  ;;  %v1144_v41 = vld [vmem:[%s11856_s8 + $0xf8] sm:$0xff]  ;;  %12095 = vst [vmem:[#allocation45_spill] sm:$0xff] %v8479_v55 }
 0x3a0   : > { %6713 = vtanh.f32 %v1957_v37  ;;  %12090 = vst [vmem:[#allocation40_spill] sm:$0xff] %v8451_v19  ;;  %12092 = vst [vmem:[#allocation42_spill] sm:$0xff] %v8457_v24  ;;  %v1143_v37 = vld [vmem:[%s11856_s8 + $0xf0] sm:$0xff]  ;;  %v1148_v4 = vld [vmem:[%s11856_s8 + $0x118] sm:$0xff]  ;;  %v8503_v17 = vcombine.low %v1140_v38, %v1144_v41 }
 0x3a1   : > { %v1152_v6 = vld [vmem:[%s11856_s8 + $0x138] sm:$0xff]  ;;  %v8501_v10 = vcombine.low %v1139_v27, %v1143_v37 }
 0x3a2   : > { %12099 = vst [vmem:[#allocation49_spill] sm:$0xff] %v8503_v17 }
 0x3a3   : > { %12098 = vst [vmem:[#allocation48_spill] sm:$0xff] %v8501_v10 }
 0x3aa   : > { %v6714_v56 = vpop.eup %6713 }
 0x3ab   : > { %v8429_v58 = vpack.c.bf16 %v6714_v56, %v6714_v56  ;;  %v8483_v56 = vcombine.high %v1139_v27, %v1143_v37  ;;  %v1156_v27 = vld [vmem:[%s11856_s8 + $0x158] sm:$0xff] }
 0x3ac   : > { %v1160_v37 = vld [vmem:[%s11856_s8 + $0x178] sm:$0xff] }
 0x3ad   : > { %2358 = vmatmul.mubr.bf16.vlgmr.msra.gmra.mrb[40].mxu1 %v8429_v58  ;;  %2399 = vmatmul.mubr.bf16.vlgmr.msra.gmra.mrb[4].mxu0 %v8429_v58  ;;  %12096 = vst [vmem:[#allocation46_spill] sm:$0xff] %v8483_v56 }
 0x3ae   : > { %2408 = vmatpush1.bf16.msra.mxu1 %v8408_v15  ;;  %2449 = vmatpush1.bf16.msra.mxu0 %v8411_v16  ;;  %v8509_v16 = vcombine.high %v1148_v4, %v1152_v6 }
 0x3af   : > { %2409 = vmatprep.subr.bf16.mxu1 %v8431_v60  ;;  %2450 = vmatprep.subr.bf16.mxu0 %v8433_v2  ;;  %v8485_v2 = vcombine.high %v1140_v38, %v1144_v41  ;;  %v8527_v41 = vcombine.low %v1148_v4, %v1152_v6  ;;  %v8551_v6 = vcombine.low %v1156_v27, %v1160_v37 }
 0x3b0   : > { %2439 = vmatprep.mubr.bf16.mxu1 %v11870_v3  ;;  %2480 = vmatprep.mubr.bf16.mxu0 %v11870_v3  ;;  %v1147_v3 = vld [vmem:[%s11856_s8 + $0x110] sm:$0xff]  ;;  %12101 = vst [vmem:[#allocation51_spill] sm:$0xff] %v8509_v16 }
 0x3b1   : > { %12097 = vst [vmem:[#allocation47_spill] sm:$0xff] %v8485_v2  ;;  %12103 = vst [vmem:[#allocation53_spill] sm:$0xff] %v8527_v41 }
 0x3b2   : > { %2410 = vmatpush1.bf16.msra.mxu1 %v8451_v19  ;;  %2451 = vmatpush1.bf16.msra.mxu0 %v8453_v23  ;;  %v1151_v23 = vld [vmem:[%s11856_s8 + $0x130] sm:$0xff]  ;;  %12107 = vst [vmem:[#allocation57_spill] sm:$0xff] %v8551_v6 }
 0x3b3   : > { %2411 = vmatprep.subr.bf16.mxu1 %v8457_v24  ;;  %2452 = vmatprep.subr.bf16.mxu0 %v8459_v25  ;;  %v8507_v25 = vcombine.high %v1147_v3, %v1151_v23  ;;  %v8525_v38 = vcombine.low %v1147_v3, %v1151_v23  ;;  %v1164_v3 = vld [vmem:[%s11856_s8 + $0x198] sm:$0xff]  ;;  %v1991_v24 = vsub.s32 6, %v7890_v47 }
 0x3b4   : > { %v1168_v23 = vld [vmem:[%s11856_s8 + $0x1b8] sm:$0xff] }
 0x3b5   : > { %12100 = vst [vmem:[#allocation50_spill] sm:$0xff] %v8507_v25  ;;  %12102 = vst [vmem:[#allocation52_spill] sm:$0xff] %v8525_v38 }
 0x3b6   : > { %2412 = vmatpush1.bf16.msra.mxu1 %v8477_v45  ;;  %2453 = vmatpush1.bf16.msra.mxu0 %v8479_v55  ;;  %v1159_v55 = vld [vmem:[%s11856_s8 + $0x170] sm:$0xff] }
 0x3b7   : > { %2413 = vmatprep.subr.bf16.mxu1 %v8483_v56  ;;  %2454 = vmatprep.subr.bf16.mxu0 %v8485_v2  ;;  %v8531_v2 = vcombine.high %v1155_v11, %v1159_v55  ;;  %v8533_v56 = vcombine.high %v1156_v27, %v1160_v37  ;;  %v1163_v45 = vld [vmem:[%s11856_s8 + $0x190] sm:$0xff]  ;;  %v8549_v4 = vcombine.low %v1155_v11, %v1159_v55  ;;  %v1172_v11 = vld [vmem:[%s11856_s8 + $0x1d8] sm:$0xff] }
 0x3b8   : > { %v1176_v55 = vld [vmem:[%s11856_s8 + $0x1f8] sm:$0xff]  ;;  %v8575_v37 = vcombine.low %v1164_v3, %v1168_v23 }
 0x3b9   : > { %12104 = vst [vmem:[#allocation54_spill] sm:$0xff] %v8531_v2  ;;  %12105 = vst [vmem:[#allocation55_spill] sm:$0xff] %v8533_v56 }
 0x3ba   : > { %2414 = vmatpush1.bf16.msra.mxu1 %v8501_v10  ;;  %2455 = vmatpush1.bf16.msra.mxu0 %v8503_v17  ;;  %v1167_v17 = vld [vmem:[%s11856_s8 + $0x1b0] sm:$0xff]  ;;  %12106 = vst [vmem:[#allocation56_spill] sm:$0xff] %v8549_v4  ;;  %12111 = vst [vmem:[#allocation61_spill] sm:$0xff] %v8575_v37 }
 0x3bb   : > { %2415 = vmatprep.subr.bf16.mxu1 %v8507_v25  ;;  %2456 = vmatprep.subr.bf16.mxu0 %v8509_v16  ;;  %v8555_v16 = vcombine.high %v1163_v45, %v1167_v17  ;;  %v8557_v25 = vcombine.high %v1164_v3, %v1168_v23  ;;  %v1171_v10 = vld [vmem:[%s11856_s8 + $0x1d0] sm:$0xff]  ;;  %v8573_v27 = vcombine.low %v1163_v45, %v1167_v17  ;;  %v6441_v45 = vld [vmem:[%s11858_s10 + $0x4] ss:$8 sps:$4 sm:$0xff]   ;;  %v6449_v3 = vld [vmem:[%s11858_s10 + $0x20] ss:$8 sps:$4 sm:$0xff]  }
 0x3bc   : > { %v6444_v17 = vld [vmem:[%s11858_s10 + $0x14] ss:$8 sps:$4 sm:$0xff]  }
 0x3bd   : > { %12108 = vst [vmem:[#allocation58_spill] sm:$0xff] %v8555_v16  ;;  %12109 = vst [vmem:[#allocation59_spill] sm:$0xff] %v8557_v25  ;;  %v6450_v23 = vld [vmem:[%s11858_s10 + $0x34] ss:$8 sps:$4 sm:$0xff]  }
 0x3be   : > { %2416 = vmatpush1.bf16.msra.mxu1 %v8525_v38  ;;  %2457 = vmatpush1.bf16.msra.mxu0 %v8527_v41  ;;  %v1175_v41 = vld [vmem:[%s11856_s8 + $0x1f0] sm:$0xff]  ;;  %12110 = vst [vmem:[#allocation60_spill] sm:$0xff] %v8573_v27 }
 0x3bf   : > { %2417 = vmatprep.subr.bf16.mxu1 %v8531_v2  ;;  %2458 = vmatprep.subr.bf16.mxu0 %v8533_v56  ;;  %v8579_v56 = vcombine.high %v1171_v10, %v1175_v41  ;;  %v8581_v2 = vcombine.high %v1172_v11, %v1176_v55  ;;  %v8585_v38 = vcombine.low %v1171_v10, %v1175_v41  ;;  %v6443_v10 = vld [vmem:[%s11858_s10] ss:$8 sps:$4 sm:$0xff]   ;;  %v6446_v41 = vld [vmem:[%s11858_s10 + $0x10] ss:$8 sps:$4 sm:$0xff]  }
 0x3c1   : > { %12112 = vst [vmem:[#allocation62_spill] sm:$0xff] %v8579_v56  ;;  %12113 = vst [vmem:[#allocation63_spill] sm:$0xff] %v8581_v2 }
 0x3c2   : > { %2418 = vmatpush1.bf16.msra.mxu1 %v8549_v4  ;;  %2459 = vmatpush1.bf16.msra.mxu0 %v8551_v6  ;;  %12114 = vst [vmem:[#allocation64_spill] sm:$0xff] %v8585_v38  ;;  %v8587_v4 = vcombine.low %v1172_v11, %v1176_v55  ;;  %v6452_v11 = vld [vmem:[%s11858_s10 + $0x30] ss:$8 sps:$4 sm:$0xff]   ;;  %v6453_v55 = vld [vmem:[%s11858_s10 + $0x44] ss:$8 sps:$4 sm:$0xff]  }
 0x3c3   : > { %2419 = vmatprep.subr.bf16.mxu1 %v8555_v16  ;;  %2460 = vmatprep.subr.bf16.mxu0 %v8557_v25 }
 0x3c4   : > { %12115 = vst [vmem:[#allocation65_spill] sm:$0xff] %v8587_v4 }
 0x3c6   : > { %2420 = vmatpush1.bf16.msra.mxu1 %v8573_v27  ;;  %2461 = vmatpush1.bf16.msra.mxu0 %v8575_v37 }
 0x3c7   : > { %2421 = vmatprep.subr.bf16.mxu1 %v8579_v56  ;;  %2462 = vmatprep.subr.bf16.mxu0 %v8581_v2 }
 0x3ca   : > { %2422 = vmatpush1.bf16.msra.mxu1 %v8585_v38  ;;  %2463 = vmatpush1.bf16.msra.mxu0 %v8587_v4 }
 0x3cb   : > { %3198 = vmatprep.subr.bf16.mxu1 %v6441_v45  ;;  %v6455_v45 = vld [vmem:[%s11858_s10 + $0x40] ss:$8 sps:$4 sm:$0xff]  }
 0x3cd   : > { %2440 = vmatmul.mubr.bf16.vlgmr.msra.gmra.mrb[44].mxu1 %v8429_v58  ;;  %2481 = vmatmul.mubr.bf16.vlgmr.msra.gmra.mrb[8].mxu0 %v8429_v58  ;;  %v6447_v58 = vld [vmem:[%s11858_s10 + $0x24] ss:$8 sps:$4 sm:$0xff]  }
 0x3ce   : > { %3199 = vmatpush1.bf16.msra.mxu1 %v6443_v10  ;;  %v6456_v10 = vld [vmem:[%s11858_s10 + $0x54] ss:$8 sps:$4 sm:$0xff]  }
 0x3cf   : > { %3200 = vmatprep.subr.bf16.mxu1 %v6444_v17  ;;  %v6458_v17 = vld [vmem:[%s11858_s10 + $0x50] ss:$8 sps:$4 sm:$0xff]  }
 0x3d2   : > { %3201 = vmatpush1.bf16.msra.mxu1 %v6446_v41  ;;  %v6459_v41 = vld [vmem:[%s11858_s10 + $0x64] ss:$8 sps:$4 sm:$0xff]  }
 0x3d3   : > { %3202 = vmatprep.subr.bf16.mxu1 %v6447_v58  ;;  %v6461_v58 = vld [vmem:[%s11858_s10 + $0x60] ss:$8 sps:$4 sm:$0xff]  }
 0x3d6   : > { %3203 = vmatpush1.bf16.msra.mxu1 %v6449_v3  ;;  %v6462_v3 = vld [vmem:[%s11858_s10 + $0x74] ss:$8 sps:$4 sm:$0xff]  }
 0x3d7   : > { %3204 = vmatprep.subr.bf16.mxu1 %v6450_v23  ;;  %v6464_v23 = vld [vmem:[%s11858_s10 + $0x70] ss:$8 sps:$4 sm:$0xff]  }
 0x3da   : > { %3205 = vmatpush1.bf16.msra.mxu1 %v6452_v11  ;;  %v6465_v11 = vld [vmem:[%s11858_s10 + $0x84] ss:$8 sps:$4 sm:$0xff]  }
 0x3db   : > { %3206 = vmatprep.subr.bf16.mxu1 %v6453_v55  ;;  %v6467_v55 = vld [vmem:[%s11858_s10 + $0x80] ss:$8 sps:$4 sm:$0xff]  }
 0x3de   : > { %3207 = vmatpush1.bf16.msra.mxu1 %v6455_v45  ;;  %v6468_v45 = vld [vmem:[%s11858_s10 + $0x94] ss:$8 sps:$4 sm:$0xff]  }
 0x3df   : > { %3208 = vmatprep.subr.bf16.mxu1 %v6456_v10  ;;  %v6470_v10 = vld [vmem:[%s11858_s10 + $0x90] ss:$8 sps:$4 sm:$0xff]  }
 0x3e2   : > { %3209 = vmatpush1.bf16.msra.mxu1 %v6458_v17  ;;  %v6471_v17 = vld [vmem:[%s11858_s10 + $0xa4] ss:$8 sps:$4 sm:$0xff]  }
 0x3e3   : > { %3210 = vmatprep.subr.bf16.mxu1 %v6459_v41  ;;  %v6473_v41 = vld [vmem:[%s11858_s10 + $0xa0] ss:$8 sps:$4 sm:$0xff]  }
 0x3e6   : > { %3211 = vmatpush1.bf16.msra.mxu1 %v6461_v58  ;;  %v6474_v58 = vld [vmem:[%s11858_s10 + $0xb4] ss:$8 sps:$4 sm:$0xff]  }
 0x3e7   : > { %3212 = vmatprep.subr.bf16.mxu1 %v6462_v3  ;;  %v6476_v3 = vld [vmem:[%s11858_s10 + $0xb0] ss:$8 sps:$4 sm:$0xff]  }
 0x3ea   : > { %3213 = vmatpush1.bf16.msra.mxu1 %v6464_v23  ;;  %v6477_v23 = vld [vmem:[%s11858_s10 + $0xc4] ss:$8 sps:$4 sm:$0xff]  }
 0x3eb   : > { %3214 = vmatprep.subr.bf16.mxu1 %v6465_v11  ;;  %v6479_v11 = vld [vmem:[%s11858_s10 + $0xc0] ss:$8 sps:$4 sm:$0xff]  }
 0x3ee   : > { %3215 = vmatpush1.bf16.msra.mxu1 %v6467_v55  ;;  %v6480_v55 = vld [vmem:[%s11858_s10 + $0xd4] ss:$8 sps:$4 sm:$0xff]  }
 0x3ef   : > { %3216 = vmatprep.subr.bf16.mxu1 %v6468_v45  ;;  %v6482_v45 = vld [vmem:[%s11858_s10 + $0xd0] ss:$8 sps:$4 sm:$0xff]  }
 0x3f2   : > { %3217 = vmatpush1.bf16.msra.mxu1 %v6470_v10  ;;  %v6483_v10 = vld [vmem:[%s11858_s10 + $0xe4] ss:$8 sps:$4 sm:$0xff]  }
 0x3f3   : > { %3218 = vmatprep.subr.bf16.mxu1 %v6471_v17  ;;  %v6485_v17 = vld [vmem:[%s11858_s10 + $0xe0] ss:$8 sps:$4 sm:$0xff]  }
 0x3f6   : > { %3219 = vmatpush1.bf16.msra.mxu1 %v6473_v41  ;;  %v6486_v41 = vld [vmem:[%s11858_s10 + $0xf4] ss:$8 sps:$4 sm:$0xff]  }
 0x3f7   : > { %3220 = vmatprep.subr.bf16.mxu1 %v6474_v58  ;;  %v6488_v58 = vld [vmem:[%s11858_s10 + $0xf0] ss:$8 sps:$4 sm:$0xff]  }
 0x3fa   : > { %3221 = vmatpush1.bf16.msra.mxu1 %v6476_v3  ;;  %v6489_v3 = vld [vmem:[%s11858_s10 + $0x104] ss:$8 sps:$4 sm:$0xff]  }
 0x3fb   : > { %3222 = vmatprep.subr.bf16.mxu1 %v6477_v23  ;;  %v1177_v23 = vld [vmem:[%s11857_s9] sm:$0xff] }
 0x3fe   : > { %3223 = vmatpush1.bf16.msra.mxu1 %v6479_v11  ;;  %v8698_v11 = vrot.slane %v1177_v23, %v7920_v53 }
 0x3ff   : > { %3224 = vmatprep.subr.bf16.mxu1 %v6480_v55  ;;  %v8701_v55 = vrot.slane %v1177_v23, %v7893_v48 }
 0x400   : > { %12116 = vst [vmem:[#allocation66_spill] sm:$0xff] %v8698_v11 }
 0x401   : > { %12117 = vst [vmem:[#allocation67_spill] sm:$0xff] %v8701_v55 }
 0x402   : > { %3225 = vmatpush1.bf16.msra.mxu1 %v6482_v45  ;;  %v8704_v45 = vrot.slane %v1177_v23, %v7923_v54 }
 0x403   : > { %3226 = vmatprep.subr.bf16.mxu1 %v6483_v10  ;;  %v8707_v10 = vrot.slane %v1177_v23, %v7899_v50  ;;  %v1983_v50 = vsub.s32 4, %v7890_v47 }
 0x404   : > { %12118 = vst [vmem:[#allocation68_spill] sm:$0xff] %v8704_v45 }
 0x405   : > { %12119 = vst [vmem:[#allocation69_spill] sm:$0xff] %v8707_v10 }
 0x406   : > { %3227 = vmatpush1.bf16.msra.mxu1 %v6485_v17 }
 0x407   : > { %3228 = vmatprep.subr.bf16.mxu1 %v6486_v41 }
 0x40a   : > { %3229 = vmatpush1.bf16.msra.mxu1 %v6488_v58 }
 0x40b   : > { %3239 = vmatprep.subr.bf16.mxu1 %v6489_v3 }
 0x480   : > { %v2359_v17 = vpop.f32.mrb[40].mxu1  ;;  %v2400_v41 = vpop.f32.mrb[4].mxu0 }
 0x481   : > { %v2360_v58 = vadd.f32 %v2359_v17, %v8698_v11  ;;  %v2401_v3 = vadd.f32 %v2400_v41, %v8701_v55  ;;  %v2361_v4 = vpop.f32.mrb[41].mxu1  ;;  %v2402_v2 = vpop.f32.mrb[5].mxu0  ;;  %v1987_v17 = vsub.s32 5, %v7890_v47  ;;  %v1995_v41 = vsub.s32 7, %v7890_v47 }
 0x482   : > { %v2362_v37 = vadd.f32 %v2361_v4, %v8704_v45  ;;  %v2403_v25 = vadd.f32 %v2402_v2, %v8707_v10  ;;  %v2363_v48 = vpop.f32.mrb[42].mxu1  ;;  %v2404_v6 = vpop.f32.mrb[6].mxu0  ;;  %v8717_v55 = vrot.slane %v1177_v23, %v1983_v50  ;;  %v8719_v11 = vrot.slane %v1177_v23, %v1991_v24 }
 0x483   : > { %v2489_v38 = vmax.f32 %v2360_v58, %v2401_v3  ;;  %v2364_v56 = vpop.f32.mrb[43].mxu1  ;;  %v2405_v27 = vpop.f32.mrb[7].mxu0  ;;  %v8721_v4 = vrot.slane %v1177_v23, %v1987_v17  ;;  %v8723_v2 = vrot.slane %v1177_v23, %v1995_v41 }
 0x484   : > { %v2490_v16 = vmax.f32 %v2362_v37, %v2403_v25  ;;  %12120 = vst [vmem:[#allocation70_spill] sm:$0xff] %v8717_v55  ;;  %12121 = vst [vmem:[#allocation71_spill] sm:$0xff] %v8719_v11 }
 0x485   : > { %12122 = vst [vmem:[#allocation72_spill] sm:$0xff] %v8721_v4  ;;  %12123 = vst [vmem:[#allocation73_spill] sm:$0xff] %v8723_v2 }
 0x4a0   : > { %v2441_v6 = vpop.f32.mrb[44].mxu1  ;;  %v2482_v56 = vpop.f32.mrb[8].mxu0 }
 0x4a1   : > { %v2442_v27 = vadd.f32 %v2441_v6, %v8717_v55  ;;  %v2483_v48 = vadd.f32 %v2482_v56, %v8719_v11  ;;  %v2443_v10 = vpop.f32.mrb[45].mxu1  ;;  %v2484_v45 = vpop.f32.mrb[9].mxu0 }
 0x4a2   : > { %v2444_v19 = vadd.f32 %v2443_v10, %v8721_v4  ;;  %v2485_v47 = vadd.f32 %v2484_v45, %v8723_v2  ;;  %v2445_v50 = vpop.f32.mrb[46].mxu1  ;;  %v2486_v60 = vpop.f32.mrb[10].mxu0  ;;  %v9055_v2 = vld [vmem:[%s11860_s12 + $0xb0] ss:$8 sps:$4 sm:$0xff]  }
 0x4a3   : > { %v2491_v24 = vmax.f32 %v2442_v27, %v2483_v48  ;;  %v2446_v15 = vpop.f32.mrb[47].mxu1  ;;  %v2487_v17 = vpop.f32.mrb[11].mxu0 }
 0x4a4   : > { %v2492_v7 = vmax.f32 %v2444_v19, %v2485_v47 }
 0x4a5   : > { %v2493_v23 = vmax.f32 %v2489_v38, %v2491_v24 }
 0x4a6   : > { %v2494_v41 = vmax.f32 %v2490_v16, %v2492_v7 }
 0x4a7   : > { %v2495_v1 = vsub.f32 %v2360_v58, %v2493_v23  ;;  %v2501_v61 = vsub.f32 %v2401_v3, %v2493_v23  ;;  %v2507_v51 = vsub.f32 %v2442_v27, %v2493_v23  ;;  %v2513_v6 = vsub.f32 %v2483_v48, %v2493_v23 }
 0x4a8   : > { %v2496_v55 = vsub.f32 %v2362_v37, %v2494_v41  ;;  %v2502_v56 = vsub.f32 %v2403_v25, %v2494_v41  ;;  %v2508_v11 = vsub.f32 %v2444_v19, %v2494_v41  ;;  %v2514_v46 = vsub.f32 %v2485_v47, %v2494_v41 }
 0x4a9   : > { %v2497_v32 = vmul.f32 1.442695, %v2495_v1  ;;  %v2503_v10 = vmul.f32 1.442695, %v2501_v61  ;;  %v2509_v4 = vmul.f32 1.442695, %v2507_v51 }
 0x4aa   : > { %v2515_v45 = vmul.f32 1.442695, %v2513_v6  ;;  %v2499_v60 = vmul.f32 1.442695, %v2496_v55  ;;  %v2505_v15 = vmul.f32 1.442695, %v2502_v56 }
 0x4ab   : > { %6715 = vpow2.f32 %v2497_v32  ;;  %v2511_v38 = vmul.f32 1.442695, %v2508_v11  ;;  %v2517_v7 = vmul.f32 1.442695, %v2514_v46 }
 0x4ac   : > { %6717 = vpow2.f32 %v2503_v10 }
 0x4ad   : > { %6719 = vpow2.f32 %v2509_v4 }
 0x4ae   : > { %6721 = vpow2.f32 %v2515_v45 }
 0x4af   : > { %6723 = vpow2.f32 %v2499_v60 }
 0x4b0   : > { %6725 = vpow2.f32 %v2505_v15 }
 0x4b1   : > { %6727 = vpow2.f32 %v2511_v38 }
 0x4b2   : > { %6729 = vpow2.f32 %v2517_v7  ;;  %v6491_v7 = vld [vmem:[%s11858_s10 + $0x100] ss:$8 sps:$4 sm:$0xff]  }
 0x4b5   : > { %v6716_v16 = vpop.eup %6715 }
 0x4b6   : > { %v6718_v25 = vpop.eup %6717 }
 0x4b7   : > { %v6720_v19 = vpop.eup %6719  ;;  %v2519_v37 = vadd.f32 %v6718_v25, %v6716_v16 }
 0x4b8   : > { %v6722_v1 = vpop.eup %6721 }
 0x4b9   : > { %v6724_v61 = vpop.eup %6723  ;;  %v2521_v51 = vadd.f32 %v6720_v19, %v2519_v37  ;;  %v6494_v37 = vld [vmem:[%s11858_s10 + $0x110] ss:$8 sps:$4 sm:$0xff]  }
 0x4ba   : > { %v6726_v58 = vpop.eup %6725 }
 0x4bb   : > { %v2523_v32 = vadd.f32 %v6722_v1, %v2521_v51  ;;  %v2520_v55 = vadd.f32 %v6726_v58, %v6724_v61  ;;  %v6728_v3 = vpop.eup %6727  ;;  %v6498_v51 = vld [vmem:[%s11858_s10 + $0x134] ss:$8 sps:$4 sm:$0xff]  }
 0x4bc   : > { %v6730_v27 = vpop.eup %6729 }
 0x4bd   : > { %6731 = vrcp.f32 %v2523_v32  ;;  %v2522_v4 = vadd.f32 %v6728_v3, %v2520_v55  ;;  %v6501_v32 = vld [vmem:[%s11858_s10 + $0x144] ss:$8 sps:$4 sm:$0xff]   ;;  %v6503_v55 = vld [vmem:[%s11858_s10 + $0x140] ss:$8 sps:$4 sm:$0xff]  }
 0x4bf   : > { %v2524_v11 = vadd.f32 %v6730_v27, %v2522_v4  ;;  %v6506_v4 = vld [vmem:[%s11858_s10 + $0x150] ss:$8 sps:$4 sm:$0xff]  }
 0x4c1   : > { %6733 = vrcp.f32 %v2524_v11  ;;  %v6509_v11 = vld [vmem:[%s11858_s10 + $0x160] ss:$8 sps:$4 sm:$0xff]  }
 0x4c7   : > { %v6732_v48 = vpop.eup %6731 }
 0x4c8   : > { %v2527_v46 = vmul.f32 %v6732_v48, %v8250_v62  ;;  %v2529_v47 = vmul.f32 %v6732_v48, %v8252_v63  ;;  %v6510_v48 = vld [vmem:[%s11858_s10 + $0x174] ss:$8 sps:$4 sm:$0xff]  }
 0x4ca   : > { %v2531_v50 = vmul.f32 %v6716_v16, %v2527_v46  ;;  %v8731_v24 = vmul.f32 %v6718_v25, %v2527_v46  ;;  %v8733_v17 = vmul.f32 %v6720_v19, %v2529_v47  ;;  %v8735_v23 = vmul.f32 %v6722_v1, %v2529_v47  ;;  %v6492_v25 = vld [vmem:[%s11858_s10 + $0x114] ss:$8 sps:$4 sm:$0xff]   ;;  %v6495_v1 = vld [vmem:[%s11858_s10 + $0x124] ss:$8 sps:$4 sm:$0xff]   ;;  %v6512_v46 = vld [vmem:[%s11858_s10 + $0x170] ss:$8 sps:$4 sm:$0xff]  }
 0x4cb   : > { %v6734_v41 = vpop.eup %6733  ;;  %v6513_v47 = vld [vmem:[%s11858_s10 + $0x184] ss:$8 sps:$4 sm:$0xff]  }
 0x4cc   : > { %v2528_v6 = vmul.f32 %v6734_v41, %v8250_v62  ;;  %v2530_v56 = vmul.f32 %v6734_v41, %v8252_v63  ;;  %v2533_v16 = vpack.c.bf16 %v2531_v50, %v2531_v50  ;;  %v6515_v50 = vld [vmem:[%s11858_s10 + $0x180] ss:$8 sps:$4 sm:$0xff]   ;;  %v6516_v41 = vld [vmem:[%s11858_s10 + $0x194] ss:$8 sps:$4 sm:$0xff]  }
 0x4ce   : > { %v2532_v10 = vmul.f32 %v6724_v61, %v2528_v6  ;;  %v2536_v45 = vmul.f32 %v6726_v58, %v2528_v6  ;;  %v8739_v60 = vmul.f32 %v6728_v3, %v2530_v56  ;;  %v8741_v15 = vmul.f32 %v6730_v27, %v2530_v56  ;;  %v6497_v61 = vld [vmem:[%s11858_s10 + $0x120] ss:$8 sps:$4 sm:$0xff]   ;;  %v6500_v58 = vld [vmem:[%s11858_s10 + $0x130] ss:$8 sps:$4 sm:$0xff]   ;;  %v6504_v3 = vld [vmem:[%s11858_s10 + $0x154] ss:$8 sps:$4 sm:$0xff]  }
 0x4cf   : > { %v6507_v27 = vld [vmem:[%s11858_s10 + $0x164] ss:$8 sps:$4 sm:$0xff]   ;;  %v6518_v6 = vld [vmem:[%s11858_s10 + $0x190] ss:$8 sps:$4 sm:$0xff]  }
 0x4d0   : > { %v2534_v38 = vpack.c.bf16 %v2532_v10, %v2532_v10  ;;  %v2538_v19 = vpack.c.bf16 %v2536_v45, %v2536_v45  ;;  %v6519_v56 = vld [vmem:[%s11858_s10 + $0x1a4] ss:$8 sps:$4 sm:$0xff]   ;;  %v6521_v10 = vld [vmem:[%s11858_s10 + $0x1a0] ss:$8 sps:$4 sm:$0xff]   ;;  %v6522_v45 = vld [vmem:[%s11858_s10 + $0x1b4] ss:$8 sps:$4 sm:$0xff]  }
 0x4d2   : > { %3230 = vmatprep.mubr.bf16.mxu1 %v2534_v38  ;;  %v6524_v38 = vld [vmem:[%s11858_s10 + $0x1b0] ss:$8 sps:$4 sm:$0xff]  }
 0x4d3   : > { %3231 = vmatmul.mubr.bf16.vlgmr.msra.gmra.mrb[48].mxu1 %v2533_v16  ;;  %v6527_v16 = vld [vmem:[%s11858_s10 + $0x1c0] ss:$8 sps:$4 sm:$0xff]  }
 0x4d4   : > { %3240 = vmatpush1.bf16.msra.mxu1 %v6491_v7  ;;  %3271 = vmatprep.mubr.bf16.mxu1 %v2538_v19  ;;  %v6525_v7 = vld [vmem:[%s11858_s10 + $0x1c4] ss:$8 sps:$4 sm:$0xff]   ;;  %v6530_v19 = vld [vmem:[%s11858_s10 + $0x1d0] ss:$8 sps:$4 sm:$0xff]  }
 0x4d5   : > { %3241 = vmatprep.subr.bf16.mxu1 %v6492_v25  ;;  %v6528_v25 = vld [vmem:[%s11858_s10 + $0x1d4] ss:$8 sps:$4 sm:$0xff]  }
 0x4d8   : > { %3242 = vmatpush1.bf16.msra.mxu1 %v6494_v37  ;;  %v6531_v37 = vld [vmem:[%s11858_s10 + $0x1e4] ss:$8 sps:$4 sm:$0xff]  }
 0x4d9   : > { %3243 = vmatprep.subr.bf16.mxu1 %v6495_v1  ;;  %v6533_v1 = vld [vmem:[%s11858_s10 + $0x1e0] ss:$8 sps:$4 sm:$0xff]  }
 0x4dc   : > { %3244 = vmatpush1.bf16.msra.mxu1 %v6497_v61  ;;  %v6534_v61 = vld [vmem:[%s11858_s10 + $0x1f4] ss:$8 sps:$4 sm:$0xff]  }
 0x4dd   : > { %3245 = vmatprep.subr.bf16.mxu1 %v6498_v51  ;;  %v6536_v51 = vld [vmem:[%s11858_s10 + $0x1f0] ss:$8 sps:$4 sm:$0xff]  }
 0x4e0   : > { %3246 = vmatpush1.bf16.msra.mxu1 %v6500_v58  ;;  %v6537_v58 = vld [vmem:[%s11858_s10 + $0x204] ss:$8 sps:$4 sm:$0xff]  }
 0x4e1   : > { %3247 = vmatprep.subr.bf16.mxu1 %v6501_v32  ;;  %v6539_v32 = vld [vmem:[%s11858_s10 + $0x200] ss:$8 sps:$4 sm:$0xff]  }
 0x4e4   : > { %3248 = vmatpush1.bf16.msra.mxu1 %v6503_v55  ;;  %v2537_v55 = vpack.c.bf16 %v8731_v24, %v8731_v24  ;;  %v8862_v24 = vld [vmem:[%s11860_s12 + $0x14] ss:$8 sps:$4 sm:$0xff]  }
 0x4e5   : > { %3249 = vmatprep.subr.bf16.mxu1 %v6504_v3  ;;  %v6540_v3 = vld [vmem:[%s11858_s10 + $0x214] ss:$8 sps:$4 sm:$0xff]  }
 0x4e8   : > { %3250 = vmatpush1.bf16.msra.mxu1 %v6506_v4  ;;  %v2542_v4 = vpack.c.bf16 %v8739_v60, %v8739_v60  ;;  %v6542_v60 = vld [vmem:[%s11858_s10 + $0x210] ss:$8 sps:$4 sm:$0xff]  }
 0x4e9   : > { %3251 = vmatprep.subr.bf16.mxu1 %v6507_v27  ;;  %v8852_v27 = vld [vmem:[%s11860_s12 + $0x4] ss:$8 sps:$4 sm:$0xff]  }
 0x4ea   : > { %3537 = vmatprep.subr.bf16.mxu0 %v8852_v27 }
 0x4ec   : > { %3252 = vmatpush1.bf16.msra.mxu1 %v6509_v11  ;;  %v8857_v11 = vld [vmem:[%s11860_s12] ss:$8 sps:$4 sm:$0xff]  }
 0x4ed   : > { %3253 = vmatprep.subr.bf16.mxu1 %v6510_v48  ;;  %v6543_v48 = vld [vmem:[%s11858_s10 + $0x224] ss:$8 sps:$4 sm:$0xff]   ;;  %3538 = vmatpush1.bf16.msra.mxu0 %v8857_v11 }
 0x4ee   : > { %3539 = vmatprep.subr.bf16.mxu0 %v8862_v24 }
 0x4f0   : > { %3254 = vmatpush1.bf16.msra.mxu1 %v6512_v46  ;;  %v8875_v46 = vld [vmem:[%s11860_s12 + $0x10] ss:$8 sps:$4 sm:$0xff]  }
 0x4f1   : > { %3255 = vmatprep.subr.bf16.mxu1 %v6513_v47  ;;  %v8881_v47 = vld [vmem:[%s11860_s12 + $0x24] ss:$8 sps:$4 sm:$0xff]   ;;  %3540 = vmatpush1.bf16.msra.mxu0 %v8875_v46 }
 0x4f2   : > { %3541 = vmatprep.subr.bf16.mxu0 %v8881_v47 }
 0x4f4   : > { %3256 = vmatpush1.bf16.msra.mxu1 %v6515_v50  ;;  %v6545_v50 = vld [vmem:[%s11858_s10 + $0x220] ss:$8 sps:$4 sm:$0xff]  }
 0x4f5   : > { %3257 = vmatprep.subr.bf16.mxu1 %v6516_v41  ;;  %v6546_v41 = vld [vmem:[%s11858_s10 + $0x234] ss:$8 sps:$4 sm:$0xff]  }
 0x4f8   : > { %3258 = vmatpush1.bf16.msra.mxu1 %v6518_v6  ;;  %v8893_v6 = vld [vmem:[%s11860_s12 + $0x20] ss:$8 sps:$4 sm:$0xff]  }
 0x4f9   : > { %3259 = vmatprep.subr.bf16.mxu1 %v6519_v56  ;;  %v8899_v56 = vld [vmem:[%s11860_s12 + $0x34] ss:$8 sps:$4 sm:$0xff]   ;;  %3542 = vmatpush1.bf16.msra.mxu0 %v8893_v6 }
 0x4fa   : > { %3543 = vmatprep.subr.bf16.mxu0 %v8899_v56 }
 0x4fc   : > { %3260 = vmatpush1.bf16.msra.mxu1 %v6521_v10  ;;  %v6548_v10 = vld [vmem:[%s11858_s10 + $0x230] ss:$8 sps:$4 sm:$0xff]  }
 0x4fd   : > { %3261 = vmatprep.subr.bf16.mxu1 %v6522_v45  ;;  %v6549_v45 = vld [vmem:[%s11858_s10 + $0x244] ss:$8 sps:$4 sm:$0xff]  }
 0x500   : > { %3262 = vmatpush1.bf16.msra.mxu1 %v6524_v38  ;;  %v8911_v38 = vld [vmem:[%s11860_s12 + $0x30] ss:$8 sps:$4 sm:$0xff]  }
 0x501   : > { %3263 = vmatprep.subr.bf16.mxu1 %v6525_v7  ;;  %v8917_v7 = vld [vmem:[%s11860_s12 + $0x44] ss:$8 sps:$4 sm:$0xff]   ;;  %3544 = vmatpush1.bf16.msra.mxu0 %v8911_v38 }
 0x502   : > { %3545 = vmatprep.subr.bf16.mxu0 %v8917_v7 }
 0x504   : > { %3264 = vmatpush1.bf16.msra.mxu1 %v6527_v16  ;;  %v6551_v16 = vld [vmem:[%s11858_s10 + $0x240] ss:$8 sps:$4 sm:$0xff]  }
 0x505   : > { %3265 = vmatprep.subr.bf16.mxu1 %v6528_v25  ;;  %v6552_v25 = vld [vmem:[%s11858_s10 + $0x254] ss:$8 sps:$4 sm:$0xff]  }
 0x508   : > { %3266 = vmatpush1.bf16.msra.mxu1 %v6530_v19  ;;  %v8929_v19 = vld [vmem:[%s11860_s12 + $0x40] ss:$8 sps:$4 sm:$0xff]  }
 0x509   : > { %3267 = vmatprep.subr.bf16.mxu1 %v6531_v37  ;;  %v8935_v37 = vld [vmem:[%s11860_s12 + $0x54] ss:$8 sps:$4 sm:$0xff]   ;;  %3546 = vmatpush1.bf16.msra.mxu0 %v8929_v19 }
 0x50a   : > { %3547 = vmatprep.subr.bf16.mxu0 %v8935_v37 }
 0x50c   : > { %3268 = vmatpush1.bf16.msra.mxu1 %v6533_v1  ;;  %v6554_v1 = vld [vmem:[%s11858_s10 + $0x250] ss:$8 sps:$4 sm:$0xff]  }
 0x50d   : > { %3269 = vmatprep.subr.bf16.mxu1 %v6534_v61  ;;  %v6555_v61 = vld [vmem:[%s11858_s10 + $0x264] ss:$8 sps:$4 sm:$0xff]  }
 0x510   : > { %3270 = vmatpush1.bf16.msra.mxu1 %v6536_v51  ;;  %v8947_v51 = vld [vmem:[%s11860_s12 + $0x50] ss:$8 sps:$4 sm:$0xff]  }
 0x511   : > { %3280 = vmatprep.subr.bf16.mxu1 %v6537_v58  ;;  %v8953_v58 = vld [vmem:[%s11860_s12 + $0x64] ss:$8 sps:$4 sm:$0xff]   ;;  %3548 = vmatpush1.bf16.msra.mxu0 %v8947_v51 }
 0x512   : > { %3549 = vmatprep.subr.bf16.mxu0 %v8953_v58 }
 0x513   : > { %3272 = vmatmul.mubr.bf16.vlgmr.msra.gmra.mrb[48].mxu1 %v2537_v55  ;;  %v6558_v55 = vld [vmem:[%s11858_s10 + $0x274] ss:$8 sps:$4 sm:$0xff]  }
 0x514   : > { %3281 = vmatpush1.bf16.msra.mxu1 %v6539_v32  ;;  %3312 = vmatprep.mubr.bf16.mxu1 %v2542_v4  ;;  %v6557_v32 = vld [vmem:[%s11858_s10 + $0x260] ss:$8 sps:$4 sm:$0xff]   ;;  %v8971_v4 = vld [vmem:[%s11860_s12 + $0x74] ss:$8 sps:$4 sm:$0xff]  }
 0x515   : > { %3282 = vmatprep.subr.bf16.mxu1 %v6540_v3  ;;  %v8965_v3 = vld [vmem:[%s11860_s12 + $0x60] ss:$8 sps:$4 sm:$0xff]  }
 0x516   : > { %3550 = vmatpush1.bf16.msra.mxu0 %v8965_v3 }
 0x517   : > { %3551 = vmatprep.subr.bf16.mxu0 %v8971_v4 }
 0x518   : > { %3283 = vmatpush1.bf16.msra.mxu1 %v6542_v60  ;;  %v6560_v60 = vld [vmem:[%s11858_s10 + $0x270] ss:$8 sps:$4 sm:$0xff]  }
 0x519   : > { %3284 = vmatprep.subr.bf16.mxu1 %v6543_v48  ;;  %v6561_v48 = vld [vmem:[%s11858_s10 + $0x284] ss:$8 sps:$4 sm:$0xff]  }
 0x51c   : > { %3285 = vmatpush1.bf16.msra.mxu1 %v6545_v50  ;;  %v8983_v50 = vld [vmem:[%s11860_s12 + $0x70] ss:$8 sps:$4 sm:$0xff]  }
 0x51d   : > { %3286 = vmatprep.subr.bf16.mxu1 %v6546_v41  ;;  %v8989_v41 = vld [vmem:[%s11860_s12 + $0x84] ss:$8 sps:$4 sm:$0xff]   ;;  %3552 = vmatpush1.bf16.msra.mxu0 %v8983_v50 }
 0x51e   : > { %3553 = vmatprep.subr.bf16.mxu0 %v8989_v41 }
 0x520   : > { %3287 = vmatpush1.bf16.msra.mxu1 %v6548_v10  ;;  %v6563_v10 = vld [vmem:[%s11858_s10 + $0x280] ss:$8 sps:$4 sm:$0xff]  }
 0x521   : > { %3288 = vmatprep.subr.bf16.mxu1 %v6549_v45  ;;  %v6564_v45 = vld [vmem:[%s11858_s10 + $0x294] ss:$8 sps:$4 sm:$0xff]  }
 0x524   : > { %3289 = vmatpush1.bf16.msra.mxu1 %v6551_v16  ;;  %v9001_v16 = vld [vmem:[%s11860_s12 + $0x80] ss:$8 sps:$4 sm:$0xff]  }
 0x525   : > { %3290 = vmatprep.subr.bf16.mxu1 %v6552_v25  ;;  %v9007_v25 = vld [vmem:[%s11860_s12 + $0x94] ss:$8 sps:$4 sm:$0xff]   ;;  %3554 = vmatpush1.bf16.msra.mxu0 %v9001_v16 }
 0x526   : > { %3555 = vmatprep.subr.bf16.mxu0 %v9007_v25 }
 0x528   : > { %3291 = vmatpush1.bf16.msra.mxu1 %v6554_v1  ;;  %v6566_v1 = vld [vmem:[%s11858_s10 + $0x290] ss:$8 sps:$4 sm:$0xff]  }
 0x529   : > { %3292 = vmatprep.subr.bf16.mxu1 %v6555_v61  ;;  %v6567_v61 = vld [vmem:[%s11858_s10 + $0x2a4] ss:$8 sps:$4 sm:$0xff]  }
 0x52c   : > { %3293 = vmatpush1.bf16.msra.mxu1 %v6557_v32  ;;  %v9019_v32 = vld [vmem:[%s11860_s12 + $0x90] ss:$8 sps:$4 sm:$0xff]  }
 0x52d   : > { %3294 = vmatprep.subr.bf16.mxu1 %v6558_v55  ;;  %v9025_v55 = vld [vmem:[%s11860_s12 + $0xa4] ss:$8 sps:$4 sm:$0xff]   ;;  %3556 = vmatpush1.bf16.msra.mxu0 %v9019_v32 }
 0x52e   : > { %3557 = vmatprep.subr.bf16.mxu0 %v9025_v55 }
 0x530   : > { %3295 = vmatpush1.bf16.msra.mxu1 %v6560_v60  ;;  %v6569_v60 = vld [vmem:[%s11858_s10 + $0x2a0] ss:$8 sps:$4 sm:$0xff]  }
 0x531   : > { %3296 = vmatprep.subr.bf16.mxu1 %v6561_v48  ;;  %v6570_v48 = vld [vmem:[%s11858_s10 + $0x2b4] ss:$8 sps:$4 sm:$0xff]  }
 0x534   : > { %3297 = vmatpush1.bf16.msra.mxu1 %v6563_v10  ;;  %v9037_v10 = vld [vmem:[%s11860_s12 + $0xa0] ss:$8 sps:$4 sm:$0xff]  }
 0x535   : > { %3298 = vmatprep.subr.bf16.mxu1 %v6564_v45  ;;  %v9043_v45 = vld [vmem:[%s11860_s12 + $0xb4] ss:$8 sps:$4 sm:$0xff]   ;;  %3558 = vmatpush1.bf16.msra.mxu0 %v9037_v10 }
 0x536   : > { %3559 = vmatprep.subr.bf16.mxu0 %v9043_v45 }
 0x538   : > { %3299 = vmatpush1.bf16.msra.mxu1 %v6566_v1  ;;  %v6572_v1 = vld [vmem:[%s11858_s10 + $0x2b0] ss:$8 sps:$4 sm:$0xff]  }
 0x539   : > { %3300 = vmatprep.subr.bf16.mxu1 %v6567_v61  ;;  %v6573_v61 = vld [vmem:[%s11858_s10 + $0x2c4] ss:$8 sps:$4 sm:$0xff]   ;;  %3560 = vmatpush1.bf16.msra.mxu0 %v9055_v2 }
 0x53c   : > { %3301 = vmatpush1.bf16.msra.mxu1 %v6569_v60  ;;  %v6575_v60 = vld [vmem:[%s11858_s10 + $0x2c0] ss:$8 sps:$4 sm:$0xff]  }
 0x53d   : > { %3302 = vmatprep.subr.bf16.mxu1 %v6570_v48  ;;  %v6576_v48 = vld [vmem:[%s11858_s10 + $0x2d4] ss:$8 sps:$4 sm:$0xff]  }
 0x540   : > { %3303 = vmatpush1.bf16.msra.mxu1 %v6572_v1  ;;  %v6579_v1 = vld [vmem:[%s11858_s10 + $0x2e4] ss:$8 sps:$4 sm:$0xff]  }
 0x541   : > { %3304 = vmatprep.subr.bf16.mxu1 %v6573_v61  ;;  %v6581_v61 = vld [vmem:[%s11858_s10 + $0x2e0] ss:$8 sps:$4 sm:$0xff]  }
 0x544   : > { %3305 = vmatpush1.bf16.msra.mxu1 %v6575_v60  ;;  %v6584_v60 = vld [vmem:[%s11858_s10 + $0x2f0] ss:$8 sps:$4 sm:$0xff]  }
 0x545   : > { %3306 = vmatprep.subr.bf16.mxu1 %v6576_v48  ;;  %v6585_v48 = vld [vmem:[%s11858_s10 + $0x304] ss:$8 sps:$4 sm:$0xff]  }
 0x548   : > { %3307 = vmatpush1.bf16.msra.mxu1 %v6578_v29  ;;  %v6587_v29 = vld [vmem:[%s11858_s10 + $0x300] ss:$8 sps:$4 sm:$0xff]  }
 0x549   : > { %3308 = vmatprep.subr.bf16.mxu1 %v6579_v1  ;;  %v2541_v1 = vpack.c.bf16 %v8733_v17, %v8733_v17  ;;  %v6591_v17 = vld [vmem:[%s11858_s10 + $0x324] ss:$8 sps:$4 sm:$0xff]  }
 0x54c   : > { %3309 = vmatpush1.bf16.msra.mxu1 %v6581_v61  ;;  %v6588_v61 = vld [vmem:[%s11858_s10 + $0x314] ss:$8 sps:$4 sm:$0xff]  }
 0x54d   : > { %3310 = vmatprep.subr.bf16.mxu1 %v6582_v22  ;;  %v2546_v22 = vpack.c.bf16 %v8741_v15, %v8741_v15  ;;  %v6594_v15 = vld [vmem:[%s11858_s10 + $0x334] ss:$8 sps:$4 sm:$0xff]  }
 0x550   : > { %3311 = vmatpush1.bf16.msra.mxu1 %v6584_v60  ;;  %v6590_v60 = vld [vmem:[%s11858_s10 + $0x310] ss:$8 sps:$4 sm:$0xff]  }
 0x551   : > { %3321 = vmatprep.subr.bf16.mxu1 %v6585_v48  ;;  %v6593_v48 = vld [vmem:[%s11858_s10 + $0x320] ss:$8 sps:$4 sm:$0xff]  }
 0x553   : > { %3313 = vmatmul.mubr.bf16.vlgmr.msra.gmra.mrb[48].mxu1 %v2541_v1  ;;  %v6597_v1 = vld [vmem:[%s11858_s10 + $0x344] ss:$8 sps:$4 sm:$0xff]  }
 0x554   : > { %3322 = vmatpush1.bf16.msra.mxu1 %v6587_v29  ;;  %3353 = vmatprep.mubr.bf16.mxu1 %v2546_v22  ;;  %v6596_v29 = vld [vmem:[%s11858_s10 + $0x330] ss:$8 sps:$4 sm:$0xff]   ;;  %v6600_v22 = vld [vmem:[%s11858_s10 + $0x354] ss:$8 sps:$4 sm:$0xff]  }
 0x555   : > { %3323 = vmatprep.subr.bf16.mxu1 %v6588_v61  ;;  %v6599_v61 = vld [vmem:[%s11858_s10 + $0x340] ss:$8 sps:$4 sm:$0xff]  }
 0x558   : > { %3324 = vmatpush1.bf16.msra.mxu1 %v6590_v60  ;;  %v6602_v60 = vld [vmem:[%s11858_s10 + $0x350] ss:$8 sps:$4 sm:$0xff]  }
 0x559   : > { %3325 = vmatprep.subr.bf16.mxu1 %v6591_v17  ;;  %v6603_v17 = vld [vmem:[%s11858_s10 + $0x364] ss:$8 sps:$4 sm:$0xff]  }
 0x55c   : > { %3326 = vmatpush1.bf16.msra.mxu1 %v6593_v48  ;;  %v6605_v48 = vld [vmem:[%s11858_s10 + $0x360] ss:$8 sps:$4 sm:$0xff]  }
 0x55d   : > { %3327 = vmatprep.subr.bf16.mxu1 %v6594_v15  ;;  %v6606_v15 = vld [vmem:[%s11858_s10 + $0x374] ss:$8 sps:$4 sm:$0xff]  }
 0x560   : > { %3328 = vmatpush1.bf16.msra.mxu1 %v6596_v29  ;;  %v6608_v29 = vld [vmem:[%s11858_s10 + $0x370] ss:$8 sps:$4 sm:$0xff]  }
 0x561   : > { %3329 = vmatprep.subr.bf16.mxu1 %v6597_v1  ;;  %v6609_v1 = vld [vmem:[%s11858_s10 + $0x384] ss:$8 sps:$4 sm:$0xff]  }
 0x564   : > { %3330 = vmatpush1.bf16.msra.mxu1 %v6599_v61  ;;  %v6611_v61 = vld [vmem:[%s11858_s10 + $0x380] ss:$8 sps:$4 sm:$0xff]  }
 0x565   : > { %3331 = vmatprep.subr.bf16.mxu1 %v6600_v22  ;;  %v6612_v22 = vld [vmem:[%s11858_s10 + $0x394] ss:$8 sps:$4 sm:$0xff]  }
 0x568   : > { %3332 = vmatpush1.bf16.msra.mxu1 %v6602_v60  ;;  %v6614_v60 = vld [vmem:[%s11858_s10 + $0x390] ss:$8 sps:$4 sm:$0xff]  }
 0x569   : > { %3333 = vmatprep.subr.bf16.mxu1 %v6603_v17  ;;  %v6615_v17 = vld [vmem:[%s11858_s10 + $0x3a4] ss:$8 sps:$4 sm:$0xff]  }
 0x56c   : > { %3334 = vmatpush1.bf16.msra.mxu1 %v6605_v48  ;;  %v6617_v48 = vld [vmem:[%s11858_s10 + $0x3a0] ss:$8 sps:$4 sm:$0xff]  }
 0x56d   : > { %3335 = vmatprep.subr.bf16.mxu1 %v6606_v15  ;;  %v6618_v15 = vld [vmem:[%s11858_s10 + $0x3b4] ss:$8 sps:$4 sm:$0xff]  }
 0x570   : > { %3336 = vmatpush1.bf16.msra.mxu1 %v6608_v29  ;;  %v6620_v29 = vld [vmem:[%s11858_s10 + $0x3b0] ss:$8 sps:$4 sm:$0xff]  }
 0x571   : > { %3337 = vmatprep.subr.bf16.mxu1 %v6609_v1  ;;  %v6621_v1 = vld [vmem:[%s11858_s10 + $0x3c4] ss:$8 sps:$4 sm:$0xff]  }
 0x574   : > { %3338 = vmatpush1.bf16.msra.mxu1 %v6611_v61  ;;  %v6623_v61 = vld [vmem:[%s11858_s10 + $0x3c0] ss:$8 sps:$4 sm:$0xff]  }
 0x575   : > { %3339 = vmatprep.subr.bf16.mxu1 %v6612_v22  ;;  %v6624_v22 = vld [vmem:[%s11858_s10 + $0x3d4] ss:$8 sps:$4 sm:$0xff]  }
 0x578   : > { %3340 = vmatpush1.bf16.msra.mxu1 %v6614_v60  ;;  %v6626_v60 = vld [vmem:[%s11858_s10 + $0x3d0] ss:$8 sps:$4 sm:$0xff]  }
 0x579   : > { %3341 = vmatprep.subr.bf16.mxu1 %v6615_v17  ;;  %v6627_v17 = vld [vmem:[%s11858_s10 + $0x3e4] ss:$8 sps:$4 sm:$0xff]  }
 0x57c   : > { %3342 = vmatpush1.bf16.msra.mxu1 %v6617_v48  ;;  %v6629_v48 = vld [vmem:[%s11858_s10 + $0x3e0] ss:$8 sps:$4 sm:$0xff]  }
 0x57d   : > { %3343 = vmatprep.subr.bf16.mxu1 %v6618_v15  ;;  %v6630_v15 = vld [vmem:[%s11858_s10 + $0x3f4] ss:$8 sps:$4 sm:$0xff]  }
 0x580   : > { %3344 = vmatpush1.bf16.msra.mxu1 %v6620_v29  ;;  %v6632_v29 = vld [vmem:[%s11858_s10 + $0x3f0] ss:$8 sps:$4 sm:$0xff]  }
 0x581   : > { %3345 = vmatprep.subr.bf16.mxu1 %v6621_v1  ;;  %v2545_v1 = vpack.c.bf16 %v8735_v23, %v8735_v23  ;;  %v6916_v23 = vld [vmem:[%s11853_s5 + $0x28] ss:$16 sps:$4 sm:$0xff]  }
 0x584   : > { %3346 = vmatpush1.bf16.msra.mxu1 %v6623_v61  ;;  %v9185_v61 = vld [vmem:[%s11853_s5 + $0xc] ss:$16 sps:$4 sm:$0xff]  }
 0x585   : > { %3347 = vmatprep.subr.bf16.mxu1 %v6624_v22  ;;  %v6914_v22 = vld [vmem:[%s11853_s5 + $0x8] ss:$16 sps:$4 sm:$0xff]  }
 0x588   : > { %3348 = vmatpush1.bf16.msra.mxu1 %v6626_v60  ;;  %v6915_v60 = vld [vmem:[%s11853_s5 + $0x2c] ss:$16 sps:$4 sm:$0xff]  }
 0x589   : > { %3349 = vmatprep.subr.bf16.mxu1 %v6627_v17  ;;  %v6917_v17 = vld [vmem:[%s11853_s5 + $0x4c] ss:$16 sps:$4 sm:$0xff]  }
 0x58c   : > { %3350 = vmatpush1.bf16.msra.mxu1 %v6629_v48  ;;  %v6918_v48 = vld [vmem:[%s11853_s5 + $0x48] ss:$16 sps:$4 sm:$0xff]  }
 0x58d   : > { %3351 = vmatprep.subr.bf16.mxu1 %v6630_v15  ;;  %v6919_v15 = vld [vmem:[%s11853_s5 + $0x6c] ss:$16 sps:$4 sm:$0xff]  }
 0x590   : > { %3352 = vmatpush1.bf16.msra.mxu1 %v6632_v29  ;;  %v6920_v29 = vld [vmem:[%s11853_s5 + $0x68] ss:$16 sps:$4 sm:$0xff]  }
 0x591   : > { %3625 = vmatprep.subr.bf16.mxu1 %v9185_v61 }
 0x593   : > { %3354 = vmatmul.mubr.bf16.vlgmr.msra.gmra.mrb[48].mxu1 %v2545_v1  ;;  %v6921_v1 = vld [vmem:[%s11853_s5 + $0x8c] ss:$16 sps:$4 sm:$0xff]  }
 0x594   : > { %3626 = vmatpush1.bf16.msra.mxu1 %v6914_v22  ;;  %v6922_v22 = vld [vmem:[%s11853_s5 + $0x88] ss:$16 sps:$4 sm:$0xff]  }
 0x595   : > { %3627 = vmatprep.subr.bf16.mxu1 %v6915_v60  ;;  %v6923_v60 = vld [vmem:[%s11853_s5 + $0xac] ss:$16 sps:$4 sm:$0xff]  }
 0x598   : > { %3628 = vmatpush1.bf16.msra.mxu1 %v6916_v23  ;;  %v6924_v23 = vld [vmem:[%s11853_s5 + $0xa8] ss:$16 sps:$4 sm:$0xff]  }
 0x599   : > { %3629 = vmatprep.subr.bf16.mxu1 %v6917_v17  ;;  %v6925_v17 = vld [vmem:[%s11853_s5 + $0xcc] ss:$16 sps:$4 sm:$0xff]  }
 0x59c   : > { %3630 = vmatpush1.bf16.msra.mxu1 %v6918_v48  ;;  %v6926_v48 = vld [vmem:[%s11853_s5 + $0xc8] ss:$16 sps:$4 sm:$0xff]  }
 0x59d   : > { %3631 = vmatprep.subr.bf16.mxu1 %v6919_v15  ;;  %v6927_v15 = vld [vmem:[%s11853_s5 + $0xec] ss:$16 sps:$4 sm:$0xff]  }
 0x5a0   : > { %3632 = vmatpush1.bf16.msra.mxu1 %v6920_v29  ;;  %v6928_v29 = vld [vmem:[%s11853_s5 + $0xe8] ss:$16 sps:$4 sm:$0xff]  }
 0x5a1   : > { %3633 = vmatprep.subr.bf16.mxu1 %v6921_v1  ;;  %v6929_v1 = vld [vmem:[%s11853_s5 + $0x10c] ss:$16 sps:$4 sm:$0xff]  }
 0x5a4   : > { %3634 = vmatpush1.bf16.msra.mxu1 %v6922_v22  ;;  %v6930_v22 = vld [vmem:[%s11853_s5 + $0x108] ss:$16 sps:$4 sm:$0xff]  }
 0x5a5   : > { %3635 = vmatprep.subr.bf16.mxu1 %v6923_v60  ;;  %v6931_v60 = vld [vmem:[%s11853_s5 + $0x12c] ss:$16 sps:$4 sm:$0xff]  }
 0x5a8   : > { %3636 = vmatpush1.bf16.msra.mxu1 %v6924_v23  ;;  %v6932_v23 = vld [vmem:[%s11853_s5 + $0x128] ss:$16 sps:$4 sm:$0xff]  }
 0x5a9   : > { %3637 = vmatprep.subr.bf16.mxu1 %v6925_v17  ;;  %v6933_v17 = vld [vmem:[%s11853_s5 + $0x14c] ss:$16 sps:$4 sm:$0xff]  }
 0x5ac   : > { %3638 = vmatpush1.bf16.msra.mxu1 %v6926_v48  ;;  %v6934_v48 = vld [vmem:[%s11853_s5 + $0x148] ss:$16 sps:$4 sm:$0xff]  }
 0x5ad   : > { %3639 = vmatprep.subr.bf16.mxu1 %v6927_v15  ;;  %v6935_v15 = vld [vmem:[%s11853_s5 + $0x16c] ss:$16 sps:$4 sm:$0xff]  }
 0x5b0   : > { %3640 = vmatpush1.bf16.msra.mxu1 %v6928_v29  ;;  %v6936_v29 = vld [vmem:[%s11853_s5 + $0x168] ss:$16 sps:$4 sm:$0xff]  }
 0x5b1   : > { %3641 = vmatprep.subr.bf16.mxu1 %v6929_v1  ;;  %v6937_v1 = vld [vmem:[%s11853_s5 + $0x18c] ss:$16 sps:$4 sm:$0xff]  }
 0x5b4   : > { %3642 = vmatpush1.bf16.msra.mxu1 %v6930_v22  ;;  %v6938_v22 = vld [vmem:[%s11853_s5 + $0x188] ss:$16 sps:$4 sm:$0xff]  }
 0x5b5   : > { %3643 = vmatprep.subr.bf16.mxu1 %v6931_v60  ;;  %v6939_v60 = vld [vmem:[%s11853_s5 + $0x1ac] ss:$16 sps:$4 sm:$0xff]  }
 0x5b8   : > { %3644 = vmatpush1.bf16.msra.mxu1 %v6932_v23  ;;  %v6940_v23 = vld [vmem:[%s11853_s5 + $0x1a8] ss:$16 sps:$4 sm:$0xff]  }
 0x5b9   : > { %3645 = vmatprep.subr.bf16.mxu1 %v6933_v17  ;;  %v6941_v17 = vld [vmem:[%s11853_s5 + $0x1cc] ss:$16 sps:$4 sm:$0xff]  }
 0x5bc   : > { %3646 = vmatpush1.bf16.msra.mxu1 %v6934_v48  ;;  %v6942_v48 = vld [vmem:[%s11853_s5 + $0x1c8] ss:$16 sps:$4 sm:$0xff]  }
 0x5bd   : > { %3647 = vmatprep.subr.bf16.mxu1 %v6935_v15  ;;  %v6943_v15 = vld [vmem:[%s11853_s5 + $0x1ec] ss:$16 sps:$4 sm:$0xff]  }
 0x5c0   : > { %3648 = vmatpush1.bf16.msra.mxu1 %v6936_v29  ;;  %v6944_v29 = vld [vmem:[%s11853_s5 + $0x1e8] ss:$16 sps:$4 sm:$0xff]  }
 0x5c1   : > { %3649 = vmatprep.subr.bf16.mxu1 %v6937_v1  ;;  %v9285_v1 = vld [vmem:[%s11860_s12 + $0xc4] ss:$8 sps:$4 sm:$0xff]  }
 0x5c2   : > { %3561 = vmatprep.subr.bf16.mxu0 %v9285_v1 }
 0x5c4   : > { %3650 = vmatpush1.bf16.msra.mxu1 %v6938_v22  ;;  %v9290_v22 = vld [vmem:[%s11860_s12 + $0xc0] ss:$8 sps:$4 sm:$0xff]  }
 0x5c5   : > { %3651 = vmatprep.subr.bf16.mxu1 %v6939_v60  ;;  %3562 = vmatpush1.bf16.msra.mxu0 %v9290_v22  ;;  %v9297_v60 = vld [vmem:[%s11860_s12 + $0xd4] ss:$8 sps:$4 sm:$0xff]  }
 0x5c6   : > { %3563 = vmatprep.subr.bf16.mxu0 %v9297_v60 }
 0x5c8   : > { %3652 = vmatpush1.bf16.msra.mxu1 %v6940_v23  ;;  %v9309_v23 = vld [vmem:[%s11860_s12 + $0xe4] ss:$8 sps:$4 sm:$0xff]  }
 0x5c9   : > { %3653 = vmatprep.subr.bf16.mxu1 %v6941_v17  ;;  %v9314_v17 = vld [vmem:[%s11860_s12 + $0xe0] ss:$8 sps:$4 sm:$0xff]  }
 0x5cc   : > { %3654 = vmatpush1.bf16.msra.mxu1 %v6942_v48  ;;  %v9321_v48 = vld [vmem:[%s11860_s12 + $0xf4] ss:$8 sps:$4 sm:$0xff]  }
 0x5cd   : > { %3655 = vmatprep.subr.bf16.mxu1 %v6943_v15  ;;  %v9326_v15 = vld [vmem:[%s11860_s12 + $0xf0] ss:$8 sps:$4 sm:$0xff]  }
 0x5d0   : > { %3656 = vmatpush1.bf16.msra.mxu1 %v6944_v29  ;;  %v9333_v29 = vld [vmem:[%s11853_s5 + $0x4] ss:$16 sps:$4 sm:$0xff]  }
 0x5d1   : > { %4167 = vmatprep.subr.bf16.mxu1 %v8852_v27  ;;  %v9302_v27 = vld [vmem:[%s11860_s12 + $0xd0] ss:$8 sps:$4 sm:$0xff]   ;;  %12124 = vst [vmem:[#allocation74_spill] sm:$0xff] %v9333_v29 }
 0x5d2   : > { %3564 = vmatpush1.bf16.msra.mxu0 %v9302_v27 }
 0x5d3   : > { %3565 = vmatprep.subr.bf16.mxu0 %v9309_v23 }
 0x5d6   : > { %3566 = vmatpush1.bf16.msra.mxu0 %v9314_v17 }
 0x5d7   : > { %3567 = vmatprep.subr.bf16.mxu0 %v9321_v48 }
 0x5da   : > { %3568 = vmatpush1.bf16.msra.mxu0 %v9326_v15 }
 0x5db   : > { %3582 = vmatprep.subr.bf16.mxu0 %v9333_v29 }
 0x666   : > { %v3355_v12 = vpop.f32.mrb[48].mxu1 }
 0x667   : > { %v6150_v9 = vadd.f32 %v3355_v12, %v9340_v14  ;;  %v3357_v8 = vpop.f32.mrb[49].mxu1  ;;  %v9386_v12 = vld [vmem:[%s11853_s5 + $0x60] ss:$16 sps:$4 sm:$0xff]  }
 0x668   : > { %v6151_v5 = vadd.f32 %v3357_v8, %v9343_v13  ;;  %v3359_v34 = vpop.f32.mrb[50].mxu1  ;;  %v9374_v8 = vld [vmem:[%s11853_s5 + $0x40] ss:$16 sps:$4 sm:$0xff]   ;;  %12131 = vst [vmem:[#allocation81_spill] sm:$0xff] %v9386_v12  ;;  %v9416_v13 = vld [vmem:[%s11853_s5 + $0xc4] ss:$16 sps:$4 sm:$0xff]  }
 0x669   : > { %6735 = vtanh.f32 %v6150_v9  ;;  %v3360_v33 = vpop.f32.mrb[51].mxu1  ;;  %v9356_v34 = vld [vmem:[%s11853_s5 + $0x24] ss:$16 sps:$4 sm:$0xff]   ;;  %12129 = vst [vmem:[#allocation79_spill] sm:$0xff] %v9374_v8  ;;  %12136 = vst [vmem:[#allocation86_spill] sm:$0xff] %v9416_v13 }
 0x66a   : > { %6737 = vtanh.f32 %v6151_v5  ;;  %v9362_v33 = vld [vmem:[%s11853_s5 + $0x20] ss:$16 sps:$4 sm:$0xff]   ;;  %v9368_v5 = vld [vmem:[%s11853_s5 + $0x44] ss:$16 sps:$4 sm:$0xff]  }
 0x66b   : > { %12127 = vst [vmem:[#allocation77_spill] sm:$0xff] %v9362_v33  ;;  %12128 = vst [vmem:[#allocation78_spill] sm:$0xff] %v9368_v5  ;;  %v9380_v9 = vld [vmem:[%s11853_s5 + $0x64] ss:$16 sps:$4 sm:$0xff]   ;;  %v9422_v14 = vld [vmem:[%s11853_s5 + $0xc0] ss:$16 sps:$4 sm:$0xff]  }
 0x66c   : > { %12130 = vst [vmem:[#allocation80_spill] sm:$0xff] %v9380_v9  ;;  %12137 = vst [vmem:[#allocation87_spill] sm:$0xff] %v9422_v14 }
 0x673   : > { %v6736_v29 = vpop.eup %6735 }
 0x674   : > { %v6738_v0 = vpop.eup %6737  ;;  %v3364_v49 = vpack.c.bf16 %v6736_v29, %v6736_v29  ;;  %v9410_v29 = vld [vmem:[%s11853_s5 + $0xa0] ss:$16 sps:$4 sm:$0xff]  }
 0x675   : > { %v3365_v59 = vpack.c.bf16 %v6738_v0, %v6738_v0  ;;  %v9404_v0 = vld [vmem:[%s11853_s5 + $0xa4] ss:$16 sps:$4 sm:$0xff]   ;;  %12135 = vst [vmem:[#allocation85_spill] sm:$0xff] %v9410_v29 }
 0x676   : > { %12134 = vst [vmem:[#allocation84_spill] sm:$0xff] %v9404_v0 }
 0x677   : > { %3569 = vmatprep.mubr.bf16.mxu0 %v3365_v59  ;;  %v9398_v59 = vld [vmem:[%s11853_s5 + $0x80] ss:$16 sps:$4 sm:$0xff]  }
 0x678   : > { %3570 = vmatmul.mubr.bf16.vlgmr.msra.gmra.mrb[12].mxu0 %v3364_v49  ;;  %v9392_v49 = vld [vmem:[%s11853_s5 + $0x84] ss:$16 sps:$4 sm:$0xff]   ;;  %12133 = vst [vmem:[#allocation83_spill] sm:$0xff] %v9398_v59 }
 0x679   : > { %3583 = vmatpush1.bf16.msra.mxu0 %v9350_v20  ;;  %12132 = vst [vmem:[#allocation82_spill] sm:$0xff] %v9392_v49 }
 0x67a   : > { %3584 = vmatprep.subr.bf16.mxu0 %v9356_v34 }
 0x67d   : > { %3585 = vmatpush1.bf16.msra.mxu0 %v9362_v33  ;;  %v3580_v33 = vpack.c.bf16 %v8252_v63, %v8250_v62  ;;  %v6980_v62 = vld [vmem:[%s11854_s6 + $0x8] sm:$0xff]   ;;  %v6981_v63 = vld [vmem:[%s11854_s6 + $0x50] sm:$0xff]  }
 0x67e   : > { %3586 = vmatprep.subr.bf16.mxu0 %v9368_v5 }
 0x681   : > { %3587 = vmatpush1.bf16.msra.mxu0 %v9374_v8 }
 0x682   : > { %3588 = vmatprep.subr.bf16.mxu0 %v9380_v9 }
 0x685   : > { %3589 = vmatpush1.bf16.msra.mxu0 %v9386_v12 }
 0x686   : > { %3590 = vmatprep.subr.bf16.mxu0 %v9392_v49 }
 0x689   : > { %3591 = vmatpush1.bf16.msra.mxu0 %v9398_v59 }
 0x68a   : > { %3592 = vmatprep.subr.bf16.mxu0 %v9404_v0  ;;  %v9428_v0 = vld [vmem:[%s11853_s5 + $0xe4] ss:$16 sps:$4 sm:$0xff]  }
 0x68b   : > { %12138 = vst [vmem:[#allocation88_spill] sm:$0xff] %v9428_v0 }
 0x68d   : > { %3593 = vmatpush1.bf16.msra.mxu0 %v9410_v29  ;;  %v9434_v29 = vld [vmem:[%s11853_s5 + $0xe0] ss:$16 sps:$4 sm:$0xff]  }
 0x68e   : > { %3594 = vmatprep.subr.bf16.mxu0 %v9416_v13  ;;  %12139 = vst [vmem:[#allocation89_spill] sm:$0xff] %v9434_v29  ;;  %v9440_v13 = vld [vmem:[%s11853_s5 + $0x104] ss:$16 sps:$4 sm:$0xff]  }
 0x68f   : > { %12140 = vst [vmem:[#allocation90_spill] sm:$0xff] %v9440_v13 }
 0x691   : > { %3595 = vmatpush1.bf16.msra.mxu0 %v9422_v14  ;;  %v9446_v14 = vld [vmem:[%s11853_s5 + $0x100] ss:$16 sps:$4 sm:$0xff]  }
 0x692   : > { %3596 = vmatprep.subr.bf16.mxu0 %v9428_v0  ;;  %12141 = vst [vmem:[#allocation91_spill] sm:$0xff] %v9446_v14  ;;  %v9452_v0 = vld [vmem:[%s11853_s5 + $0x124] ss:$16 sps:$4 sm:$0xff]  }
 0x693   : > { %12142 = vst [vmem:[#allocation92_spill] sm:$0xff] %v9452_v0 }
 0x695   : > { %3597 = vmatpush1.bf16.msra.mxu0 %v9434_v29  ;;  %v9458_v29 = vld [vmem:[%s11853_s5 + $0x120] ss:$16 sps:$4 sm:$0xff]  }
 0x696   : > { %3598 = vmatprep.subr.bf16.mxu0 %v9440_v13  ;;  %12143 = vst [vmem:[#allocation93_spill] sm:$0xff] %v9458_v29  ;;  %v9464_v13 = vld [vmem:[%s11853_s5 + $0x144] ss:$16 sps:$4 sm:$0xff]  }
 0x697   : > { %12144 = vst [vmem:[#allocation94_spill] sm:$0xff] %v9464_v13 }
 0x699   : > { %3599 = vmatpush1.bf16.msra.mxu0 %v9446_v14  ;;  %v9470_v14 = vld [vmem:[%s11853_s5 + $0x140] ss:$16 sps:$4 sm:$0xff]  }
 0x69a   : > { %3600 = vmatprep.subr.bf16.mxu0 %v9452_v0  ;;  %12145 = vst [vmem:[#allocation95_spill] sm:$0xff] %v9470_v14  ;;  %v9476_v0 = vld [vmem:[%s11853_s5 + $0x164] ss:$16 sps:$4 sm:$0xff]  }
 0x69b   : > { %12146 = vst [vmem:[#allocation96_spill] sm:$0xff] %v9476_v0 }
 0x69d   : > { %3601 = vmatpush1.bf16.msra.mxu0 %v9458_v29  ;;  %v9482_v29 = vld [vmem:[%s11853_s5 + $0x160] ss:$16 sps:$4 sm:$0xff]  }
 0x69e   : > { %3602 = vmatprep.subr.bf16.mxu0 %v9464_v13  ;;  %12147 = vst [vmem:[#allocation97_spill] sm:$0xff] %v9482_v29  ;;  %v9488_v13 = vld [vmem:[%s11853_s5 + $0x184] ss:$16 sps:$4 sm:$0xff]  }
 0x69f   : > { %12148 = vst [vmem:[#allocation98_spill] sm:$0xff] %v9488_v13 }
 0x6a1   : > { %3603 = vmatpush1.bf16.msra.mxu0 %v9470_v14  ;;  %v9494_v14 = vld [vmem:[%s11853_s5 + $0x180] ss:$16 sps:$4 sm:$0xff]  }
 0x6a2   : > { %3604 = vmatprep.subr.bf16.mxu0 %v9476_v0  ;;  %12149 = vst [vmem:[#allocation99_spill] sm:$0xff] %v9494_v14  ;;  %v9500_v0 = vld [vmem:[%s11853_s5 + $0x1a4] ss:$16 sps:$4 sm:$0xff]  }
 0x6a3   : > { %12150 = vst [vmem:[#allocation100_spill] sm:$0xff] %v9500_v0 }
 0x6a5   : > { %3605 = vmatpush1.bf16.msra.mxu0 %v9482_v29  ;;  %v9506_v29 = vld [vmem:[%s11853_s5 + $0x1a0] ss:$16 sps:$4 sm:$0xff]  }
 0x6a6   : > { %3606 = vmatprep.subr.bf16.mxu0 %v9488_v13  ;;  %12151 = vst [vmem:[#allocation101_spill] sm:$0xff] %v9506_v29  ;;  %v9512_v13 = vld [vmem:[%s11853_s5 + $0x1c4] ss:$16 sps:$4 sm:$0xff]  }
 0x6a7   : > { %12152 = vst [vmem:[#allocation102_spill] sm:$0xff] %v9512_v13 }
 0x6a9   : > { %3607 = vmatpush1.bf16.msra.mxu0 %v9494_v14  ;;  %v9518_v14 = vld [vmem:[%s11853_s5 + $0x1c0] ss:$16 sps:$4 sm:$0xff]  }
 0x6aa   : > { %3608 = vmatprep.subr.bf16.mxu0 %v9500_v0  ;;  %12153 = vst [vmem:[#allocation103_spill] sm:$0xff] %v9518_v14  ;;  %v9524_v0 = vld [vmem:[%s11853_s5 + $0x1e4] ss:$16 sps:$4 sm:$0xff]  }
 0x6ab   : > { %12154 = vst [vmem:[#allocation104_spill] sm:$0xff] %v9524_v0 }
 0x6ad   : > { %3609 = vmatpush1.bf16.msra.mxu0 %v9506_v29  ;;  %v6977_v29 = vld [vmem:[%s11854_s6 + $0x40] sm:$0xff]  }
 0x6ae   : > { %3610 = vmatprep.subr.bf16.mxu0 %v9512_v13  ;;  %v9530_v13 = vld [vmem:[%s11853_s5 + $0x1e0] ss:$16 sps:$4 sm:$0xff]  }
 0x6af   : > { %12155 = vst [vmem:[#allocation105_spill] sm:$0xff] %v9530_v13 }
 0x6b1   : > { %3611 = vmatpush1.bf16.msra.mxu0 %v9518_v14  ;;  %v1339_v14 = vld [vmem:[%s11861_s13] sm:$0x3] }
 0x6b2   : > { %3612 = vmatprep.subr.bf16.mxu0 %v9524_v0  ;;  %v9540_v59 = vrot.slane %v1339_v14, %v7920_v53  ;;  %v9543_v0 = vrot.slane %v1339_v14, %v7923_v54  ;;  %v6978_v53 = vld [vmem:[%s11854_s6] sm:$0xff]   ;;  %v6979_v54 = vld [vmem:[%s11854_s6 + $0x48] sm:$0xff]   ;;  %v6983_v14 = vld [vmem:[%s11854_s6 + $0x58] sm:$0xff]  }
 0x6b4   : > { %12156 = vst [vmem:[#allocation106_spill] sm:$0xff] %v9540_v59  ;;  %12157 = vst [vmem:[#allocation107_spill] sm:$0xff] %v9543_v0 }
 0x6b5   : > { %3613 = vmatpush1.bf16.msra.mxu0 %v9530_v13 }
 0x6b6   : > { %6000 = vmatprep.subr.bf16.mxu0 %v6977_v29 }
 0x74b   : > { %v3571_v49 = vpop.f32.mrb[12].mxu0 }
 0x74c   : > { %v3572_v12 = vadd.f32 %v3571_v49, %v9540_v59  ;;  %v3573_v9 = vpop.f32.mrb[13].mxu0 }
 0x74d   : > { %v3574_v13 = vadd.f32 %v3573_v9, %v9543_v0  ;;  %v3575_v8 = vpop.f32.mrb[14].mxu0 }
 0x74e   : > { %3578 = vst [vmem:[%s7769_s15] sm:$0xff] %v3572_v12  ;;  %v3576_v5 = vpop.f32.mrb[15].mxu0 }
 0x74f   : > { %3579 = vst [vmem:[%s7769_s15 + $0x8] sm:$0xff] %v3574_v13  ;;  %v3581_v29 = vpack.c.bf16 %v3574_v13, %v3572_v12  ;;  %v6982_v13 = vld [vmem:[%s11854_s6 + $0x10] sm:$0xff]  }
 0x751   : > { %3614 = vmatprep.mubr.bf16.mxu0 %v3581_v29  ;;  %3657 = vmatprep.mubr.bf16.mxu1 %v3581_v29  ;;  %v6124_v29 = vld [vmem:[#allocation2 + $0x78] sm:$0xff] }
 0x752   : > { %3615 = vmatmul.mubr.bf16.vlgmr.msra.gmra.mrb[16].mxu0 %v3580_v33  ;;  %3658 = vmatmul.mubr.bf16.vlgmr.msra.gmra.mrb[20].mxu1 %v3580_v33  ;;  %v6118_v33 = vld [vmem:[#allocation2 + $0x58] sm:$0xff] }
 0x753   : > { %6001 = vmatpush3.bf16.msra.mxu0 %v6978_v53  ;;  %4168 = vmatpush1.bf16.msra.mxu1 %v8857_v11  ;;  %v6984_v11 = vld [vmem:[%s11854_s6 + $0x18] sm:$0xff]  }
 0x754   : > { %6002 = vmatprep.subr.bf16.mxu0 %v6979_v54  ;;  %4169 = vmatprep.subr.bf16.mxu1 %v8862_v24  ;;  %v6985_v24 = vld [vmem:[%s11854_s6 + $0x60] sm:$0xff]  }
 0x757   : > { %6003 = vmatpush3.bf16.msra.mxu0 %v6980_v62  ;;  %4170 = vmatpush1.bf16.msra.mxu1 %v8875_v46  ;;  %v6986_v46 = vld [vmem:[%s11854_s6 + $0x20] sm:$0xff]  }
 0x758   : > { %6004 = vmatprep.subr.bf16.mxu0 %v6981_v63  ;;  %4171 = vmatprep.subr.bf16.mxu1 %v8881_v47  ;;  %v6987_v47 = vld [vmem:[%s11854_s6 + $0x68] sm:$0xff]  }
 0x75b   : > { %6005 = vmatpush3.bf16.msra.mxu0 %v6982_v13  ;;  %4172 = vmatpush1.bf16.msra.mxu1 %v8893_v6  ;;  %v6988_v6 = vld [vmem:[%s11854_s6 + $0x28] sm:$0xff]  }
 0x75c   : > { %6006 = vmatprep.subr.bf16.mxu0 %v6983_v14  ;;  %4173 = vmatprep.subr.bf16.mxu1 %v8899_v56  ;;  %v6989_v56 = vld [vmem:[%s11854_s6 + $0x70] sm:$0xff]  }
 0x75f   : > { %6007 = vmatpush3.bf16.msra.mxu0 %v6984_v11  ;;  %4174 = vmatpush1.bf16.msra.mxu1 %v8911_v38  ;;  %v6990_v38 = vld [vmem:[%s11854_s6 + $0x30] sm:$0xff]  }
 0x760   : > { %6008 = vmatprep.subr.bf16.mxu0 %v6985_v24  ;;  %4175 = vmatprep.subr.bf16.mxu1 %v8917_v7  ;;  %v6991_v7 = vld [vmem:[%s11854_s6 + $0x78] sm:$0xff]  }
 0x763   : > { %6009 = vmatpush3.bf16.msra.mxu0 %v6986_v46  ;;  %4176 = vmatpush1.bf16.msra.mxu1 %v8929_v19  ;;  %v6992_v19 = vld [vmem:[%s11854_s6 + $0x38] sm:$0xff]  }
 0x764   : > { %6010 = vmatprep.subr.bf16.mxu0 %v6987_v47  ;;  %4177 = vmatprep.subr.bf16.mxu1 %v8935_v37  ;;  %v6068_v37 = vld [vmem:[#allocation2 + $0x40] sm:$0xff] }
 0x767   : > { %6011 = vmatpush3.bf16.msra.mxu0 %v6988_v6  ;;  %4178 = vmatpush1.bf16.msra.mxu1 %v8947_v51 }
 0x768   : > { %6012 = vmatprep.subr.bf16.mxu0 %v6989_v56  ;;  %4179 = vmatprep.subr.bf16.mxu1 %v8953_v58 }
 0x76b   : > { %6013 = vmatpush3.bf16.msra.mxu0 %v6990_v38  ;;  %4180 = vmatpush1.bf16.msra.mxu1 %v8965_v3  ;;  %v6076_v3 = vld [vmem:[#allocation2 + $0x60] sm:$0xff] }
 0x76c   : > { %6014 = vmatprep.subr.bf16.mxu0 %v6991_v7  ;;  %4181 = vmatprep.subr.bf16.mxu1 %v8971_v4 }
 0x76f   : > { %6015 = vmatpush3.bf16.msra.mxu0 %v6992_v19  ;;  %4182 = vmatpush1.bf16.msra.mxu1 %v8983_v50 }
 0x770   : > { %3777 = vmatprep.subr.bf16.mxu0 %v8194_v28  ;;  %4183 = vmatprep.subr.bf16.mxu1 %v8989_v41 }
 0x773   : > { %4184 = vmatpush1.bf16.msra.mxu1 %v9001_v16  ;;  %v6080_v16 = vld [vmem:[#allocation2 + $0x68] sm:$0xff] }
 0x774   : > { %4185 = vmatprep.subr.bf16.mxu1 %v9007_v25 }
 0x777   : > { %4186 = vmatpush1.bf16.msra.mxu1 %v9019_v32 }
 0x778   : > { %4187 = vmatprep.subr.bf16.mxu1 %v9025_v55 }
 0x77b   : > { %4188 = vmatpush1.bf16.msra.mxu1 %v9037_v10 }
 0x77c   : > { %4189 = vmatprep.subr.bf16.mxu1 %v9043_v45 }
 0x77f   : > { %4190 = vmatpush1.bf16.msra.mxu1 %v9055_v2  ;;  %v6072_v2 = vld [vmem:[#allocation2 + $0x48] sm:$0xff] }
 0x780   : > { %4191 = vmatprep.subr.bf16.mxu1 %v9285_v1 }
 0x783   : > { %4192 = vmatpush1.bf16.msra.mxu1 %v9290_v22 }
 0x784   : > { %4193 = vmatprep.subr.bf16.mxu1 %v9297_v60 }
 0x787   : > { %4194 = vmatpush1.bf16.msra.mxu1 %v9302_v27 }
 0x788   : > { %4195 = vmatprep.subr.bf16.mxu1 %v9309_v23  ;;  %v6115_v23 = vld [vmem:[#allocation2 + $0x50] sm:$0xff] }
 0x78b   : > { %4196 = vmatpush1.bf16.msra.mxu1 %v9314_v17 }
 0x78c   : > { %4197 = vmatprep.subr.bf16.mxu1 %v9321_v48  ;;  %v6121_v48 = vld [vmem:[#allocation2 + $0x70] sm:$0xff] }
 0x78f   : > { %4198 = vmatpush1.bf16.msra.mxu1 %v9326_v15 }
 0x790   : > { %4256 = vmatprep.subr.bf16.mxu1 %v9185_v61 }
 0x825   : > { %v3616_v51 = vpop.f32.mrb[16].mxu0  ;;  %v3659_v58 = vpop.f32.mrb[20].mxu1 }
 0x826   : > { %v6069_v4 = vadd.f32 %v6068_v37, %v3616_v51  ;;  %v3618_v50 = vpop.f32.mrb[17].mxu0  ;;  %v3661_v41 = vpop.f32.mrb[21].mxu1  ;;  %v6116_v15 = vadd.f32 %v6115_v23, %v3659_v58  ;;  %v12162_v23 = vld [vmem:[#allocation15_spill] sm:$0xff] }
 0x827   : > { %v6073_v25 = vadd.f32 %v6072_v2, %v3618_v50  ;;  %v3620_v32 = vpop.f32.mrb[18].mxu0  ;;  %v3663_v55 = vpop.f32.mrb[22].mxu1  ;;  %v6119_v8 = vadd.f32 %v6118_v33, %v3661_v41 }
 0x828   : > { %v5946_v10 = vmul.f32 -1.442695, %v6069_v4  ;;  %v6077_v45 = vadd.f32 %v6076_v3, %v3620_v32  ;;  %v3622_v1 = vpop.f32.mrb[19].mxu0  ;;  %v3665_v22 = vpop.f32.mrb[23].mxu1  ;;  %v6122_v5 = vadd.f32 %v6121_v48, %v3663_v55  ;;  %v5948_v9 = vmul.f32 -1.442695, %v6116_v15 }
 0x829   : > { %v5947_v60 = vmul.f32 -1.442695, %v6073_v25  ;;  %v6081_v27 = vadd.f32 %v6080_v16, %v3622_v1  ;;  %v6125_v13 = vadd.f32 %v6124_v29, %v3665_v22  ;;  %v12158_v22 = vmov 0   ;;  %v12163_v29 = vld [vmem:[#allocation16_spill] sm:$0xff] }
 0x82a   : > { %6739 = vpow2.f32 %v5946_v10  ;;  %v5949_v61 = vmul.f32 -1.442695, %v6077_v45  ;;  %v5951_v49 = vmul.f32 -1.442695, %v6122_v5 }
 0x82b   : > { %v5950_v17 = vmul.f32 -1.442695, %v6081_v27  ;;  %6741 = vpow2.f32 %v5947_v60  ;;  %v12159_v60 = vld [vmem:[#allocation28_spill] sm:$0xff]  ;;  %v12160_v27 = vld [vmem:[#allocation30_spill] sm:$0xff] }
 0x82c   : > { %6743 = vpow2.f32 %v5949_v61  ;;  %v12161_v61 = vld [vmem:[#allocation32_spill] sm:$0xff] }
 0x82d   : > { %6745 = vpow2.f32 %v5950_v17 }
 0x82e   : > { %6747 = vtanh.f32 %v6119_v8  ;;  %v6993_v8 = vld [vmem:[%s11855_s7] ss:$0 sm:$0xff] }
 0x82f   : > { %6749 = vpow2.f32 %v5948_v9 }
 0x834   : > { %v6740_v12 = vpop.eup %6739 }
 0x835   : > { %v3703_v53 = vadd.f32 1.0, %v6740_v12  ;;  %v6742_v54 = vpop.eup %6741 }
 0x836   : > { %v6744_v62 = vpop.eup %6743  ;;  %v3704_v63 = vadd.f32 1.0, %v6742_v54  ;;  %v12165_v54 = vld [vmem:[#allocation18_spill] sm:$0xff] }
 0x837   : > { %6751 = vrcp.f32 %v3703_v53  ;;  %v3706_v14 = vadd.f32 1.0, %v6744_v62  ;;  %v6746_v11 = vpop.eup %6745  ;;  %v12164_v53 = vld [vmem:[#allocation17_spill] sm:$0xff]  ;;  %v12166_v62 = vld [vmem:[#allocation19_spill] sm:$0xff] }
 0x838   : > { %6753 = vpow2.f32 %v5951_v49  ;;  %v3707_v24 = vadd.f32 1.0, %v6746_v11  ;;  %v6748_v46 = vpop.eup %6747  ;;  %v12170_v11 = vld [vmem:[#allocation23_spill] sm:$0xff] }
 0x839   : > { %6755 = vrcp.f32 %v3704_v63  ;;  %v6750_v47 = vpop.eup %6749  ;;  %v12167_v63 = vld [vmem:[#allocation20_spill] sm:$0xff] }
 0x83a   : > { %6757 = vrcp.f32 %v3706_v14  ;;  %v3705_v51 = vadd.f32 1.0, %v6750_v47  ;;  %v12169_v14 = vld [vmem:[#allocation22_spill] sm:$0xff] }
 0x83b   : > { %6759 = vtanh.f32 %v6125_v13  ;;  %v12168_v13 = vld [vmem:[#allocation21_spill] sm:$0xff]  ;;  %v12173_v47 = vld [vmem:[#allocation26_spill] sm:$0xff] }
 0x83c   : > { %6761 = vrcp.f32 %v3707_v24  ;;  %v12171_v24 = vld [vmem:[#allocation24_spill] sm:$0xff] }
 0x841   : > { %v6752_v6 = vpop.eup %6751 }
 0x842   : > { %v6754_v56 = vpop.eup %6753  ;;  %v3723_v38 = vmul.f32 %v6752_v6, %v8244_v52  ;;  %v12174_v6 = vld [vmem:[#allocation27_spill] sm:$0xff] }
 0x843   : > { %v6756_v7 = vpop.eup %6755  ;;  %v3708_v50 = vadd.f32 1.0, %v6754_v56  ;;  %v12175_v56 = vld [vmem:[#allocation29_spill] sm:$0xff] }
 0x844   : > { %v6758_v19 = vpop.eup %6757  ;;  %v3725_v37 = vmul.f32 %v6756_v7, %v6748_v46  ;;  %v12172_v46 = vld [vmem:[#allocation25_spill] sm:$0xff] }
 0x845   : > { %v6760_v2 = vpop.eup %6759  ;;  %v3724_v58 = vmul.f32 %v6758_v19, %v8247_v57  ;;  %v12177_v7 = vld [vmem:[#allocation33_spill] sm:$0xff]  ;;  %v12178_v19 = vld [vmem:[#allocation34_spill] sm:$0xff] }
 0x846   : > { %v6762_v3 = vpop.eup %6761  ;;  %v9631_v4 = vadd.f32 %v3725_v37, %v3723_v38  ;;  %v12176_v38 = vld [vmem:[#allocation31_spill] sm:$0xff]  ;;  %v12179_v37 = vld [vmem:[#allocation36_spill] sm:$0xff] }
 0x847   : > { %v3726_v41 = vmul.f32 %v6762_v3, %v6760_v2  ;;  %v12180_v2 = vld [vmem:[#allocation38_spill] sm:$0xff]  ;;  %v12183_v3 = vld [vmem:[#allocation44_spill] sm:$0xff] }
 0x848   : > { %6763 = vtanh.f32 %v9631_v4 }
 0x849   : > { %6765 = vrcp.f32 %v3705_v51  ;;  %v9634_v16 = vadd.f32 %v3726_v41, %v3724_v58  ;;  %v12181_v51 = vld [vmem:[#allocation40_spill] sm:$0xff]  ;;  %v12182_v58 = vld [vmem:[#allocation42_spill] sm:$0xff] }
 0x84a   : > { %6767 = vrcp.f32 %v3708_v50  ;;  %v12184_v50 = vld [vmem:[#allocation46_spill] sm:$0xff]  ;;  %v12185_v41 = vld [vmem:[#allocation48_spill] sm:$0xff] }
 0x84b   : > { %6769 = vtanh.f32 %v9634_v16 }
 0x852   : > { %v6764_v52 = vpop.eup %6763 }
 0x853   : > { %v6766_v25 = vpop.eup %6765 }
 0x854   : > { %v6768_v32 = vpop.eup %6767  ;;  %v9637_v10 = vmul.f32 %v6766_v25, %v6764_v52  ;;  %v12186_v52 = vld [vmem:[#allocation50_spill] sm:$0xff]  ;;  %v12187_v25 = vld [vmem:[#allocation52_spill] sm:$0xff] }
 0x855   : > { %v6770_v55 = vpop.eup %6769 }
 0x856   : > { %v9639_v57 = vmul.f32 %v6770_v55, %v6768_v32  ;;  %v3733_v1 = vpack.c.bf16 %v9637_v10, %v9637_v10  ;;  %v12188_v32 = vld [vmem:[#allocation54_spill] sm:$0xff]  ;;  %v12189_v55 = vld [vmem:[#allocation56_spill] sm:$0xff] }
 0x858   : > { %v3734_v45 = vpack.c.bf16 %v9639_v57, %v9639_v57 }
 0x85a   : > { %3767 = vmatprep.mubr.bf16.mxu0 %v3734_v45  ;;  %v12190_v45 = vld [vmem:[#allocation58_spill] sm:$0xff] }
 0x85b   : > { %3768 = vmatmul.mubr.bf16.vlgmr.msra.gmra.mrb[20].mxu0 %v3733_v1  ;;  %v12191_v1 = vld [vmem:[#allocation60_spill] sm:$0xff] }
 0x85c   : > { %3778 = vmatpush1.bf16.msra.mxu0 %v8199_v30  ;;  %3809 = vmatprep.mubr.bf16.mxu0 %v12158_v22 }
 0x85d   : > { %3779 = vmatprep.subr.bf16.mxu0 %v8211_v35 }
 0x860   : > { %3780 = vmatpush1.bf16.msra.mxu0 %v8216_v36 }
 0x861   : > { %3781 = vmatprep.subr.bf16.mxu0 %v8225_v39 }
 0x864   : > { %3782 = vmatpush1.bf16.msra.mxu0 %v8228_v40 }
 0x865   : > { %3783 = vmatprep.subr.bf16.mxu0 %v8237_v43 }
 0x868   : > { %3784 = vmatpush1.bf16.msra.mxu0 %v8240_v44 }
 0x869   : > { %3785 = vmatprep.subr.bf16.mxu0 %v8305_v18 }
 0x86c   : > { %3786 = vmatpush1.bf16.msra.mxu0 %v8312_v21 }
 0x86d   : > { %3787 = vmatprep.subr.bf16.mxu0 %v8329_v26 }
 0x870   : > { %3788 = vmatpush1.bf16.msra.mxu0 %v8336_v31 }
 0x871   : > { %3789 = vmatprep.subr.bf16.mxu0 %v8353_v42 }
 0x874   : > { %3790 = vmatpush1.bf16.msra.mxu0 %v12159_v60 }
 0x875   : > { %3791 = vmatprep.subr.bf16.mxu0 %v12160_v27 }
 0x878   : > { %3792 = vmatpush1.bf16.msra.mxu0 %v12161_v61 }
 0x879   : > { %3818 = vmatprep.subr.bf16.mxu0 %v12162_v23 }
 0x92e   : > { %v6016_v17 = vpop.f32.mrb[20].mxu0 }
 0x92f   : > { %v6017_v48 = vpop.f32.mrb[21].mxu0 }
 0x930   : > { %v6018_v15 = vadd.f32 %v6017_v48, %v6016_v17  ;;  %v6019_v33 = vpop.f32.mrb[22].mxu0  ;;  %v12192_v17 = vld [vmem:[#allocation62_spill] sm:$0xff]  ;;  %v12193_v48 = vld [vmem:[#allocation64_spill] sm:$0xff] }
 0x931   : > { %v6020_v5 = vpop.f32.mrb[23].mxu0  ;;  %v12195_v33 = vld [vmem:[#allocation37_spill] sm:$0xff] }
 0x932   : > { %v3770_v9 = vadd.f32 %v6993_v8, %v6018_v15  ;;  %v12194_v15 = vld [vmem:[#allocation35_spill] sm:$0xff]  ;;  %v12197_v8 = vld [vmem:[#allocation41_spill] sm:$0xff] }
 0x933   : > { %v12196_v5 = vld [vmem:[#allocation39_spill] sm:$0xff] }
 0x934   : > { %6771 = vtanh.f32 %v3770_v9  ;;  %v12198_v9 = vld [vmem:[#allocation43_spill] sm:$0xff] }
 0x93e   : > { %v6772_v12 = vpop.eup %6771 }
 0x93f   : > { %v3776_v49 = vpack.c.bf16 %v6772_v12, %v6772_v12  ;;  %v12199_v12 = vld [vmem:[#allocation45_spill] sm:$0xff] }
 0x941   : > { %3810 = vmatmul.mubr.bf16.vlgmr.msra.gmra.mrb[24].mxu0 %v3776_v49 }
 0x942   : > { %3819 = vmatpush1.bf16.msra.mxu0 %v12163_v29  ;;  %3850 = vmatprep.mubr.bf16.mxu0 %v12158_v22 }
 0x943   : > { %3820 = vmatprep.subr.bf16.mxu0 %v12164_v53 }
 0x946   : > { %3821 = vmatpush1.bf16.msra.mxu0 %v12165_v54 }
 0x947   : > { %3822 = vmatprep.subr.bf16.mxu0 %v12166_v62 }
 0x94a   : > { %3823 = vmatpush1.bf16.msra.mxu0 %v12167_v63 }
 0x94b   : > { %3824 = vmatprep.subr.bf16.mxu0 %v12168_v13 }
 0x94e   : > { %3825 = vmatpush1.bf16.msra.mxu0 %v12169_v14 }
 0x94f   : > { %3826 = vmatprep.subr.bf16.mxu0 %v12170_v11 }
 0x952   : > { %3827 = vmatpush1.bf16.msra.mxu0 %v12171_v24 }
 0x953   : > { %3828 = vmatprep.subr.bf16.mxu0 %v12172_v46 }
 0x956   : > { %3829 = vmatpush1.bf16.msra.mxu0 %v12173_v47 }
 0x957   : > { %3830 = vmatprep.subr.bf16.mxu0 %v12174_v6 }
 0x95a   : > { %3831 = vmatpush1.bf16.msra.mxu0 %v12175_v56 }
 0x95b   : > { %3832 = vmatprep.subr.bf16.mxu0 %v12176_v38  ;;  %v12217_v38 = vld [vmem:[#allocation73_spill] sm:$0xff] }
 0x95e   : > { %3833 = vmatpush1.bf16.msra.mxu0 %v12177_v7  ;;  %v12215_v7 = vld [vmem:[#allocation71_spill] sm:$0xff] }
 0x95f   : > { %3859 = vmatprep.subr.bf16.mxu0 %v12178_v19 }
 0x961   : > { %3851 = vmatmul.mubr.bf16.vlgmr.msra.gmra.mrb[28].mxu0 %v3776_v49 }
 0x962   : > { %3860 = vmatpush1.bf16.msra.mxu0 %v12179_v37  ;;  %3891 = vmatprep.mubr.bf16.mxu0 %v12158_v22 }
 0x963   : > { %3861 = vmatprep.subr.bf16.mxu0 %v12180_v2 }
 0x966   : > { %3862 = vmatpush1.bf16.msra.mxu0 %v12181_v51 }
 0x967   : > { %3863 = vmatprep.subr.bf16.mxu0 %v12182_v58 }
 0x96a   : > { %3864 = vmatpush1.bf16.msra.mxu0 %v12183_v3 }
 0x96b   : > { %3865 = vmatprep.subr.bf16.mxu0 %v12184_v50 }
 0x96e   : > { %3866 = vmatpush1.bf16.msra.mxu0 %v12185_v41 }
 0x96f   : > { %3867 = vmatprep.subr.bf16.mxu0 %v12186_v52  ;;  %v12213_v52 = vld [vmem:[#allocation69_spill] sm:$0xff] }
 0x972   : > { %3868 = vmatpush1.bf16.msra.mxu0 %v12187_v25 }
 0x973   : > { %3869 = vmatprep.subr.bf16.mxu0 %v12188_v32  ;;  %v12212_v32 = vld [vmem:[#allocation68_spill] sm:$0xff] }
 0x976   : > { %3870 = vmatpush1.bf16.msra.mxu0 %v12189_v55  ;;  %v12206_v55 = vld [vmem:[#allocation59_spill] sm:$0xff] }
 0x977   : > { %3871 = vmatprep.subr.bf16.mxu0 %v12190_v45  ;;  %v12204_v45 = vld [vmem:[#allocation55_spill] sm:$0xff] }
 0x97a   : > { %3872 = vmatpush1.bf16.msra.mxu0 %v12191_v1  ;;  %v12200_v1 = vld [vmem:[#allocation47_spill] sm:$0xff] }
 0x97b   : > { %3873 = vmatprep.subr.bf16.mxu0 %v12192_v17  ;;  %v12201_v17 = vld [vmem:[#allocation49_spill] sm:$0xff] }
 0x97e   : > { %3874 = vmatpush1.bf16.msra.mxu0 %v12193_v48  ;;  %v12202_v48 = vld [vmem:[#allocation51_spill] sm:$0xff] }
 0x97f   : > { %3900 = vmatprep.subr.bf16.mxu0 %v12194_v15  ;;  %v12203_v15 = vld [vmem:[#allocation53_spill] sm:$0xff] }
 0x981   : > { %3892 = vmatmul.mubr.bf16.vlgmr.msra.gmra.mrb[32].mxu0 %v3776_v49 }
 0x982   : > { %3901 = vmatpush1.bf16.msra.mxu0 %v12195_v33  ;;  %3932 = vmatprep.mubr.bf16.mxu0 %v12158_v22  ;;  %v12205_v33 = vld [vmem:[#allocation57_spill] sm:$0xff] }
 0x983   : > { %3902 = vmatprep.subr.bf16.mxu0 %v12196_v5  ;;  %v12207_v5 = vld [vmem:[#allocation61_spill] sm:$0xff] }
 0x986   : > { %3903 = vmatpush1.bf16.msra.mxu0 %v12197_v8  ;;  %v12208_v8 = vld [vmem:[#allocation63_spill] sm:$0xff] }
 0x987   : > { %3904 = vmatprep.subr.bf16.mxu0 %v12198_v9  ;;  %v12209_v9 = vld [vmem:[#allocation65_spill] sm:$0xff] }
 0x98a   : > { %3905 = vmatpush1.bf16.msra.mxu0 %v12199_v12 }
 0x98b   : > { %3906 = vmatprep.subr.bf16.mxu0 %v12200_v1  ;;  %v12211_v1 = vld [vmem:[#allocation67_spill] sm:$0xff] }
 0x98e   : > { %3907 = vmatpush1.bf16.msra.mxu0 %v12201_v17  ;;  %v6994_v17 = vld [vmem:[%s11858_s10 + $0x4] ss:$8 sps:$4 sm:$0xff]  }
 0x98f   : > { %3908 = vmatprep.subr.bf16.mxu0 %v12202_v48 }
 0x992   : > { %3909 = vmatpush1.bf16.msra.mxu0 %v12203_v15  ;;  %v12210_v15 = vld [vmem:[#allocation66_spill] sm:$0xff] }
 0x993   : > { %3910 = vmatprep.subr.bf16.mxu0 %v12204_v45  ;;  %v6995_v45 = vld [vmem:[%s11858_s10] ss:$8 sps:$4 sm:$0xff]  }
 0x996   : > { %3911 = vmatpush1.bf16.msra.mxu0 %v12205_v33 }
 0x997   : > { %3912 = vmatprep.subr.bf16.mxu0 %v12206_v55  ;;  %v6996_v55 = vld [vmem:[%s11858_s10 + $0x14] ss:$8 sps:$4 sm:$0xff]  }
 0x99a   : > { %3913 = vmatpush1.bf16.msra.mxu0 %v12207_v5 }
 0x99b   : > { %3914 = vmatprep.subr.bf16.mxu0 %v12208_v8 }
 0x99e   : > { %3915 = vmatpush1.bf16.msra.mxu0 %v12209_v9  ;;  %v6997_v9 = vld [vmem:[%s11858_s10 + $0x10] ss:$8 sps:$4 sm:$0xff]  }
 0x99f   : > { %3999 = vmatprep.subr.bf16.mxu0 %v6994_v17  ;;  %v6998_v17 = vld [vmem:[%s11858_s10 + $0x24] ss:$8 sps:$4 sm:$0xff]  }
 0x9a1   : > { %3933 = vmatmul.mubr.bf16.vlgmr.msra.gmra.mrb[36].mxu0 %v3776_v49  ;;  %v6999_v49 = vld [vmem:[%s11858_s10 + $0x20] ss:$8 sps:$4 sm:$0xff]  }
 0x9a2   : > { %4000 = vmatpush1.bf16.msra.mxu0 %v6995_v45  ;;  %v7000_v45 = vld [vmem:[%s11858_s10 + $0x34] ss:$8 sps:$4 sm:$0xff]  }
 0x9a3   : > { %4001 = vmatprep.subr.bf16.mxu0 %v6996_v55  ;;  %v7001_v55 = vld [vmem:[%s11858_s10 + $0x30] ss:$8 sps:$4 sm:$0xff]  }
 0x9a6   : > { %4002 = vmatpush1.bf16.msra.mxu0 %v6997_v9  ;;  %v7002_v9 = vld [vmem:[%s11858_s10 + $0x44] ss:$8 sps:$4 sm:$0xff]  }
 0x9a7   : > { %4003 = vmatprep.subr.bf16.mxu0 %v6998_v17  ;;  %v7003_v17 = vld [vmem:[%s11858_s10 + $0x40] ss:$8 sps:$4 sm:$0xff]  }
 0x9aa   : > { %4004 = vmatpush1.bf16.msra.mxu0 %v6999_v49  ;;  %v7004_v49 = vld [vmem:[%s11858_s10 + $0x54] ss:$8 sps:$4 sm:$0xff]  }
 0x9ab   : > { %4005 = vmatprep.subr.bf16.mxu0 %v7000_v45  ;;  %v7005_v45 = vld [vmem:[%s11858_s10 + $0x50] ss:$8 sps:$4 sm:$0xff]  }
 0x9ae   : > { %4006 = vmatpush1.bf16.msra.mxu0 %v7001_v55  ;;  %v7006_v55 = vld [vmem:[%s11858_s10 + $0x64] ss:$8 sps:$4 sm:$0xff]  }
 0x9af   : > { %4007 = vmatprep.subr.bf16.mxu0 %v7002_v9  ;;  %v7007_v9 = vld [vmem:[%s11858_s10 + $0x60] ss:$8 sps:$4 sm:$0xff]  }
 0x9b2   : > { %4008 = vmatpush1.bf16.msra.mxu0 %v7003_v17  ;;  %v7008_v17 = vld [vmem:[%s11858_s10 + $0x74] ss:$8 sps:$4 sm:$0xff]  }
 0x9b3   : > { %4009 = vmatprep.subr.bf16.mxu0 %v7004_v49  ;;  %v7009_v49 = vld [vmem:[%s11858_s10 + $0x70] ss:$8 sps:$4 sm:$0xff]  }
 0x9b6   : > { %4010 = vmatpush1.bf16.msra.mxu0 %v7005_v45  ;;  %v7010_v45 = vld [vmem:[%s11858_s10 + $0x84] ss:$8 sps:$4 sm:$0xff]  }
 0x9b7   : > { %4011 = vmatprep.subr.bf16.mxu0 %v7006_v55  ;;  %v7011_v55 = vld [vmem:[%s11858_s10 + $0x80] ss:$8 sps:$4 sm:$0xff]  }
 0x9ba   : > { %4012 = vmatpush1.bf16.msra.mxu0 %v7007_v9  ;;  %v7012_v9 = vld [vmem:[%s11858_s10 + $0x94] ss:$8 sps:$4 sm:$0xff]  }
 0x9bb   : > { %4013 = vmatprep.subr.bf16.mxu0 %v7008_v17  ;;  %v7013_v17 = vld [vmem:[%s11858_s10 + $0x90] ss:$8 sps:$4 sm:$0xff]  }
 0x9be   : > { %4014 = vmatpush1.bf16.msra.mxu0 %v7009_v49  ;;  %v7014_v49 = vld [vmem:[%s11858_s10 + $0xa4] ss:$8 sps:$4 sm:$0xff]  }
 0x9bf   : > { %4015 = vmatprep.subr.bf16.mxu0 %v7010_v45  ;;  %v7015_v45 = vld [vmem:[%s11858_s10 + $0xa0] ss:$8 sps:$4 sm:$0xff]  }
 0x9c2   : > { %4016 = vmatpush1.bf16.msra.mxu0 %v7011_v55  ;;  %v7016_v55 = vld [vmem:[%s11858_s10 + $0xb4] ss:$8 sps:$4 sm:$0xff]  }
 0x9c3   : > { %4017 = vmatprep.subr.bf16.mxu0 %v7012_v9  ;;  %v7017_v9 = vld [vmem:[%s11858_s10 + $0xb0] ss:$8 sps:$4 sm:$0xff]  }
 0x9c6   : > { %4018 = vmatpush1.bf16.msra.mxu0 %v7013_v17  ;;  %v7018_v17 = vld [vmem:[%s11858_s10 + $0xc4] ss:$8 sps:$4 sm:$0xff]  }
 0x9c7   : > { %4019 = vmatprep.subr.bf16.mxu0 %v7014_v49  ;;  %v7019_v49 = vld [vmem:[%s11858_s10 + $0xc0] ss:$8 sps:$4 sm:$0xff]  }
 0x9ca   : > { %4020 = vmatpush1.bf16.msra.mxu0 %v7015_v45  ;;  %v7020_v45 = vld [vmem:[%s11858_s10 + $0xd4] ss:$8 sps:$4 sm:$0xff]  }
 0x9cb   : > { %4021 = vmatprep.subr.bf16.mxu0 %v7016_v55  ;;  %v7021_v55 = vld [vmem:[%s11858_s10 + $0xd0] ss:$8 sps:$4 sm:$0xff]  }
 0x9ce   : > { %4022 = vmatpush1.bf16.msra.mxu0 %v7017_v9  ;;  %v7022_v9 = vld [vmem:[%s11858_s10 + $0xe4] ss:$8 sps:$4 sm:$0xff]  }
 0x9cf   : > { %4023 = vmatprep.subr.bf16.mxu0 %v7018_v17  ;;  %v7023_v17 = vld [vmem:[%s11858_s10 + $0xe0] ss:$8 sps:$4 sm:$0xff]  }
 0x9d2   : > { %4024 = vmatpush1.bf16.msra.mxu0 %v7019_v49  ;;  %v7024_v49 = vld [vmem:[%s11858_s10 + $0xf4] ss:$8 sps:$4 sm:$0xff]  }
 0x9d3   : > { %4025 = vmatprep.subr.bf16.mxu0 %v7020_v45  ;;  %v7025_v45 = vld [vmem:[%s11858_s10 + $0xf0] ss:$8 sps:$4 sm:$0xff]  }
 0x9d6   : > { %4026 = vmatpush1.bf16.msra.mxu0 %v7021_v55  ;;  %v7026_v55 = vld [vmem:[%s11858_s10 + $0x104] ss:$8 sps:$4 sm:$0xff]  }
 0x9d7   : > { %4027 = vmatprep.subr.bf16.mxu0 %v7022_v9 }
 0x9da   : > { %4028 = vmatpush1.bf16.msra.mxu0 %v7023_v17 }
 0x9db   : > { %4029 = vmatprep.subr.bf16.mxu0 %v7024_v49 }
 0x9de   : > { %4030 = vmatpush1.bf16.msra.mxu0 %v7025_v45 }
 0x9df   : > { %4040 = vmatprep.subr.bf16.mxu0 %v7026_v55 }
 0xa14   : > { %v3811_v9 = vpop.f32.mrb[24].mxu0 }
 0xa15   : > { %v3813_v8 = vpop.f32.mrb[25].mxu0  ;;  %v3812_v48 = vadd.f32 %v3811_v9, %v12210_v15 }
 0xa16   : > { %v3815_v5 = vpop.f32.mrb[26].mxu0  ;;  %v3814_v25 = vadd.f32 %v3813_v8, %v12212_v32 }
 0xa17   : > { %v3816_v33 = vpop.f32.mrb[27].mxu0 }
 0xa18   : > { %v12214_v33 = vld [vmem:[#allocation70_spill] sm:$0xff] }
 0xa34   : > { %v3852_v17 = vpop.f32.mrb[28].mxu0 }
 0xa35   : > { %v3853_v12 = vadd.f32 %v3852_v17, %v12211_v1  ;;  %v3854_v49 = vpop.f32.mrb[29].mxu0  ;;  %v12216_v17 = vld [vmem:[#allocation72_spill] sm:$0xff] }
 0xa36   : > { %v3855_v41 = vadd.f32 %v3854_v49, %v12213_v52  ;;  %v3856_v45 = vpop.f32.mrb[30].mxu0 }
 0xa37   : > { %v3941_v50 = vmax.f32 %v3812_v48, %v3853_v12  ;;  %v3857_v3 = vpop.f32.mrb[31].mxu0 }
 0xa38   : > { %v3942_v58 = vmax.f32 %v3814_v25, %v3855_v41 }
 0xa54   : > { %v3893_v51 = vpop.f32.mrb[32].mxu0 }
 0xa55   : > { %v3895_v55 = vpop.f32.mrb[33].mxu0  ;;  %v3894_v19 = vadd.f32 %v3893_v51, %v12214_v33 }
 0xa56   : > { %v3897_v2 = vpop.f32.mrb[34].mxu0  ;;  %v3896_v1 = vadd.f32 %v3895_v55, %v12216_v17 }
 0xa57   : > { %v3898_v37 = vpop.f32.mrb[35].mxu0 }
 0xa74   : > { %v3934_v5 = vpop.f32.mrb[36].mxu0 }
 0xa75   : > { %v3935_v9 = vadd.f32 %v3934_v5, %v12215_v7  ;;  %v3936_v15 = vpop.f32.mrb[37].mxu0 }
 0xa76   : > { %v3937_v8 = vadd.f32 %v3936_v15, %v12217_v38  ;;  %v3938_v32 = vpop.f32.mrb[38].mxu0 }
 0xa77   : > { %v3943_v49 = vmax.f32 %v3894_v19, %v3935_v9  ;;  %v3939_v45 = vpop.f32.mrb[39].mxu0 }
 0xa78   : > { %v3944_v52 = vmax.f32 %v3896_v1, %v3937_v8 }
 0xa79   : > { %v3945_v3 = vmax.f32 %v3941_v50, %v3943_v49 }
 0xa7a   : > { %v3946_v56 = vmax.f32 %v3942_v58, %v3944_v52 }
 0xa7b   : > { %v3947_v6 = vsub.f32 %v3812_v48, %v3945_v3  ;;  %v3953_v47 = vsub.f32 %v3853_v12, %v3945_v3  ;;  %v3959_v2 = vsub.f32 %v3894_v19, %v3945_v3  ;;  %v3965_v37 = vsub.f32 %v3935_v9, %v3945_v3 }
 0xa7c   : > { %v3948_v46 = vsub.f32 %v3814_v25, %v3946_v56  ;;  %v3954_v24 = vsub.f32 %v3855_v41, %v3946_v56  ;;  %v3960_v51 = vsub.f32 %v3896_v1, %v3946_v56  ;;  %v3966_v33 = vsub.f32 %v3937_v8, %v3946_v56 }
 0xa7d   : > { %v3949_v5 = vmul.f32 1.442695, %v3947_v6  ;;  %v3955_v7 = vmul.f32 1.442695, %v3953_v47  ;;  %v3961_v11 = vmul.f32 1.442695, %v3959_v2 }
 0xa7e   : > { %v3967_v55 = vmul.f32 1.442695, %v3965_v37  ;;  %v3951_v15 = vmul.f32 1.442695, %v3948_v46  ;;  %v3957_v32 = vmul.f32 1.442695, %v3954_v24 }
 0xa7f   : > { %6773 = vpow2.f32 %v3949_v5  ;;  %v3963_v50 = vmul.f32 1.442695, %v3960_v51  ;;  %v3969_v58 = vmul.f32 1.442695, %v3966_v33 }
 0xa80   : > { %6775 = vpow2.f32 %v3955_v7 }
 0xa81   : > { %6777 = vpow2.f32 %v3961_v11 }
 0xa82   : > { %6779 = vpow2.f32 %v3967_v55 }
 0xa83   : > { %6781 = vpow2.f32 %v3951_v15 }
 0xa84   : > { %6783 = vpow2.f32 %v3957_v32 }
 0xa85   : > { %6785 = vpow2.f32 %v3963_v50 }
 0xa86   : > { %6787 = vpow2.f32 %v3969_v58 }
 0xa89   : > { %v6774_v19 = vpop.eup %6773 }
 0xa8a   : > { %v6776_v41 = vpop.eup %6775 }
 0xa8b   : > { %v6778_v52 = vpop.eup %6777  ;;  %v3971_v56 = vadd.f32 %v6776_v41, %v6774_v19 }
 0xa8c   : > { %v6780_v6 = vpop.eup %6779 }
 0xa8d   : > { %v6782_v47 = vpop.eup %6781  ;;  %v3973_v25 = vadd.f32 %v6778_v52, %v3971_v56 }
 0xa8e   : > { %v6784_v1 = vpop.eup %6783 }
 0xa8f   : > { %v3975_v48 = vadd.f32 %v6780_v6, %v3973_v25  ;;  %v3972_v46 = vadd.f32 %v6784_v1, %v6782_v47  ;;  %v6786_v7 = vpop.eup %6785  ;;  %v7031_v25 = vld [vmem:[%s11858_s10 + $0x120] ss:$8 sps:$4 sm:$0xff]  }
 0xa90   : > { %v6788_v24 = vpop.eup %6787 }
 0xa91   : > { %6789 = vrcp.f32 %v3975_v48  ;;  %v3974_v11 = vadd.f32 %v6786_v7, %v3972_v46  ;;  %v7033_v48 = vld [vmem:[%s11858_s10 + $0x130] ss:$8 sps:$4 sm:$0xff]   ;;  %v7034_v46 = vld [vmem:[%s11858_s10 + $0x144] ss:$8 sps:$4 sm:$0xff]  }
 0xa93   : > { %v3976_v12 = vadd.f32 %v6788_v24, %v3974_v11  ;;  %v7036_v11 = vld [vmem:[%s11858_s10 + $0x154] ss:$8 sps:$4 sm:$0xff]  }
 0xa95   : > { %6791 = vrcp.f32 %v3976_v12  ;;  %v7038_v12 = vld [vmem:[%s11858_s10 + $0x164] ss:$8 sps:$4 sm:$0xff]  }
 0xa9b   : > { %v6790_v9 = vpop.eup %6789 }
 0xa9c   : > { %v3979_v33 = vmul.f32 %v6790_v9, %v9637_v10  ;;  %v3981_v8 = vmul.f32 %v6790_v9, %v9639_v57  ;;  %v7039_v9 = vld [vmem:[%s11858_s10 + $0x160] ss:$8 sps:$4 sm:$0xff]  }
 0xa9e   : > { %v3983_v49 = vmul.f32 %v6774_v19, %v3979_v33  ;;  %v9824_v45 = vmul.f32 %v6776_v41, %v3979_v33  ;;  %v9826_v3 = vmul.f32 %v6778_v52, %v3981_v8  ;;  %v9828_v2 = vmul.f32 %v6780_v6, %v3981_v8  ;;  %v7027_v41 = vld [vmem:[%s11858_s10 + $0x100] ss:$8 sps:$4 sm:$0xff]   ;;  %v7028_v52 = vld [vmem:[%s11858_s10 + $0x114] ss:$8 sps:$4 sm:$0xff]   ;;  %v7029_v6 = vld [vmem:[%s11858_s10 + $0x110] ss:$8 sps:$4 sm:$0xff]  }
 0xa9f   : > { %v6792_v37 = vpop.eup %6791  ;;  %v7040_v33 = vld [vmem:[%s11858_s10 + $0x174] ss:$8 sps:$4 sm:$0xff]   ;;  %v7041_v8 = vld [vmem:[%s11858_s10 + $0x170] ss:$8 sps:$4 sm:$0xff]  }
 0xaa0   : > { %v3980_v51 = vmul.f32 %v6792_v37, %v9637_v10  ;;  %v3982_v5 = vmul.f32 %v6792_v37, %v9639_v57  ;;  %v3985_v56 = vpack.c.bf16 %v3983_v49, %v3983_v49  ;;  %v7042_v49 = vld [vmem:[%s11858_s10 + $0x184] ss:$8 sps:$4 sm:$0xff]   ;;  %v7043_v37 = vld [vmem:[%s11858_s10 + $0x180] ss:$8 sps:$4 sm:$0xff]  }
 0xaa2   : > { %v3984_v55 = vmul.f32 %v6782_v47, %v3980_v51  ;;  %v3988_v15 = vmul.f32 %v6784_v1, %v3980_v51  ;;  %v9832_v32 = vmul.f32 %v6786_v7, %v3982_v5  ;;  %v9834_v50 = vmul.f32 %v6788_v24, %v3982_v5  ;;  %v7030_v47 = vld [vmem:[%s11858_s10 + $0x124] ss:$8 sps:$4 sm:$0xff]   ;;  %v7032_v1 = vld [vmem:[%s11858_s10 + $0x134] ss:$8 sps:$4 sm:$0xff]   ;;  %v7035_v7 = vld [vmem:[%s11858_s10 + $0x140] ss:$8 sps:$4 sm:$0xff]  }
 0xaa3   : > { %v7037_v24 = vld [vmem:[%s11858_s10 + $0x150] ss:$8 sps:$4 sm:$0xff]   ;;  %v7044_v51 = vld [vmem:[%s11858_s10 + $0x194] ss:$8 sps:$4 sm:$0xff]  }
 0xaa4   : > { %v3986_v58 = vpack.c.bf16 %v3984_v55, %v3984_v55  ;;  %v3990_v19 = vpack.c.bf16 %v3988_v15, %v3988_v15  ;;  %v7045_v5 = vld [vmem:[%s11858_s10 + $0x190] ss:$8 sps:$4 sm:$0xff]   ;;  %v7046_v55 = vld [vmem:[%s11858_s10 + $0x1a4] ss:$8 sps:$4 sm:$0xff]   ;;  %v7047_v15 = vld [vmem:[%s11858_s10 + $0x1a0] ss:$8 sps:$4 sm:$0xff]  }
 0xaa6   : > { %4031 = vmatprep.mubr.bf16.mxu0 %v3986_v58  ;;  %v7048_v58 = vld [vmem:[%s11858_s10 + $0x1b4] ss:$8 sps:$4 sm:$0xff]  }
 0xaa7   : > { %4032 = vmatmul.mubr.bf16.vlgmr.msra.gmra.mrb[40].mxu0 %v3985_v56  ;;  %v7049_v56 = vld [vmem:[%s11858_s10 + $0x1b0] ss:$8 sps:$4 sm:$0xff]  }
 0xaa8   : > { %4041 = vmatpush1.bf16.msra.mxu0 %v7027_v41  ;;  %4072 = vmatprep.mubr.bf16.mxu0 %v3990_v19  ;;  %v7050_v19 = vld [vmem:[%s11858_s10 + $0x1c4] ss:$8 sps:$4 sm:$0xff]   ;;  %v7051_v41 = vld [vmem:[%s11858_s10 + $0x1c0] ss:$8 sps:$4 sm:$0xff]  }
 0xaa9   : > { %4042 = vmatprep.subr.bf16.mxu0 %v7028_v52  ;;  %v7052_v52 = vld [vmem:[%s11858_s10 + $0x1d4] ss:$8 sps:$4 sm:$0xff]  }
 0xaac   : > { %4043 = vmatpush1.bf16.msra.mxu0 %v7029_v6  ;;  %v7053_v6 = vld [vmem:[%s11858_s10 + $0x1d0] ss:$8 sps:$4 sm:$0xff]  }
 0xaad   : > { %4044 = vmatprep.subr.bf16.mxu0 %v7030_v47  ;;  %v7054_v47 = vld [vmem:[%s11858_s10 + $0x1e4] ss:$8 sps:$4 sm:$0xff]  }
 0xab0   : > { %4045 = vmatpush1.bf16.msra.mxu0 %v7031_v25  ;;  %v7055_v25 = vld [vmem:[%s11858_s10 + $0x1e0] ss:$8 sps:$4 sm:$0xff]  }
 0xab1   : > { %4046 = vmatprep.subr.bf16.mxu0 %v7032_v1  ;;  %v7056_v1 = vld [vmem:[%s11858_s10 + $0x1f4] ss:$8 sps:$4 sm:$0xff]  }
 0xab4   : > { %4047 = vmatpush1.bf16.msra.mxu0 %v7033_v48  ;;  %v7057_v48 = vld [vmem:[%s11858_s10 + $0x1f0] ss:$8 sps:$4 sm:$0xff]  }
 0xab5   : > { %4048 = vmatprep.subr.bf16.mxu0 %v7034_v46  ;;  %v3989_v46 = vpack.c.bf16 %v9824_v45, %v9824_v45  ;;  %v7061_v45 = vld [vmem:[%s11858_s10 + $0x210] ss:$8 sps:$4 sm:$0xff]  }
 0xab8   : > { %4049 = vmatpush1.bf16.msra.mxu0 %v7035_v7  ;;  %v7058_v7 = vld [vmem:[%s11858_s10 + $0x204] ss:$8 sps:$4 sm:$0xff]  }
 0xab9   : > { %4050 = vmatprep.subr.bf16.mxu0 %v7036_v11  ;;  %v3994_v11 = vpack.c.bf16 %v9832_v32, %v9832_v32  ;;  %v7062_v32 = vld [vmem:[%s11858_s10 + $0x224] ss:$8 sps:$4 sm:$0xff]  }
 0xabc   : > { %4051 = vmatpush1.bf16.msra.mxu0 %v7037_v24  ;;  %v7059_v24 = vld [vmem:[%s11858_s10 + $0x200] ss:$8 sps:$4 sm:$0xff]  }
 0xabd   : > { %4052 = vmatprep.subr.bf16.mxu0 %v7038_v12  ;;  %v7060_v12 = vld [vmem:[%s11858_s10 + $0x214] ss:$8 sps:$4 sm:$0xff]  }
 0xac0   : > { %4053 = vmatpush1.bf16.msra.mxu0 %v7039_v9  ;;  %v7063_v9 = vld [vmem:[%s11858_s10 + $0x220] ss:$8 sps:$4 sm:$0xff]  }
 0xac1   : > { %4054 = vmatprep.subr.bf16.mxu0 %v7040_v33  ;;  %v7064_v33 = vld [vmem:[%s11858_s10 + $0x234] ss:$8 sps:$4 sm:$0xff]  }
 0xac4   : > { %4055 = vmatpush1.bf16.msra.mxu0 %v7041_v8  ;;  %v7065_v8 = vld [vmem:[%s11858_s10 + $0x230] ss:$8 sps:$4 sm:$0xff]  }
 0xac5   : > { %4056 = vmatprep.subr.bf16.mxu0 %v7042_v49  ;;  %v7066_v49 = vld [vmem:[%s11858_s10 + $0x244] ss:$8 sps:$4 sm:$0xff]  }
 0xac8   : > { %4057 = vmatpush1.bf16.msra.mxu0 %v7043_v37  ;;  %v7067_v37 = vld [vmem:[%s11858_s10 + $0x240] ss:$8 sps:$4 sm:$0xff]  }
 0xac9   : > { %4058 = vmatprep.subr.bf16.mxu0 %v7044_v51  ;;  %v7068_v51 = vld [vmem:[%s11858_s10 + $0x254] ss:$8 sps:$4 sm:$0xff]  }
 0xacc   : > { %4059 = vmatpush1.bf16.msra.mxu0 %v7045_v5  ;;  %v7069_v5 = vld [vmem:[%s11858_s10 + $0x250] ss:$8 sps:$4 sm:$0xff]  }
 0xacd   : > { %4060 = vmatprep.subr.bf16.mxu0 %v7046_v55  ;;  %v7070_v55 = vld [vmem:[%s11858_s10 + $0x264] ss:$8 sps:$4 sm:$0xff]  }
 0xad0   : > { %4061 = vmatpush1.bf16.msra.mxu0 %v7047_v15  ;;  %v7071_v15 = vld [vmem:[%s11858_s10 + $0x260] ss:$8 sps:$4 sm:$0xff]  }
 0xad1   : > { %4062 = vmatprep.subr.bf16.mxu0 %v7048_v58  ;;  %v7072_v58 = vld [vmem:[%s11858_s10 + $0x274] ss:$8 sps:$4 sm:$0xff]  }
 0xad4   : > { %4063 = vmatpush1.bf16.msra.mxu0 %v7049_v56  ;;  %v7073_v56 = vld [vmem:[%s11858_s10 + $0x270] ss:$8 sps:$4 sm:$0xff]  }
 0xad5   : > { %4064 = vmatprep.subr.bf16.mxu0 %v7050_v19  ;;  %v7074_v19 = vld [vmem:[%s11858_s10 + $0x284] ss:$8 sps:$4 sm:$0xff]  }
 0xad8   : > { %4065 = vmatpush1.bf16.msra.mxu0 %v7051_v41  ;;  %v7075_v41 = vld [vmem:[%s11858_s10 + $0x280] ss:$8 sps:$4 sm:$0xff]  }
 0xad9   : > { %4066 = vmatprep.subr.bf16.mxu0 %v7052_v52  ;;  %v7076_v52 = vld [vmem:[%s11858_s10 + $0x294] ss:$8 sps:$4 sm:$0xff]  }
 0xadc   : > { %4067 = vmatpush1.bf16.msra.mxu0 %v7053_v6  ;;  %v7077_v6 = vld [vmem:[%s11858_s10 + $0x290] ss:$8 sps:$4 sm:$0xff]  }
 0xadd   : > { %4068 = vmatprep.subr.bf16.mxu0 %v7054_v47  ;;  %v7078_v47 = vld [vmem:[%s11858_s10 + $0x2a4] ss:$8 sps:$4 sm:$0xff]  }
 0xae0   : > { %4069 = vmatpush1.bf16.msra.mxu0 %v7055_v25  ;;  %v7079_v25 = vld [vmem:[%s11858_s10 + $0x2a0] ss:$8 sps:$4 sm:$0xff]  }
 0xae1   : > { %4070 = vmatprep.subr.bf16.mxu0 %v7056_v1  ;;  %v7080_v1 = vld [vmem:[%s11858_s10 + $0x2b4] ss:$8 sps:$4 sm:$0xff]  }
 0xae4   : > { %4071 = vmatpush1.bf16.msra.mxu0 %v7057_v48  ;;  %v7081_v48 = vld [vmem:[%s11858_s10 + $0x2b0] ss:$8 sps:$4 sm:$0xff]  }
 0xae5   : > { %4081 = vmatprep.subr.bf16.mxu0 %v7058_v7  ;;  %v7083_v7 = vld [vmem:[%s11858_s10 + $0x2c0] ss:$8 sps:$4 sm:$0xff]  }
 0xae7   : > { %4073 = vmatmul.mubr.bf16.vlgmr.msra.gmra.mrb[40].mxu0 %v3989_v46  ;;  %v7082_v46 = vld [vmem:[%s11858_s10 + $0x2c4] ss:$8 sps:$4 sm:$0xff]  }
 0xae8   : > { %4082 = vmatpush1.bf16.msra.mxu0 %v7059_v24  ;;  %4113 = vmatprep.mubr.bf16.mxu0 %v3994_v11  ;;  %v7084_v11 = vld [vmem:[%s11858_s10 + $0x2d4] ss:$8 sps:$4 sm:$0xff]   ;;  %v7085_v24 = vld [vmem:[%s11858_s10 + $0x2d0] ss:$8 sps:$4 sm:$0xff]  }
 0xae9   : > { %4083 = vmatprep.subr.bf16.mxu0 %v7060_v12  ;;  %v7086_v12 = vld [vmem:[%s11858_s10 + $0x2e4] ss:$8 sps:$4 sm:$0xff]  }
 0xaec   : > { %4084 = vmatpush1.bf16.msra.mxu0 %v7061_v45  ;;  %v7087_v45 = vld [vmem:[%s11858_s10 + $0x2e0] ss:$8 sps:$4 sm:$0xff]  }
 0xaed   : > { %4085 = vmatprep.subr.bf16.mxu0 %v7062_v32  ;;  %v7088_v32 = vld [vmem:[%s11858_s10 + $0x2f4] ss:$8 sps:$4 sm:$0xff]  }
 0xaf0   : > { %4086 = vmatpush1.bf16.msra.mxu0 %v7063_v9  ;;  %v7089_v9 = vld [vmem:[%s11858_s10 + $0x2f0] ss:$8 sps:$4 sm:$0xff]  }
 0xaf1   : > { %4087 = vmatprep.subr.bf16.mxu0 %v7064_v33  ;;  %v3993_v33 = vpack.c.bf16 %v9826_v3, %v9826_v3  ;;  %v7093_v3 = vld [vmem:[%s11858_s10 + $0x310] ss:$8 sps:$4 sm:$0xff]  }
 0xaf4   : > { %4088 = vmatpush1.bf16.msra.mxu0 %v7065_v8  ;;  %v7090_v8 = vld [vmem:[%s11858_s10 + $0x304] ss:$8 sps:$4 sm:$0xff]  }
 0xaf5   : > { %4089 = vmatprep.subr.bf16.mxu0 %v7066_v49  ;;  %v3998_v49 = vpack.c.bf16 %v9834_v50, %v9834_v50  ;;  %v7094_v50 = vld [vmem:[%s11858_s10 + $0x324] ss:$8 sps:$4 sm:$0xff]  }
 0xaf8   : > { %4090 = vmatpush1.bf16.msra.mxu0 %v7067_v37  ;;  %v7091_v37 = vld [vmem:[%s11858_s10 + $0x300] ss:$8 sps:$4 sm:$0xff]  }
 0xaf9   : > { %4091 = vmatprep.subr.bf16.mxu0 %v7068_v51  ;;  %v7092_v51 = vld [vmem:[%s11858_s10 + $0x314] ss:$8 sps:$4 sm:$0xff]  }
 0xafc   : > { %4092 = vmatpush1.bf16.msra.mxu0 %v7069_v5  ;;  %v7095_v5 = vld [vmem:[%s11858_s10 + $0x320] ss:$8 sps:$4 sm:$0xff]  }
 0xafd   : > { %4093 = vmatprep.subr.bf16.mxu0 %v7070_v55  ;;  %v7096_v55 = vld [vmem:[%s11858_s10 + $0x334] ss:$8 sps:$4 sm:$0xff]  }
 0xb00   : > { %4094 = vmatpush1.bf16.msra.mxu0 %v7071_v15  ;;  %v7097_v15 = vld [vmem:[%s11858_s10 + $0x330] ss:$8 sps:$4 sm:$0xff]  }
 0xb01   : > { %4095 = vmatprep.subr.bf16.mxu0 %v7072_v58  ;;  %v7098_v58 = vld [vmem:[%s11858_s10 + $0x344] ss:$8 sps:$4 sm:$0xff]  }
 0xb04   : > { %4096 = vmatpush1.bf16.msra.mxu0 %v7073_v56  ;;  %v7099_v56 = vld [vmem:[%s11858_s10 + $0x340] ss:$8 sps:$4 sm:$0xff]  }
 0xb05   : > { %4097 = vmatprep.subr.bf16.mxu0 %v7074_v19  ;;  %v7100_v19 = vld [vmem:[%s11858_s10 + $0x354] ss:$8 sps:$4 sm:$0xff]  }
 0xb08   : > { %4098 = vmatpush1.bf16.msra.mxu0 %v7075_v41  ;;  %v7101_v41 = vld [vmem:[%s11858_s10 + $0x350] ss:$8 sps:$4 sm:$0xff]  }
 0xb09   : > { %4099 = vmatprep.subr.bf16.mxu0 %v7076_v52  ;;  %v7102_v52 = vld [vmem:[%s11858_s10 + $0x364] ss:$8 sps:$4 sm:$0xff]  }
 0xb0c   : > { %4100 = vmatpush1.bf16.msra.mxu0 %v7077_v6  ;;  %v7103_v6 = vld [vmem:[%s11858_s10 + $0x360] ss:$8 sps:$4 sm:$0xff]  }
 0xb0d   : > { %4101 = vmatprep.subr.bf16.mxu0 %v7078_v47  ;;  %v7104_v47 = vld [vmem:[%s11858_s10 + $0x374] ss:$8 sps:$4 sm:$0xff]  }
 0xb10   : > { %4102 = vmatpush1.bf16.msra.mxu0 %v7079_v25  ;;  %v7105_v25 = vld [vmem:[%s11858_s10 + $0x370] ss:$8 sps:$4 sm:$0xff]  }
 0xb11   : > { %4103 = vmatprep.subr.bf16.mxu0 %v7080_v1  ;;  %v7106_v1 = vld [vmem:[%s11858_s10 + $0x384] ss:$8 sps:$4 sm:$0xff]  }
 0xb14   : > { %4104 = vmatpush1.bf16.msra.mxu0 %v7081_v48  ;;  %v7107_v48 = vld [vmem:[%s11858_s10 + $0x380] ss:$8 sps:$4 sm:$0xff]  }
 0xb15   : > { %4105 = vmatprep.subr.bf16.mxu0 %v7082_v46  ;;  %v7108_v46 = vld [vmem:[%s11858_s10 + $0x394] ss:$8 sps:$4 sm:$0xff]  }
 0xb18   : > { %4106 = vmatpush1.bf16.msra.mxu0 %v7083_v7  ;;  %v7109_v7 = vld [vmem:[%s11858_s10 + $0x390] ss:$8 sps:$4 sm:$0xff]  }
 0xb19   : > { %4107 = vmatprep.subr.bf16.mxu0 %v7084_v11  ;;  %v7110_v11 = vld [vmem:[%s11858_s10 + $0x3a4] ss:$8 sps:$4 sm:$0xff]  }
 0xb1c   : > { %4108 = vmatpush1.bf16.msra.mxu0 %v7085_v24  ;;  %v7111_v24 = vld [vmem:[%s11858_s10 + $0x3a0] ss:$8 sps:$4 sm:$0xff]  }
 0xb1d   : > { %4109 = vmatprep.subr.bf16.mxu0 %v7086_v12  ;;  %v7112_v12 = vld [vmem:[%s11858_s10 + $0x3b4] ss:$8 sps:$4 sm:$0xff]  }
 0xb20   : > { %4110 = vmatpush1.bf16.msra.mxu0 %v7087_v45  ;;  %v7113_v45 = vld [vmem:[%s11858_s10 + $0x3b0] ss:$8 sps:$4 sm:$0xff]  }
 0xb21   : > { %4111 = vmatprep.subr.bf16.mxu0 %v7088_v32  ;;  %v7114_v32 = vld [vmem:[%s11858_s10 + $0x3c4] ss:$8 sps:$4 sm:$0xff]  }
 0xb24   : > { %4112 = vmatpush1.bf16.msra.mxu0 %v7089_v9  ;;  %v7115_v9 = vld [vmem:[%s11858_s10 + $0x3c0] ss:$8 sps:$4 sm:$0xff]  }
 0xb25   : > { %4122 = vmatprep.subr.bf16.mxu0 %v7090_v8  ;;  %v7117_v8 = vld [vmem:[%s11858_s10 + $0x3d0] ss:$8 sps:$4 sm:$0xff]  }
 0xb27   : > { %4114 = vmatmul.mubr.bf16.vlgmr.msra.gmra.mrb[40].mxu0 %v3993_v33  ;;  %v7116_v33 = vld [vmem:[%s11858_s10 + $0x3d4] ss:$8 sps:$4 sm:$0xff]  }
 0xb28   : > { %4123 = vmatpush1.bf16.msra.mxu0 %v7091_v37  ;;  %4154 = vmatprep.mubr.bf16.mxu0 %v3998_v49  ;;  %v7118_v49 = vld [vmem:[%s11858_s10 + $0x3e4] ss:$8 sps:$4 sm:$0xff]   ;;  %v7119_v37 = vld [vmem:[%s11858_s10 + $0x3e0] ss:$8 sps:$4 sm:$0xff]  }
 0xb29   : > { %4124 = vmatprep.subr.bf16.mxu0 %v7092_v51  ;;  %v7120_v51 = vld [vmem:[%s11858_s10 + $0x3f4] ss:$8 sps:$4 sm:$0xff]  }
 0xb2c   : > { %4125 = vmatpush1.bf16.msra.mxu0 %v7093_v3  ;;  %v7121_v3 = vld [vmem:[%s11858_s10 + $0x3f0] ss:$8 sps:$4 sm:$0xff]  }
 0xb2d   : > { %4126 = vmatprep.subr.bf16.mxu0 %v7094_v50  ;;  %v3997_v50 = vpack.c.bf16 %v9828_v2, %v9828_v2  ;;  %v12225_v2 = vld [vmem:[#allocation83_spill] sm:$0xff] }
 0xb30   : > { %4127 = vmatpush1.bf16.msra.mxu0 %v7095_v5  ;;  %v12218_v5 = vld [vmem:[#allocation74_spill] sm:$0xff] }
 0xb31   : > { %4128 = vmatprep.subr.bf16.mxu0 %v7096_v55  ;;  %v12219_v55 = vld [vmem:[#allocation77_spill] sm:$0xff] }
 0xb34   : > { %4129 = vmatpush1.bf16.msra.mxu0 %v7097_v15  ;;  %v12220_v15 = vld [vmem:[#allocation78_spill] sm:$0xff] }
 0xb35   : > { %4130 = vmatprep.subr.bf16.mxu0 %v7098_v58  ;;  %v12221_v58 = vld [vmem:[#allocation79_spill] sm:$0xff] }
 0xb38   : > { %4131 = vmatpush1.bf16.msra.mxu0 %v7099_v56  ;;  %v12222_v56 = vld [vmem:[#allocation80_spill] sm:$0xff] }
 0xb39   : > { %4132 = vmatprep.subr.bf16.mxu0 %v7100_v19  ;;  %v12223_v19 = vld [vmem:[#allocation81_spill] sm:$0xff] }
 0xb3c   : > { %4133 = vmatpush1.bf16.msra.mxu0 %v7101_v41  ;;  %v12224_v41 = vld [vmem:[#allocation82_spill] sm:$0xff] }
 0xb3d   : > { %4134 = vmatprep.subr.bf16.mxu0 %v7102_v52  ;;  %v12226_v52 = vld [vmem:[#allocation84_spill] sm:$0xff] }
 0xb40   : > { %4135 = vmatpush1.bf16.msra.mxu0 %v7103_v6  ;;  %v12227_v6 = vld [vmem:[#allocation85_spill] sm:$0xff] }
 0xb41   : > { %4136 = vmatprep.subr.bf16.mxu0 %v7104_v47  ;;  %v12230_v47 = vld [vmem:[#allocation88_spill] sm:$0xff] }
 0xb44   : > { %4137 = vmatpush1.bf16.msra.mxu0 %v7105_v25  ;;  %v12231_v25 = vld [vmem:[#allocation89_spill] sm:$0xff] }
 0xb45   : > { %4138 = vmatprep.subr.bf16.mxu0 %v7106_v1  ;;  %v12232_v1 = vld [vmem:[#allocation90_spill] sm:$0xff] }
 0xb48   : > { %4139 = vmatpush1.bf16.msra.mxu0 %v7107_v48  ;;  %v12233_v48 = vld [vmem:[#allocation91_spill] sm:$0xff] }
 0xb49   : > { %4140 = vmatprep.subr.bf16.mxu0 %v7108_v46  ;;  %v12234_v46 = vld [vmem:[#allocation92_spill] sm:$0xff] }
 0xb4c   : > { %4141 = vmatpush1.bf16.msra.mxu0 %v7109_v7  ;;  %v12235_v7 = vld [vmem:[#allocation93_spill] sm:$0xff] }
 0xb4d   : > { %4142 = vmatprep.subr.bf16.mxu0 %v7110_v11  ;;  %v12236_v11 = vld [vmem:[#allocation94_spill] sm:$0xff] }
 0xb50   : > { %4143 = vmatpush1.bf16.msra.mxu0 %v7111_v24  ;;  %v12237_v24 = vld [vmem:[#allocation95_spill] sm:$0xff] }
 0xb51   : > { %4144 = vmatprep.subr.bf16.mxu0 %v7112_v12  ;;  %v12238_v12 = vld [vmem:[#allocation96_spill] sm:$0xff] }
 0xb54   : > { %4145 = vmatpush1.bf16.msra.mxu0 %v7113_v45  ;;  %v12239_v45 = vld [vmem:[#allocation97_spill] sm:$0xff] }
 0xb55   : > { %4146 = vmatprep.subr.bf16.mxu0 %v7114_v32  ;;  %v12240_v32 = vld [vmem:[#allocation98_spill] sm:$0xff] }
 0xb58   : > { %4147 = vmatpush1.bf16.msra.mxu0 %v7115_v9  ;;  %v12241_v9 = vld [vmem:[#allocation99_spill] sm:$0xff] }
 0xb59   : > { %4148 = vmatprep.subr.bf16.mxu0 %v7116_v33  ;;  %v12242_v33 = vld [vmem:[#allocation100_spill] sm:$0xff] }
 0xb5c   : > { %4149 = vmatpush1.bf16.msra.mxu0 %v7117_v8  ;;  %v12243_v8 = vld [vmem:[#allocation101_spill] sm:$0xff] }
 0xb5d   : > { %4150 = vmatprep.subr.bf16.mxu0 %v7118_v49  ;;  %v12244_v49 = vld [vmem:[#allocation102_spill] sm:$0xff] }
 0xb60   : > { %4151 = vmatpush1.bf16.msra.mxu0 %v7119_v37  ;;  %v12245_v37 = vld [vmem:[#allocation103_spill] sm:$0xff] }
 0xb61   : > { %4152 = vmatprep.subr.bf16.mxu0 %v7120_v51  ;;  %v12246_v51 = vld [vmem:[#allocation104_spill] sm:$0xff] }
 0xb64   : > { %4153 = vmatpush1.bf16.msra.mxu0 %v7121_v3  ;;  %v12247_v3 = vld [vmem:[#allocation105_spill] sm:$0xff] }
 0xb65   : > { %4213 = vmatprep.subr.bf16.mxu0 %v12218_v5 }
 0xb67   : > { %4155 = vmatmul.mubr.bf16.vlgmr.msra.gmra.mrb[40].mxu0 %v3997_v50  ;;  %v7122_v50 = vld [vmem:[%s11860_s12 + $0x4] ss:$8 sps:$4 sm:$0xff]  }
 0xb68   : > { %4214 = vmatpush1.bf16.msra.mxu0 %v9350_v20  ;;  %v12228_v20 = vld [vmem:[#allocation86_spill] sm:$0xff] }
 0xb69   : > { %4215 = vmatprep.subr.bf16.mxu0 %v9356_v34  ;;  %v12229_v34 = vld [vmem:[#allocation87_spill] sm:$0xff] }
 0xb6c   : > { %4216 = vmatpush1.bf16.msra.mxu0 %v12219_v55  ;;  %v12248_v55 = vld [vmem:[#allocation75_spill] sm:$0xff] }
 0xb6d   : > { %4217 = vmatprep.subr.bf16.mxu0 %v12220_v15 }
 0xb70   : > { %4218 = vmatpush1.bf16.msra.mxu0 %v12221_v58 }
 0xb71   : > { %4219 = vmatprep.subr.bf16.mxu0 %v12222_v56  ;;  %v12249_v56 = vld [vmem:[#allocation76_spill] sm:$0xff] }
 0xb74   : > { %4220 = vmatpush1.bf16.msra.mxu0 %v12223_v19 }
 0xb75   : > { %4221 = vmatprep.subr.bf16.mxu0 %v12224_v41 }
 0xb78   : > { %4222 = vmatpush1.bf16.msra.mxu0 %v12225_v2 }
 0xb79   : > { %4223 = vmatprep.subr.bf16.mxu0 %v12226_v52 }
 0xb7c   : > { %4224 = vmatpush1.bf16.msra.mxu0 %v12227_v6 }
 0xb7d   : > { %4225 = vmatprep.subr.bf16.mxu0 %v12228_v20 }
 0xb80   : > { %4226 = vmatpush1.bf16.msra.mxu0 %v12229_v34 }
 0xb81   : > { %4227 = vmatprep.subr.bf16.mxu0 %v12230_v47  ;;  %v10171_v47 = vld [vmem:[%s11853_s5 + $0x8] ss:$16 sps:$4 sm:$0xff]  }
 0xb84   : > { %4228 = vmatpush1.bf16.msra.mxu0 %v12231_v25  ;;  %v10177_v25 = vld [vmem:[%s11853_s5 + $0x2c] ss:$16 sps:$4 sm:$0xff]  }
 0xb85   : > { %4229 = vmatprep.subr.bf16.mxu0 %v12232_v1  ;;  %v10183_v1 = vld [vmem:[%s11853_s5 + $0x28] ss:$16 sps:$4 sm:$0xff]  }
 0xb88   : > { %4230 = vmatpush1.bf16.msra.mxu0 %v12233_v48  ;;  %v10189_v48 = vld [vmem:[%s11853_s5 + $0x4c] ss:$16 sps:$4 sm:$0xff]  }
 0xb89   : > { %4231 = vmatprep.subr.bf16.mxu0 %v12234_v46  ;;  %v10195_v46 = vld [vmem:[%s11853_s5 + $0x48] ss:$16 sps:$4 sm:$0xff]  }
 0xb8c   : > { %4232 = vmatpush1.bf16.msra.mxu0 %v12235_v7  ;;  %v10201_v7 = vld [vmem:[%s11853_s5 + $0x6c] ss:$16 sps:$4 sm:$0xff]  }
 0xb8d   : > { %4233 = vmatprep.subr.bf16.mxu0 %v12236_v11  ;;  %v10207_v11 = vld [vmem:[%s11853_s5 + $0x68] ss:$16 sps:$4 sm:$0xff]  }
 0xb90   : > { %4234 = vmatpush1.bf16.msra.mxu0 %v12237_v24  ;;  %v10213_v24 = vld [vmem:[%s11853_s5 + $0x8c] ss:$16 sps:$4 sm:$0xff]  }
 0xb91   : > { %4235 = vmatprep.subr.bf16.mxu0 %v12238_v12  ;;  %v10219_v12 = vld [vmem:[%s11853_s5 + $0x88] ss:$16 sps:$4 sm:$0xff]  }
 0xb94   : > { %4236 = vmatpush1.bf16.msra.mxu0 %v12239_v45  ;;  %v10225_v45 = vld [vmem:[%s11853_s5 + $0xac] ss:$16 sps:$4 sm:$0xff]  }
 0xb95   : > { %4237 = vmatprep.subr.bf16.mxu0 %v12240_v32  ;;  %v10231_v32 = vld [vmem:[%s11853_s5 + $0xa8] ss:$16 sps:$4 sm:$0xff]  }
 0xb98   : > { %4238 = vmatpush1.bf16.msra.mxu0 %v12241_v9  ;;  %v10237_v9 = vld [vmem:[%s11853_s5 + $0xcc] ss:$16 sps:$4 sm:$0xff]  }
 0xb99   : > { %4239 = vmatprep.subr.bf16.mxu0 %v12242_v33  ;;  %v10243_v33 = vld [vmem:[%s11853_s5 + $0xc8] ss:$16 sps:$4 sm:$0xff]  }
 0xb9a   : > { %12250 = vst [vmem:[#allocation28_spill] sm:$0xff] %v10243_v33 }
 0xb9c   : > { %4240 = vmatpush1.bf16.msra.mxu0 %v12243_v8  ;;  %v10249_v8 = vld [vmem:[%s11853_s5 + $0xec] ss:$16 sps:$4 sm:$0xff]  }
 0xb9d   : > { %4241 = vmatprep.subr.bf16.mxu0 %v12244_v49  ;;  %12251 = vst [vmem:[#allocation30_spill] sm:$0xff] %v10249_v8  ;;  %v10255_v49 = vld [vmem:[%s11853_s5 + $0xe8] ss:$16 sps:$4 sm:$0xff]  }
 0xb9e   : > { %12252 = vst [vmem:[#allocation32_spill] sm:$0xff] %v10255_v49 }
 0xba0   : > { %4242 = vmatpush1.bf16.msra.mxu0 %v12245_v37  ;;  %v10261_v37 = vld [vmem:[%s11853_s5 + $0x10c] ss:$16 sps:$4 sm:$0xff]  }
 0xba1   : > { %4243 = vmatprep.subr.bf16.mxu0 %v12246_v51  ;;  %12253 = vst [vmem:[#allocation15_spill] sm:$0xff] %v10261_v37  ;;  %v10267_v51 = vld [vmem:[%s11853_s5 + $0x108] ss:$16 sps:$4 sm:$0xff]  }
 0xba2   : > { %12254 = vst [vmem:[#allocation72_spill] sm:$0xff] %v10267_v51 }
 0xba4   : > { %4244 = vmatpush1.bf16.msra.mxu0 %v12247_v3  ;;  %v10273_v3 = vld [vmem:[%s11853_s5 + $0x12c] ss:$16 sps:$4 sm:$0xff]  }
 0xba5   : > { %4798 = vmatprep.subr.bf16.mxu0 %v7122_v50  ;;  %12255 = vst [vmem:[#allocation73_spill] sm:$0xff] %v10273_v3  ;;  %v10279_v50 = vld [vmem:[%s11853_s5 + $0x128] ss:$16 sps:$4 sm:$0xff]  }
 0xba6   : > { %12256 = vst [vmem:[#allocation74_spill] sm:$0xff] %v10279_v50 }
 0xc3a   : > { %v4156_v5 = vpop.f32.mrb[40].mxu0 }
 0xc3b   : > { %v6152_v15 = vadd.f32 %v4156_v5, %v12248_v55  ;;  %v4158_v58 = vpop.f32.mrb[41].mxu0  ;;  %v10285_v5 = vld [vmem:[%s11853_s5 + $0x14c] ss:$16 sps:$4 sm:$0xff]   ;;  %v10351_v55 = vld [vmem:[%s11853_s5 + $0x1e8] ss:$16 sps:$4 sm:$0xff]  }
 0xc3c   : > { %v6153_v19 = vadd.f32 %v4158_v58, %v12249_v56  ;;  %v4160_v41 = vpop.f32.mrb[42].mxu0  ;;  %12257 = vst [vmem:[#allocation77_spill] sm:$0xff] %v10285_v5  ;;  %v10297_v58 = vld [vmem:[%s11853_s5 + $0x16c] ss:$16 sps:$4 sm:$0xff]   ;;  %12268 = vst [vmem:[#allocation88_spill] sm:$0xff] %v10351_v55 }
 0xc3d   : > { %6793 = vtanh.f32 %v6152_v15  ;;  %v4161_v2 = vpop.f32.mrb[43].mxu0  ;;  %v10291_v15 = vld [vmem:[%s11853_s5 + $0x148] ss:$16 sps:$4 sm:$0xff]   ;;  %12259 = vst [vmem:[#allocation79_spill] sm:$0xff] %v10297_v58  ;;  %v10309_v41 = vld [vmem:[%s11853_s5 + $0x18c] ss:$16 sps:$4 sm:$0xff]  }
 0xc3e   : > { %6795 = vtanh.f32 %v6153_v19  ;;  %12258 = vst [vmem:[#allocation78_spill] sm:$0xff] %v10291_v15  ;;  %v10303_v19 = vld [vmem:[%s11853_s5 + $0x168] ss:$16 sps:$4 sm:$0xff]   ;;  %12261 = vst [vmem:[#allocation81_spill] sm:$0xff] %v10309_v41  ;;  %v10345_v56 = vld [vmem:[%s11853_s5 + $0x1ec] ss:$16 sps:$4 sm:$0xff]  }
 0xc3f   : > { %12260 = vst [vmem:[#allocation80_spill] sm:$0xff] %v10303_v19  ;;  %v10315_v2 = vld [vmem:[%s11853_s5 + $0x188] ss:$16 sps:$4 sm:$0xff]   ;;  %12267 = vst [vmem:[#allocation87_spill] sm:$0xff] %v10345_v56 }
 0xc40   : > { %12262 = vst [vmem:[#allocation82_spill] sm:$0xff] %v10315_v2 }
 0xc47   : > { %v6794_v52 = vpop.eup %6793 }
 0xc48   : > { %v6796_v6 = vpop.eup %6795  ;;  %v4165_v34 = vpack.c.bf16 %v6794_v52, %v6794_v52  ;;  %v10321_v52 = vld [vmem:[%s11853_s5 + $0x1ac] ss:$16 sps:$4 sm:$0xff]  }
 0xc49   : > { %v4166_v20 = vpack.c.bf16 %v6796_v6, %v6796_v6  ;;  %12263 = vst [vmem:[#allocation83_spill] sm:$0xff] %v10321_v52  ;;  %v10327_v6 = vld [vmem:[%s11853_s5 + $0x1a8] ss:$16 sps:$4 sm:$0xff]  }
 0xc4a   : > { %12264 = vst [vmem:[#allocation84_spill] sm:$0xff] %v10327_v6 }
 0xc4b   : > { %4199 = vmatprep.mubr.bf16.mxu1 %v4166_v20  ;;  %v10333_v20 = vld [vmem:[%s11853_s5 + $0x1cc] ss:$16 sps:$4 sm:$0xff]  }
 0xc4c   : > { %4200 = vmatmul.mubr.bf16.vlgmr.msra.gmra.mrb[52].mxu1 %v4165_v34  ;;  %12265 = vst [vmem:[#allocation85_spill] sm:$0xff] %v10333_v20  ;;  %v10339_v34 = vld [vmem:[%s11853_s5 + $0x1c8] ss:$16 sps:$4 sm:$0xff]  }
 0xc4d   : > { %4257 = vmatpush1.bf16.msra.mxu1 %v10171_v47  ;;  %12266 = vst [vmem:[#allocation86_spill] sm:$0xff] %v10339_v34 }
 0xc4e   : > { %4258 = vmatprep.subr.bf16.mxu1 %v10177_v25 }
 0xc51   : > { %4259 = vmatpush1.bf16.msra.mxu1 %v10183_v1 }
 0xc52   : > { %4260 = vmatprep.subr.bf16.mxu1 %v10189_v48 }
 0xc55   : > { %4261 = vmatpush1.bf16.msra.mxu1 %v10195_v46 }
 0xc56   : > { %4262 = vmatprep.subr.bf16.mxu1 %v10201_v7 }
 0xc59   : > { %4263 = vmatpush1.bf16.msra.mxu1 %v10207_v11 }
 0xc5a   : > { %4264 = vmatprep.subr.bf16.mxu1 %v10213_v24 }
 0xc5d   : > { %4265 = vmatpush1.bf16.msra.mxu1 %v10219_v12 }
 0xc5e   : > { %4266 = vmatprep.subr.bf16.mxu1 %v10225_v45 }
 0xc61   : > { %4267 = vmatpush1.bf16.msra.mxu1 %v10231_v32 }
 0xc62   : > { %4268 = vmatprep.subr.bf16.mxu1 %v10237_v9 }
 0xc65   : > { %4269 = vmatpush1.bf16.msra.mxu1 %v10243_v33 }
 0xc66   : > { %4270 = vmatprep.subr.bf16.mxu1 %v10249_v8 }
 0xc69   : > { %4271 = vmatpush1.bf16.msra.mxu1 %v10255_v49  ;;  %v6133_v49 = vld [vmem:[#allocation2 + $0xb0] sm:$0xff] }
 0xc6a   : > { %4272 = vmatprep.subr.bf16.mxu1 %v10261_v37 }
 0xc6d   : > { %4273 = vmatpush1.bf16.msra.mxu1 %v10267_v51  ;;  %v6127_v51 = vld [vmem:[#allocation2 + $0x90] sm:$0xff] }
 0xc6e   : > { %4274 = vmatprep.subr.bf16.mxu1 %v10273_v3 }
 0xc71   : > { %4275 = vmatpush1.bf16.msra.mxu1 %v10279_v50 }
 0xc72   : > { %4276 = vmatprep.subr.bf16.mxu1 %v10285_v5 }
 0xc75   : > { %4277 = vmatpush1.bf16.msra.mxu1 %v10291_v15 }
 0xc76   : > { %4278 = vmatprep.subr.bf16.mxu1 %v10297_v58  ;;  %v4211_v58 = vpack.c.bf16 %v9639_v57, %v9637_v10  ;;  %v7158_v10 = vld [vmem:[%s11860_s12 + $0x14] ss:$8 sps:$4 sm:$0xff]   ;;  %v7159_v57 = vld [vmem:[%s11854_s6 + $0x8] sm:$0xff]  }
 0xc79   : > { %4279 = vmatpush1.bf16.msra.mxu1 %v10303_v19 }
 0xc7a   : > { %4280 = vmatprep.subr.bf16.mxu1 %v10309_v41 }
 0xc7d   : > { %4281 = vmatpush1.bf16.msra.mxu1 %v10315_v2 }
 0xc7e   : > { %4282 = vmatprep.subr.bf16.mxu1 %v10321_v52 }
 0xc81   : > { %4283 = vmatpush1.bf16.msra.mxu1 %v10327_v6 }
 0xc82   : > { %4284 = vmatprep.subr.bf16.mxu1 %v10333_v20  ;;  %v7154_v20 = vld [vmem:[%s11854_s6 + $0x40] sm:$0xff]  }
 0xc85   : > { %4285 = vmatpush1.bf16.msra.mxu1 %v10339_v34 }
 0xc86   : > { %4286 = vmatprep.subr.bf16.mxu1 %v10345_v56 }
 0xc89   : > { %4287 = vmatpush1.bf16.msra.mxu1 %v10351_v55 }
 0xc8a   : > { %6022 = vmatprep.subr.bf16.mxu1 %v7154_v20  ;;  %v7155_v20 = vld [vmem:[%s11854_s6] sm:$0xff]  }
 0xd1f   : > { %v4201_v34 = vpop.f32.mrb[52].mxu1 }
 0xd20   : > { %v4202_v6 = vadd.f32 %v4201_v34, %v9540_v59  ;;  %v4203_v52 = vpop.f32.mrb[53].mxu1  ;;  %v7165_v34 = vld [vmem:[%s11854_s6 + $0x58] sm:$0xff]  }
 0xd21   : > { %v4204_v2 = vadd.f32 %v4203_v52, %v9543_v0  ;;  %v4205_v41 = vpop.f32.mrb[54].mxu1  ;;  %v7163_v52 = vld [vmem:[%s11854_s6 + $0x10] sm:$0xff]  }
 0xd22   : > { %5952 = vst [vmem:[%s7769_s15 + $0x10] sm:$0xff] %v4202_v6  ;;  %v4206_v56 = vpop.f32.mrb[55].mxu1  ;;  %v7156_v41 = vld [vmem:[%s11860_s12] ss:$8 sps:$4 sm:$0xff]  }
 0xd23   : > { %5953 = vst [vmem:[%s7769_s15 + $0x18] sm:$0xff] %v4204_v2  ;;  %v4212_v19 = vpack.c.bf16 %v4204_v2, %v4202_v6  ;;  %v7157_v56 = vld [vmem:[%s11854_s6 + $0x48] sm:$0xff]  }
 0xd24   : > { %v7162_v2 = vld [vmem:[%s11860_s12 + $0x24] ss:$8 sps:$4 sm:$0xff]   ;;  %v7164_v6 = vld [vmem:[%s11860_s12 + $0x20] ss:$8 sps:$4 sm:$0xff]  }
 0xd25   : > { %4245 = vmatprep.mubr.bf16.mxu0 %v4212_v19  ;;  %4288 = vmatprep.mubr.bf16.mxu1 %v4212_v19  ;;  %v7161_v19 = vld [vmem:[%s11854_s6 + $0x50] sm:$0xff]  }
 0xd26   : > { %4246 = vmatmul.mubr.bf16.vlgmr.msra.gmra.mrb[44].mxu0 %v4211_v58  ;;  %4289 = vmatmul.mubr.bf16.vlgmr.msra.gmra.mrb[24].mxu1 %v4211_v58  ;;  %v7160_v58 = vld [vmem:[%s11860_s12 + $0x10] ss:$8 sps:$4 sm:$0xff]  }
 0xd27   : > { %6023 = vmatpush3.bf16.msra.mxu1 %v7155_v20  ;;  %4799 = vmatpush1.bf16.msra.mxu0 %v7156_v41  ;;  %v7166_v20 = vld [vmem:[%s11860_s12 + $0x34] ss:$8 sps:$4 sm:$0xff]  }
 0xd28   : > { %6024 = vmatprep.subr.bf16.mxu1 %v7157_v56  ;;  %4800 = vmatprep.subr.bf16.mxu0 %v7158_v10  ;;  %v7167_v41 = vld [vmem:[%s11854_s6 + $0x18] sm:$0xff]   ;;  %v7169_v10 = vld [vmem:[%s11854_s6 + $0x60] sm:$0xff]  }
 0xd29   : > { %v7168_v56 = vld [vmem:[%s11860_s12 + $0x30] ss:$8 sps:$4 sm:$0xff]  }
 0xd2b   : > { %6025 = vmatpush3.bf16.msra.mxu1 %v7159_v57  ;;  %4801 = vmatpush1.bf16.msra.mxu0 %v7160_v58  ;;  %v7170_v57 = vld [vmem:[%s11860_s12 + $0x44] ss:$8 sps:$4 sm:$0xff]  }
 0xd2c   : > { %6026 = vmatprep.subr.bf16.mxu1 %v7161_v19  ;;  %4802 = vmatprep.subr.bf16.mxu0 %v7162_v2  ;;  %v7171_v58 = vld [vmem:[%s11854_s6 + $0x20] sm:$0xff]   ;;  %v7173_v2 = vld [vmem:[%s11854_s6 + $0x68] sm:$0xff]  }
 0xd2d   : > { %v7172_v19 = vld [vmem:[%s11860_s12 + $0x40] ss:$8 sps:$4 sm:$0xff]  }
 0xd2f   : > { %6027 = vmatpush3.bf16.msra.mxu1 %v7163_v52  ;;  %4803 = vmatpush1.bf16.msra.mxu0 %v7164_v6  ;;  %v7174_v52 = vld [vmem:[%s11860_s12 + $0x54] ss:$8 sps:$4 sm:$0xff]   ;;  %v7175_v6 = vld [vmem:[%s11854_s6 + $0x28] sm:$0xff]  }
 0xd30   : > { %6028 = vmatprep.subr.bf16.mxu1 %v7165_v34  ;;  %4804 = vmatprep.subr.bf16.mxu0 %v7166_v20  ;;  %v7176_v34 = vld [vmem:[%s11860_s12 + $0x50] ss:$8 sps:$4 sm:$0xff]  }
 0xd31   : > { %v7177_v20 = vld [vmem:[%s11854_s6 + $0x70] sm:$0xff]  }
 0xd33   : > { %6029 = vmatpush3.bf16.msra.mxu1 %v7167_v41  ;;  %4805 = vmatpush1.bf16.msra.mxu0 %v7168_v56  ;;  %v7178_v41 = vld [vmem:[%s11860_s12 + $0x64] ss:$8 sps:$4 sm:$0xff]   ;;  %v7179_v56 = vld [vmem:[%s11854_s6 + $0x30] sm:$0xff]  }
 0xd34   : > { %6030 = vmatprep.subr.bf16.mxu1 %v7169_v10  ;;  %4806 = vmatprep.subr.bf16.mxu0 %v7170_v57  ;;  %v7180_v10 = vld [vmem:[%s11860_s12 + $0x60] ss:$8 sps:$4 sm:$0xff]   ;;  %v7181_v57 = vld [vmem:[%s11854_s6 + $0x78] sm:$0xff]  }
 0xd37   : > { %6031 = vmatpush3.bf16.msra.mxu1 %v7171_v58  ;;  %4807 = vmatpush1.bf16.msra.mxu0 %v7172_v19  ;;  %v7182_v58 = vld [vmem:[%s11860_s12 + $0x74] ss:$8 sps:$4 sm:$0xff]  }
 0xd38   : > { %6032 = vmatprep.subr.bf16.mxu1 %v7173_v2  ;;  %4808 = vmatprep.subr.bf16.mxu0 %v7174_v52  ;;  %v7183_v19 = vld [vmem:[%s11854_s6 + $0x38] sm:$0xff]   ;;  %v7185_v52 = vld [vmem:[%s11860_s12 + $0x84] ss:$8 sps:$4 sm:$0xff]  }
 0xd39   : > { %v7184_v2 = vld [vmem:[%s11860_s12 + $0x70] ss:$8 sps:$4 sm:$0xff]  }
 0xd3b   : > { %6033 = vmatpush3.bf16.msra.mxu1 %v7175_v6  ;;  %4809 = vmatpush1.bf16.msra.mxu0 %v7176_v34  ;;  %v7186_v6 = vld [vmem:[%s11860_s12 + $0x80] ss:$8 sps:$4 sm:$0xff]   ;;  %v7187_v34 = vld [vmem:[%s11860_s12 + $0x94] ss:$8 sps:$4 sm:$0xff]  }
 0xd3c   : > { %6034 = vmatprep.subr.bf16.mxu1 %v7177_v20  ;;  %4810 = vmatprep.subr.bf16.mxu0 %v7178_v41  ;;  %v7188_v20 = vld [vmem:[%s11860_s12 + $0x90] ss:$8 sps:$4 sm:$0xff]   ;;  %v7189_v41 = vld [vmem:[%s11860_s12 + $0xa4] ss:$8 sps:$4 sm:$0xff]  }
 0xd3f   : > { %6035 = vmatpush3.bf16.msra.mxu1 %v7179_v56  ;;  %4811 = vmatpush1.bf16.msra.mxu0 %v7180_v10  ;;  %v7190_v56 = vld [vmem:[%s11860_s12 + $0xa0] ss:$8 sps:$4 sm:$0xff]   ;;  %v7191_v10 = vld [vmem:[%s11860_s12 + $0xb4] ss:$8 sps:$4 sm:$0xff]  }
 0xd40   : > { %6036 = vmatprep.subr.bf16.mxu1 %v7181_v57  ;;  %4812 = vmatprep.subr.bf16.mxu0 %v7182_v58  ;;  %v7192_v57 = vld [vmem:[%s11860_s12 + $0xb0] ss:$8 sps:$4 sm:$0xff]   ;;  %v7193_v58 = vld [vmem:[%s11860_s12 + $0xc4] ss:$8 sps:$4 sm:$0xff]  }
 0xd43   : > { %6037 = vmatpush3.bf16.msra.mxu1 %v7183_v19  ;;  %4813 = vmatpush1.bf16.msra.mxu0 %v7184_v2  ;;  %v7194_v19 = vld [vmem:[%s11860_s12 + $0xc0] ss:$8 sps:$4 sm:$0xff]   ;;  %v7195_v2 = vld [vmem:[%s11860_s12 + $0xd4] ss:$8 sps:$4 sm:$0xff]  }
 0xd44   : > { %4408 = vmatprep.subr.bf16.mxu1 %v8194_v28  ;;  %4814 = vmatprep.subr.bf16.mxu0 %v7185_v52  ;;  %v7196_v52 = vld [vmem:[%s11860_s12 + $0xd0] ss:$8 sps:$4 sm:$0xff]   ;;  %v6096_v28 = vld [vmem:[#allocation2 + $0xa8] sm:$0xff] }
 0xd47   : > { %4815 = vmatpush1.bf16.msra.mxu0 %v7186_v6  ;;  %v7197_v6 = vld [vmem:[%s11860_s12 + $0xe4] ss:$8 sps:$4 sm:$0xff]  }
 0xd48   : > { %4816 = vmatprep.subr.bf16.mxu0 %v7187_v34  ;;  %v7198_v34 = vld [vmem:[%s11860_s12 + $0xe0] ss:$8 sps:$4 sm:$0xff]  }
 0xd4b   : > { %4817 = vmatpush1.bf16.msra.mxu0 %v7188_v20  ;;  %v7199_v20 = vld [vmem:[%s11860_s12 + $0xf4] ss:$8 sps:$4 sm:$0xff]  }
 0xd4c   : > { %4818 = vmatprep.subr.bf16.mxu0 %v7189_v41  ;;  %v7200_v41 = vld [vmem:[%s11860_s12 + $0xf0] ss:$8 sps:$4 sm:$0xff]  }
 0xd4f   : > { %4819 = vmatpush1.bf16.msra.mxu0 %v7190_v56  ;;  %v7201_v56 = vld [vmem:[%s11853_s5 + $0x4] ss:$16 sps:$4 sm:$0xff]  }
 0xd50   : > { %4820 = vmatprep.subr.bf16.mxu0 %v7191_v10  ;;  %v6084_v10 = vld [vmem:[#allocation2 + $0x80] sm:$0xff] }
 0xd53   : > { %4821 = vmatpush1.bf16.msra.mxu0 %v7192_v57  ;;  %v6088_v57 = vld [vmem:[#allocation2 + $0x88] sm:$0xff] }
 0xd54   : > { %4822 = vmatprep.subr.bf16.mxu0 %v7193_v58 }
 0xd57   : > { %4823 = vmatpush1.bf16.msra.mxu0 %v7194_v19 }
 0xd58   : > { %4824 = vmatprep.subr.bf16.mxu0 %v7195_v2  ;;  %v6092_v2 = vld [vmem:[#allocation2 + $0xa0] sm:$0xff] }
 0xd5b   : > { %4825 = vmatpush1.bf16.msra.mxu0 %v7196_v52 }
 0xd5c   : > { %4826 = vmatprep.subr.bf16.mxu0 %v7197_v6 }
 0xd5f   : > { %4827 = vmatpush1.bf16.msra.mxu0 %v7198_v34 }
 0xd60   : > { %4828 = vmatprep.subr.bf16.mxu0 %v7199_v20 }
 0xd63   : > { %4829 = vmatpush1.bf16.msra.mxu0 %v7200_v41 }
 0xd64   : > { %4844 = vmatprep.subr.bf16.mxu0 %v7201_v56 }
 0xdf9   : > { %v4247_v58 = vpop.f32.mrb[44].mxu0  ;;  %v4290_v19 = vpop.f32.mrb[24].mxu1 }
 0xdfa   : > { %v6085_v52 = vadd.f32 %v6084_v10, %v4247_v58  ;;  %v4249_v6 = vpop.f32.mrb[45].mxu0  ;;  %v4292_v34 = vpop.f32.mrb[25].mxu1  ;;  %v6128_v10 = vadd.f32 %v6127_v51, %v4290_v19  ;;  %v6130_v58 = vld [vmem:[#allocation2 + $0x98] sm:$0xff] }
 0xdfb   : > { %v6089_v20 = vadd.f32 %v6088_v57, %v4249_v6  ;;  %v4251_v0 = vpop.f32.mrb[46].mxu0  ;;  %v4294_v59 = vpop.f32.mrb[26].mxu1  ;;  %v6131_v57 = vadd.f32 %v6130_v58, %v4292_v34 }
 0xdfc   : > { %v5954_v55 = vmul.f32 -1.442695, %v6085_v52  ;;  %v6093_v15 = vadd.f32 %v6092_v2, %v4251_v0  ;;  %v4253_v41 = vpop.f32.mrb[47].mxu0  ;;  %v4296_v5 = vpop.f32.mrb[27].mxu1  ;;  %v6134_v8 = vadd.f32 %v6133_v49, %v4294_v59  ;;  %v5956_v6 = vmul.f32 -1.442695, %v6128_v10 }
 0xdfd   : > { %v5955_v50 = vmul.f32 -1.442695, %v6089_v20  ;;  %v6097_v3 = vadd.f32 %v6096_v28, %v4253_v41  ;;  %v6136_v0 = vld [vmem:[#allocation2 + $0xb8] sm:$0xff] }
 0xdfe   : > { %6797 = vpow2.f32 %v5954_v55  ;;  %v5957_v56 = vmul.f32 -1.442695, %v6093_v15  ;;  %v5959_v52 = vmul.f32 -1.442695, %v6134_v8 }
 0xdff   : > { %v5958_v37 = vmul.f32 -1.442695, %v6097_v3  ;;  %6799 = vpow2.f32 %v5955_v50  ;;  %v6137_v3 = vadd.f32 %v6136_v0, %v4296_v5 }
 0xe00   : > { %6801 = vpow2.f32 %v5957_v56 }
 0xe01   : > { %6803 = vpow2.f32 %v5958_v37 }
 0xe02   : > { %6805 = vtanh.f32 %v6131_v57 }
 0xe03   : > { %6807 = vpow2.f32 %v5956_v6 }
 0xe08   : > { %v6798_v33 = vpop.eup %6797 }
 0xe09   : > { %v4334_v2 = vadd.f32 1.0, %v6798_v33  ;;  %v6800_v20 = vpop.eup %6799 }
 0xe0a   : > { %v6802_v28 = vpop.eup %6801  ;;  %v4335_v55 = vadd.f32 1.0, %v6800_v20 }
 0xe0b   : > { %6809 = vrcp.f32 %v4334_v2  ;;  %v4337_v50 = vadd.f32 1.0, %v6802_v28  ;;  %v6804_v15 = vpop.eup %6803 }
 0xe0c   : > { %6811 = vpow2.f32 %v5959_v52  ;;  %v4338_v37 = vadd.f32 1.0, %v6804_v15  ;;  %v6806_v59 = vpop.eup %6805 }
 0xe0d   : > { %6813 = vrcp.f32 %v4335_v55  ;;  %v6808_v49 = vpop.eup %6807 }
 0xe0e   : > { %6815 = vrcp.f32 %v4337_v50  ;;  %v4336_v10 = vadd.f32 1.0, %v6808_v49 }
 0xe0f   : > { %6817 = vtanh.f32 %v6137_v3 }
 0xe10   : > { %6819 = vrcp.f32 %v4338_v37 }
 0xe15   : > { %v6810_v8 = vpop.eup %6809 }
 0xe16   : > { %v6812_v51 = vpop.eup %6811  ;;  %v4354_v33 = vmul.f32 %v6810_v8, %v9631_v4 }
 0xe17   : > { %v6814_v19 = vpop.eup %6813  ;;  %v4339_v6 = vadd.f32 1.0, %v6812_v51  ;;  %v7202_v51 = vld [vmem:[%s11855_s7] ss:$0 sm:$0xff] }
 0xe18   : > { %v6816_v34 = vpop.eup %6815  ;;  %v4356_v41 = vmul.f32 %v6814_v19, %v6806_v59 }
 0xe19   : > { %v6818_v56 = vpop.eup %6817  ;;  %v4355_v5 = vmul.f32 %v6816_v34, %v9634_v16 }
 0xe1a   : > { %v6820_v58 = vpop.eup %6819  ;;  %v10507_v57 = vadd.f32 %v4356_v41, %v4354_v33  ;;  %v12269_v41 = vld [vmem:[#allocation23_spill] sm:$0xff] }
 0xe1b   : > { %v4357_v52 = vmul.f32 %v6820_v58, %v6818_v56  ;;  %v12270_v56 = vld [vmem:[#allocation24_spill] sm:$0xff]  ;;  %v12273_v58 = vld [vmem:[#allocation27_spill] sm:$0xff] }
 0xe1c   : > { %6821 = vtanh.f32 %v10507_v57 }
 0xe1d   : > { %6823 = vrcp.f32 %v4336_v10  ;;  %v10510_v0 = vadd.f32 %v4357_v52, %v4355_v5  ;;  %v12271_v10 = vld [vmem:[#allocation25_spill] sm:$0xff]  ;;  %v12272_v5 = vld [vmem:[#allocation26_spill] sm:$0xff]  ;;  %v12275_v52 = vld [vmem:[#allocation31_spill] sm:$0xff] }
 0xe1e   : > { %6825 = vrcp.f32 %v4339_v6  ;;  %v12274_v6 = vld [vmem:[#allocation29_spill] sm:$0xff] }
 0xe1f   : > { %6827 = vtanh.f32 %v10510_v0 }
 0xe26   : > { %v6822_v4 = vpop.eup %6821 }
 0xe27   : > { %v6824_v2 = vpop.eup %6823 }
 0xe28   : > { %v6826_v20 = vpop.eup %6825  ;;  %v10513_v55 = vmul.f32 %v6824_v2, %v6822_v4  ;;  %v12276_v4 = vld [vmem:[#allocation33_spill] sm:$0xff]  ;;  %v12277_v2 = vld [vmem:[#allocation34_spill] sm:$0xff] }
 0xe29   : > { %v6828_v28 = vpop.eup %6827 }
 0xe2a   : > { %v10515_v16 = vmul.f32 %v6828_v28, %v6826_v20  ;;  %v4364_v50 = vpack.c.bf16 %v10513_v55, %v10513_v55  ;;  %v12278_v20 = vld [vmem:[#allocation36_spill] sm:$0xff]  ;;  %v12279_v28 = vld [vmem:[#allocation38_spill] sm:$0xff] }
 0xe2c   : > { %v4365_v3 = vpack.c.bf16 %v10515_v16, %v10515_v16 }
 0xe2e   : > { %4398 = vmatprep.mubr.bf16.mxu1 %v4365_v3  ;;  %v12280_v3 = vld [vmem:[#allocation40_spill] sm:$0xff] }
 0xe2f   : > { %4399 = vmatmul.mubr.bf16.vlgmr.msra.gmra.mrb[56].mxu1 %v4364_v50  ;;  %v12281_v50 = vld [vmem:[#allocation42_spill] sm:$0xff] }
 0xe30   : > { %4409 = vmatpush1.bf16.msra.mxu1 %v8199_v30  ;;  %4440 = vmatprep.mubr.bf16.mxu1 %v12158_v22 }
 0xe31   : > { %4410 = vmatprep.subr.bf16.mxu1 %v8211_v35 }
 0xe34   : > { %4411 = vmatpush1.bf16.msra.mxu1 %v8216_v36 }
 0xe35   : > { %4412 = vmatprep.subr.bf16.mxu1 %v8225_v39 }
 0xe38   : > { %4413 = vmatpush1.bf16.msra.mxu1 %v8228_v40 }
 0xe39   : > { %4414 = vmatprep.subr.bf16.mxu1 %v8237_v43 }
 0xe3c   : > { %4415 = vmatpush1.bf16.msra.mxu1 %v8240_v44 }
 0xe3d   : > { %4416 = vmatprep.subr.bf16.mxu1 %v8305_v18 }
 0xe40   : > { %4417 = vmatpush1.bf16.msra.mxu1 %v8312_v21 }
 0xe41   : > { %4418 = vmatprep.subr.bf16.mxu1 %v8329_v26 }
 0xe44   : > { %4419 = vmatpush1.bf16.msra.mxu1 %v8336_v31 }
 0xe45   : > { %4420 = vmatprep.subr.bf16.mxu1 %v8353_v42 }
 0xe48   : > { %4421 = vmatpush1.bf16.msra.mxu1 %v12159_v60 }
 0xe49   : > { %4422 = vmatprep.subr.bf16.mxu1 %v12160_v27 }
 0xe4c   : > { %4423 = vmatpush1.bf16.msra.mxu1 %v12161_v61 }
 0xe4d   : > { %4449 = vmatprep.subr.bf16.mxu1 %v12162_v23 }
 0xf02   : > { %v6038_v15 = vpop.f32.mrb[56].mxu1 }
 0xf03   : > { %v6039_v37 = vpop.f32.mrb[57].mxu1 }
 0xf04   : > { %v6040_v59 = vadd.f32 %v6039_v37, %v6038_v15  ;;  %v6041_v49 = vpop.f32.mrb[58].mxu1  ;;  %v12282_v15 = vld [vmem:[#allocation44_spill] sm:$0xff]  ;;  %v12283_v37 = vld [vmem:[#allocation46_spill] sm:$0xff] }
 0xf05   : > { %v6042_v8 = vpop.f32.mrb[59].mxu1  ;;  %v12285_v49 = vld [vmem:[#allocation50_spill] sm:$0xff] }
 0xf06   : > { %v4401_v33 = vadd.f32 %v7202_v51, %v6040_v59  ;;  %v12284_v59 = vld [vmem:[#allocation48_spill] sm:$0xff]  ;;  %v12287_v51 = vld [vmem:[#allocation54_spill] sm:$0xff] }
 0xf07   : > { %v12286_v8 = vld [vmem:[#allocation52_spill] sm:$0xff] }
 0xf08   : > { %6829 = vtanh.f32 %v4401_v33  ;;  %v12288_v33 = vld [vmem:[#allocation56_spill] sm:$0xff] }
 0xf12   : > { %v6830_v19 = vpop.eup %6829 }
 0xf13   : > { %v4407_v34 = vpack.c.bf16 %v6830_v19, %v6830_v19  ;;  %v12289_v19 = vld [vmem:[#allocation58_spill] sm:$0xff] }
 0xf15   : > { %4441 = vmatmul.mubr.bf16.vlgmr.msra.gmra.mrb[60].mxu1 %v4407_v34 }
 0xf16   : > { %4450 = vmatpush1.bf16.msra.mxu1 %v12163_v29  ;;  %4481 = vmatprep.mubr.bf16.mxu1 %v12158_v22 }
 0xf17   : > { %4451 = vmatprep.subr.bf16.mxu1 %v12164_v53 }
 0xf1a   : > { %4452 = vmatpush1.bf16.msra.mxu1 %v12165_v54 }
 0xf1b   : > { %4453 = vmatprep.subr.bf16.mxu1 %v12166_v62 }
 0xf1e   : > { %4454 = vmatpush1.bf16.msra.mxu1 %v12167_v63 }
 0xf1f   : > { %4455 = vmatprep.subr.bf16.mxu1 %v12168_v13  ;;  %v12314_v13 = vld [vmem:[#allocation71_spill] sm:$0xff] }
 0xf22   : > { %4456 = vmatpush1.bf16.msra.mxu1 %v12169_v14 }
 0xf23   : > { %4457 = vmatprep.subr.bf16.mxu1 %v12269_v41 }
 0xf26   : > { %4458 = vmatpush1.bf16.msra.mxu1 %v12270_v56 }
 0xf27   : > { %4459 = vmatprep.subr.bf16.mxu1 %v12271_v10 }
 0xf2a   : > { %4460 = vmatpush1.bf16.msra.mxu1 %v12272_v5 }
 0xf2b   : > { %4461 = vmatprep.subr.bf16.mxu1 %v12273_v58 }
 0xf2e   : > { %4462 = vmatpush1.bf16.msra.mxu1 %v12274_v6 }
 0xf2f   : > { %4463 = vmatprep.subr.bf16.mxu1 %v12275_v52 }
 0xf32   : > { %4464 = vmatpush1.bf16.msra.mxu1 %v12276_v4  ;;  %v12312_v4 = vld [vmem:[#allocation69_spill] sm:$0xff] }
 0xf33   : > { %4490 = vmatprep.subr.bf16.mxu1 %v12277_v2 }
 0xf35   : > { %4482 = vmatmul.mubr.bf16.vlgmr.msra.gmra.mrb[64].mxu1 %v4407_v34 }
 0xf36   : > { %4491 = vmatpush1.bf16.msra.mxu1 %v12278_v20  ;;  %4522 = vmatprep.mubr.bf16.mxu1 %v12158_v22  ;;  %v12311_v20 = vld [vmem:[#allocation68_spill] sm:$0xff] }
 0xf37   : > { %4492 = vmatprep.subr.bf16.mxu1 %v12279_v28  ;;  %v12290_v28 = vld [vmem:[#allocation60_spill] sm:$0xff] }
 0xf3a   : > { %4493 = vmatpush1.bf16.msra.mxu1 %v12280_v3  ;;  %v12291_v3 = vld [vmem:[#allocation62_spill] sm:$0xff] }
 0xf3b   : > { %4494 = vmatprep.subr.bf16.mxu1 %v12281_v50  ;;  %v12292_v50 = vld [vmem:[#allocation64_spill] sm:$0xff] }
 0xf3e   : > { %4495 = vmatpush1.bf16.msra.mxu1 %v12282_v15  ;;  %v12293_v15 = vld [vmem:[#allocation35_spill] sm:$0xff] }
 0xf3f   : > { %4496 = vmatprep.subr.bf16.mxu1 %v12283_v37  ;;  %v12305_v37 = vld [vmem:[#allocation59_spill] sm:$0xff] }
 0xf42   : > { %4497 = vmatpush1.bf16.msra.mxu1 %v12284_v59  ;;  %v12294_v59 = vld [vmem:[#allocation37_spill] sm:$0xff] }
 0xf43   : > { %4498 = vmatprep.subr.bf16.mxu1 %v12285_v49  ;;  %v12303_v49 = vld [vmem:[#allocation55_spill] sm:$0xff] }
 0xf46   : > { %4499 = vmatpush1.bf16.msra.mxu1 %v12286_v8  ;;  %v12295_v8 = vld [vmem:[#allocation39_spill] sm:$0xff] }
 0xf47   : > { %4500 = vmatprep.subr.bf16.mxu1 %v12287_v51  ;;  %v12296_v51 = vld [vmem:[#allocation41_spill] sm:$0xff] }
 0xf4a   : > { %4501 = vmatpush1.bf16.msra.mxu1 %v12288_v33  ;;  %v12297_v33 = vld [vmem:[#allocation43_spill] sm:$0xff] }
 0xf4b   : > { %4502 = vmatprep.subr.bf16.mxu1 %v12289_v19  ;;  %v12298_v19 = vld [vmem:[#allocation45_spill] sm:$0xff] }
 0xf4e   : > { %4503 = vmatpush1.bf16.msra.mxu1 %v12290_v28  ;;  %v12299_v28 = vld [vmem:[#allocation47_spill] sm:$0xff] }
 0xf4f   : > { %4504 = vmatprep.subr.bf16.mxu1 %v12291_v3  ;;  %v12300_v3 = vld [vmem:[#allocation49_spill] sm:$0xff] }
 0xf52   : > { %4505 = vmatpush1.bf16.msra.mxu1 %v12292_v50  ;;  %v12301_v50 = vld [vmem:[#allocation51_spill] sm:$0xff] }
 0xf53   : > { %4531 = vmatprep.subr.bf16.mxu1 %v12293_v15  ;;  %v12302_v15 = vld [vmem:[#allocation53_spill] sm:$0xff] }
 0xf55   : > { %4523 = vmatmul.mubr.bf16.vlgmr.msra.gmra.mrb[68].mxu1 %v4407_v34 }
 0xf56   : > { %4532 = vmatpush1.bf16.msra.mxu1 %v12294_v59  ;;  %4563 = vmatprep.mubr.bf16.mxu1 %v12158_v22  ;;  %v12304_v59 = vld [vmem:[#allocation57_spill] sm:$0xff] }
 0xf57   : > { %4533 = vmatprep.subr.bf16.mxu1 %v12295_v8  ;;  %v12306_v8 = vld [vmem:[#allocation61_spill] sm:$0xff] }
 0xf5a   : > { %4534 = vmatpush1.bf16.msra.mxu1 %v12296_v51  ;;  %v12307_v51 = vld [vmem:[#allocation63_spill] sm:$0xff] }
 0xf5b   : > { %4535 = vmatprep.subr.bf16.mxu1 %v12297_v33  ;;  %v12308_v33 = vld [vmem:[#allocation65_spill] sm:$0xff] }
 0xf5e   : > { %4536 = vmatpush1.bf16.msra.mxu1 %v12298_v19 }
 0xf5f   : > { %4537 = vmatprep.subr.bf16.mxu1 %v12299_v28  ;;  %v12310_v28 = vld [vmem:[#allocation67_spill] sm:$0xff] }
 0xf62   : > { %4538 = vmatpush1.bf16.msra.mxu1 %v12300_v3  ;;  %v7203_v3 = vld [vmem:[%s11858_s10 + $0x4] ss:$8 sps:$4 sm:$0xff]  }
 0xf63   : > { %4539 = vmatprep.subr.bf16.mxu1 %v12301_v50 }
 0xf66   : > { %4540 = vmatpush1.bf16.msra.mxu1 %v12302_v15  ;;  %v12309_v15 = vld [vmem:[#allocation66_spill] sm:$0xff] }
 0xf67   : > { %4541 = vmatprep.subr.bf16.mxu1 %v12303_v49  ;;  %v7204_v49 = vld [vmem:[%s11858_s10] ss:$8 sps:$4 sm:$0xff]  }
 0xf6a   : > { %4542 = vmatpush1.bf16.msra.mxu1 %v12304_v59 }
 0xf6b   : > { %4543 = vmatprep.subr.bf16.mxu1 %v12305_v37  ;;  %v7205_v37 = vld [vmem:[%s11858_s10 + $0x14] ss:$8 sps:$4 sm:$0xff]  }
 0xf6e   : > { %4544 = vmatpush1.bf16.msra.mxu1 %v12306_v8 }
 0xf6f   : > { %4545 = vmatprep.subr.bf16.mxu1 %v12307_v51 }
 0xf72   : > { %4546 = vmatpush1.bf16.msra.mxu1 %v12308_v33  ;;  %v7206_v33 = vld [vmem:[%s11858_s10 + $0x10] ss:$8 sps:$4 sm:$0xff]  }
 0xf73   : > { %4630 = vmatprep.subr.bf16.mxu1 %v7203_v3  ;;  %v7207_v3 = vld [vmem:[%s11858_s10 + $0x24] ss:$8 sps:$4 sm:$0xff]  }
 0xf75   : > { %4564 = vmatmul.mubr.bf16.vlgmr.msra.gmra.mrb[72].mxu1 %v4407_v34  ;;  %v7208_v34 = vld [vmem:[%s11858_s10 + $0x20] ss:$8 sps:$4 sm:$0xff]  }
 0xf76   : > { %4631 = vmatpush1.bf16.msra.mxu1 %v7204_v49  ;;  %v7209_v49 = vld [vmem:[%s11858_s10 + $0x34] ss:$8 sps:$4 sm:$0xff]  }
 0xf77   : > { %4632 = vmatprep.subr.bf16.mxu1 %v7205_v37  ;;  %v7210_v37 = vld [vmem:[%s11858_s10 + $0x30] ss:$8 sps:$4 sm:$0xff]  }
 0xf7a   : > { %4633 = vmatpush1.bf16.msra.mxu1 %v7206_v33  ;;  %v7211_v33 = vld [vmem:[%s11858_s10 + $0x44] ss:$8 sps:$4 sm:$0xff]  }
 0xf7b   : > { %4634 = vmatprep.subr.bf16.mxu1 %v7207_v3  ;;  %v7212_v3 = vld [vmem:[%s11858_s10 + $0x40] ss:$8 sps:$4 sm:$0xff]  }
 0xf7e   : > { %4635 = vmatpush1.bf16.msra.mxu1 %v7208_v34  ;;  %v7213_v34 = vld [vmem:[%s11858_s10 + $0x54] ss:$8 sps:$4 sm:$0xff]  }
 0xf7f   : > { %4636 = vmatprep.subr.bf16.mxu1 %v7209_v49  ;;  %v7214_v49 = vld [vmem:[%s11858_s10 + $0x50] ss:$8 sps:$4 sm:$0xff]  }
 0xf82   : > { %4637 = vmatpush1.bf16.msra.mxu1 %v7210_v37  ;;  %v7215_v37 = vld [vmem:[%s11858_s10 + $0x64] ss:$8 sps:$4 sm:$0xff]  }
 0xf83   : > { %4638 = vmatprep.subr.bf16.mxu1 %v7211_v33  ;;  %v7216_v33 = vld [vmem:[%s11858_s10 + $0x60] ss:$8 sps:$4 sm:$0xff]  }
 0xf86   : > { %4639 = vmatpush1.bf16.msra.mxu1 %v7212_v3  ;;  %v7217_v3 = vld [vmem:[%s11858_s10 + $0x74] ss:$8 sps:$4 sm:$0xff]  }
 0xf87   : > { %4640 = vmatprep.subr.bf16.mxu1 %v7213_v34  ;;  %v7218_v34 = vld [vmem:[%s11858_s10 + $0x70] ss:$8 sps:$4 sm:$0xff]  }
 0xf8a   : > { %4641 = vmatpush1.bf16.msra.mxu1 %v7214_v49  ;;  %v7219_v49 = vld [vmem:[%s11858_s10 + $0x84] ss:$8 sps:$4 sm:$0xff]  }
 0xf8b   : > { %4642 = vmatprep.subr.bf16.mxu1 %v7215_v37  ;;  %v7220_v37 = vld [vmem:[%s11858_s10 + $0x80] ss:$8 sps:$4 sm:$0xff]  }
 0xf8e   : > { %4643 = vmatpush1.bf16.msra.mxu1 %v7216_v33  ;;  %v7221_v33 = vld [vmem:[%s11858_s10 + $0x94] ss:$8 sps:$4 sm:$0xff]  }
 0xf8f   : > { %4644 = vmatprep.subr.bf16.mxu1 %v7217_v3  ;;  %v7222_v3 = vld [vmem:[%s11858_s10 + $0x90] ss:$8 sps:$4 sm:$0xff]  }
 0xf92   : > { %4645 = vmatpush1.bf16.msra.mxu1 %v7218_v34  ;;  %v7223_v34 = vld [vmem:[%s11858_s10 + $0xa4] ss:$8 sps:$4 sm:$0xff]  }
 0xf93   : > { %4646 = vmatprep.subr.bf16.mxu1 %v7219_v49  ;;  %v7224_v49 = vld [vmem:[%s11858_s10 + $0xa0] ss:$8 sps:$4 sm:$0xff]  }
 0xf96   : > { %4647 = vmatpush1.bf16.msra.mxu1 %v7220_v37  ;;  %v7225_v37 = vld [vmem:[%s11858_s10 + $0xb4] ss:$8 sps:$4 sm:$0xff]  }
 0xf97   : > { %4648 = vmatprep.subr.bf16.mxu1 %v7221_v33  ;;  %v7226_v33 = vld [vmem:[%s11858_s10 + $0xb0] ss:$8 sps:$4 sm:$0xff]  }
 0xf9a   : > { %4649 = vmatpush1.bf16.msra.mxu1 %v7222_v3  ;;  %v7227_v3 = vld [vmem:[%s11858_s10 + $0xc4] ss:$8 sps:$4 sm:$0xff]  }
 0xf9b   : > { %4650 = vmatprep.subr.bf16.mxu1 %v7223_v34  ;;  %v7228_v34 = vld [vmem:[%s11858_s10 + $0xc0] ss:$8 sps:$4 sm:$0xff]  }
 0xf9e   : > { %4651 = vmatpush1.bf16.msra.mxu1 %v7224_v49  ;;  %v7229_v49 = vld [vmem:[%s11858_s10 + $0xd4] ss:$8 sps:$4 sm:$0xff]  }
 0xf9f   : > { %4652 = vmatprep.subr.bf16.mxu1 %v7225_v37  ;;  %v7230_v37 = vld [vmem:[%s11858_s10 + $0xd0] ss:$8 sps:$4 sm:$0xff]  }
 0xfa2   : > { %4653 = vmatpush1.bf16.msra.mxu1 %v7226_v33  ;;  %v7231_v33 = vld [vmem:[%s11858_s10 + $0xe4] ss:$8 sps:$4 sm:$0xff]  }
 0xfa3   : > { %4654 = vmatprep.subr.bf16.mxu1 %v7227_v3  ;;  %v7232_v3 = vld [vmem:[%s11858_s10 + $0xe0] ss:$8 sps:$4 sm:$0xff]  }
 0xfa6   : > { %4655 = vmatpush1.bf16.msra.mxu1 %v7228_v34  ;;  %v7233_v34 = vld [vmem:[%s11858_s10 + $0xf4] ss:$8 sps:$4 sm:$0xff]  }
 0xfa7   : > { %4656 = vmatprep.subr.bf16.mxu1 %v7229_v49  ;;  %v7234_v49 = vld [vmem:[%s11858_s10 + $0xf0] ss:$8 sps:$4 sm:$0xff]  }
 0xfaa   : > { %4657 = vmatpush1.bf16.msra.mxu1 %v7230_v37  ;;  %v7235_v37 = vld [vmem:[%s11858_s10 + $0x104] ss:$8 sps:$4 sm:$0xff]  }
 0xfab   : > { %4658 = vmatprep.subr.bf16.mxu1 %v7231_v33 }
 0xfae   : > { %4659 = vmatpush1.bf16.msra.mxu1 %v7232_v3 }
 0xfaf   : > { %4660 = vmatprep.subr.bf16.mxu1 %v7233_v34 }
 0xfb2   : > { %4661 = vmatpush1.bf16.msra.mxu1 %v7234_v49 }
 0xfb3   : > { %4671 = vmatprep.subr.bf16.mxu1 %v7235_v37 }
 0xfe8   : > { %v4442_v33 = vpop.f32.mrb[60].mxu1 }
 0xfe9   : > { %v4444_v51 = vpop.f32.mrb[61].mxu1  ;;  %v4443_v50 = vadd.f32 %v4442_v33, %v12309_v15 }
 0xfea   : > { %v4446_v8 = vpop.f32.mrb[62].mxu1  ;;  %v4445_v2 = vadd.f32 %v4444_v51, %v12311_v20 }
 0xfeb   : > { %v4447_v59 = vpop.f32.mrb[63].mxu1 }
 0xfec   : > { %v12313_v59 = vld [vmem:[#allocation70_spill] sm:$0xff] }
0x1008   : > { %v4483_v3 = vpop.f32.mrb[64].mxu1 }
0x1009   : > { %v4484_v19 = vadd.f32 %v4483_v3, %v12310_v28  ;;  %v4485_v34 = vpop.f32.mrb[65].mxu1 }
0x100a   : > { %v4486_v52 = vadd.f32 %v4485_v34, %v12312_v4  ;;  %v4487_v49 = vpop.f32.mrb[66].mxu1 }
0x100b   : > { %v4572_v6 = vmax.f32 %v4443_v50, %v4484_v19  ;;  %v4488_v58 = vpop.f32.mrb[67].mxu1 }
0x100c   : > { %v4573_v5 = vmax.f32 %v4445_v2, %v4486_v52 }
0x1028   : > { %v4524_v10 = vpop.f32.mrb[68].mxu1 }
0x1029   : > { %v4526_v37 = vpop.f32.mrb[69].mxu1  ;;  %v4525_v14 = vadd.f32 %v4524_v10, %v12313_v59 }
0x102a   : > { %v4528_v56 = vpop.f32.mrb[70].mxu1  ;;  %v4527_v3 = vadd.f32 %v4526_v37, %v12216_v17 }
0x102b   : > { %v4529_v41 = vpop.f32.mrb[71].mxu1 }
0x1048   : > { %v4565_v8 = vpop.f32.mrb[72].mxu1 }
0x1049   : > { %v4566_v33 = vadd.f32 %v4565_v8, %v12314_v13  ;;  %v4567_v15 = vpop.f32.mrb[73].mxu1 }
0x104a   : > { %v4568_v51 = vadd.f32 %v4567_v15, %v12217_v38  ;;  %v4569_v20 = vpop.f32.mrb[74].mxu1 }
0x104b   : > { %v4574_v34 = vmax.f32 %v4525_v14, %v4566_v33  ;;  %v4570_v49 = vpop.f32.mrb[75].mxu1 }
0x104c   : > { %v4575_v4 = vmax.f32 %v4527_v3, %v4568_v51 }
0x104d   : > { %v4576_v58 = vmax.f32 %v4572_v6, %v4574_v34 }
0x104e   : > { %v4577_v28 = vmax.f32 %v4573_v5, %v4575_v4 }
0x104f   : > { %v4578_v63 = vsub.f32 %v4443_v50, %v4576_v58  ;;  %v4584_v62 = vsub.f32 %v4484_v19, %v4576_v58  ;;  %v4590_v56 = vsub.f32 %v4525_v14, %v4576_v58  ;;  %v4596_v41 = vsub.f32 %v4566_v33, %v4576_v58 }
0x1050   : > { %v4579_v54 = vsub.f32 %v4445_v2, %v4577_v28  ;;  %v4585_v53 = vsub.f32 %v4486_v52, %v4577_v28  ;;  %v4591_v10 = vsub.f32 %v4527_v3, %v4577_v28  ;;  %v4597_v59 = vsub.f32 %v4568_v51, %v4577_v28 }
0x1051   : > { %v4580_v8 = vmul.f32 1.442695, %v4578_v63  ;;  %v4586_v13 = vmul.f32 1.442695, %v4584_v62  ;;  %v4592_v29 = vmul.f32 1.442695, %v4590_v56 }
0x1052   : > { %v4598_v37 = vmul.f32 1.442695, %v4596_v41  ;;  %v4582_v15 = vmul.f32 1.442695, %v4579_v54  ;;  %v4588_v20 = vmul.f32 1.442695, %v4585_v53 }
0x1053   : > { %6831 = vpow2.f32 %v4580_v8  ;;  %v4594_v6 = vmul.f32 1.442695, %v4591_v10  ;;  %v4600_v5 = vmul.f32 1.442695, %v4597_v59 }
0x1054   : > { %6833 = vpow2.f32 %v4586_v13 }
0x1055   : > { %6835 = vpow2.f32 %v4592_v29 }
0x1056   : > { %6837 = vpow2.f32 %v4598_v37 }
0x1057   : > { %6839 = vpow2.f32 %v4582_v15 }
0x1058   : > { %6841 = vpow2.f32 %v4588_v20 }
0x1059   : > { %6843 = vpow2.f32 %v4594_v6 }
0x105a   : > { %6845 = vpow2.f32 %v4600_v5 }
0x105d   : > { %v6832_v14 = vpop.eup %6831 }
0x105e   : > { %v6834_v52 = vpop.eup %6833 }
0x105f   : > { %v6836_v4 = vpop.eup %6835  ;;  %v4602_v2 = vadd.f32 %v6834_v52, %v6832_v14 }
0x1060   : > { %v6838_v63 = vpop.eup %6837 }
0x1061   : > { %v6840_v62 = vpop.eup %6839  ;;  %v4604_v28 = vadd.f32 %v6836_v4, %v4602_v2 }
0x1062   : > { %v6842_v50 = vpop.eup %6841 }
0x1063   : > { %v4606_v19 = vadd.f32 %v6838_v63, %v4604_v28  ;;  %v4603_v54 = vadd.f32 %v6842_v50, %v6840_v62  ;;  %v6844_v13 = vpop.eup %6843  ;;  %v7240_v28 = vld [vmem:[%s11858_s10 + $0x120] ss:$8 sps:$4 sm:$0xff]  }
0x1064   : > { %v6846_v53 = vpop.eup %6845 }
0x1065   : > { %6847 = vrcp.f32 %v4606_v19  ;;  %v4605_v29 = vadd.f32 %v6844_v13, %v4603_v54  ;;  %v7242_v19 = vld [vmem:[%s11858_s10 + $0x130] ss:$8 sps:$4 sm:$0xff]   ;;  %v7243_v54 = vld [vmem:[%s11858_s10 + $0x144] ss:$8 sps:$4 sm:$0xff]  }
0x1067   : > { %v4607_v33 = vadd.f32 %v6846_v53, %v4605_v29  ;;  %v7245_v29 = vld [vmem:[%s11858_s10 + $0x154] ss:$8 sps:$4 sm:$0xff]  }
0x1069   : > { %6849 = vrcp.f32 %v4607_v33  ;;  %v7247_v33 = vld [vmem:[%s11858_s10 + $0x164] ss:$8 sps:$4 sm:$0xff]  }
0x106f   : > { %v6848_v3 = vpop.eup %6847 }
0x1070   : > { %v4610_v59 = vmul.f32 %v6848_v3, %v10513_v55  ;;  %v4612_v51 = vmul.f32 %v6848_v3, %v10515_v16  ;;  %v7248_v3 = vld [vmem:[%s11858_s10 + $0x160] ss:$8 sps:$4 sm:$0xff]  }
0x1072   : > { %v4614_v34 = vmul.f32 %v6832_v14, %v4610_v59  ;;  %v10700_v49 = vmul.f32 %v6834_v52, %v4610_v59  ;;  %v10702_v58 = vmul.f32 %v6836_v4, %v4612_v51  ;;  %v10704_v56 = vmul.f32 %v6838_v63, %v4612_v51  ;;  %v7236_v52 = vld [vmem:[%s11858_s10 + $0x100] ss:$8 sps:$4 sm:$0xff]   ;;  %v7237_v4 = vld [vmem:[%s11858_s10 + $0x114] ss:$8 sps:$4 sm:$0xff]   ;;  %v7238_v63 = vld [vmem:[%s11858_s10 + $0x110] ss:$8 sps:$4 sm:$0xff]  }
0x1073   : > { %v6850_v41 = vpop.eup %6849  ;;  %v7249_v59 = vld [vmem:[%s11858_s10 + $0x174] ss:$8 sps:$4 sm:$0xff]   ;;  %v7250_v51 = vld [vmem:[%s11858_s10 + $0x170] ss:$8 sps:$4 sm:$0xff]  }
0x1074   : > { %v4611_v10 = vmul.f32 %v6850_v41, %v10513_v55  ;;  %v4613_v8 = vmul.f32 %v6850_v41, %v10515_v16  ;;  %v4616_v2 = vpack.c.bf16 %v4614_v34, %v4614_v34  ;;  %v7251_v34 = vld [vmem:[%s11858_s10 + $0x184] ss:$8 sps:$4 sm:$0xff]   ;;  %v7252_v41 = vld [vmem:[%s11858_s10 + $0x180] ss:$8 sps:$4 sm:$0xff]  }
0x1076   : > { %v4615_v37 = vmul.f32 %v6840_v62, %v4611_v10  ;;  %v4619_v15 = vmul.f32 %v6842_v50, %v4611_v10  ;;  %v10708_v20 = vmul.f32 %v6844_v13, %v4613_v8  ;;  %v10710_v6 = vmul.f32 %v6846_v53, %v4613_v8  ;;  %v7239_v62 = vld [vmem:[%s11858_s10 + $0x124] ss:$8 sps:$4 sm:$0xff]   ;;  %v7241_v50 = vld [vmem:[%s11858_s10 + $0x134] ss:$8 sps:$4 sm:$0xff]   ;;  %v7244_v13 = vld [vmem:[%s11858_s10 + $0x140] ss:$8 sps:$4 sm:$0xff]  }
0x1077   : > { %v7246_v53 = vld [vmem:[%s11858_s10 + $0x150] ss:$8 sps:$4 sm:$0xff]   ;;  %v7253_v10 = vld [vmem:[%s11858_s10 + $0x194] ss:$8 sps:$4 sm:$0xff]  }
0x1078   : > { %v4617_v5 = vpack.c.bf16 %v4615_v37, %v4615_v37  ;;  %v4621_v14 = vpack.c.bf16 %v4619_v15, %v4619_v15  ;;  %v7254_v8 = vld [vmem:[%s11858_s10 + $0x190] ss:$8 sps:$4 sm:$0xff]   ;;  %v7255_v37 = vld [vmem:[%s11858_s10 + $0x1a4] ss:$8 sps:$4 sm:$0xff]   ;;  %v7256_v15 = vld [vmem:[%s11858_s10 + $0x1a0] ss:$8 sps:$4 sm:$0xff]  }
0x107a   : > { %4662 = vmatprep.mubr.bf16.mxu1 %v4617_v5  ;;  %v7257_v5 = vld [vmem:[%s11858_s10 + $0x1b4] ss:$8 sps:$4 sm:$0xff]  }
0x107b   : > { %4663 = vmatmul.mubr.bf16.vlgmr.msra.gmra.mrb[76].mxu1 %v4616_v2  ;;  %v7258_v2 = vld [vmem:[%s11858_s10 + $0x1b0] ss:$8 sps:$4 sm:$0xff]  }
0x107c   : > { %4672 = vmatpush1.bf16.msra.mxu1 %v7236_v52  ;;  %4703 = vmatprep.mubr.bf16.mxu1 %v4621_v14  ;;  %v7259_v14 = vld [vmem:[%s11858_s10 + $0x1c4] ss:$8 sps:$4 sm:$0xff]   ;;  %v7260_v52 = vld [vmem:[%s11858_s10 + $0x1c0] ss:$8 sps:$4 sm:$0xff]  }
0x107d   : > { %4673 = vmatprep.subr.bf16.mxu1 %v7237_v4  ;;  %v7261_v4 = vld [vmem:[%s11858_s10 + $0x1d4] ss:$8 sps:$4 sm:$0xff]  }
0x1080   : > { %4674 = vmatpush1.bf16.msra.mxu1 %v7238_v63  ;;  %v7262_v63 = vld [vmem:[%s11858_s10 + $0x1d0] ss:$8 sps:$4 sm:$0xff]  }
0x1081   : > { %4675 = vmatprep.subr.bf16.mxu1 %v7239_v62  ;;  %v7263_v62 = vld [vmem:[%s11858_s10 + $0x1e4] ss:$8 sps:$4 sm:$0xff]  }
0x1084   : > { %4676 = vmatpush1.bf16.msra.mxu1 %v7240_v28  ;;  %v7264_v28 = vld [vmem:[%s11858_s10 + $0x1e0] ss:$8 sps:$4 sm:$0xff]  }
0x1085   : > { %4677 = vmatprep.subr.bf16.mxu1 %v7241_v50  ;;  %v7265_v50 = vld [vmem:[%s11858_s10 + $0x1f4] ss:$8 sps:$4 sm:$0xff]  }
0x1088   : > { %4678 = vmatpush1.bf16.msra.mxu1 %v7242_v19  ;;  %v7266_v19 = vld [vmem:[%s11858_s10 + $0x1f0] ss:$8 sps:$4 sm:$0xff]  }
0x1089   : > { %4679 = vmatprep.subr.bf16.mxu1 %v7243_v54  ;;  %v4620_v54 = vpack.c.bf16 %v10700_v49, %v10700_v49  ;;  %v7270_v49 = vld [vmem:[%s11858_s10 + $0x210] ss:$8 sps:$4 sm:$0xff]  }
0x108c   : > { %4680 = vmatpush1.bf16.msra.mxu1 %v7244_v13  ;;  %v7267_v13 = vld [vmem:[%s11858_s10 + $0x204] ss:$8 sps:$4 sm:$0xff]  }
0x108d   : > { %4681 = vmatprep.subr.bf16.mxu1 %v7245_v29  ;;  %v4625_v29 = vpack.c.bf16 %v10708_v20, %v10708_v20  ;;  %v7271_v20 = vld [vmem:[%s11858_s10 + $0x224] ss:$8 sps:$4 sm:$0xff]  }
0x1090   : > { %4682 = vmatpush1.bf16.msra.mxu1 %v7246_v53  ;;  %v7268_v53 = vld [vmem:[%s11858_s10 + $0x200] ss:$8 sps:$4 sm:$0xff]  }
0x1091   : > { %4683 = vmatprep.subr.bf16.mxu1 %v7247_v33  ;;  %v7269_v33 = vld [vmem:[%s11858_s10 + $0x214] ss:$8 sps:$4 sm:$0xff]  }
0x1094   : > { %4684 = vmatpush1.bf16.msra.mxu1 %v7248_v3  ;;  %v7272_v3 = vld [vmem:[%s11858_s10 + $0x220] ss:$8 sps:$4 sm:$0xff]  }
0x1095   : > { %4685 = vmatprep.subr.bf16.mxu1 %v7249_v59  ;;  %v7273_v59 = vld [vmem:[%s11858_s10 + $0x234] ss:$8 sps:$4 sm:$0xff]  }
0x1098   : > { %4686 = vmatpush1.bf16.msra.mxu1 %v7250_v51  ;;  %v7274_v51 = vld [vmem:[%s11858_s10 + $0x230] ss:$8 sps:$4 sm:$0xff]  }
0x1099   : > { %4687 = vmatprep.subr.bf16.mxu1 %v7251_v34  ;;  %v7275_v34 = vld [vmem:[%s11858_s10 + $0x244] ss:$8 sps:$4 sm:$0xff]  }
0x109c   : > { %4688 = vmatpush1.bf16.msra.mxu1 %v7252_v41  ;;  %v7276_v41 = vld [vmem:[%s11858_s10 + $0x240] ss:$8 sps:$4 sm:$0xff]  }
0x109d   : > { %4689 = vmatprep.subr.bf16.mxu1 %v7253_v10  ;;  %v7277_v10 = vld [vmem:[%s11858_s10 + $0x254] ss:$8 sps:$4 sm:$0xff]  }
0x10a0   : > { %4690 = vmatpush1.bf16.msra.mxu1 %v7254_v8  ;;  %v7278_v8 = vld [vmem:[%s11858_s10 + $0x250] ss:$8 sps:$4 sm:$0xff]  }
0x10a1   : > { %4691 = vmatprep.subr.bf16.mxu1 %v7255_v37  ;;  %v7279_v37 = vld [vmem:[%s11858_s10 + $0x264] ss:$8 sps:$4 sm:$0xff]  }
0x10a4   : > { %4692 = vmatpush1.bf16.msra.mxu1 %v7256_v15  ;;  %v7280_v15 = vld [vmem:[%s11858_s10 + $0x260] ss:$8 sps:$4 sm:$0xff]  }
0x10a5   : > { %4693 = vmatprep.subr.bf16.mxu1 %v7257_v5  ;;  %v7281_v5 = vld [vmem:[%s11858_s10 + $0x274] ss:$8 sps:$4 sm:$0xff]  }
0x10a8   : > { %4694 = vmatpush1.bf16.msra.mxu1 %v7258_v2  ;;  %v7282_v2 = vld [vmem:[%s11858_s10 + $0x270] ss:$8 sps:$4 sm:$0xff]  }
0x10a9   : > { %4695 = vmatprep.subr.bf16.mxu1 %v7259_v14  ;;  %v7283_v14 = vld [vmem:[%s11858_s10 + $0x284] ss:$8 sps:$4 sm:$0xff]  }
0x10ac   : > { %4696 = vmatpush1.bf16.msra.mxu1 %v7260_v52  ;;  %v7284_v52 = vld [vmem:[%s11858_s10 + $0x280] ss:$8 sps:$4 sm:$0xff]  }
0x10ad   : > { %4697 = vmatprep.subr.bf16.mxu1 %v7261_v4  ;;  %v7285_v4 = vld [vmem:[%s11858_s10 + $0x294] ss:$8 sps:$4 sm:$0xff]  }
0x10b0   : > { %4698 = vmatpush1.bf16.msra.mxu1 %v7262_v63  ;;  %v7286_v63 = vld [vmem:[%s11858_s10 + $0x290] ss:$8 sps:$4 sm:$0xff]  }
0x10b1   : > { %4699 = vmatprep.subr.bf16.mxu1 %v7263_v62  ;;  %v7287_v62 = vld [vmem:[%s11858_s10 + $0x2a4] ss:$8 sps:$4 sm:$0xff]  }
0x10b4   : > { %4700 = vmatpush1.bf16.msra.mxu1 %v7264_v28  ;;  %v7288_v28 = vld [vmem:[%s11858_s10 + $0x2a0] ss:$8 sps:$4 sm:$0xff]  }
0x10b5   : > { %4701 = vmatprep.subr.bf16.mxu1 %v7265_v50  ;;  %v7289_v50 = vld [vmem:[%s11858_s10 + $0x2b4] ss:$8 sps:$4 sm:$0xff]  }
0x10b8   : > { %4702 = vmatpush1.bf16.msra.mxu1 %v7266_v19  ;;  %v7290_v19 = vld [vmem:[%s11858_s10 + $0x2b0] ss:$8 sps:$4 sm:$0xff]  }
0x10b9   : > { %4712 = vmatprep.subr.bf16.mxu1 %v7267_v13  ;;  %v7292_v13 = vld [vmem:[%s11858_s10 + $0x2c0] ss:$8 sps:$4 sm:$0xff]  }
0x10bb   : > { %4704 = vmatmul.mubr.bf16.vlgmr.msra.gmra.mrb[76].mxu1 %v4620_v54  ;;  %v7291_v54 = vld [vmem:[%s11858_s10 + $0x2c4] ss:$8 sps:$4 sm:$0xff]  }
0x10bc   : > { %4713 = vmatpush1.bf16.msra.mxu1 %v7268_v53  ;;  %4744 = vmatprep.mubr.bf16.mxu1 %v4625_v29  ;;  %v7293_v29 = vld [vmem:[%s11858_s10 + $0x2d4] ss:$8 sps:$4 sm:$0xff]   ;;  %v7294_v53 = vld [vmem:[%s11858_s10 + $0x2d0] ss:$8 sps:$4 sm:$0xff]  }
0x10bd   : > { %4714 = vmatprep.subr.bf16.mxu1 %v7269_v33  ;;  %v7295_v33 = vld [vmem:[%s11858_s10 + $0x2e4] ss:$8 sps:$4 sm:$0xff]  }
0x10c0   : > { %4715 = vmatpush1.bf16.msra.mxu1 %v7270_v49  ;;  %v7296_v49 = vld [vmem:[%s11858_s10 + $0x2e0] ss:$8 sps:$4 sm:$0xff]  }
0x10c1   : > { %4716 = vmatprep.subr.bf16.mxu1 %v7271_v20  ;;  %v7297_v20 = vld [vmem:[%s11858_s10 + $0x2f4] ss:$8 sps:$4 sm:$0xff]  }
0x10c4   : > { %4717 = vmatpush1.bf16.msra.mxu1 %v7272_v3  ;;  %v7298_v3 = vld [vmem:[%s11858_s10 + $0x2f0] ss:$8 sps:$4 sm:$0xff]  }
0x10c5   : > { %4718 = vmatprep.subr.bf16.mxu1 %v7273_v59  ;;  %v4624_v59 = vpack.c.bf16 %v10702_v58, %v10702_v58  ;;  %v7302_v58 = vld [vmem:[%s11858_s10 + $0x310] ss:$8 sps:$4 sm:$0xff]  }
0x10c8   : > { %4719 = vmatpush1.bf16.msra.mxu1 %v7274_v51  ;;  %v7299_v51 = vld [vmem:[%s11858_s10 + $0x304] ss:$8 sps:$4 sm:$0xff]  }
0x10c9   : > { %4720 = vmatprep.subr.bf16.mxu1 %v7275_v34  ;;  %v4629_v34 = vpack.c.bf16 %v10710_v6, %v10710_v6  ;;  %v7303_v6 = vld [vmem:[%s11858_s10 + $0x324] ss:$8 sps:$4 sm:$0xff]  }
0x10cc   : > { %4721 = vmatpush1.bf16.msra.mxu1 %v7276_v41  ;;  %v7300_v41 = vld [vmem:[%s11858_s10 + $0x300] ss:$8 sps:$4 sm:$0xff]  }
0x10cd   : > { %4722 = vmatprep.subr.bf16.mxu1 %v7277_v10  ;;  %v7301_v10 = vld [vmem:[%s11858_s10 + $0x314] ss:$8 sps:$4 sm:$0xff]  }
0x10d0   : > { %4723 = vmatpush1.bf16.msra.mxu1 %v7278_v8  ;;  %v7304_v8 = vld [vmem:[%s11858_s10 + $0x320] ss:$8 sps:$4 sm:$0xff]  }
0x10d1   : > { %4724 = vmatprep.subr.bf16.mxu1 %v7279_v37  ;;  %v7305_v37 = vld [vmem:[%s11858_s10 + $0x334] ss:$8 sps:$4 sm:$0xff]  }
0x10d4   : > { %4725 = vmatpush1.bf16.msra.mxu1 %v7280_v15  ;;  %v7306_v15 = vld [vmem:[%s11858_s10 + $0x330] ss:$8 sps:$4 sm:$0xff]  }
0x10d5   : > { %4726 = vmatprep.subr.bf16.mxu1 %v7281_v5  ;;  %v7307_v5 = vld [vmem:[%s11858_s10 + $0x344] ss:$8 sps:$4 sm:$0xff]  }
0x10d8   : > { %4727 = vmatpush1.bf16.msra.mxu1 %v7282_v2  ;;  %v7308_v2 = vld [vmem:[%s11858_s10 + $0x340] ss:$8 sps:$4 sm:$0xff]  }
0x10d9   : > { %4728 = vmatprep.subr.bf16.mxu1 %v7283_v14  ;;  %v7309_v14 = vld [vmem:[%s11858_s10 + $0x354] ss:$8 sps:$4 sm:$0xff]  }
0x10dc   : > { %4729 = vmatpush1.bf16.msra.mxu1 %v7284_v52  ;;  %v7310_v52 = vld [vmem:[%s11858_s10 + $0x350] ss:$8 sps:$4 sm:$0xff]  }
0x10dd   : > { %4730 = vmatprep.subr.bf16.mxu1 %v7285_v4  ;;  %v7311_v4 = vld [vmem:[%s11858_s10 + $0x364] ss:$8 sps:$4 sm:$0xff]  }
0x10e0   : > { %4731 = vmatpush1.bf16.msra.mxu1 %v7286_v63  ;;  %v7312_v63 = vld [vmem:[%s11858_s10 + $0x360] ss:$8 sps:$4 sm:$0xff]  }
0x10e1   : > { %4732 = vmatprep.subr.bf16.mxu1 %v7287_v62  ;;  %v7313_v62 = vld [vmem:[%s11858_s10 + $0x374] ss:$8 sps:$4 sm:$0xff]  }
0x10e4   : > { %4733 = vmatpush1.bf16.msra.mxu1 %v7288_v28  ;;  %v7314_v28 = vld [vmem:[%s11858_s10 + $0x370] ss:$8 sps:$4 sm:$0xff]  }
0x10e5   : > { %4734 = vmatprep.subr.bf16.mxu1 %v7289_v50  ;;  %v7315_v50 = vld [vmem:[%s11858_s10 + $0x384] ss:$8 sps:$4 sm:$0xff]  }
0x10e8   : > { %4735 = vmatpush1.bf16.msra.mxu1 %v7290_v19  ;;  %v7316_v19 = vld [vmem:[%s11858_s10 + $0x380] ss:$8 sps:$4 sm:$0xff]  }
0x10e9   : > { %4736 = vmatprep.subr.bf16.mxu1 %v7291_v54  ;;  %v7317_v54 = vld [vmem:[%s11858_s10 + $0x394] ss:$8 sps:$4 sm:$0xff]  }
0x10ec   : > { %4737 = vmatpush1.bf16.msra.mxu1 %v7292_v13  ;;  %v7318_v13 = vld [vmem:[%s11858_s10 + $0x390] ss:$8 sps:$4 sm:$0xff]  }
0x10ed   : > { %4738 = vmatprep.subr.bf16.mxu1 %v7293_v29  ;;  %v7319_v29 = vld [vmem:[%s11858_s10 + $0x3a4] ss:$8 sps:$4 sm:$0xff]  }
0x10f0   : > { %4739 = vmatpush1.bf16.msra.mxu1 %v7294_v53  ;;  %v7320_v53 = vld [vmem:[%s11858_s10 + $0x3a0] ss:$8 sps:$4 sm:$0xff]  }
0x10f1   : > { %4740 = vmatprep.subr.bf16.mxu1 %v7295_v33  ;;  %v7321_v33 = vld [vmem:[%s11858_s10 + $0x3b4] ss:$8 sps:$4 sm:$0xff]  }
0x10f4   : > { %4741 = vmatpush1.bf16.msra.mxu1 %v7296_v49  ;;  %v7322_v49 = vld [vmem:[%s11858_s10 + $0x3b0] ss:$8 sps:$4 sm:$0xff]  }
0x10f5   : > { %4742 = vmatprep.subr.bf16.mxu1 %v7297_v20  ;;  %v7323_v20 = vld [vmem:[%s11858_s10 + $0x3c4] ss:$8 sps:$4 sm:$0xff]  }
0x10f8   : > { %4743 = vmatpush1.bf16.msra.mxu1 %v7298_v3  ;;  %v7324_v3 = vld [vmem:[%s11858_s10 + $0x3c0] ss:$8 sps:$4 sm:$0xff]  }
0x10f9   : > { %4753 = vmatprep.subr.bf16.mxu1 %v7299_v51  ;;  %v7326_v51 = vld [vmem:[%s11858_s10 + $0x3d0] ss:$8 sps:$4 sm:$0xff]  }
0x10fb   : > { %4745 = vmatmul.mubr.bf16.vlgmr.msra.gmra.mrb[76].mxu1 %v4624_v59  ;;  %v7325_v59 = vld [vmem:[%s11858_s10 + $0x3d4] ss:$8 sps:$4 sm:$0xff]  }
0x10fc   : > { %4754 = vmatpush1.bf16.msra.mxu1 %v7300_v41  ;;  %4785 = vmatprep.mubr.bf16.mxu1 %v4629_v34  ;;  %v7327_v34 = vld [vmem:[%s11858_s10 + $0x3e4] ss:$8 sps:$4 sm:$0xff]   ;;  %v7328_v41 = vld [vmem:[%s11858_s10 + $0x3e0] ss:$8 sps:$4 sm:$0xff]  }
0x10fd   : > { %4755 = vmatprep.subr.bf16.mxu1 %v7301_v10  ;;  %v7329_v10 = vld [vmem:[%s11858_s10 + $0x3f4] ss:$8 sps:$4 sm:$0xff]  }
0x1100   : > { %4756 = vmatpush1.bf16.msra.mxu1 %v7302_v58  ;;  %v7330_v58 = vld [vmem:[%s11858_s10 + $0x3f0] ss:$8 sps:$4 sm:$0xff]  }
0x1101   : > { %4757 = vmatprep.subr.bf16.mxu1 %v7303_v6  ;;  %v4628_v6 = vpack.c.bf16 %v10704_v56, %v10704_v56  ;;  %v12327_v56 = vld [vmem:[#allocation82_spill] sm:$0xff] }
0x1104   : > { %4758 = vmatpush1.bf16.msra.mxu1 %v7304_v8  ;;  %v7331_v8 = vld [vmem:[%s11853_s5 + $0xc] ss:$16 sps:$4 sm:$0xff]  }
0x1105   : > { %4759 = vmatprep.subr.bf16.mxu1 %v7305_v37  ;;  %v12328_v37 = vld [vmem:[#allocation83_spill] sm:$0xff] }
0x1108   : > { %4760 = vmatpush1.bf16.msra.mxu1 %v7306_v15  ;;  %v12329_v15 = vld [vmem:[#allocation84_spill] sm:$0xff] }
0x1109   : > { %4761 = vmatprep.subr.bf16.mxu1 %v7307_v5  ;;  %v12330_v5 = vld [vmem:[#allocation85_spill] sm:$0xff] }
0x110c   : > { %4762 = vmatpush1.bf16.msra.mxu1 %v7308_v2  ;;  %v12331_v2 = vld [vmem:[#allocation86_spill] sm:$0xff] }
0x110d   : > { %4763 = vmatprep.subr.bf16.mxu1 %v7309_v14  ;;  %v12332_v14 = vld [vmem:[#allocation87_spill] sm:$0xff] }
0x1110   : > { %4764 = vmatpush1.bf16.msra.mxu1 %v7310_v52  ;;  %v12333_v52 = vld [vmem:[#allocation88_spill] sm:$0xff] }
0x1111   : > { %4765 = vmatprep.subr.bf16.mxu1 %v7311_v4  ;;  %v7332_v4 = vld [vmem:[%s11860_s12 + $0x4] ss:$8 sps:$4 sm:$0xff]  }
0x1114   : > { %4766 = vmatpush1.bf16.msra.mxu1 %v7312_v63 }
0x1115   : > { %4767 = vmatprep.subr.bf16.mxu1 %v7313_v62  ;;  %v12334_v62 = vld [vmem:[#allocation75_spill] sm:$0xff] }
0x1118   : > { %4768 = vmatpush1.bf16.msra.mxu1 %v7314_v28 }
0x1119   : > { %4769 = vmatprep.subr.bf16.mxu1 %v7315_v50 }
0x111c   : > { %4770 = vmatpush1.bf16.msra.mxu1 %v7316_v19  ;;  %v12335_v19 = vld [vmem:[#allocation76_spill] sm:$0xff] }
0x111d   : > { %4771 = vmatprep.subr.bf16.mxu1 %v7317_v54 }
0x1120   : > { %4772 = vmatpush1.bf16.msra.mxu1 %v7318_v13 }
0x1121   : > { %4773 = vmatprep.subr.bf16.mxu1 %v7319_v29 }
0x1124   : > { %4774 = vmatpush1.bf16.msra.mxu1 %v7320_v53 }
0x1125   : > { %4775 = vmatprep.subr.bf16.mxu1 %v7321_v33 }
0x1128   : > { %4776 = vmatpush1.bf16.msra.mxu1 %v7322_v49 }
0x1129   : > { %4777 = vmatprep.subr.bf16.mxu1 %v7323_v20 }
0x112c   : > { %4778 = vmatpush1.bf16.msra.mxu1 %v7324_v3  ;;  %v7333_v3 = vld [vmem:[%s11853_s5] ss:$16 sps:$4 sm:$0xff]  }
0x112d   : > { %4779 = vmatprep.subr.bf16.mxu1 %v7325_v59  ;;  %v7334_v59 = vld [vmem:[%s11853_s5 + $0x24] ss:$16 sps:$4 sm:$0xff]  }
0x1130   : > { %4780 = vmatpush1.bf16.msra.mxu1 %v7326_v51  ;;  %v7335_v51 = vld [vmem:[%s11853_s5 + $0x20] ss:$16 sps:$4 sm:$0xff]  }
0x1131   : > { %4781 = vmatprep.subr.bf16.mxu1 %v7327_v34  ;;  %v7336_v34 = vld [vmem:[%s11853_s5 + $0x44] ss:$16 sps:$4 sm:$0xff]  }
0x1134   : > { %4782 = vmatpush1.bf16.msra.mxu1 %v7328_v41  ;;  %v7337_v41 = vld [vmem:[%s11853_s5 + $0x40] ss:$16 sps:$4 sm:$0xff]  }
0x1135   : > { %4783 = vmatprep.subr.bf16.mxu1 %v7329_v10  ;;  %v7338_v10 = vld [vmem:[%s11853_s5 + $0x64] ss:$16 sps:$4 sm:$0xff]  }
0x1138   : > { %4784 = vmatpush1.bf16.msra.mxu1 %v7330_v58  ;;  %v7339_v58 = vld [vmem:[%s11853_s5 + $0x60] ss:$16 sps:$4 sm:$0xff]  }
0x1139   : > { %4887 = vmatprep.subr.bf16.mxu1 %v7331_v8  ;;  %v7341_v8 = vld [vmem:[%s11853_s5 + $0x80] ss:$16 sps:$4 sm:$0xff]  }
0x113b   : > { %4786 = vmatmul.mubr.bf16.vlgmr.msra.gmra.mrb[76].mxu1 %v4628_v6  ;;  %v7340_v6 = vld [vmem:[%s11853_s5 + $0x84] ss:$16 sps:$4 sm:$0xff]  }
0x113c   : > { %4888 = vmatpush1.bf16.msra.mxu1 %v10171_v47  ;;  %v12315_v47 = vld [vmem:[#allocation28_spill] sm:$0xff] }
0x113d   : > { %4889 = vmatprep.subr.bf16.mxu1 %v10177_v25  ;;  %v12316_v25 = vld [vmem:[#allocation30_spill] sm:$0xff] }
0x1140   : > { %4890 = vmatpush1.bf16.msra.mxu1 %v10183_v1  ;;  %v12317_v1 = vld [vmem:[#allocation32_spill] sm:$0xff] }
0x1141   : > { %4891 = vmatprep.subr.bf16.mxu1 %v10189_v48  ;;  %v12318_v48 = vld [vmem:[#allocation15_spill] sm:$0xff] }
0x1144   : > { %4892 = vmatpush1.bf16.msra.mxu1 %v10195_v46  ;;  %v12319_v46 = vld [vmem:[#allocation72_spill] sm:$0xff] }
0x1145   : > { %4893 = vmatprep.subr.bf16.mxu1 %v10201_v7  ;;  %v12320_v7 = vld [vmem:[#allocation73_spill] sm:$0xff] }
0x1148   : > { %4894 = vmatpush1.bf16.msra.mxu1 %v10207_v11  ;;  %v12321_v11 = vld [vmem:[#allocation74_spill] sm:$0xff] }
0x1149   : > { %4895 = vmatprep.subr.bf16.mxu1 %v10213_v24  ;;  %v12322_v24 = vld [vmem:[#allocation77_spill] sm:$0xff] }
0x114c   : > { %4896 = vmatpush1.bf16.msra.mxu1 %v10219_v12  ;;  %v12323_v12 = vld [vmem:[#allocation78_spill] sm:$0xff] }
0x114d   : > { %4897 = vmatprep.subr.bf16.mxu1 %v10225_v45  ;;  %v12324_v45 = vld [vmem:[#allocation79_spill] sm:$0xff] }
0x1150   : > { %4898 = vmatpush1.bf16.msra.mxu1 %v10231_v32  ;;  %v12325_v32 = vld [vmem:[#allocation80_spill] sm:$0xff] }
0x1151   : > { %4899 = vmatprep.subr.bf16.mxu1 %v10237_v9  ;;  %v12326_v9 = vld [vmem:[#allocation81_spill] sm:$0xff] }
0x1154   : > { %4900 = vmatpush1.bf16.msra.mxu1 %v12315_v47  ;;  %v7342_v47 = vld [vmem:[%s11853_s5 + $0xa4] ss:$16 sps:$4 sm:$0xff]  }
0x1155   : > { %4901 = vmatprep.subr.bf16.mxu1 %v12316_v25  ;;  %v7343_v25 = vld [vmem:[%s11853_s5 + $0xa0] ss:$16 sps:$4 sm:$0xff]  }
0x1158   : > { %4902 = vmatpush1.bf16.msra.mxu1 %v12317_v1  ;;  %v7344_v1 = vld [vmem:[%s11853_s5 + $0xc4] ss:$16 sps:$4 sm:$0xff]  }
0x1159   : > { %4903 = vmatprep.subr.bf16.mxu1 %v12318_v48  ;;  %v7345_v48 = vld [vmem:[%s11853_s5 + $0xc0] ss:$16 sps:$4 sm:$0xff]  }
0x115c   : > { %4904 = vmatpush1.bf16.msra.mxu1 %v12319_v46  ;;  %v7346_v46 = vld [vmem:[%s11853_s5 + $0xe4] ss:$16 sps:$4 sm:$0xff]  }
0x115d   : > { %4905 = vmatprep.subr.bf16.mxu1 %v12320_v7  ;;  %v7347_v7 = vld [vmem:[%s11853_s5 + $0xe0] ss:$16 sps:$4 sm:$0xff]  }
0x1160   : > { %4906 = vmatpush1.bf16.msra.mxu1 %v12321_v11  ;;  %v7348_v11 = vld [vmem:[%s11853_s5 + $0x104] ss:$16 sps:$4 sm:$0xff]  }
0x1161   : > { %4907 = vmatprep.subr.bf16.mxu1 %v12322_v24  ;;  %v7349_v24 = vld [vmem:[%s11853_s5 + $0x100] ss:$16 sps:$4 sm:$0xff]  }
0x1164   : > { %4908 = vmatpush1.bf16.msra.mxu1 %v12323_v12  ;;  %v7350_v12 = vld [vmem:[%s11853_s5 + $0x124] ss:$16 sps:$4 sm:$0xff]  }
0x1165   : > { %4909 = vmatprep.subr.bf16.mxu1 %v12324_v45  ;;  %v7351_v45 = vld [vmem:[%s11853_s5 + $0x120] ss:$16 sps:$4 sm:$0xff]  }
0x1168   : > { %4910 = vmatpush1.bf16.msra.mxu1 %v12325_v32  ;;  %v7352_v32 = vld [vmem:[%s11853_s5 + $0x144] ss:$16 sps:$4 sm:$0xff]  }
0x1169   : > { %4911 = vmatprep.subr.bf16.mxu1 %v12326_v9  ;;  %v7353_v9 = vld [vmem:[%s11853_s5 + $0x140] ss:$16 sps:$4 sm:$0xff]  }
0x116c   : > { %4912 = vmatpush1.bf16.msra.mxu1 %v12327_v56  ;;  %v7354_v56 = vld [vmem:[%s11853_s5 + $0x164] ss:$16 sps:$4 sm:$0xff]  }
0x116d   : > { %4913 = vmatprep.subr.bf16.mxu1 %v12328_v37  ;;  %v7355_v37 = vld [vmem:[%s11853_s5 + $0x160] ss:$16 sps:$4 sm:$0xff]  }
0x1170   : > { %4914 = vmatpush1.bf16.msra.mxu1 %v12329_v15  ;;  %v7356_v15 = vld [vmem:[%s11853_s5 + $0x184] ss:$16 sps:$4 sm:$0xff]  }
0x1171   : > { %4915 = vmatprep.subr.bf16.mxu1 %v12330_v5  ;;  %v7357_v5 = vld [vmem:[%s11853_s5 + $0x180] ss:$16 sps:$4 sm:$0xff]  }
0x1174   : > { %4916 = vmatpush1.bf16.msra.mxu1 %v12331_v2  ;;  %v7358_v2 = vld [vmem:[%s11853_s5 + $0x1a4] ss:$16 sps:$4 sm:$0xff]  }
0x1175   : > { %4917 = vmatprep.subr.bf16.mxu1 %v12332_v14  ;;  %v7359_v14 = vld [vmem:[%s11853_s5 + $0x1a0] ss:$16 sps:$4 sm:$0xff]  }
0x1178   : > { %4918 = vmatpush1.bf16.msra.mxu1 %v12333_v52  ;;  %v7360_v52 = vld [vmem:[%s11853_s5 + $0x1c4] ss:$16 sps:$4 sm:$0xff]  }
0x1179   : > { %5429 = vmatprep.subr.bf16.mxu1 %v7332_v4  ;;  %v7361_v4 = vld [vmem:[%s11853_s5 + $0x1c0] ss:$16 sps:$4 sm:$0xff]  }
0x120e   : > { %v4787_v63 = vpop.f32.mrb[76].mxu1 }
0x120f   : > { %v6154_v28 = vadd.f32 %v4787_v63, %v12334_v62  ;;  %v4789_v50 = vpop.f32.mrb[77].mxu1  ;;  %v7362_v63 = vld [vmem:[%s11853_s5 + $0x1e4] ss:$16 sps:$4 sm:$0xff]  }
0x1210   : > { %v6155_v54 = vadd.f32 %v4789_v50, %v12335_v19  ;;  %v4791_v13 = vpop.f32.mrb[78].mxu1  ;;  %v7364_v50 = vld [vmem:[%s11854_s6 + $0x40] sm:$0xff]  }
0x1211   : > { %6851 = vtanh.f32 %v6154_v28  ;;  %v4792_v29 = vpop.f32.mrb[79].mxu1  ;;  %v7363_v28 = vld [vmem:[%s11853_s5 + $0x1e0] ss:$16 sps:$4 sm:$0xff]  }
0x1212   : > { %6853 = vtanh.f32 %v6155_v54  ;;  %v12336_v13 = vld [vmem:[#allocation106_spill] sm:$0xff] }
0x121b   : > { %v6852_v53 = vpop.eup %6851 }
0x121c   : > { %v6854_v33 = vpop.eup %6853  ;;  %v4796_v20 = vpack.c.bf16 %v6852_v53, %v6852_v53 }
0x121d   : > { %v4797_v49 = vpack.c.bf16 %v6854_v33, %v6854_v33  ;;  %v12337_v33 = vld [vmem:[#allocation107_spill] sm:$0xff] }
0x121f   : > { %4830 = vmatprep.mubr.bf16.mxu0 %v4797_v49 }
0x1220   : > { %4831 = vmatmul.mubr.bf16.vlgmr.msra.gmra.mrb[48].mxu0 %v4796_v20 }
0x1221   : > { %4845 = vmatpush1.bf16.msra.mxu0 %v7333_v3 }
0x1222   : > { %4846 = vmatprep.subr.bf16.mxu0 %v7334_v59 }
0x1225   : > { %4847 = vmatpush1.bf16.msra.mxu0 %v7335_v51  ;;  %v4842_v51 = vpack.c.bf16 %v10515_v16, %v10513_v55  ;;  %v7368_v55 = vld [vmem:[%s11860_s12 + $0x14] ss:$8 sps:$4 sm:$0xff]   ;;  %v7369_v16 = vld [vmem:[%s11854_s6 + $0x8] sm:$0xff]  }
0x1226   : > { %4848 = vmatprep.subr.bf16.mxu0 %v7336_v34  ;;  %v7365_v34 = vld [vmem:[%s11854_s6] sm:$0xff]  }
0x1229   : > { %4849 = vmatpush1.bf16.msra.mxu0 %v7337_v41  ;;  %v7366_v41 = vld [vmem:[%s11860_s12] ss:$8 sps:$4 sm:$0xff]  }
0x122a   : > { %4850 = vmatprep.subr.bf16.mxu0 %v7338_v10  ;;  %v7367_v10 = vld [vmem:[%s11854_s6 + $0x48] sm:$0xff]  }
0x122d   : > { %4851 = vmatpush1.bf16.msra.mxu0 %v7339_v58  ;;  %v7370_v58 = vld [vmem:[%s11860_s12 + $0x10] ss:$8 sps:$4 sm:$0xff]  }
0x122e   : > { %4852 = vmatprep.subr.bf16.mxu0 %v7340_v6  ;;  %v7371_v6 = vld [vmem:[%s11854_s6 + $0x50] sm:$0xff]  }
0x1231   : > { %4853 = vmatpush1.bf16.msra.mxu0 %v7341_v8  ;;  %v7372_v8 = vld [vmem:[%s11860_s12 + $0x24] ss:$8 sps:$4 sm:$0xff]  }
0x1232   : > { %4854 = vmatprep.subr.bf16.mxu0 %v7342_v47  ;;  %v7373_v47 = vld [vmem:[%s11854_s6 + $0x10] sm:$0xff]  }
0x1235   : > { %4855 = vmatpush1.bf16.msra.mxu0 %v7343_v25  ;;  %v7374_v25 = vld [vmem:[%s11860_s12 + $0x20] ss:$8 sps:$4 sm:$0xff]  }
0x1236   : > { %4856 = vmatprep.subr.bf16.mxu0 %v7344_v1  ;;  %v7375_v1 = vld [vmem:[%s11854_s6 + $0x58] sm:$0xff]  }
0x1239   : > { %4857 = vmatpush1.bf16.msra.mxu0 %v7345_v48  ;;  %v7376_v48 = vld [vmem:[%s11860_s12 + $0x34] ss:$8 sps:$4 sm:$0xff]  }
0x123a   : > { %4858 = vmatprep.subr.bf16.mxu0 %v7346_v46  ;;  %v7377_v46 = vld [vmem:[%s11854_s6 + $0x18] sm:$0xff]  }
0x123d   : > { %4859 = vmatpush1.bf16.msra.mxu0 %v7347_v7  ;;  %v7378_v7 = vld [vmem:[%s11860_s12 + $0x30] ss:$8 sps:$4 sm:$0xff]  }
0x123e   : > { %4860 = vmatprep.subr.bf16.mxu0 %v7348_v11  ;;  %v7379_v11 = vld [vmem:[%s11854_s6 + $0x60] sm:$0xff]  }
0x1241   : > { %4861 = vmatpush1.bf16.msra.mxu0 %v7349_v24  ;;  %v7380_v24 = vld [vmem:[%s11860_s12 + $0x44] ss:$8 sps:$4 sm:$0xff]  }
0x1242   : > { %4862 = vmatprep.subr.bf16.mxu0 %v7350_v12  ;;  %v7381_v12 = vld [vmem:[%s11854_s6 + $0x20] sm:$0xff]  }
0x1245   : > { %4863 = vmatpush1.bf16.msra.mxu0 %v7351_v45  ;;  %v7382_v45 = vld [vmem:[%s11860_s12 + $0x40] ss:$8 sps:$4 sm:$0xff]  }
0x1246   : > { %4864 = vmatprep.subr.bf16.mxu0 %v7352_v32  ;;  %v7383_v32 = vld [vmem:[%s11854_s6 + $0x68] sm:$0xff]  }
0x1249   : > { %4865 = vmatpush1.bf16.msra.mxu0 %v7353_v9  ;;  %v7384_v9 = vld [vmem:[%s11860_s12 + $0x54] ss:$8 sps:$4 sm:$0xff]  }
0x124a   : > { %4866 = vmatprep.subr.bf16.mxu0 %v7354_v56  ;;  %v7385_v56 = vld [vmem:[%s11854_s6 + $0x28] sm:$0xff]  }
0x124d   : > { %4867 = vmatpush1.bf16.msra.mxu0 %v7355_v37  ;;  %v7386_v37 = vld [vmem:[%s11860_s12 + $0x50] ss:$8 sps:$4 sm:$0xff]  }
0x124e   : > { %4868 = vmatprep.subr.bf16.mxu0 %v7356_v15  ;;  %v7387_v15 = vld [vmem:[%s11854_s6 + $0x70] sm:$0xff]  }
0x1251   : > { %4869 = vmatpush1.bf16.msra.mxu0 %v7357_v5  ;;  %v7388_v5 = vld [vmem:[%s11860_s12 + $0x64] ss:$8 sps:$4 sm:$0xff]  }
0x1252   : > { %4870 = vmatprep.subr.bf16.mxu0 %v7358_v2  ;;  %v7389_v2 = vld [vmem:[%s11854_s6 + $0x30] sm:$0xff]  }
0x1255   : > { %4871 = vmatpush1.bf16.msra.mxu0 %v7359_v14  ;;  %v7390_v14 = vld [vmem:[%s11860_s12 + $0x60] ss:$8 sps:$4 sm:$0xff]  }
0x1256   : > { %4872 = vmatprep.subr.bf16.mxu0 %v7360_v52  ;;  %v7391_v52 = vld [vmem:[%s11854_s6 + $0x78] sm:$0xff]  }
0x1259   : > { %4873 = vmatpush1.bf16.msra.mxu0 %v7361_v4  ;;  %v7392_v4 = vld [vmem:[%s11860_s12 + $0x74] ss:$8 sps:$4 sm:$0xff]  }
0x125a   : > { %4874 = vmatprep.subr.bf16.mxu0 %v7362_v63  ;;  %v7393_v63 = vld [vmem:[%s11854_s6 + $0x38] sm:$0xff]  }
0x125d   : > { %4875 = vmatpush1.bf16.msra.mxu0 %v7363_v28  ;;  %v7394_v28 = vld [vmem:[%s11860_s12 + $0x70] ss:$8 sps:$4 sm:$0xff]  }
0x125e   : > { %6044 = vmatprep.subr.bf16.mxu0 %v7364_v50  ;;  %v12338_v50 = vld [vmem:[#allocation14_spill] sm:$0xff] }
0x12f3   : > { %v4832_v54 = vpop.f32.mrb[48].mxu0 }
0x12f4   : > { %v4833_v29 = vadd.f32 %v4832_v54, %v12336_v13  ;;  %v4834_v53 = vpop.f32.mrb[49].mxu0  ;;  %v7395_v54 = vld [vmem:[%s11860_s12 + $0x84] ss:$8 sps:$4 sm:$0xff]  }
0x12f5   : > { %v4835_v49 = vadd.f32 %v4834_v53, %v12337_v33  ;;  %v4836_v20 = vpop.f32.mrb[50].mxu0  ;;  %v7397_v53 = vld [vmem:[%s11860_s12 + $0x94] ss:$8 sps:$4 sm:$0xff]  }
0x12f6   : > { %5960 = vst [vmem:[%s7769_s15 + $0x20] sm:$0xff] %v4833_v29  ;;  %v4837_v3 = vpop.f32.mrb[51].mxu0  ;;  %v7399_v20 = vld [vmem:[%s11860_s12 + $0xa4] ss:$8 sps:$4 sm:$0xff]  }
0x12f7   : > { %5961 = vst [vmem:[%s7769_s15 + $0x28] sm:$0xff] %v4835_v49  ;;  %v4843_v59 = vpack.c.bf16 %v4835_v49, %v4833_v29  ;;  %v7396_v29 = vld [vmem:[%s11860_s12 + $0x80] ss:$8 sps:$4 sm:$0xff]   ;;  %v7398_v49 = vld [vmem:[%s11860_s12 + $0x90] ss:$8 sps:$4 sm:$0xff]  }
0x12f8   : > { %v7400_v3 = vld [vmem:[%s11860_s12 + $0xa0] ss:$8 sps:$4 sm:$0xff]  }
0x12f9   : > { %4876 = vmatprep.mubr.bf16.mxu0 %v4843_v59  ;;  %4919 = vmatprep.mubr.bf16.mxu1 %v4843_v59  ;;  %v7401_v59 = vld [vmem:[%s11860_s12 + $0xb4] ss:$8 sps:$4 sm:$0xff]  }
0x12fa   : > { %4877 = vmatmul.mubr.bf16.vlgmr.msra.gmra.mrb[52].mxu0 %v4842_v51  ;;  %4920 = vmatmul.mubr.bf16.vlgmr.msra.gmra.mrb[28].mxu1 %v4842_v51  ;;  %v7402_v51 = vld [vmem:[%s11860_s12 + $0xb0] ss:$8 sps:$4 sm:$0xff]  }
0x12fb   : > { %6045 = vmatpush3.bf16.msra.mxu0 %v7365_v34  ;;  %5430 = vmatpush1.bf16.msra.mxu1 %v7366_v41  ;;  %v7403_v34 = vld [vmem:[%s11860_s12 + $0xc4] ss:$8 sps:$4 sm:$0xff]   ;;  %v7404_v41 = vld [vmem:[%s11860_s12 + $0xc0] ss:$8 sps:$4 sm:$0xff]  }
0x12fc   : > { %6046 = vmatprep.subr.bf16.mxu0 %v7367_v10  ;;  %5431 = vmatprep.subr.bf16.mxu1 %v7368_v55  ;;  %v7405_v10 = vld [vmem:[%s11860_s12 + $0xd4] ss:$8 sps:$4 sm:$0xff]   ;;  %v7406_v55 = vld [vmem:[%s11860_s12 + $0xd0] ss:$8 sps:$4 sm:$0xff]  }
0x12ff   : > { %6047 = vmatpush3.bf16.msra.mxu0 %v7369_v16  ;;  %5432 = vmatpush1.bf16.msra.mxu1 %v7370_v58  ;;  %v7407_v16 = vld [vmem:[%s11860_s12 + $0xe4] ss:$8 sps:$4 sm:$0xff]   ;;  %v7408_v58 = vld [vmem:[%s11860_s12 + $0xe0] ss:$8 sps:$4 sm:$0xff]  }
0x1300   : > { %6048 = vmatprep.subr.bf16.mxu0 %v7371_v6  ;;  %5433 = vmatprep.subr.bf16.mxu1 %v7372_v8  ;;  %v7409_v6 = vld [vmem:[%s11860_s12 + $0xf4] ss:$8 sps:$4 sm:$0xff]   ;;  %v7410_v8 = vld [vmem:[%s11860_s12 + $0xf0] ss:$8 sps:$4 sm:$0xff]  }
0x1303   : > { %6049 = vmatpush3.bf16.msra.mxu0 %v7373_v47  ;;  %5434 = vmatpush1.bf16.msra.mxu1 %v7374_v25  ;;  %v6100_v47 = vld [vmem:[#allocation2 + $0xc0] sm:$0xff]  ;;  %v6104_v25 = vld [vmem:[#allocation2 + $0xc8] sm:$0xff] }
0x1304   : > { %6050 = vmatprep.subr.bf16.mxu0 %v7375_v1  ;;  %5435 = vmatprep.subr.bf16.mxu1 %v7376_v48 }
0x1307   : > { %6051 = vmatpush3.bf16.msra.mxu0 %v7377_v46  ;;  %5436 = vmatpush1.bf16.msra.mxu1 %v7378_v7  ;;  %v6108_v46 = vld [vmem:[#allocation2 + $0xe0] sm:$0xff] }
0x1308   : > { %6052 = vmatprep.subr.bf16.mxu0 %v7379_v11  ;;  %5437 = vmatprep.subr.bf16.mxu1 %v7380_v24 }
0x130b   : > { %6053 = vmatpush3.bf16.msra.mxu0 %v7381_v12  ;;  %5438 = vmatpush1.bf16.msra.mxu1 %v7382_v45  ;;  %v6112_v12 = vld [vmem:[#allocation2 + $0xe8] sm:$0xff] }
0x130c   : > { %6054 = vmatprep.subr.bf16.mxu0 %v7383_v32  ;;  %5439 = vmatprep.subr.bf16.mxu1 %v7384_v9 }
0x130f   : > { %6055 = vmatpush3.bf16.msra.mxu0 %v7385_v56  ;;  %5440 = vmatpush1.bf16.msra.mxu1 %v7386_v37 }
0x1310   : > { %6056 = vmatprep.subr.bf16.mxu0 %v7387_v15  ;;  %5441 = vmatprep.subr.bf16.mxu1 %v7388_v5 }
0x1313   : > { %6057 = vmatpush3.bf16.msra.mxu0 %v7389_v2  ;;  %5442 = vmatpush1.bf16.msra.mxu1 %v7390_v14 }
0x1314   : > { %6058 = vmatprep.subr.bf16.mxu0 %v7391_v52  ;;  %5443 = vmatprep.subr.bf16.mxu1 %v7392_v4  ;;  %v6139_v4 = vld [vmem:[#allocation2 + $0xd0] sm:$0xff] }
0x1317   : > { %6059 = vmatpush3.bf16.msra.mxu0 %v7393_v63  ;;  %5444 = vmatpush1.bf16.msra.mxu1 %v7394_v28  ;;  %v6145_v28 = vld [vmem:[#allocation2 + $0xf0] sm:$0xff] }
0x1318   : > { %5039 = vmatprep.subr.bf16.mxu0 %v12338_v50  ;;  %5445 = vmatprep.subr.bf16.mxu1 %v7395_v54  ;;  %v6142_v54 = vld [vmem:[#allocation2 + $0xd8] sm:$0xff] }
0x131b   : > { %5446 = vmatpush1.bf16.msra.mxu1 %v7396_v29 }
0x131c   : > { %5447 = vmatprep.subr.bf16.mxu1 %v7397_v53 }
0x131f   : > { %5448 = vmatpush1.bf16.msra.mxu1 %v7398_v49 }
0x1320   : > { %5449 = vmatprep.subr.bf16.mxu1 %v7399_v20 }
0x1323   : > { %5450 = vmatpush1.bf16.msra.mxu1 %v7400_v3 }
0x1324   : > { %5451 = vmatprep.subr.bf16.mxu1 %v7401_v59  ;;  %v6148_v59 = vld [vmem:[#allocation2 + $0xf8] sm:$0xff] }
0x1327   : > { %5452 = vmatpush1.bf16.msra.mxu1 %v7402_v51 }
0x1328   : > { %5453 = vmatprep.subr.bf16.mxu1 %v7403_v34 }
0x132b   : > { %5454 = vmatpush1.bf16.msra.mxu1 %v7404_v41 }
0x132c   : > { %5455 = vmatprep.subr.bf16.mxu1 %v7405_v10 }
0x132f   : > { %5456 = vmatpush1.bf16.msra.mxu1 %v7406_v55 }
0x1330   : > { %5457 = vmatprep.subr.bf16.mxu1 %v7407_v16 }
0x1333   : > { %5458 = vmatpush1.bf16.msra.mxu1 %v7408_v58 }
0x1334   : > { %5459 = vmatprep.subr.bf16.mxu1 %v7409_v6 }
0x1337   : > { %5460 = vmatpush1.bf16.msra.mxu1 %v7410_v8 }
0x13cd   : > { %v4878_v1 = vpop.f32.mrb[52].mxu0  ;;  %v4921_v48 = vpop.f32.mrb[28].mxu1 }
0x13ce   : > { %v6101_v7 = vadd.f32 %v6100_v47, %v4878_v1  ;;  %v4880_v11 = vpop.f32.mrb[53].mxu0  ;;  %v4923_v24 = vpop.f32.mrb[29].mxu1  ;;  %v6140_v50 = vadd.f32 %v6139_v4, %v4921_v48 }
0x13cf   : > { %v6105_v45 = vadd.f32 %v6104_v25, %v4880_v11  ;;  %v4882_v32 = vpop.f32.mrb[54].mxu0  ;;  %v4925_v9 = vpop.f32.mrb[30].mxu1  ;;  %v6143_v53 = vadd.f32 %v6142_v54, %v4923_v24  ;;  %v12348_v54 = vld [vmem:[#allocation25_spill] sm:$0xff] }
0x13d0   : > { %v5962_v56 = vmul.f32 -1.442695, %v6101_v7  ;;  %v6109_v37 = vadd.f32 %v6108_v46, %v4882_v32  ;;  %v4884_v15 = vpop.f32.mrb[55].mxu0  ;;  %v4927_v5 = vpop.f32.mrb[31].mxu1  ;;  %v6146_v29 = vadd.f32 %v6145_v28, %v4925_v9  ;;  %v5964_v49 = vmul.f32 -1.442695, %v6140_v50 }
0x13d1   : > { %v5963_v2 = vmul.f32 -1.442695, %v6105_v45  ;;  %v6113_v14 = vadd.f32 %v6112_v12, %v4884_v15  ;;  %v6149_v55 = vadd.f32 %v6148_v59, %v4927_v5  ;;  %v12346_v28 = vld [vmem:[#allocation23_spill] sm:$0xff]  ;;  %v12347_v50 = vld [vmem:[#allocation24_spill] sm:$0xff]  ;;  %v12354_v59 = vld [vmem:[#allocation34_spill] sm:$0xff] }
0x13d2   : > { %6855 = vpow2.f32 %v5962_v56  ;;  %v5965_v52 = vmul.f32 -1.442695, %v6109_v37  ;;  %v5967_v3 = vmul.f32 -1.442695, %v6146_v29  ;;  %v12349_v29 = vld [vmem:[#allocation26_spill] sm:$0xff] }
0x13d3   : > { %v5966_v63 = vmul.f32 -1.442695, %v6113_v14  ;;  %6857 = vpow2.f32 %v5963_v2 }
0x13d4   : > { %6859 = vpow2.f32 %v5965_v52 }
0x13d5   : > { %6861 = vpow2.f32 %v5966_v63 }
0x13d6   : > { %6863 = vtanh.f32 %v6143_v53  ;;  %v12350_v53 = vld [vmem:[#allocation27_spill] sm:$0xff] }
0x13d7   : > { %6865 = vpow2.f32 %v5964_v49  ;;  %v12351_v49 = vld [vmem:[#allocation29_spill] sm:$0xff] }
0x13dc   : > { %v6856_v20 = vpop.eup %6855 }
0x13dd   : > { %v4965_v51 = vadd.f32 1.0, %v6856_v20  ;;  %v6858_v34 = vpop.eup %6857  ;;  %v12352_v20 = vld [vmem:[#allocation31_spill] sm:$0xff] }
0x13de   : > { %v6860_v41 = vpop.eup %6859  ;;  %v4966_v10 = vadd.f32 1.0, %v6858_v34  ;;  %v12356_v34 = vld [vmem:[#allocation38_spill] sm:$0xff] }
0x13df   : > { %6867 = vrcp.f32 %v4965_v51  ;;  %v4968_v16 = vadd.f32 1.0, %v6860_v41  ;;  %v6862_v58 = vpop.eup %6861  ;;  %v12355_v51 = vld [vmem:[#allocation36_spill] sm:$0xff] }
0x13e0   : > { %6869 = vpow2.f32 %v5967_v3  ;;  %v4969_v6 = vadd.f32 1.0, %v6862_v58  ;;  %v6864_v8 = vpop.eup %6863  ;;  %v12353_v3 = vld [vmem:[#allocation33_spill] sm:$0xff]  ;;  %v12357_v41 = vld [vmem:[#allocation40_spill] sm:$0xff] }
0x13e1   : > { %6871 = vrcp.f32 %v4966_v10  ;;  %v6866_v47 = vpop.eup %6865  ;;  %v12358_v10 = vld [vmem:[#allocation42_spill] sm:$0xff]  ;;  %v12361_v58 = vld [vmem:[#allocation48_spill] sm:$0xff] }
0x13e2   : > { %6873 = vrcp.f32 %v4968_v16  ;;  %v4967_v7 = vadd.f32 1.0, %v6866_v47  ;;  %v12360_v16 = vld [vmem:[#allocation46_spill] sm:$0xff] }
0x13e3   : > { %6875 = vtanh.f32 %v6149_v55  ;;  %v12359_v55 = vld [vmem:[#allocation44_spill] sm:$0xff]  ;;  %v12364_v47 = vld [vmem:[#allocation54_spill] sm:$0xff] }
0x13e4   : > { %6877 = vrcp.f32 %v4969_v6  ;;  %v12362_v6 = vld [vmem:[#allocation50_spill] sm:$0xff] }
0x13e5   : > { %6879 = vrcp.f32 %v4967_v7  ;;  %v12369_v7 = vld [vmem:[#allocation64_spill] sm:$0xff] }
0x13e9   : > { %v6868_v25 = vpop.eup %6867 }
0x13ea   : > { %v6870_v1 = vpop.eup %6869  ;;  %v4985_v48 = vmul.f32 %v6868_v25, %v10507_v57  ;;  %v12365_v25 = vld [vmem:[#allocation56_spill] sm:$0xff] }
0x13eb   : > { %v6872_v46 = vpop.eup %6871  ;;  %v4970_v56 = vadd.f32 1.0, %v6870_v1  ;;  %v12366_v1 = vld [vmem:[#allocation58_spill] sm:$0xff] }
0x13ec   : > { %v6874_v11 = vpop.eup %6873  ;;  %v4987_v24 = vmul.f32 %v6872_v46, %v6864_v8  ;;  %v12363_v8 = vld [vmem:[#allocation52_spill] sm:$0xff]  ;;  %v12368_v46 = vld [vmem:[#allocation62_spill] sm:$0xff] }
0x13ed   : > { %v6876_v12 = vpop.eup %6875  ;;  %v4986_v45 = vmul.f32 %v6874_v11, %v10510_v0  ;;  %v12370_v11 = vld [vmem:[#allocation35_spill] sm:$0xff] }
0x13ee   : > { %v6878_v32 = vpop.eup %6877  ;;  %v4989_v9 = vadd.f32 %v4987_v24, %v4985_v48  ;;  %v12367_v48 = vld [vmem:[#allocation60_spill] sm:$0xff]  ;;  %v12371_v24 = vld [vmem:[#allocation37_spill] sm:$0xff] }
0x13ef   : > { %v4988_v37 = vmul.f32 %v6878_v32, %v6876_v12  ;;  %v6880_v5 = vpop.eup %6879  ;;  %v12372_v12 = vld [vmem:[#allocation39_spill] sm:$0xff] }
0x13f0   : > { %6881 = vtanh.f32 %v4989_v9  ;;  %5473 = vst [vmem:[#allocation3] sm:$0xff] %v4989_v9  ;;  %v12374_v32 = vld [vmem:[#allocation43_spill] sm:$0xff]  ;;  %v12375_v9 = vld [vmem:[#allocation45_spill] sm:$0xff] }
0x13f1   : > { %v4990_v15 = vadd.f32 %v4988_v37, %v4986_v45  ;;  %6883 = vrcp.f32 %v4970_v56  ;;  %v12373_v45 = vld [vmem:[#allocation41_spill] sm:$0xff]  ;;  %v12376_v56 = vld [vmem:[#allocation47_spill] sm:$0xff] }
0x13f2   : > { %v12377_v37 = vld [vmem:[#allocation49_spill] sm:$0xff] }
0x13f3   : > { %6885 = vtanh.f32 %v4990_v15  ;;  %5474 = vst [vmem:[#allocation3 + $0x8] sm:$0xff] %v4990_v15  ;;  %v12378_v15 = vld [vmem:[#allocation51_spill] sm:$0xff] }
0x13fa   : > { %v6882_v57 = vpop.eup %6881 }
0x13fb   : > { %v11289_v2 = vmul.f32 %v6882_v57, %v6880_v5  ;;  %v6884_v14 = vpop.eup %6883  ;;  %v12379_v5 = vld [vmem:[#allocation53_spill] sm:$0xff]  ;;  %v12380_v57 = vld [vmem:[#allocation55_spill] sm:$0xff] }
0x13fd   : > { %v6886_v52 = vpop.eup %6885  ;;  %5475 = vst [vmem:[#allocation4] sm:$0xff] %v11289_v2  ;;  %v4995_v63 = vpack.c.bf16 %v11289_v2, %v11289_v2 }
0x13fe   : > { %v11292_v0 = vmul.f32 %v6886_v52, %v6884_v14  ;;  %v12381_v14 = vld [vmem:[#allocation57_spill] sm:$0xff] }
0x13ff   : > { %v12383_v52 = vld [vmem:[#allocation61_spill] sm:$0xff] }
0x1400   : > { %v4996_v4 = vpack.c.bf16 %v11292_v0, %v11292_v0  ;;  %5476 = vst [vmem:[#allocation4 + $0x8] sm:$0xff] %v11292_v0 }
0x1402   : > { %5029 = vmatprep.mubr.bf16.mxu0 %v4996_v4  ;;  %v12384_v4 = vld [vmem:[#allocation63_spill] sm:$0xff] }
0x1403   : > { %5030 = vmatmul.mubr.bf16.vlgmr.msra.gmra.mrb[56].mxu0 %v4995_v63  ;;  %v12385_v63 = vld [vmem:[#allocation65_spill] sm:$0xff] }
0x1404   : > { %5040 = vmatpush1.bf16.msra.mxu0 %v8199_v30  ;;  %5071 = vmatprep.mubr.bf16.mxu0 %v12158_v22 }
0x1405   : > { %5041 = vmatprep.subr.bf16.mxu0 %v8211_v35 }
0x1408   : > { %5042 = vmatpush1.bf16.msra.mxu0 %v8216_v36 }
0x1409   : > { %5043 = vmatprep.subr.bf16.mxu0 %v8225_v39 }
0x140c   : > { %5044 = vmatpush1.bf16.msra.mxu0 %v8228_v40 }
0x140d   : > { %5045 = vmatprep.subr.bf16.mxu0 %v8237_v43  ;;  %v7411_v43 = vld [vmem:[%s11855_s7] ss:$0 sm:$0xff] }
0x1410   : > { %5046 = vmatpush1.bf16.msra.mxu0 %v8240_v44 }
0x1411   : > { %5047 = vmatprep.subr.bf16.mxu0 %v8305_v18 }
0x1414   : > { %5048 = vmatpush1.bf16.msra.mxu0 %v8312_v21 }
0x1415   : > { %5049 = vmatprep.subr.bf16.mxu0 %v8329_v26  ;;  %v12339_v26 = vld [vmem:[#allocation16_spill] sm:$0xff] }
0x1418   : > { %5050 = vmatpush1.bf16.msra.mxu0 %v8336_v31  ;;  %v12340_v31 = vld [vmem:[#allocation17_spill] sm:$0xff] }
0x1419   : > { %5051 = vmatprep.subr.bf16.mxu0 %v8353_v42  ;;  %v12341_v42 = vld [vmem:[#allocation18_spill] sm:$0xff] }
0x141c   : > { %5052 = vmatpush1.bf16.msra.mxu0 %v12159_v60  ;;  %v12342_v60 = vld [vmem:[#allocation19_spill] sm:$0xff] }
0x141d   : > { %5053 = vmatprep.subr.bf16.mxu0 %v12160_v27  ;;  %v12343_v27 = vld [vmem:[#allocation20_spill] sm:$0xff] }
0x1420   : > { %5054 = vmatpush1.bf16.msra.mxu0 %v12161_v61  ;;  %v12344_v61 = vld [vmem:[#allocation21_spill] sm:$0xff] }
0x1421   : > { %5080 = vmatprep.subr.bf16.mxu0 %v12162_v23  ;;  %v12345_v23 = vld [vmem:[#allocation22_spill] sm:$0xff] }
0x14d6   : > { %v6060_v30 = vpop.f32.mrb[56].mxu0 }
0x14d7   : > { %v6061_v35 = vpop.f32.mrb[57].mxu0 }
0x14d8   : > { %v6062_v36 = vadd.f32 %v6061_v35, %v6060_v30  ;;  %v6063_v39 = vpop.f32.mrb[58].mxu0  ;;  %v7412_v30 = vld [vmem:[%s11858_s10 + $0x4] ss:$8 sps:$4 sm:$0xff]   ;;  %v7413_v35 = vld [vmem:[%s11858_s10] ss:$8 sps:$4 sm:$0xff]  }
0x14d9   : > { %v6064_v40 = vpop.f32.mrb[59].mxu0  ;;  %v7415_v39 = vld [vmem:[%s11858_s10 + $0x10] ss:$8 sps:$4 sm:$0xff]  }
0x14da   : > { %v5032_v44 = vadd.f32 %v7411_v43, %v6062_v36  ;;  %v7414_v36 = vld [vmem:[%s11858_s10 + $0x14] ss:$8 sps:$4 sm:$0xff]   ;;  %v7416_v40 = vld [vmem:[%s11858_s10 + $0x24] ss:$8 sps:$4 sm:$0xff]   ;;  %v7417_v43 = vld [vmem:[%s11858_s10 + $0x20] ss:$8 sps:$4 sm:$0xff]  }
0x14dc   : > { %6887 = vtanh.f32 %v5032_v44  ;;  %v7418_v44 = vld [vmem:[%s11858_s10 + $0x34] ss:$8 sps:$4 sm:$0xff]  }
0x14e6   : > { %v6888_v18 = vpop.eup %6887 }
0x14e7   : > { %v5038_v21 = vpack.c.bf16 %v6888_v18, %v6888_v18  ;;  %v7419_v18 = vld [vmem:[%s11858_s10 + $0x30] ss:$8 sps:$4 sm:$0xff]  }
0x14e9   : > { %5072 = vmatmul.mubr.bf16.vlgmr.msra.gmra.mrb[60].mxu0 %v5038_v21 }
0x14ea   : > { %5081 = vmatpush1.bf16.msra.mxu0 %v12339_v26  ;;  %5112 = vmatprep.mubr.bf16.mxu0 %v12158_v22  ;;  %v7421_v26 = vld [vmem:[%s11858_s10 + $0x40] ss:$8 sps:$4 sm:$0xff]  }
0x14eb   : > { %5082 = vmatprep.subr.bf16.mxu0 %v12340_v31  ;;  %v7422_v31 = vld [vmem:[%s11858_s10 + $0x54] ss:$8 sps:$4 sm:$0xff]  }
0x14ee   : > { %5083 = vmatpush1.bf16.msra.mxu0 %v12341_v42  ;;  %v7423_v42 = vld [vmem:[%s11858_s10 + $0x50] ss:$8 sps:$4 sm:$0xff]  }
0x14ef   : > { %5084 = vmatprep.subr.bf16.mxu0 %v12342_v60  ;;  %v7424_v60 = vld [vmem:[%s11858_s10 + $0x64] ss:$8 sps:$4 sm:$0xff]  }
0x14f2   : > { %5085 = vmatpush1.bf16.msra.mxu0 %v12343_v27  ;;  %v7425_v27 = vld [vmem:[%s11858_s10 + $0x60] ss:$8 sps:$4 sm:$0xff]  }
0x14f3   : > { %5086 = vmatprep.subr.bf16.mxu0 %v12344_v61  ;;  %v7426_v61 = vld [vmem:[%s11858_s10 + $0x74] ss:$8 sps:$4 sm:$0xff]  }
0x14f6   : > { %5087 = vmatpush1.bf16.msra.mxu0 %v12345_v23  ;;  %v7427_v23 = vld [vmem:[%s11858_s10 + $0x70] ss:$8 sps:$4 sm:$0xff]  }
0x14f7   : > { %5088 = vmatprep.subr.bf16.mxu0 %v12346_v28  ;;  %v7428_v28 = vld [vmem:[%s11858_s10 + $0x84] ss:$8 sps:$4 sm:$0xff]  }
0x14fa   : > { %5089 = vmatpush1.bf16.msra.mxu0 %v12347_v50  ;;  %v7429_v50 = vld [vmem:[%s11858_s10 + $0x80] ss:$8 sps:$4 sm:$0xff]  }
0x14fb   : > { %5090 = vmatprep.subr.bf16.mxu0 %v12348_v54  ;;  %v7430_v54 = vld [vmem:[%s11858_s10 + $0x94] ss:$8 sps:$4 sm:$0xff]  }
0x14fe   : > { %5091 = vmatpush1.bf16.msra.mxu0 %v12349_v29  ;;  %v7431_v29 = vld [vmem:[%s11858_s10 + $0x90] ss:$8 sps:$4 sm:$0xff]  }
0x14ff   : > { %5092 = vmatprep.subr.bf16.mxu0 %v12350_v53  ;;  %v7432_v53 = vld [vmem:[%s11858_s10 + $0xa4] ss:$8 sps:$4 sm:$0xff]  }
0x1502   : > { %5093 = vmatpush1.bf16.msra.mxu0 %v12351_v49  ;;  %v7433_v49 = vld [vmem:[%s11858_s10 + $0xa0] ss:$8 sps:$4 sm:$0xff]  }
0x1503   : > { %5094 = vmatprep.subr.bf16.mxu0 %v12352_v20  ;;  %v7434_v20 = vld [vmem:[%s11858_s10 + $0xb4] ss:$8 sps:$4 sm:$0xff]  }
0x1506   : > { %5095 = vmatpush1.bf16.msra.mxu0 %v12353_v3  ;;  %v7435_v3 = vld [vmem:[%s11858_s10 + $0xb0] ss:$8 sps:$4 sm:$0xff]  }
0x1507   : > { %5121 = vmatprep.subr.bf16.mxu0 %v12354_v59  ;;  %v7436_v59 = vld [vmem:[%s11858_s10 + $0xc4] ss:$8 sps:$4 sm:$0xff]  }
0x1509   : > { %5113 = vmatmul.mubr.bf16.vlgmr.msra.gmra.mrb[64].mxu0 %v5038_v21 }
0x150a   : > { %5122 = vmatpush1.bf16.msra.mxu0 %v12355_v51  ;;  %5153 = vmatprep.mubr.bf16.mxu0 %v12158_v22  ;;  %v7437_v51 = vld [vmem:[%s11858_s10 + $0xc0] ss:$8 sps:$4 sm:$0xff]  }
0x150b   : > { %5123 = vmatprep.subr.bf16.mxu0 %v12356_v34  ;;  %v7438_v34 = vld [vmem:[%s11858_s10 + $0xd4] ss:$8 sps:$4 sm:$0xff]  }
0x150e   : > { %5124 = vmatpush1.bf16.msra.mxu0 %v12357_v41  ;;  %v7439_v41 = vld [vmem:[%s11858_s10 + $0xd0] ss:$8 sps:$4 sm:$0xff]  }
0x150f   : > { %5125 = vmatprep.subr.bf16.mxu0 %v12358_v10  ;;  %v7440_v10 = vld [vmem:[%s11858_s10 + $0xe4] ss:$8 sps:$4 sm:$0xff]  }
0x1512   : > { %5126 = vmatpush1.bf16.msra.mxu0 %v12359_v55  ;;  %v7441_v55 = vld [vmem:[%s11858_s10 + $0xe0] ss:$8 sps:$4 sm:$0xff]  }
0x1513   : > { %5127 = vmatprep.subr.bf16.mxu0 %v12360_v16  ;;  %v7442_v16 = vld [vmem:[%s11858_s10 + $0xf4] ss:$8 sps:$4 sm:$0xff]  }
0x1516   : > { %5128 = vmatpush1.bf16.msra.mxu0 %v12361_v58  ;;  %v7443_v58 = vld [vmem:[%s11858_s10 + $0xf0] ss:$8 sps:$4 sm:$0xff]  }
0x1517   : > { %5129 = vmatprep.subr.bf16.mxu0 %v12362_v6  ;;  %v7444_v6 = vld [vmem:[%s11858_s10 + $0x104] ss:$8 sps:$4 sm:$0xff]  }
0x151a   : > { %5130 = vmatpush1.bf16.msra.mxu0 %v12363_v8 }
0x151b   : > { %5131 = vmatprep.subr.bf16.mxu0 %v12364_v47 }
0x151e   : > { %5132 = vmatpush1.bf16.msra.mxu0 %v12365_v25 }
0x151f   : > { %5133 = vmatprep.subr.bf16.mxu0 %v12366_v1 }
0x1522   : > { %5134 = vmatpush1.bf16.msra.mxu0 %v12367_v48 }
0x1523   : > { %5135 = vmatprep.subr.bf16.mxu0 %v12368_v46  ;;  %v12386_v46 = vld [vmem:[#allocation66_spill] sm:$0xff] }
0x1526   : > { %5136 = vmatpush1.bf16.msra.mxu0 %v12369_v7 }
0x1527   : > { %5162 = vmatprep.subr.bf16.mxu0 %v12370_v11  ;;  %v12387_v11 = vld [vmem:[#allocation67_spill] sm:$0xff] }
0x1529   : > { %5154 = vmatmul.mubr.bf16.vlgmr.msra.gmra.mrb[68].mxu0 %v5038_v21 }
0x152a   : > { %5163 = vmatpush1.bf16.msra.mxu0 %v12371_v24  ;;  %5194 = vmatprep.mubr.bf16.mxu0 %v12158_v22  ;;  %v12382_v22 = vld [vmem:[#allocation59_spill] sm:$0xff] }
0x152b   : > { %5164 = vmatprep.subr.bf16.mxu0 %v12372_v12 }
0x152e   : > { %5165 = vmatpush1.bf16.msra.mxu0 %v12373_v45  ;;  %v12388_v45 = vld [vmem:[#allocation68_spill] sm:$0xff] }
0x152f   : > { %5166 = vmatprep.subr.bf16.mxu0 %v12374_v32 }
0x1532   : > { %5167 = vmatpush1.bf16.msra.mxu0 %v12375_v9  ;;  %v12389_v9 = vld [vmem:[#allocation69_spill] sm:$0xff] }
0x1533   : > { %5168 = vmatprep.subr.bf16.mxu0 %v12376_v56 }
0x1536   : > { %5169 = vmatpush1.bf16.msra.mxu0 %v12377_v37 }
0x1537   : > { %5170 = vmatprep.subr.bf16.mxu0 %v12378_v15 }
0x153a   : > { %5171 = vmatpush1.bf16.msra.mxu0 %v12379_v5 }
0x153b   : > { %5172 = vmatprep.subr.bf16.mxu0 %v12380_v57 }
0x153e   : > { %5173 = vmatpush1.bf16.msra.mxu0 %v12381_v14 }
0x153f   : > { %5174 = vmatprep.subr.bf16.mxu0 %v12382_v22 }
0x1542   : > { %5175 = vmatpush1.bf16.msra.mxu0 %v12383_v52 }
0x1543   : > { %5176 = vmatprep.subr.bf16.mxu0 %v12384_v4 }
0x1546   : > { %5177 = vmatpush1.bf16.msra.mxu0 %v12385_v63 }
0x1547   : > { %5261 = vmatprep.subr.bf16.mxu0 %v7412_v30  ;;  %v12390_v30 = vld [vmem:[#allocation70_spill] sm:$0xff] }
0x1549   : > { %5195 = vmatmul.mubr.bf16.vlgmr.msra.gmra.mrb[72].mxu0 %v5038_v21  ;;  %v7420_v21 = vld [vmem:[%s11858_s10 + $0x44] ss:$8 sps:$4 sm:$0xff]  }
0x154a   : > { %5262 = vmatpush1.bf16.msra.mxu0 %v7413_v35 }
0x154b   : > { %5263 = vmatprep.subr.bf16.mxu0 %v7414_v36  ;;  %v12391_v36 = vld [vmem:[#allocation71_spill] sm:$0xff] }
0x154e   : > { %5264 = vmatpush1.bf16.msra.mxu0 %v7415_v39 }
0x154f   : > { %5265 = vmatprep.subr.bf16.mxu0 %v7416_v40 }
0x1552   : > { %5266 = vmatpush1.bf16.msra.mxu0 %v7417_v43 }
0x1553   : > { %5267 = vmatprep.subr.bf16.mxu0 %v7418_v44 }
0x1556   : > { %5268 = vmatpush1.bf16.msra.mxu0 %v7419_v18 }
0x1557   : > { %5269 = vmatprep.subr.bf16.mxu0 %v7420_v21 }
0x155a   : > { %5270 = vmatpush1.bf16.msra.mxu0 %v7421_v26 }
0x155b   : > { %5271 = vmatprep.subr.bf16.mxu0 %v7422_v31 }
0x155e   : > { %5272 = vmatpush1.bf16.msra.mxu0 %v7423_v42 }
0x155f   : > { %5273 = vmatprep.subr.bf16.mxu0 %v7424_v60 }
0x1562   : > { %5274 = vmatpush1.bf16.msra.mxu0 %v7425_v27 }
0x1563   : > { %5275 = vmatprep.subr.bf16.mxu0 %v7426_v61 }
0x1566   : > { %5276 = vmatpush1.bf16.msra.mxu0 %v7427_v23 }
0x1567   : > { %5277 = vmatprep.subr.bf16.mxu0 %v7428_v28 }
0x156a   : > { %5278 = vmatpush1.bf16.msra.mxu0 %v7429_v50 }
0x156b   : > { %5279 = vmatprep.subr.bf16.mxu0 %v7430_v54 }
0x156e   : > { %5280 = vmatpush1.bf16.msra.mxu0 %v7431_v29 }
0x156f   : > { %5281 = vmatprep.subr.bf16.mxu0 %v7432_v53 }
0x1572   : > { %5282 = vmatpush1.bf16.msra.mxu0 %v7433_v49 }
0x1573   : > { %5283 = vmatprep.subr.bf16.mxu0 %v7434_v20 }
0x1576   : > { %5284 = vmatpush1.bf16.msra.mxu0 %v7435_v3 }
0x1577   : > { %5285 = vmatprep.subr.bf16.mxu0 %v7436_v59 }
0x157a   : > { %5286 = vmatpush1.bf16.msra.mxu0 %v7437_v51 }
0x157b   : > { %5287 = vmatprep.subr.bf16.mxu0 %v7438_v34 }
0x157e   : > { %5288 = vmatpush1.bf16.msra.mxu0 %v7439_v41 }
0x157f   : > { %5289 = vmatprep.subr.bf16.mxu0 %v7440_v10 }
0x1582   : > { %5290 = vmatpush1.bf16.msra.mxu0 %v7441_v55 }
0x1583   : > { %5291 = vmatprep.subr.bf16.mxu0 %v7442_v16 }
0x1586   : > { %5292 = vmatpush1.bf16.msra.mxu0 %v7443_v58 }
0x1587   : > { %5302 = vmatprep.subr.bf16.mxu0 %v7444_v6 }
0x15bc   : > { %v5073_v8 = vpop.f32.mrb[60].mxu0 }
0x15bd   : > { %v5075_v47 = vpop.f32.mrb[61].mxu0  ;;  %v5074_v7 = vadd.f32 %v5073_v8, %v12386_v46 }
0x15be   : > { %v5077_v25 = vpop.f32.mrb[62].mxu0  ;;  %v5076_v32 = vadd.f32 %v5075_v47, %v12388_v45 }
0x15bf   : > { %v5078_v1 = vpop.f32.mrb[63].mxu0 }
0x15dc   : > { %v5114_v48 = vpop.f32.mrb[64].mxu0 }
0x15dd   : > { %v5115_v24 = vadd.f32 %v5114_v48, %v12387_v11  ;;  %v5116_v12 = vpop.f32.mrb[65].mxu0 }
0x15de   : > { %v5117_v56 = vadd.f32 %v5116_v12, %v12389_v9  ;;  %v5118_v37 = vpop.f32.mrb[66].mxu0 }
0x15df   : > { %v5203_v15 = vmax.f32 %v5074_v7, %v5115_v24  ;;  %v5119_v5 = vpop.f32.mrb[67].mxu0 }
0x15e0   : > { %v5204_v57 = vmax.f32 %v5076_v32, %v5117_v56 }
0x15fc   : > { %v5155_v14 = vpop.f32.mrb[68].mxu0 }
0x15fd   : > { %v5157_v22 = vpop.f32.mrb[69].mxu0  ;;  %v5156_v35 = vadd.f32 %v5155_v14, %v12390_v30 }
0x15fe   : > { %v5159_v52 = vpop.f32.mrb[70].mxu0  ;;  %v5158_v43 = vadd.f32 %v5157_v22, %v12216_v17 }
0x15ff   : > { %v5160_v4 = vpop.f32.mrb[71].mxu0 }
0x161c   : > { %v5196_v63 = vpop.f32.mrb[72].mxu0 }
0x161d   : > { %v5197_v39 = vadd.f32 %v5196_v63, %v12391_v36  ;;  %v5198_v40 = vpop.f32.mrb[73].mxu0  ;;  %v7445_v36 = vld [vmem:[%s11858_s10 + $0x100] ss:$8 sps:$4 sm:$0xff]  }
0x161e   : > { %v5199_v44 = vadd.f32 %v5198_v40, %v12217_v38  ;;  %v5200_v18 = vpop.f32.mrb[74].mxu0  ;;  %v7449_v40 = vld [vmem:[%s11858_s10 + $0x120] ss:$8 sps:$4 sm:$0xff]  }
0x161f   : > { %v5205_v21 = vmax.f32 %v5156_v35, %v5197_v39  ;;  %v5201_v26 = vpop.f32.mrb[75].mxu0  ;;  %v7452_v18 = vld [vmem:[%s11858_s10 + $0x144] ss:$8 sps:$4 sm:$0xff]  }
0x1620   : > { %v5206_v31 = vmax.f32 %v5158_v43, %v5199_v44  ;;  %v7454_v26 = vld [vmem:[%s11858_s10 + $0x154] ss:$8 sps:$4 sm:$0xff]  }
0x1621   : > { %v5207_v42 = vmax.f32 %v5203_v15, %v5205_v21  ;;  %v7453_v21 = vld [vmem:[%s11858_s10 + $0x140] ss:$8 sps:$4 sm:$0xff]  }
0x1622   : > { %v5208_v60 = vmax.f32 %v5204_v57, %v5206_v31  ;;  %v7455_v31 = vld [vmem:[%s11858_s10 + $0x150] ss:$8 sps:$4 sm:$0xff]  }
0x1623   : > { %v5209_v27 = vsub.f32 %v5074_v7, %v5207_v42  ;;  %v5215_v61 = vsub.f32 %v5115_v24, %v5207_v42  ;;  %v5221_v23 = vsub.f32 %v5156_v35, %v5207_v42  ;;  %v5227_v28 = vsub.f32 %v5197_v39, %v5207_v42  ;;  %v7448_v39 = vld [vmem:[%s11858_s10 + $0x124] ss:$8 sps:$4 sm:$0xff]  }
0x1624   : > { %v5210_v50 = vsub.f32 %v5076_v32, %v5208_v60  ;;  %v5216_v54 = vsub.f32 %v5117_v56, %v5208_v60  ;;  %v5222_v29 = vsub.f32 %v5158_v43, %v5208_v60  ;;  %v5228_v53 = vsub.f32 %v5199_v44, %v5208_v60  ;;  %v7450_v43 = vld [vmem:[%s11858_s10 + $0x134] ss:$8 sps:$4 sm:$0xff]   ;;  %v7451_v44 = vld [vmem:[%s11858_s10 + $0x130] ss:$8 sps:$4 sm:$0xff]   ;;  %v7456_v42 = vld [vmem:[%s11858_s10 + $0x164] ss:$8 sps:$4 sm:$0xff]  }
0x1625   : > { %v5211_v49 = vmul.f32 1.442695, %v5209_v27  ;;  %v5217_v20 = vmul.f32 1.442695, %v5215_v61  ;;  %v5223_v3 = vmul.f32 1.442695, %v5221_v23 }
0x1626   : > { %v5229_v17 = vmul.f32 1.442695, %v5227_v28  ;;  %v5213_v38 = vmul.f32 1.442695, %v5210_v50  ;;  %v5219_v59 = vmul.f32 1.442695, %v5216_v54 }
0x1627   : > { %6889 = vpow2.f32 %v5211_v49  ;;  %v5225_v51 = vmul.f32 1.442695, %v5222_v29  ;;  %v5231_v34 = vmul.f32 1.442695, %v5228_v53  ;;  %v7457_v60 = vld [vmem:[%s11858_s10 + $0x160] ss:$8 sps:$4 sm:$0xff]  }
0x1628   : > { %6891 = vpow2.f32 %v5217_v20  ;;  %v7458_v27 = vld [vmem:[%s11858_s10 + $0x174] ss:$8 sps:$4 sm:$0xff]   ;;  %v7459_v61 = vld [vmem:[%s11858_s10 + $0x170] ss:$8 sps:$4 sm:$0xff]   ;;  %v7460_v23 = vld [vmem:[%s11858_s10 + $0x184] ss:$8 sps:$4 sm:$0xff]  }
0x1629   : > { %6893 = vpow2.f32 %v5223_v3  ;;  %v7461_v28 = vld [vmem:[%s11858_s10 + $0x180] ss:$8 sps:$4 sm:$0xff]   ;;  %v7462_v50 = vld [vmem:[%s11858_s10 + $0x194] ss:$8 sps:$4 sm:$0xff]   ;;  %v7463_v54 = vld [vmem:[%s11858_s10 + $0x190] ss:$8 sps:$4 sm:$0xff]  }
0x162a   : > { %6895 = vpow2.f32 %v5229_v17  ;;  %v7464_v29 = vld [vmem:[%s11858_s10 + $0x1a4] ss:$8 sps:$4 sm:$0xff]   ;;  %v7465_v53 = vld [vmem:[%s11858_s10 + $0x1a0] ss:$8 sps:$4 sm:$0xff]   ;;  %v7466_v49 = vld [vmem:[%s11858_s10 + $0x1b4] ss:$8 sps:$4 sm:$0xff]  }
0x162b   : > { %6897 = vpow2.f32 %v5213_v38  ;;  %v7467_v20 = vld [vmem:[%s11858_s10 + $0x1b0] ss:$8 sps:$4 sm:$0xff]   ;;  %v7468_v3 = vld [vmem:[%s11858_s10 + $0x1c4] ss:$8 sps:$4 sm:$0xff]   ;;  %v7469_v17 = vld [vmem:[%s11858_s10 + $0x1c0] ss:$8 sps:$4 sm:$0xff]  }
0x162c   : > { %6899 = vpow2.f32 %v5219_v59  ;;  %v7470_v38 = vld [vmem:[%s11858_s10 + $0x1d4] ss:$8 sps:$4 sm:$0xff]   ;;  %v7471_v59 = vld [vmem:[%s11858_s10 + $0x1d0] ss:$8 sps:$4 sm:$0xff]  }
0x162d   : > { %6901 = vpow2.f32 %v5225_v51  ;;  %v7472_v51 = vld [vmem:[%s11858_s10 + $0x1e4] ss:$8 sps:$4 sm:$0xff]  }
0x162e   : > { %6903 = vpow2.f32 %v5231_v34  ;;  %v7473_v34 = vld [vmem:[%s11858_s10 + $0x1e0] ss:$8 sps:$4 sm:$0xff]  }
0x1631   : > { %v6890_v41 = vpop.eup %6889 }
0x1632   : > { %v6892_v10 = vpop.eup %6891 }
0x1633   : > { %v6894_v55 = vpop.eup %6893  ;;  %v5233_v16 = vadd.f32 %v6892_v10, %v6890_v41 }
0x1634   : > { %v6896_v58 = vpop.eup %6895 }
0x1635   : > { %v6898_v6 = vpop.eup %6897  ;;  %v5235_v8 = vadd.f32 %v6894_v55, %v5233_v16  ;;  %v7476_v16 = vld [vmem:[%s11858_s10 + $0x204] ss:$8 sps:$4 sm:$0xff]  }
0x1636   : > { %v6900_v47 = vpop.eup %6899 }
0x1637   : > { %v5237_v25 = vadd.f32 %v6896_v58, %v5235_v8  ;;  %v5234_v1 = vadd.f32 %v6900_v47, %v6898_v6  ;;  %v6902_v48 = vpop.eup %6901  ;;  %v7478_v8 = vld [vmem:[%s11858_s10 + $0x214] ss:$8 sps:$4 sm:$0xff]  }
0x1638   : > { %v6904_v7 = vpop.eup %6903 }
0x1639   : > { %6905 = vrcp.f32 %v5237_v25  ;;  %v5236_v46 = vadd.f32 %v6902_v48, %v5234_v1  ;;  %v7480_v25 = vld [vmem:[%s11858_s10 + $0x224] ss:$8 sps:$4 sm:$0xff]   ;;  %v7481_v1 = vld [vmem:[%s11858_s10 + $0x220] ss:$8 sps:$4 sm:$0xff]  }
0x163b   : > { %v5238_v11 = vadd.f32 %v6904_v7, %v5236_v46  ;;  %v7483_v46 = vld [vmem:[%s11858_s10 + $0x230] ss:$8 sps:$4 sm:$0xff]  }
0x163d   : > { %6907 = vrcp.f32 %v5238_v11  ;;  %v7485_v11 = vld [vmem:[%s11858_s10 + $0x240] ss:$8 sps:$4 sm:$0xff]  }
0x1643   : > { %v6906_v24 = vpop.eup %6905 }
0x1644   : > { %v5241_v12 = vmul.f32 %v6906_v24, %v11289_v2  ;;  %v5243_v45 = vmul.f32 %v6906_v24, %v11292_v0  ;;  %v7486_v24 = vld [vmem:[%s11858_s10 + $0x254] ss:$8 sps:$4 sm:$0xff]  }
0x1646   : > { %v5245_v32 = vmul.f32 %v6890_v41, %v5241_v12  ;;  %v11478_v9 = vmul.f32 %v6892_v10, %v5241_v12  ;;  %v11480_v56 = vmul.f32 %v6894_v55, %v5243_v45  ;;  %v11482_v37 = vmul.f32 %v6896_v58, %v5243_v45  ;;  %v7474_v41 = vld [vmem:[%s11858_s10 + $0x1f4] ss:$8 sps:$4 sm:$0xff]   ;;  %v7475_v10 = vld [vmem:[%s11858_s10 + $0x1f0] ss:$8 sps:$4 sm:$0xff]   ;;  %v7488_v45 = vld [vmem:[%s11858_s10 + $0x264] ss:$8 sps:$4 sm:$0xff]  }
0x1647   : > { %v6908_v15 = vpop.eup %6907  ;;  %v7487_v12 = vld [vmem:[%s11858_s10 + $0x250] ss:$8 sps:$4 sm:$0xff]  }
0x1648   : > { %v5242_v5 = vmul.f32 %v6908_v15, %v11289_v2  ;;  %v5244_v57 = vmul.f32 %v6908_v15, %v11292_v0  ;;  %v5247_v30 = vpack.c.bf16 %v5245_v32, %v5245_v32  ;;  %v7446_v2 = vld [vmem:[%s11858_s10 + $0x114] ss:$8 sps:$4 sm:$0xff]   ;;  %v7447_v0 = vld [vmem:[%s11858_s10 + $0x110] ss:$8 sps:$4 sm:$0xff]   ;;  %v5251_v55 = vpack.c.bf16 %v11478_v9, %v11478_v9  ;;  %v7489_v32 = vld [vmem:[%s11858_s10 + $0x260] ss:$8 sps:$4 sm:$0xff]  }
0x1649   : > { %v7490_v9 = vld [vmem:[%s11858_s10 + $0x274] ss:$8 sps:$4 sm:$0xff]   ;;  %v7491_v15 = vld [vmem:[%s11858_s10 + $0x270] ss:$8 sps:$4 sm:$0xff]  }
0x164a   : > { %v5246_v14 = vmul.f32 %v6898_v6, %v5242_v5  ;;  %v5250_v22 = vmul.f32 %v6900_v47, %v5242_v5  ;;  %v11486_v52 = vmul.f32 %v6902_v48, %v5244_v57  ;;  %v11488_v4 = vmul.f32 %v6904_v7, %v5244_v57  ;;  %v7477_v6 = vld [vmem:[%s11858_s10 + $0x200] ss:$8 sps:$4 sm:$0xff]   ;;  %v7479_v47 = vld [vmem:[%s11858_s10 + $0x210] ss:$8 sps:$4 sm:$0xff]   ;;  %v7482_v48 = vld [vmem:[%s11858_s10 + $0x234] ss:$8 sps:$4 sm:$0xff]  }
0x164b   : > { %v7484_v7 = vld [vmem:[%s11858_s10 + $0x244] ss:$8 sps:$4 sm:$0xff]   ;;  %v7493_v57 = vld [vmem:[%s11858_s10 + $0x280] ss:$8 sps:$4 sm:$0xff]  }
0x164c   : > { %v5248_v63 = vpack.c.bf16 %v5246_v14, %v5246_v14  ;;  %v5252_v35 = vpack.c.bf16 %v5250_v22, %v5250_v22  ;;  %v5256_v58 = vpack.c.bf16 %v11486_v52, %v11486_v52  ;;  %v7492_v5 = vld [vmem:[%s11858_s10 + $0x284] ss:$8 sps:$4 sm:$0xff]   ;;  %v7494_v14 = vld [vmem:[%s11858_s10 + $0x294] ss:$8 sps:$4 sm:$0xff]   ;;  %v7495_v22 = vld [vmem:[%s11858_s10 + $0x290] ss:$8 sps:$4 sm:$0xff]  }
0x164d   : > { %v7496_v52 = vld [vmem:[%s11858_s10 + $0x2a4] ss:$8 sps:$4 sm:$0xff]  }
0x164e   : > { %5293 = vmatprep.mubr.bf16.mxu0 %v5248_v63  ;;  %v7497_v63 = vld [vmem:[%s11858_s10 + $0x2a0] ss:$8 sps:$4 sm:$0xff]  }
0x164f   : > { %5294 = vmatmul.mubr.bf16.vlgmr.msra.gmra.mrb[76].mxu0 %v5247_v30  ;;  %v7498_v30 = vld [vmem:[%s11858_s10 + $0x2b4] ss:$8 sps:$4 sm:$0xff]  }
0x1650   : > { %5303 = vmatpush1.bf16.msra.mxu0 %v7445_v36  ;;  %5334 = vmatprep.mubr.bf16.mxu0 %v5252_v35  ;;  %v7499_v35 = vld [vmem:[%s11858_s10 + $0x2b0] ss:$8 sps:$4 sm:$0xff]   ;;  %v7500_v36 = vld [vmem:[%s11858_s10 + $0x2c4] ss:$8 sps:$4 sm:$0xff]  }
0x1651   : > { %5304 = vmatprep.subr.bf16.mxu0 %v7446_v2  ;;  %v7501_v2 = vld [vmem:[%s11858_s10 + $0x2c0] ss:$8 sps:$4 sm:$0xff]  }
0x1654   : > { %5305 = vmatpush1.bf16.msra.mxu0 %v7447_v0  ;;  %v7502_v0 = vld [vmem:[%s11858_s10 + $0x2d4] ss:$8 sps:$4 sm:$0xff]  }
0x1655   : > { %5306 = vmatprep.subr.bf16.mxu0 %v7448_v39  ;;  %v7503_v39 = vld [vmem:[%s11858_s10 + $0x2d0] ss:$8 sps:$4 sm:$0xff]  }
0x1658   : > { %5307 = vmatpush1.bf16.msra.mxu0 %v7449_v40  ;;  %v7504_v40 = vld [vmem:[%s11858_s10 + $0x2e4] ss:$8 sps:$4 sm:$0xff]  }
0x1659   : > { %5308 = vmatprep.subr.bf16.mxu0 %v7450_v43  ;;  %v7505_v43 = vld [vmem:[%s11858_s10 + $0x2e0] ss:$8 sps:$4 sm:$0xff]  }
0x165c   : > { %5309 = vmatpush1.bf16.msra.mxu0 %v7451_v44  ;;  %v7506_v44 = vld [vmem:[%s11858_s10 + $0x2f4] ss:$8 sps:$4 sm:$0xff]  }
0x165d   : > { %5310 = vmatprep.subr.bf16.mxu0 %v7452_v18  ;;  %v7507_v18 = vld [vmem:[%s11858_s10 + $0x2f0] ss:$8 sps:$4 sm:$0xff]  }
0x1660   : > { %5311 = vmatpush1.bf16.msra.mxu0 %v7453_v21  ;;  %v5255_v21 = vpack.c.bf16 %v11480_v56, %v11480_v56  ;;  %v7511_v56 = vld [vmem:[%s11858_s10 + $0x310] ss:$8 sps:$4 sm:$0xff]  }
0x1661   : > { %5312 = vmatprep.subr.bf16.mxu0 %v7454_v26  ;;  %v7508_v26 = vld [vmem:[%s11858_s10 + $0x304] ss:$8 sps:$4 sm:$0xff]  }
0x1664   : > { %5313 = vmatpush1.bf16.msra.mxu0 %v7455_v31  ;;  %v5260_v31 = vpack.c.bf16 %v11488_v4, %v11488_v4  ;;  %v7512_v4 = vld [vmem:[%s11858_s10 + $0x324] ss:$8 sps:$4 sm:$0xff]  }
0x1665   : > { %5314 = vmatprep.subr.bf16.mxu0 %v7456_v42  ;;  %v7509_v42 = vld [vmem:[%s11858_s10 + $0x300] ss:$8 sps:$4 sm:$0xff]  }
0x1668   : > { %5315 = vmatpush1.bf16.msra.mxu0 %v7457_v60  ;;  %v7510_v60 = vld [vmem:[%s11858_s10 + $0x314] ss:$8 sps:$4 sm:$0xff]  }
0x1669   : > { %5316 = vmatprep.subr.bf16.mxu0 %v7458_v27  ;;  %v7513_v27 = vld [vmem:[%s11858_s10 + $0x320] ss:$8 sps:$4 sm:$0xff]  }
0x166c   : > { %5317 = vmatpush1.bf16.msra.mxu0 %v7459_v61  ;;  %v7514_v61 = vld [vmem:[%s11858_s10 + $0x334] ss:$8 sps:$4 sm:$0xff]  }
0x166d   : > { %5318 = vmatprep.subr.bf16.mxu0 %v7460_v23  ;;  %v7515_v23 = vld [vmem:[%s11858_s10 + $0x330] ss:$8 sps:$4 sm:$0xff]  }
0x1670   : > { %5319 = vmatpush1.bf16.msra.mxu0 %v7461_v28  ;;  %v7516_v28 = vld [vmem:[%s11858_s10 + $0x344] ss:$8 sps:$4 sm:$0xff]  }
0x1671   : > { %5320 = vmatprep.subr.bf16.mxu0 %v7462_v50  ;;  %v7517_v50 = vld [vmem:[%s11858_s10 + $0x340] ss:$8 sps:$4 sm:$0xff]  }
0x1674   : > { %5321 = vmatpush1.bf16.msra.mxu0 %v7463_v54  ;;  %v7518_v54 = vld [vmem:[%s11858_s10 + $0x354] ss:$8 sps:$4 sm:$0xff]  }
0x1675   : > { %5322 = vmatprep.subr.bf16.mxu0 %v7464_v29  ;;  %v7519_v29 = vld [vmem:[%s11858_s10 + $0x350] ss:$8 sps:$4 sm:$0xff]  }
0x1678   : > { %5323 = vmatpush1.bf16.msra.mxu0 %v7465_v53  ;;  %v7520_v53 = vld [vmem:[%s11858_s10 + $0x364] ss:$8 sps:$4 sm:$0xff]  }
0x1679   : > { %5324 = vmatprep.subr.bf16.mxu0 %v7466_v49  ;;  %v7521_v49 = vld [vmem:[%s11858_s10 + $0x360] ss:$8 sps:$4 sm:$0xff]  }
0x167c   : > { %5325 = vmatpush1.bf16.msra.mxu0 %v7467_v20  ;;  %v7522_v20 = vld [vmem:[%s11858_s10 + $0x374] ss:$8 sps:$4 sm:$0xff]  }
0x167d   : > { %5326 = vmatprep.subr.bf16.mxu0 %v7468_v3  ;;  %v7523_v3 = vld [vmem:[%s11858_s10 + $0x370] ss:$8 sps:$4 sm:$0xff]  }
0x1680   : > { %5327 = vmatpush1.bf16.msra.mxu0 %v7469_v17  ;;  %v7524_v17 = vld [vmem:[%s11858_s10 + $0x384] ss:$8 sps:$4 sm:$0xff]  }
0x1681   : > { %5328 = vmatprep.subr.bf16.mxu0 %v7470_v38  ;;  %v7525_v38 = vld [vmem:[%s11858_s10 + $0x380] ss:$8 sps:$4 sm:$0xff]  }
0x1684   : > { %5329 = vmatpush1.bf16.msra.mxu0 %v7471_v59  ;;  %v7526_v59 = vld [vmem:[%s11858_s10 + $0x394] ss:$8 sps:$4 sm:$0xff]  }
0x1685   : > { %5330 = vmatprep.subr.bf16.mxu0 %v7472_v51  ;;  %v7527_v51 = vld [vmem:[%s11858_s10 + $0x390] ss:$8 sps:$4 sm:$0xff]  }
0x1688   : > { %5331 = vmatpush1.bf16.msra.mxu0 %v7473_v34  ;;  %v7528_v34 = vld [vmem:[%s11858_s10 + $0x3a4] ss:$8 sps:$4 sm:$0xff]  }
0x1689   : > { %5332 = vmatprep.subr.bf16.mxu0 %v7474_v41  ;;  %v7529_v41 = vld [vmem:[%s11858_s10 + $0x3a0] ss:$8 sps:$4 sm:$0xff]  }
0x168c   : > { %5333 = vmatpush1.bf16.msra.mxu0 %v7475_v10  ;;  %v7530_v10 = vld [vmem:[%s11858_s10 + $0x3b4] ss:$8 sps:$4 sm:$0xff]  }
0x168d   : > { %5343 = vmatprep.subr.bf16.mxu0 %v7476_v16  ;;  %v7532_v16 = vld [vmem:[%s11858_s10 + $0x3c4] ss:$8 sps:$4 sm:$0xff]  }
0x168f   : > { %5335 = vmatmul.mubr.bf16.vlgmr.msra.gmra.mrb[76].mxu0 %v5251_v55  ;;  %v7531_v55 = vld [vmem:[%s11858_s10 + $0x3b0] ss:$8 sps:$4 sm:$0xff]  }
0x1690   : > { %5344 = vmatpush1.bf16.msra.mxu0 %v7477_v6  ;;  %5375 = vmatprep.mubr.bf16.mxu0 %v5256_v58  ;;  %v7533_v58 = vld [vmem:[%s11858_s10 + $0x3c0] ss:$8 sps:$4 sm:$0xff]   ;;  %v7534_v6 = vld [vmem:[%s11858_s10 + $0x3d4] ss:$8 sps:$4 sm:$0xff]  }
0x1691   : > { %5345 = vmatprep.subr.bf16.mxu0 %v7478_v8  ;;  %v7535_v8 = vld [vmem:[%s11858_s10 + $0x3d0] ss:$8 sps:$4 sm:$0xff]  }
0x1694   : > { %5346 = vmatpush1.bf16.msra.mxu0 %v7479_v47  ;;  %v7536_v47 = vld [vmem:[%s11858_s10 + $0x3e4] ss:$8 sps:$4 sm:$0xff]  }
0x1695   : > { %5347 = vmatprep.subr.bf16.mxu0 %v7480_v25  ;;  %v7537_v25 = vld [vmem:[%s11858_s10 + $0x3e0] ss:$8 sps:$4 sm:$0xff]  }
0x1698   : > { %5348 = vmatpush1.bf16.msra.mxu0 %v7481_v1  ;;  %v7538_v1 = vld [vmem:[%s11858_s10 + $0x3f4] ss:$8 sps:$4 sm:$0xff]  }
0x1699   : > { %5349 = vmatprep.subr.bf16.mxu0 %v7482_v48  ;;  %v7539_v48 = vld [vmem:[%s11858_s10 + $0x3f0] ss:$8 sps:$4 sm:$0xff]  }
0x169c   : > { %5350 = vmatpush1.bf16.msra.mxu0 %v7483_v46  ;;  %v5259_v46 = vpack.c.bf16 %v11482_v37, %v11482_v37 }
0x169d   : > { %5351 = vmatprep.subr.bf16.mxu0 %v7484_v7 }
0x16a0   : > { %5352 = vmatpush1.bf16.msra.mxu0 %v7485_v11 }
0x16a1   : > { %5353 = vmatprep.subr.bf16.mxu0 %v7486_v24 }
0x16a4   : > { %5354 = vmatpush1.bf16.msra.mxu0 %v7487_v12 }
0x16a5   : > { %5355 = vmatprep.subr.bf16.mxu0 %v7488_v45 }
0x16a8   : > { %5356 = vmatpush1.bf16.msra.mxu0 %v7489_v32 }
0x16a9   : > { %5357 = vmatprep.subr.bf16.mxu0 %v7490_v9 }
0x16ac   : > { %5358 = vmatpush1.bf16.msra.mxu0 %v7491_v15 }
0x16ad   : > { %5359 = vmatprep.subr.bf16.mxu0 %v7492_v5 }
0x16b0   : > { %5360 = vmatpush1.bf16.msra.mxu0 %v7493_v57 }
0x16b1   : > { %5361 = vmatprep.subr.bf16.mxu0 %v7494_v14 }
0x16b4   : > { %5362 = vmatpush1.bf16.msra.mxu0 %v7495_v22 }
0x16b5   : > { %5363 = vmatprep.subr.bf16.mxu0 %v7496_v52 }
0x16b8   : > { %5364 = vmatpush1.bf16.msra.mxu0 %v7497_v63 }
0x16b9   : > { %5365 = vmatprep.subr.bf16.mxu0 %v7498_v30 }
0x16bc   : > { %5366 = vmatpush1.bf16.msra.mxu0 %v7499_v35 }
0x16bd   : > { %5367 = vmatprep.subr.bf16.mxu0 %v7500_v36 }
0x16c0   : > { %5368 = vmatpush1.bf16.msra.mxu0 %v7501_v2 }
0x16c1   : > { %5369 = vmatprep.subr.bf16.mxu0 %v7502_v0 }
0x16c4   : > { %5370 = vmatpush1.bf16.msra.mxu0 %v7503_v39 }
0x16c5   : > { %5371 = vmatprep.subr.bf16.mxu0 %v7504_v40 }
0x16c8   : > { %5372 = vmatpush1.bf16.msra.mxu0 %v7505_v43 }
0x16c9   : > { %5373 = vmatprep.subr.bf16.mxu0 %v7506_v44 }
0x16cc   : > { %5374 = vmatpush1.bf16.msra.mxu0 %v7507_v18 }
0x16cd   : > { %5384 = vmatprep.subr.bf16.mxu0 %v7508_v26 }
0x16cf   : > { %5376 = vmatmul.mubr.bf16.vlgmr.msra.gmra.mrb[76].mxu0 %v5255_v21 }
0x16d0   : > { %5385 = vmatpush1.bf16.msra.mxu0 %v7509_v42  ;;  %5416 = vmatprep.mubr.bf16.mxu0 %v5260_v31 }
0x16d1   : > { %5386 = vmatprep.subr.bf16.mxu0 %v7510_v60 }
0x16d4   : > { %5387 = vmatpush1.bf16.msra.mxu0 %v7511_v56 }
0x16d5   : > { %5388 = vmatprep.subr.bf16.mxu0 %v7512_v4 }
0x16d8   : > { %5389 = vmatpush1.bf16.msra.mxu0 %v7513_v27 }
0x16d9   : > { %5390 = vmatprep.subr.bf16.mxu0 %v7514_v61 }
0x16dc   : > { %5391 = vmatpush1.bf16.msra.mxu0 %v7515_v23 }
0x16dd   : > { %5392 = vmatprep.subr.bf16.mxu0 %v7516_v28 }
0x16e0   : > { %5393 = vmatpush1.bf16.msra.mxu0 %v7517_v50 }
0x16e1   : > { %5394 = vmatprep.subr.bf16.mxu0 %v7518_v54 }
0x16e4   : > { %5395 = vmatpush1.bf16.msra.mxu0 %v7519_v29 }
0x16e5   : > { %5396 = vmatprep.subr.bf16.mxu0 %v7520_v53 }
0x16e8   : > { %5397 = vmatpush1.bf16.msra.mxu0 %v7521_v49 }
0x16e9   : > { %5398 = vmatprep.subr.bf16.mxu0 %v7522_v20 }
0x16ec   : > { %5399 = vmatpush1.bf16.msra.mxu0 %v7523_v3 }
0x16ed   : > { %5400 = vmatprep.subr.bf16.mxu0 %v7524_v17 }
0x16f0   : > { %5401 = vmatpush1.bf16.msra.mxu0 %v7525_v38 }
0x16f1   : > { %5402 = vmatprep.subr.bf16.mxu0 %v7526_v59 }
0x16f4   : > { %5403 = vmatpush1.bf16.msra.mxu0 %v7527_v51 }
0x16f5   : > { %5404 = vmatprep.subr.bf16.mxu0 %v7528_v34 }
0x16f8   : > { %5405 = vmatpush1.bf16.msra.mxu0 %v7529_v41 }
0x16f9   : > { %5406 = vmatprep.subr.bf16.mxu0 %v7530_v10 }
0x16fc   : > { %5407 = vmatpush1.bf16.msra.mxu0 %v7531_v55 }
0x16fd   : > { %5408 = vmatprep.subr.bf16.mxu0 %v7532_v16 }
0x1700   : > { %5409 = vmatpush1.bf16.msra.mxu0 %v7533_v58 }
0x1701   : > { %5410 = vmatprep.subr.bf16.mxu0 %v7534_v6 }
0x1704   : > { %5411 = vmatpush1.bf16.msra.mxu0 %v7535_v8 }
0x1705   : > { %5412 = vmatprep.subr.bf16.mxu0 %v7536_v47 }
0x1708   : > { %5413 = vmatpush1.bf16.msra.mxu0 %v7537_v25 }
0x1709   : > { %5414 = vmatprep.subr.bf16.mxu0 %v7538_v1 }
0x170c   : > { %5415 = vmatpush1.bf16.msra.mxu0 %v7539_v48 }
0x170f   : > { %5417 = vmatmul.mubr.bf16.vlgmr.msra.gmra.mrb[76].mxu0 %v5259_v46 }
0x17e2   : > { %v5418_v7 = vpop.f32.mrb[76].mxu0 }
0x17e3   : > { %v6156_v11 = vadd.f32 %v5418_v7, %v12334_v62  ;;  %v5420_v24 = vpop.f32.mrb[77].mxu0 }
0x17e4   : > { %v6157_v12 = vadd.f32 %v5420_v24, %v12335_v19  ;;  %v5422_v45 = vpop.f32.mrb[78].mxu0 }
0x17e5   : > { %6909 = vtanh.f32 %v6156_v11  ;;  %v5423_v32 = vpop.f32.mrb[79].mxu0 }
0x17e6   : > { %6911 = vtanh.f32 %v6157_v12 }
0x17ef   : > { %v6910_v9 = vpop.eup %6909 }
0x17f0   : > { %v6912_v15 = vpop.eup %6911  ;;  %v5427_v57 = vpack.c.bf16 %v6910_v9, %v6910_v9 }
0x17f1   : > { %v5428_v5 = vpack.c.bf16 %v6912_v15, %v6912_v15 }
0x17f3   : > { %5461 = vmatprep.mubr.bf16.mxu1 %v5428_v5 }
0x17f4   : > { %5462 = vmatmul.mubr.bf16.vlgmr.msra.gmra.mrb[80].mxu1 %v5427_v57 }
0x18c7   : > { %v5463_v62 = vpop.f32.mrb[80].mxu1 }
0x18c8   : > { %v5464_v37 = vadd.f32 %v5463_v62, %v12336_v13  ;;  %v5465_v19 = vpop.f32.mrb[81].mxu1 }
0x18c9   : > { %v5466_v14 = vadd.f32 %v5465_v19, %v12337_v33  ;;  %v5467_v22 = vpop.f32.mrb[82].mxu1 }
0x18ca   : > { %5968 = vst [vmem:[%s7769_s15 + $0x30] sm:$0xff] %v5464_v37  ;;  %5477 = vst [vmem:[#allocation5] sm:$0xff] %v5464_v37  ;;  %v5468_v52 = vpop.f32.mrb[83].mxu1 }
0x18cb   : > { %5969 = vst [vmem:[%s7769_s15 + $0x38] sm:$0xff] %v5466_v14  ;;  %5478 = vst [vmem:[#allocation5 + $0x8] sm:$0xff] %v5466_v14 }
0x18cc   : > { %7553 = shalt.err (!%p7550_p6)
}
0x18cd   : > { %s7554_s15 = scalar_lea.hbm %s11793_s21, 1024  ;;  %s7558_s20 = scalar_lea.hbm %s11862_s14, 2048 }
0x18ce   : > { %p7555_p7 = scmp.ne.s32.totalorder %s11793_s21, %s7554_s15  ;;  %p7559_p11 = scmp.lt.u32.totalorder %s11793_s21, %s11862_s14 }
0x18cf   : > { %p7560_p12 = scmp.lt.u32.totalorder %s7558_s20, %s7554_s15  ;;  %p7562_p0 = scmp.lt.u32.totalorder %s7554_s15, %s11793_s21 }
0x18d0   : > { %p7556_p9 = pnand %p7555_p7, %p7740_p4 }
0x18d1   : > { %p7561_p13 = por %p7560_p12, %p7559_p11 }
0x18d2   : > { %p7557_p10 = pneg %p7556_p9 }
0x18d3   : > { %p7563_p1 = por %p7562_p0, %p7561_p13 }
0x18d5   : > { %p7564_p2 = pnand %p7563_p1, %p7557_p10 }
0x18d7   : > { %7567 = shalt.err (!%p7564_p2)
}
0x18d8   : > { %s7623_s16 = smov 256   ;;  %s7624_s0 = smov 16  }
0x18d9   : > { %6218 = dma.vmem_to_hbm [thread:$0]  (%p7740_p4), %s11795_s24, 1024, %s11793_s21, %s11802_s28, %s7623_s16, %s7623_s16, %s7624_s0  }
0x18da PF: > { %p6224_p3 = scmp.ge.s32.totalorder %s7618_s18, 2  ;;  %s5511_s26 = sand.u32 1, %s7598_s29  }
0x18db   : > { %s5512_s17 = scalar_lea.sflag [#allocation7], %s5511_s26 }
0x18dc   : > { %p6221_p5 = pnand %p6224_p3, %p7747_p8 }
0x18de   : > { %7593 = dma.done.wait (!%p6221_p5), %s5512_s17, 1024  }
0x18df   : > { %7595 = vsyncadd (!%p6221_p5), %s5512_s17, 4294966272  ;;  %s27_s18 = sadd.s32 1, %s7618_s18   ;;  %s12394_s15 = sld [smem:[#allocation9_spill]] }
0x18e0   : > { %p24_p6 = scmp.ge.s32.totalorder %s27_s18, 4   ;;  %s12395_s25 = sld [smem:[#allocation13_spill]] }
0x18e1   : > { %s12396_s16 = sld [smem:[#allocation10_spill]]  ;;  %s12397_s17 = sld [smem:[#allocation11_spill]] }
0x18e2   : > { %s12398_s29 = smov %s7602_s30  ;;  %26 = sbr.rel (!%p24_p6) target bundleno = 7 (0x7), region = 128 }
0x18e5   : > { %s12399_s30 = smov %s12394_s15 }
0x18e6   : > { %s12400_s15 = smov %s12395_s25 }
0x18e9   :  { %5517 = vsyncpa [#allocation7], 1 }
0x18ea   :  { %5519 = vsyncpa [#allocation7 + $0x1], 1 }

</bundles_post_ra>
